<compile_context>
chip_gen: v7x
topology: tpu7x:2x2x1
jax: 0.10.0
libtpu: 0.0.40
codegen_flags: <defaults>
</compile_context>

<pallas_src>
import functools
import numpy as np
import jax
import jax.numpy as jnp
from jax.experimental import pallas as pl
from jax.experimental.pallas import tpu as pltpu


_VMEM = pl.BlockSpec(memory_space=pltpu.MemorySpace.VMEM)
_BN_EPS = 1e-5


# ----------------------------- kernel helpers --------------------------------

def _apply_act(p, act):
    if act == "leaky":
        return jnp.where(p >= 0.0, p, 0.2 * p)
    if act == "relu":
        return jnp.maximum(p, 0.0)
    return p


def _bn_cols(y, g, bt, eps):
    """Train-mode BatchNorm over the lane (M = N*H*W) axis; single-pass stats."""
    m = y.shape[1]
    mean = jnp.sum(y, axis=1, keepdims=True) * (1.0 / m)
    var = jnp.sum(y * y, axis=1, keepdims=True) * (1.0 / m) - mean * mean
    return (y - mean) * jax.lax.rsqrt(var + eps) * g + bt


# ----------------------------- Pallas kernels --------------------------------

def _gemm_kernel(w_ref, b_ref, p_ref, o_ref, *, act):
    """act(patches) -> (Cout, K) @ (K, M) + bias, lane-dense output."""
    p = _apply_act(p_ref[...], act)
    o_ref[...] = jnp.dot(w_ref[...], p, preferred_element_type=jnp.float32) + b_ref[...]


def _gemm_bn_kernel(w_ref, b_ref, g_ref, bt_ref, p_ref, o_ref, *, act, eps):
    """act(patches) -> conv GEMM + bias + train-mode BatchNorm (batch stats)."""
    p = _apply_act(p_ref[...], act)
    y = jnp.dot(w_ref[...], p, preferred_element_type=jnp.float32) + b_ref[...]
    o_ref[...] = _bn_cols(y, g_ref[...], bt_ref[...], eps)


def _bottleneck_kernel(x3_ref,
                       w4_ref, b4_ref, g4_ref, bt4_ref, G4_ref,
                       w5_ref, b5_ref, g5_ref, bt5_ref, G5_ref,
                       wd5_ref, bd5_ref, gd5_ref, btd5_ref, R5_ref,
                       wd4_ref, bd4_ref, gd4_ref, btd4_ref, R4_ref,
                       o_ref, *, eps):
    """layer4 + layer5 + dlayer5 + dlayer4 fused.  All spatial plumbing (stride-2
    im2col, zero padding, bilinear x2 upsample) is inside constant right-operator
    matrices G/R, so the whole body is 2-D matmuls + activations + lane reductions."""
    f32 = jnp.float32

    def conv_ops(parts, w_ref, G_ref, b):
        # y = sum_t sum_parts  W_t[:, part] @ (x_part @ G_t)  + b
        # (the `parts` loop replaces the channel concat of the skip connection)
        ntaps = G_ref.shape[0]
        acc = None
        for t in range(ntaps):
            g_t = G_ref[t]
            w_t = w_ref[t]
            col = 0
            for x_part in parts:
                cpart = x_part.shape[0]
                p_t = jnp.dot(x_part, g_t, preferred_element_type=f32)
                y_t = jnp.dot(w_t[:, col:col + cpart], p_t, preferred_element_type=f32)
                acc = y_t if acc is None else acc + y_t
                col += cpart
        return acc + b

    # layer4: LeakyReLU -> Conv(4x4, s2, p1) -> BN      (8x8 -> 4x4)
    a3 = _apply_act(x3_ref[...], "leaky")
    out4 = _bn_cols(conv_ops([a3], w4_ref, G4_ref, b4_ref[...]),
                    g4_ref[...], bt4_ref[...], eps)

    # layer5: LeakyReLU -> Conv(2x2, s2, p0) -> BN      (4x4 -> 2x2)
    out5 = _bn_cols(conv_ops([_apply_act(out4, "leaky")], w5_ref, G5_ref, b5_ref[...]),
                    g5_ref[...], bt5_ref[...], eps)

    # dlayer5: ReLU -> bilinear x2 -> Conv(1x1) -> BN   (2x2 -> 4x4)
    u5 = jnp.dot(jnp.maximum(out5, 0.0), R5_ref[...], preferred_element_type=f32)
    dout5 = _bn_cols(jnp.dot(wd5_ref[...], u5, preferred_element_type=f32) + bd5_ref[...],
                     gd5_ref[...], btd5_ref[...], eps)

    # dlayer4 on cat([dout5, out4]): ReLU -> bilinear x2 -> Conv(3x3, p1) -> BN  (4x4 -> 8x8)
    parts = [jnp.maximum(dout5, 0.0), jnp.maximum(out4, 0.0)]
    o_ref[...] = _bn_cols(conv_ops(parts, wd4_ref, R4_ref, bd4_ref[...]),
                          gd4_ref[...], btd4_ref[...], eps)


# ----------------------------- Pallas wrappers --------------------------------

def _pallas_gemm(w2, b2, pt, act, bn=None):
    """Fused conv GEMM (+activation on patches) (+BN).  Single VMEM block — all
    operands are <= ~1.2 MB at the shipped shapes, so a grid is pure overhead."""
    Cout = w2.shape[0]
    M = pt.shape[1]
    if bn is None:
        kern = functools.partial(_gemm_kernel, act=act)
        ins = (w2, b2, pt)
    else:
        g, bt = bn
        kern = functools.partial(_gemm_bn_kernel, act=act, eps=_BN_EPS)
        ins = (w2, b2, g, bt, pt)
    return pl.pallas_call(
        kern,
        out_shape=jax.ShapeDtypeStruct((Cout, M), jnp.float32),
        in_specs=[_VMEM] * len(ins),
        out_specs=_VMEM,
    )(*ins)


# ----------------------------- XLA glue (channel-major) ----------------------

def _conv_layer(x_flat, spatial, p, *, k, s, pad, act, bn, w_scale=None):
    """PyTorch Conv2d (+BN) on a channel-major activation.  im2col stays in XLA
    (channel-major: no transposes), activation / bias / BN fused in-kernel."""
    N, H, W = spatial
    Cin = x_flat.shape[0]
    OH = (H + 2 * pad - k) // s + 1
    OW = (W + 2 * pad - k) // s + 1
    x4 = x_flat.reshape(Cin, N, H, W)
    xp = jnp.pad(x4, ((0, 0), (0, 0), (pad, pad), (pad, pad))) if pad else x4
    taps = [xp[:, :, i:i + s * (OH - 1) + 1:s, j:j + s * (OW - 1) + 1:s]
            for i in range(k) for j in range(k)]
    pt = jnp.stack(taps, axis=0).reshape(k * k * Cin, N * OH * OW)

    Cout = p["w"].shape[0]
    w2 = jnp.transpose(p["w"], (0, 2, 3, 1)).reshape(Cout, k * k * Cin)
    if w_scale is not None:
        w2 = w2 * w_scale                      # exact scalar fold (input normalization)
    b2 = p["b"].reshape(Cout, 1)
    bnp = (p["gamma"].reshape(Cout, 1), p["beta"].reshape(Cout, 1)) if bn else None
    out = _pallas_gemm(w2, b2, pt, act, bnp)
    return out, (N, OH, OW)


def _interp_matrix_np(in_size, out_size):
    """Bilinear, align_corners=True interpolation matrix (as in the PyTorch module)."""
    A = np.zeros((out_size, in_size), np.float32)
    if in_size == 1:
        A[:, 0] = 1.0
        return A
    for o in range(out_size):
        src = o * (in_size - 1) / (out_size - 1)
        i0 = int(np.floor(src))
        if i0 >= in_size - 1:
            A[o, in_size - 1] = 1.0
        else:
            f = src - i0
            A[o, i0] = 1.0 - f
            A[o, i0 + 1] = f
    return A


def _up_layer(x_flat, spatial, p):
    """blockUNet transposed branch: ReLU -> bilinear x2 -> Conv3x3(p1) -> BN.
    The ReLU must precede the (linear) upsample, so it stays in XLA where it fuses
    into the interpolation einsum; conv + bias + BN are one fused Pallas call."""
    # TODO(synk): the position-dependent align_corners=True weights of these large
    # stages would need >2-D in-kernel contractions to fold; they ARE folded (as
    # constant operators) for the small bottleneck stages inside _bottleneck_kernel.
    N, H, W = spatial
    C = x_flat.shape[0]
    x4 = jnp.maximum(x_flat, 0.0).reshape(C, N, H, W)
    Ah = jnp.asarray(_interp_matrix_np(H, 2 * H))
    Aw = jnp.asarray(_interp_matrix_np(W, 2 * W))
    u = jnp.einsum("oh,cnhw->cnow", Ah, x4)
    u = jnp.einsum("pw,cnow->cnop", Aw, u)
    return _conv_layer(u.reshape(C, N * 4 * H * W), (N, 2 * H, 2 * W), p,
                       k=3, s=1, pad=1, act="none", bn=True)


def _conv_transpose_layer(x_flat, spatial, p, out_scale):
    """ReLU -> ConvTranspose2d(Cin, Cout, 4, stride=2, padding=1) via sub-pixel
    (4-phase) decomposition: one lane-dense GEMM over 3x3 patches; the ReLU and
    the output rescale are folded into the kernel / effective weights."""
    N, H, W = spatial
    Cin = x_flat.shape[0]
    w_t, b = p["w"], p["b"]                    # (Cin, Cout, 4, 4)
    Cout = w_t.shape[1]
    x4 = x_flat.reshape(Cin, N, H, W)
    xp = jnp.pad(x4, ((0, 0), (0, 0), (1, 1), (1, 1)))
    taps = [xp[:, :, i:i + H, j:j + W] for i in range(3) for j in range(3)]
    pt = jnp.stack(taps, axis=0).reshape(9 * Cin, N * H * W)

    # phase -> ((patch offset d in {0,1,2} (= delta+1), kernel tap index), ...)
    tap_tbl = {0: ((1, 1), (0, 3)), 1: ((1, 2), (2, 0))}

    def phase_rows(ph, pw):
        tapmap = {}
        for dh, kh in tap_tbl[ph]:
            for dw, kw in tap_tbl[pw]:
                tapmap[(dh, dw)] = (kh, kw)
        cols = []
        for dh in range(3):
            for dw in range(3):
                if (dh, dw) in tapmap:
                    kh, kw = tapmap[(dh, dw)]
                    cols.append(w_t[:, :, kh, kw].T)        # (Cout, Cin)
                else:
                    cols.append(jnp.zeros((Cout, Cin), w_t.dtype))
        return jnp.concatenate(cols, axis=1)                # (Cout, 9*Cin)

    w_eff = jnp.concatenate([phase_rows(ph, pw) for ph in (0, 1) for pw in (0, 1)],
                            axis=0) * out_scale             # (4*Cout, 9*Cin)
    b_eff = jnp.tile(b.reshape(Cout, 1), (4, 1)) * out_scale

    out = _pallas_gemm(w_eff, b_eff, pt, act="relu")        # (4*Cout, N*H*W)
    o = out.reshape(2, 2, Cout, N, H, W)                    # (ph, pw, co, n, r, c)
    o = jnp.transpose(o, (3, 2, 4, 0, 5, 1)).reshape(N, Cout, 2 * H, 2 * W)
    return o


# ----------------------------- bottleneck (one pallas_call) ------------------

def _gather_ops_np(N, H, W, k, s, pad):
    """Per-tap im2col right-operators G[t]: (N*H*W, N*OH*OW) with patches_t = X @ G[t].
    Zero rows encode the conv's implicit zero padding."""
    OH = (H + 2 * pad - k) // s + 1
    OW = (W + 2 * pad - k) // s + 1
    G = np.zeros((k * k, N * H * W, N * OH * OW), np.float32)
    for i in range(k):
        for j in range(k):
            t = i * k + j
            for n in range(N):
                for oh in range(OH):
                    for ow in range(OW):
                        h, w = oh * s + i - pad, ow * s + j - pad
                        if 0 <= h < H and 0 <= w < W:
                            G[t, (n * H + h) * W + w, (n * OH + oh) * OW + ow] = 1.0
    return G


def _upsample_op_np(N, H, W):
    """Bilinear 2x (align_corners=True) as a right operator: up = X @ U."""
    Ah = _interp_matrix_np(H, 2 * H)
    Aw = _interp_matrix_np(W, 2 * W)
    blk = np.kron(Ah, Aw).T.astype(np.float32)              # (H*W, 4*H*W)
    U = np.zeros((N * H * W, N * 4 * H * W), np.float32)
    for n in range(N):
        U[n * H * W:(n + 1) * H * W, n * 4 * H * W:(n + 1) * 4 * H * W] = blk
    return U


def _tap_weights(w):
    """(Cout, Cin, k, k) -> (k*k, Cout, Cin), tap-major (matches _gather_ops_np)."""
    Cout, Cin, kh, kw = w.shape
    return jnp.transpose(w, (2, 3, 0, 1)).reshape(kh * kw, Cout, Cin)


def _bottleneck(out3, spatial3, params):
    N, H3, W3 = spatial3                                    # (2, 8, 8)
    H4, W4 = H3 // 2, W3 // 2
    H5, W5 = H4 // 2, W4 // 2
    p4, p5, pd5, pd4 = (params["layer4"], params["layer5"],
                        params["dlayer5"], params["dlayer4"])

    # Constant spatial operators (compile-time constants, ~420 KB total).
    G4 = jnp.asarray(_gather_ops_np(N, H3, W3, 4, 2, 1))    # (16, 128, 32)
    G5 = jnp.asarray(_gather_ops_np(N, H4, W4, 2, 2, 0))    # (4, 32, 8)
    R5 = jnp.asarray(_upsample_op_np(N, H5, W5))            # (8, 32)  (1x1 conv after)
    R4 = jnp.asarray(np.einsum("ij,tjk->tik",
                               _upsample_op_np(N, H4, W4),
                               _gather_ops_np(N, H3, W3, 3, 1, 1)))   # (9, 32, 128)

    def col(v):
        return v.reshape(-1, 1)

    cd4 = pd4["w"].shape[0]
    ins = (out3,
           _tap_weights(p4["w"]), col(p4["b"]), col(p4["gamma"]), col(p4["beta"]), G4,
           _tap_weights(p5["w"]), col(p5["b"]), col(p5["gamma"]), col(p5["beta"]), G5,
           pd5["w"][:, :, 0, 0], col(pd5["b"]), col(pd5["gamma"]), col(pd5["beta"]), R5,
           _tap_weights(pd4["w"]), col(pd4["b"]), col(pd4["gamma"]), col(pd4["beta"]), R4)
    out = pl.pallas_call(
        functools.partial(_bottleneck_kernel, eps=_BN_EPS),
        out_shape=jax.ShapeDtypeStruct((cd4, N * H3 * W3), jnp.float32),
        in_specs=[_VMEM] * len(ins),
        out_specs=_VMEM,
    )(*ins)
    return out, spatial3


# ----------------------------- UNet forward ----------------------------------

def unet_forward(params, x_nchw):
    x = x_nchw.astype(jnp.float32)
    N, C, H, W = x.shape
    # Faithful to the PyTorch module: no epsilon guard (all-zero input -> NaN there too).
    scale = jnp.max(jnp.abs(x))
    # Channel-major (C, N*H*W) layout end to end; NCHW only at the boundaries.
    xc = jnp.transpose(x, (1, 0, 2, 3)).reshape(C, N * H * W)

    # x/scale folded into layer1's weights; dout1*scale folded into dlayer1's weights.
    out1, sp1 = _conv_layer(xc, (N, H, W), params["layer1"], k=4, s=2, pad=1,
                            act="none", bn=False, w_scale=1.0 / scale)
    out2, sp2 = _conv_layer(out1, sp1, params["layer2"], k=4, s=2, pad=1,
                            act="leaky", bn=True)
    out3, sp3 = _conv_layer(out2, sp2, params["layer3"], k=4, s=2, pad=1,
                            act="leaky", bn=True)

    dout4, _ = _bottleneck(out3, sp3, params)     # layer4+layer5+dlayer5+dlayer4 fused

    dout3, _ = _up_layer(jnp.concatenate([dout4, out3], axis=0), sp3, params["dlayer3"])
    dout2, _ = _up_layer(jnp.concatenate([dout3, out2], axis=0), sp2, params["dlayer2"])
    d21 = jnp.concatenate([dout2, out1], axis=0)

    return _conv_transpose_layer(d21, sp1, params["dlayer1"], out_scale=scale)


# ----------------------------- parameters ------------------------------------

def init_params(key):
    ca = [2, 4, 8, 16, 32, 32, 2]
    keys = iter(jax.random.split(key, 64))

    def conv_p(cout, cin, kh, kw, bn):
        p = {
            "w": 0.1 * jax.random.normal(next(keys), (cout, cin, kh, kw), jnp.float32),
            "b": 0.05 * jax.random.normal(next(keys), (cout,), jnp.float32),
        }
        if bn:
            p["gamma"] = 1.0 + 0.1 * jax.random.normal(next(keys), (cout,), jnp.float32)
            p["beta"] = 0.1 * jax.random.normal(next(keys), (cout,), jnp.float32)
        return p

    params = {
        "layer1":  conv_p(ca[1], ca[0], 4, 4, bn=False),
        "layer2":  conv_p(ca[2], ca[1], 4, 4, bn=True),
        "layer3":  conv_p(ca[3], ca[2], 4, 4, bn=True),
        "layer4":  conv_p(ca[4], ca[3], 4, 4, bn=True),
        "layer5":  conv_p(ca[5], ca[4], 2, 2, bn=True),
        "dlayer5": conv_p(ca[4], ca[5], 1, 1, bn=True),
        "dlayer4": conv_p(ca[3], ca[4] * 2, 3, 3, bn=True),
        "dlayer3": conv_p(ca[2], ca[3] * 2, 3, 3, bn=True),
        "dlayer2": conv_p(ca[1], ca[2] * 2, 3, 3, bn=True),
        # ConvTranspose2d weight layout: (in_c, out_c, kh, kw)
        "dlayer1": {
            "w": 0.1 * jax.random.normal(next(keys), (ca[1] * 2, ca[6], 4, 4), jnp.float32),
            "b": 0.05 * jax.random.normal(next(keys), (ca[6],), jnp.float32),
        },
    }
    return params


# ----------------------------- main -------------------------------------------

if __name__ == "__main__":
    key = jax.random.PRNGKey(0)
    kp, kx = jax.random.split(key)
    params = init_params(kp)

    # N=2, C=2 (channel_array[0]), spatial 64x64 (divisible by 32 for the 5-level UNet)
    x = jax.random.normal(kx, (2, 2, 64, 64), jnp.float32)

    fwd = jax.jit(unet_forward)
    y = fwd(params, x)
    jax.block_until_ready(y)

    assert y.shape == (2, 2, 64, 64), y.shape
    assert jnp.all(jnp.isfinite(y))
    print("KERNEL_OK")
</pallas_src>

<mosaic_0001>
module attributes {stable_mosaic.version = 11 : i64} {
  func.func @_gemm_kernel(%arg0: memref<4x32xf32, #tpu.memory_space<vmem>>, %arg1: memref<4x1xf32, #tpu.memory_space<vmem>>, %arg2: memref<32x2048xf32, #tpu.memory_space<vmem>>, %arg3: memref<4x2048xf32, #tpu.memory_space<vmem>>) attributes {dimension_semantics = [], scalar_prefetch = 0 : i64, scratch_operands = 0 : i64, tpu.core_type = #tpu.core_type<tc>} {
    %c0 = arith.constant 0 : index
    %c0_0 = arith.constant 0 : index
    %0 = vector.load %arg2[%c0, %c0_0] : memref<32x2048xf32, #tpu.memory_space<vmem>>, vector<32x2048xf32>
    %c0_1 = arith.constant 0 : index
    %c0_2 = arith.constant 0 : index
    %1 = vector.load %arg0[%c0_1, %c0_2] : memref<4x32xf32, #tpu.memory_space<vmem>>, vector<4x32xf32>
    %cst = arith.constant dense<0.000000e+00> : vector<4x2048xf32>
    %2 = tpu.matmul %1, %0, %cst {dimension_numbers = #tpu.dot_dimension_numbers<[1], [0], [0], [1], [0, 0, 1, 1], [], []>} : vector<4x32xf32>, vector<32x2048xf32>, vector<4x2048xf32> -> vector<4x2048xf32>
    %c0_3 = arith.constant 0 : index
    %c0_4 = arith.constant 0 : index
    %3 = vector.load %arg1[%c0_3, %c0_4] : memref<4x1xf32, #tpu.memory_space<vmem>>, vector<4x1xf32>
    %4 = vector.broadcast %3 : vector<4x1xf32> to vector<4x2048xf32>
    %5 = arith.addf %2, %4 : vector<4x2048xf32>
    %c0_5 = arith.constant 0 : index
    %c0_6 = arith.constant 0 : index
    %6 = vector.load %arg3[%c0_5, %c0_6] : memref<4x2048xf32, #tpu.memory_space<vmem>>, vector<4x2048xf32>
    tpu.vector_store %arg3[%c0_5, %c0_6], %5 {strides = array<i32>} : memref<4x2048xf32, #tpu.memory_space<vmem>>, vector<4x2048xf32>,
    return
  }
}

module attributes {stable_mosaic.version = 11 : i64} {
  func.func @_gemm_bn_kernel(%arg0: memref<8x64xf32, #tpu.memory_space<vmem>>, %arg1: memref<8x1xf32, #tpu.memory_space<vmem>>, %arg2: memref<8x1xf32, #tpu.memory_space<vmem>>, %arg3: memref<8x1xf32, #tpu.memory_space<vmem>>, %arg4: memref<64x512xf32, #tpu.memory_space<vmem>>, %arg5: memref<8x512xf32, #tpu.memory_space<vmem>>) attributes {dimension_semantics = [], scalar_prefetch = 0 : i64, scratch_operands = 0 : i64, tpu.core_type = #tpu.core_type<tc>} {
    %c0 = arith.constant 0 : index
    %c0_0 = arith.constant 0 : index
    %0 = vector.load %arg4[%c0, %c0_0] : memref<64x512xf32, #tpu.memory_space<vmem>>, vector<64x512xf32>
    %cst = arith.constant 0.000000e+00 : f32
    %1 = vector.broadcast %cst : f32 to vector<64x512xf32>
    %2 = arith.cmpf oge, %0, %1 : vector<64x512xf32>
    %cst_1 = arith.constant 2.000000e-01 : f32
    %3 = vector.broadcast %cst_1 : f32 to vector<64x512xf32>
    %4 = arith.mulf %3, %0 : vector<64x512xf32>
    %5 = arith.select %2, %0, %4 : vector<64x512xi1>, vector<64x512xf32>
    %c0_2 = arith.constant 0 : index
    %c0_3 = arith.constant 0 : index
    %6 = vector.load %arg0[%c0_2, %c0_3] : memref<8x64xf32, #tpu.memory_space<vmem>>, vector<8x64xf32>
    %cst_4 = arith.constant dense<0.000000e+00> : vector<8x512xf32>
    %7 = tpu.matmul %6, %5, %cst_4 {dimension_numbers = #tpu.dot_dimension_numbers<[1], [0], [0], [1], [0, 0, 1, 1], [], []>} : vector<8x64xf32>, vector<64x512xf32>, vector<8x512xf32> -> vector<8x512xf32>
    %c0_5 = arith.constant 0 : index
    %c0_6 = arith.constant 0 : index
    %8 = vector.load %arg1[%c0_5, %c0_6] : memref<8x1xf32, #tpu.memory_space<vmem>>, vector<8x1xf32>
    %9 = vector.broadcast %8 : vector<8x1xf32> to vector<8x512xf32>
    %10 = arith.addf %7, %9 : vector<8x512xf32>
    %c0_7 = arith.constant 0 : index
    %c0_8 = arith.constant 0 : index
    %11 = vector.load %arg2[%c0_7, %c0_8] : memref<8x1xf32, #tpu.memory_space<vmem>>, vector<8x1xf32>
    %c0_9 = arith.constant 0 : index
    %c0_10 = arith.constant 0 : index
    %12 = vector.load %arg3[%c0_9, %c0_10] : memref<8x1xf32, #tpu.memory_space<vmem>>, vector<8x1xf32>
    %cst_11 = arith.constant dense<0.000000e+00> : vector<8xf32>
    %13 = vector.multi_reduction <add>, %10, %cst_11 [1] : vector<8x512xf32> to vector<8xf32>
    %14 = vector.shape_cast %13 : vector<8xf32> to vector<8x1xf32>
    %cst_12 = arith.constant 0.001953125 : f32
    %15 = vector.broadcast %cst_12 : f32 to vector<8x1xf32>
    %16 = arith.mulf %14, %15 : vector<8x1xf32>
    %17 = arith.mulf %10, %10 : vector<8x512xf32>
    %cst_13 = arith.constant dense<0.000000e+00> : vector<8xf32>
    %18 = vector.multi_reduction <add>, %17, %cst_13 [1] : vector<8x512xf32> to vector<8xf32>
    %19 = vector.shape_cast %18 : vector<8xf32> to vector<8x1xf32>
    %cst_14 = arith.constant 0.001953125 : f32
    %20 = vector.broadcast %cst_14 : f32 to vector<8x1xf32>
    %21 = arith.mulf %19, %20 : vector<8x1xf32>
    %22 = arith.mulf %16, %16 : vector<8x1xf32>
    %23 = arith.subf %21, %22 : vector<8x1xf32>
    %24 = vector.broadcast %16 : vector<8x1xf32> to vector<8x512xf32>
    %25 = arith.subf %10, %24 : vector<8x512xf32>
    %cst_15 = arith.constant 9.99999974E-6 : f32
    %26 = vector.broadcast %cst_15 : f32 to vector<8x1xf32>
    %27 = arith.addf %23, %26 : vector<8x1xf32>
    %28 = math.rsqrt %27 : vector<8x1xf32>
    %29 = vector.broadcast %28 : vector<8x1xf32> to vector<8x512xf32>
    %30 = arith.mulf %25, %29 : vector<8x512xf32>
    %31 = vector.broadcast %11 : vector<8x1xf32> to vector<8x512xf32>
    %32 = arith.mulf %30, %31 : vector<8x512xf32>
    %33 = vector.broadcast %12 : vector<8x1xf32> to vector<8x512xf32>
    %34 = arith.addf %32, %33 : vector<8x512xf32>
    %c0_16 = arith.constant 0 : index
    %c0_17 = arith.constant 0 : index
    %35 = vector.load %arg5[%c0_16, %c0_17] : memref<8x512xf32, #tpu.memory_space<vmem>>, vector<8x512xf32>
    tpu.vector_store %arg5[%c0_16, %c0_17], %34 {strides = array<i32>} : memref<8x512xf32, #tpu.memory_space<vmem>>, vector<8x512xf32>,
    return
  }
}

module attributes {stable_mosaic.version = 11 : i64} {
  func.func @_gemm_bn_kernel(%arg0: memref<16x128xf32, #tpu.memory_space<vmem>>, %arg1: memref<16x1xf32, #tpu.memory_space<vmem>>, %arg2: memref<16x1xf32, #tpu.memory_space<vmem>>, %arg3: memref<16x1xf32, #tpu.memory_space<vmem>>, %arg4: memref<128x128xf32, #tpu.memory_space<vmem>>, %arg5: memref<16x128xf32, #tpu.memory_space<vmem>>) attributes {dimension_semantics = [], scalar_prefetch = 0 : i64, scratch_operands = 0 : i64, tpu.core_type = #tpu.core_type<tc>} {
    %c0 = arith.constant 0 : index
    %c0_0 = arith.constant 0 : index
    %0 = vector.load %arg4[%c0, %c0_0] : memref<128x128xf32, #tpu.memory_space<vmem>>, vector<128x128xf32>
    %cst = arith.constant 0.000000e+00 : f32
    %1 = vector.broadcast %cst : f32 to vector<128x128xf32>
    %2 = arith.cmpf oge, %0, %1 : vector<128x128xf32>
    %cst_1 = arith.constant 2.000000e-01 : f32
    %3 = vector.broadcast %cst_1 : f32 to vector<128x128xf32>
    %4 = arith.mulf %3, %0 : vector<128x128xf32>
    %5 = arith.select %2, %0, %4 : vector<128x128xi1>, vector<128x128xf32>
    %c0_2 = arith.constant 0 : index
    %c0_3 = arith.constant 0 : index
    %6 = vector.load %arg0[%c0_2, %c0_3] : memref<16x128xf32, #tpu.memory_space<vmem>>, vector<16x128xf32>
    %cst_4 = arith.constant dense<0.000000e+00> : vector<16x128xf32>
    %7 = tpu.matmul %6, %5, %cst_4 {dimension_numbers = #tpu.dot_dimension_numbers<[1], [0], [0], [1], [0, 0, 1, 1], [], []>} : vector<16x128xf32>, vector<128x128xf32>, vector<16x128xf32> -> vector<16x128xf32>
    %c0_5 = arith.constant 0 : index
    %c0_6 = arith.constant 0 : index
    %8 = vector.load %arg1[%c0_5, %c0_6] : memref<16x1xf32, #tpu.memory_space<vmem>>, vector<16x1xf32>
    %9 = vector.broadcast %8 : vector<16x1xf32> to vector<16x128xf32>
    %10 = arith.addf %7, %9 : vector<16x128xf32>
    %c0_7 = arith.constant 0 : index
    %c0_8 = arith.constant 0 : index
    %11 = vector.load %arg2[%c0_7, %c0_8] : memref<16x1xf32, #tpu.memory_space<vmem>>, vector<16x1xf32>
    %c0_9 = arith.constant 0 : index
    %c0_10 = arith.constant 0 : index
    %12 = vector.load %arg3[%c0_9, %c0_10] : memref<16x1xf32, #tpu.memory_space<vmem>>, vector<16x1xf32>
    %cst_11 = arith.constant dense<0.000000e+00> : vector<16xf32>
    %13 = vector.multi_reduction <add>, %10, %cst_11 [1] : vector<16x128xf32> to vector<16xf32>
    %14 = vector.shape_cast %13 : vector<16xf32> to vector<16x1xf32>
    %cst_12 = arith.constant 7.812500e-03 : f32
    %15 = vector.broadcast %cst_12 : f32 to vector<16x1xf32>
    %16 = arith.mulf %14, %15 : vector<16x1xf32>
    %17 = arith.mulf %10, %10 : vector<16x128xf32>
    %cst_13 = arith.constant dense<0.000000e+00> : vector<16xf32>
    %18 = vector.multi_reduction <add>, %17, %cst_13 [1] : vector<16x128xf32> to vector<16xf32>
    %19 = vector.shape_cast %18 : vector<16xf32> to vector<16x1xf32>
    %cst_14 = arith.constant 7.812500e-03 : f32
    %20 = vector.broadcast %cst_14 : f32 to vector<16x1xf32>
    %21 = arith.mulf %19, %20 : vector<16x1xf32>
    %22 = arith.mulf %16, %16 : vector<16x1xf32>
    %23 = arith.subf %21, %22 : vector<16x1xf32>
    %24 = vector.broadcast %16 : vector<16x1xf32> to vector<16x128xf32>
    %25 = arith.subf %10, %24 : vector<16x128xf32>
    %cst_15 = arith.constant 9.99999974E-6 : f32
    %26 = vector.broadcast %cst_15 : f32 to vector<16x1xf32>
    %27 = arith.addf %23, %26 : vector<16x1xf32>
    %28 = math.rsqrt %27 : vector<16x1xf32>
    %29 = vector.broadcast %28 : vector<16x1xf32> to vector<16x128xf32>
    %30 = arith.mulf %25, %29 : vector<16x128xf32>
    %31 = vector.broadcast %11 : vector<16x1xf32> to vector<16x128xf32>
    %32 = arith.mulf %30, %31 : vector<16x128xf32>
    %33 = vector.broadcast %12 : vector<16x1xf32> to vector<16x128xf32>
    %34 = arith.addf %32, %33 : vector<16x128xf32>
    %c0_16 = arith.constant 0 : index
    %c0_17 = arith.constant 0 : index
    %35 = vector.load %arg5[%c0_16, %c0_17] : memref<16x128xf32, #tpu.memory_space<vmem>>, vector<16x128xf32>
    tpu.vector_store %arg5[%c0_16, %c0_17], %34 {strides = array<i32>} : memref<16x128xf32, #tpu.memory_space<vmem>>, vector<16x128xf32>,
    return
  }
}

module attributes {stable_mosaic.version = 11 : i64} {
  func.func @_bottleneck_kernel(%arg0: memref<16x128xf32, #tpu.memory_space<vmem>>, %arg1: memref<16x32x16xf32, #tpu.memory_space<vmem>>, %arg2: memref<32x1xf32, #tpu.memory_space<vmem>>, %arg3: memref<32x1xf32, #tpu.memory_space<vmem>>, %arg4: memref<32x1xf32, #tpu.memory_space<vmem>>, %arg5: memref<16x128x32xf32, #tpu.memory_space<vmem>>, %arg6: memref<4x32x32xf32, #tpu.memory_space<vmem>>, %arg7: memref<32x1xf32, #tpu.memory_space<vmem>>, %arg8: memref<32x1xf32, #tpu.memory_space<vmem>>, %arg9: memref<32x1xf32, #tpu.memory_space<vmem>>, %arg10: memref<4x32x8xf32, #tpu.memory_space<vmem>>, %arg11: memref<32x32xf32, #tpu.memory_space<vmem>>, %arg12: memref<32x1xf32, #tpu.memory_space<vmem>>, %arg13: memref<32x1xf32, #tpu.memory_space<vmem>>, %arg14: memref<32x1xf32, #tpu.memory_space<vmem>>, %arg15: memref<8x32xf32, #tpu.memory_space<vmem>>, %arg16: memref<9x16x64xf32, #tpu.memory_space<vmem>>, %arg17: memref<16x1xf32, #tpu.memory_space<vmem>>, %arg18: memref<16x1xf32, #tpu.memory_space<vmem>>, %arg19: memref<16x1xf32, #tpu.memory_space<vmem>>, %arg20: memref<9x32x128xf32, #tpu.memory_space<vmem>>, %arg21: memref<16x128xf32, #tpu.memory_space<vmem>>) attributes {dimension_semantics = [], scalar_prefetch = 0 : i64, scratch_operands = 0 : i64, tpu.core_type = #tpu.core_type<tc>} {
    %c0 = arith.constant 0 : index
    %c0_0 = arith.constant 0 : index
    %0 = vector.load %arg0[%c0, %c0_0] : memref<16x128xf32, #tpu.memory_space<vmem>>, vector<16x128xf32>
    %cst = arith.constant 0.000000e+00 : f32
    %1 = vector.broadcast %cst : f32 to vector<16x128xf32>
    %2 = arith.cmpf oge, %0, %1 : vector<16x128xf32>
    %cst_1 = arith.constant 2.000000e-01 : f32
    %3 = vector.broadcast %cst_1 : f32 to vector<16x128xf32>
    %4 = arith.mulf %3, %0 : vector<16x128xf32>
    %5 = arith.select %2, %0, %4 : vector<16x128xi1>, vector<16x128xf32>
    %c0_2 = arith.constant 0 : index
    %c0_3 = arith.constant 0 : index
    %6 = vector.load %arg2[%c0_2, %c0_3] : memref<32x1xf32, #tpu.memory_space<vmem>>, vector<32x1xf32>
    %c0_4 = arith.constant 0 : index
    %c0_5 = arith.constant 0 : index
    %c0_6 = arith.constant 0 : index
    %7 = vector.load %arg5[%c0_4, %c0_5, %c0_6] : memref<16x128x32xf32, #tpu.memory_space<vmem>>, vector<1x128x32xf32>
    %8 = vector.shape_cast %7 : vector<1x128x32xf32> to vector<128x32xf32>
    %c0_7 = arith.constant 0 : index
    %c0_8 = arith.constant 0 : index
    %c0_9 = arith.constant 0 : index
    %9 = vector.load %arg1[%c0_7, %c0_8, %c0_9] : memref<16x32x16xf32, #tpu.memory_space<vmem>>, vector<1x32x16xf32>
    %10 = vector.shape_cast %9 : vector<1x32x16xf32> to vector<32x16xf32>
    %cst_10 = arith.constant dense<0.000000e+00> : vector<16x32xf32>
    %11 = tpu.matmul %5, %8, %cst_10 {dimension_numbers = #tpu.dot_dimension_numbers<[1], [0], [0], [1], [0, 0, 1, 1], [], []>} : vector<16x128xf32>, vector<128x32xf32>, vector<16x32xf32> -> vector<16x32xf32>
    %cst_11 = arith.constant dense<0.000000e+00> : vector<32x32xf32>
    %12 = tpu.matmul %10, %11, %cst_11 {dimension_numbers = #tpu.dot_dimension_numbers<[1], [0], [0], [1], [0, 0, 1, 1], [], []>} : vector<32x16xf32>, vector<16x32xf32>, vector<32x32xf32> -> vector<32x32xf32>
    %c1 = arith.constant 1 : index
    %c0_12 = arith.constant 0 : index
    %c0_13 = arith.constant 0 : index
    %13 = vector.load %arg5[%c1, %c0_12, %c0_13] : memref<16x128x32xf32, #tpu.memory_space<vmem>>, vector<1x128x32xf32>
    %14 = vector.shape_cast %13 : vector<1x128x32xf32> to vector<128x32xf32>
    %c1_14 = arith.constant 1 : index
    %c0_15 = arith.constant 0 : index
    %c0_16 = arith.constant 0 : index
    %15 = vector.load %arg1[%c1_14, %c0_15, %c0_16] : memref<16x32x16xf32, #tpu.memory_space<vmem>>, vector<1x32x16xf32>
    %16 = vector.shape_cast %15 : vector<1x32x16xf32> to vector<32x16xf32>
    %cst_17 = arith.constant dense<0.000000e+00> : vector<16x32xf32>
    %17 = tpu.matmul %5, %14, %cst_17 {dimension_numbers = #tpu.dot_dimension_numbers<[1], [0], [0], [1], [0, 0, 1, 1], [], []>} : vector<16x128xf32>, vector<128x32xf32>, vector<16x32xf32> -> vector<16x32xf32>
    %cst_18 = arith.constant dense<0.000000e+00> : vector<32x32xf32>
    %18 = tpu.matmul %16, %17, %cst_18 {dimension_numbers = #tpu.dot_dimension_numbers<[1], [0], [0], [1], [0, 0, 1, 1], [], []>} : vector<32x16xf32>, vector<16x32xf32>, vector<32x32xf32> -> vector<32x32xf32>
    %19 = arith.addf %12, %18 : vector<32x32xf32>
    %c2 = arith.constant 2 : index
    %c0_19 = arith.constant 0 : index
    %c0_20 = arith.constant 0 : index
    %20 = vector.load %arg5[%c2, %c0_19, %c0_20] : memref<16x128x32xf32, #tpu.memory_space<vmem>>, vector<1x128x32xf32>
    %21 = vector.shape_cast %20 : vector<1x128x32xf32> to vector<128x32xf32>
    %c2_21 = arith.constant 2 : index
    %c0_22 = arith.constant 0 : index
    %c0_23 = arith.constant 0 : index
    %22 = vector.load %arg1[%c2_21, %c0_22, %c0_23] : memref<16x32x16xf32, #tpu.memory_space<vmem>>, vector<1x32x16xf32>
    %23 = vector.shape_cast %22 : vector<1x32x16xf32> to vector<32x16xf32>
    %cst_24 = arith.constant dense<0.000000e+00> : vector<16x32xf32>
    %24 = tpu.matmul %5, %21, %cst_24 {dimension_numbers = #tpu.dot_dimension_numbers<[1], [0], [0], [1], [0, 0, 1, 1], [], []>} : vector<16x128xf32>, vector<128x32xf32>, vector<16x32xf32> -> vector<16x32xf32>
    %cst_25 = arith.constant dense<0.000000e+00> : vector<32x32xf32>
    %25 = tpu.matmul %23, %24, %cst_25 {dimension_numbers = #tpu.dot_dimension_numbers<[1], [0], [0], [1], [0, 0, 1, 1], [], []>} : vector<32x16xf32>, vector<16x32xf32>, vector<32x32xf32> -> vector<32x32xf32>
    %26 = arith.addf %19, %25 : vector<32x32xf32>
    %c3 = arith.constant 3 : index
    %c0_26 = arith.constant 0 : index
    %c0_27 = arith.constant 0 : index
    %27 = vector.load %arg5[%c3, %c0_26, %c0_27] : memref<16x128x32xf32, #tpu.memory_space<vmem>>, vector<1x128x32xf32>
    %28 = vector.shape_cast %27 : vector<1x128x32xf32> to vector<128x32xf32>
    %c3_28 = arith.constant 3 : index
    %c0_29 = arith.constant 0 : index
    %c0_30 = arith.constant 0 : index
    %29 = vector.load %arg1[%c3_28, %c0_29, %c0_30] : memref<16x32x16xf32, #tpu.memory_space<vmem>>, vector<1x32x16xf32>
    %30 = vector.shape_cast %29 : vector<1x32x16xf32> to vector<32x16xf32>
    %cst_31 = arith.constant dense<0.000000e+00> : vector<16x32xf32>
    %31 = tpu.matmul %5, %28, %cst_31 {dimension_numbers = #tpu.dot_dimension_numbers<[1], [0], [0], [1], [0, 0, 1, 1], [], []>} : vector<16x128xf32>, vector<128x32xf32>, vector<16x32xf32> -> vector<16x32xf32>
    %cst_32 = arith.constant dense<0.000000e+00> : vector<32x32xf32>
    %32 = tpu.matmul %30, %31, %cst_32 {dimension_numbers = #tpu.dot_dimension_numbers<[1], [0], [0], [1], [0, 0, 1, 1], [], []>} : vector<32x16xf32>, vector<16x32xf32>, vector<32x32xf32> -> vector<32x32xf32>
    %33 = arith.addf %26, %32 : vector<32x32xf32>
    %c4 = arith.constant 4 : index
    %c0_33 = arith.constant 0 : index
    %c0_34 = arith.constant 0 : index
    %34 = vector.load %arg5[%c4, %c0_33, %c0_34] : memref<16x128x32xf32, #tpu.memory_space<vmem>>, vector<1x128x32xf32>
    %35 = vector.shape_cast %34 : vector<1x128x32xf32> to vector<128x32xf32>
    %c4_35 = arith.constant 4 : index
    %c0_36 = arith.constant 0 : index
    %c0_37 = arith.constant 0 : index
    %36 = vector.load %arg1[%c4_35, %c0_36, %c0_37] : memref<16x32x16xf32, #tpu.memory_space<vmem>>, vector<1x32x16xf32>
    %37 = vector.shape_cast %36 : vector<1x32x16xf32> to vector<32x16xf32>
    %cst_38 = arith.constant dense<0.000000e+00> : vector<16x32xf32>
    %38 = tpu.matmul %5, %35, %cst_38 {dimension_numbers = #tpu.dot_dimension_numbers<[1], [0], [0], [1], [0, 0, 1, 1], [], []>} : vector<16x128xf32>, vector<128x32xf32>, vector<16x32xf32> -> vector<16x32xf32>
    %cst_39 = arith.constant dense<0.000000e+00> : vector<32x32xf32>
    %39 = tpu.matmul %37, %38, %cst_39 {dimension_numbers = #tpu.dot_dimension_numbers<[1], [0], [0], [1], [0, 0, 1, 1], [], []>} : vector<32x16xf32>, vector<16x32xf32>, vector<32x32xf32> -> vector<32x32xf32>
    %40 = arith.addf %33, %39 : vector<32x32xf32>
    %c5 = arith.constant 5 : index
    %c0_40 = arith.constant 0 : index
    %c0_41 = arith.constant 0 : index
    %41 = vector.load %arg5[%c5, %c0_40, %c0_41] : memref<16x128x32xf32, #tpu.memory_space<vmem>>, vector<1x128x32xf32>
    %42 = vector.shape_cast %41 : vector<1x128x32xf32> to vector<128x32xf32>
    %c5_42 = arith.constant 5 : index
    %c0_43 = arith.constant 0 : index
    %c0_44 = arith.constant 0 : index
    %43 = vector.load %arg1[%c5_42, %c0_43, %c0_44] : memref<16x32x16xf32, #tpu.memory_space<vmem>>, vector<1x32x16xf32>
    %44 = vector.shape_cast %43 : vector<1x32x16xf32> to vector<32x16xf32>
    %cst_45 = arith.constant dense<0.000000e+00> : vector<16x32xf32>
    %45 = tpu.matmul %5, %42, %cst_45 {dimension_numbers = #tpu.dot_dimension_numbers<[1], [0], [0], [1], [0, 0, 1, 1], [], []>} : vector<16x128xf32>, vector<128x32xf32>, vector<16x32xf32> -> vector<16x32xf32>
    %cst_46 = arith.constant dense<0.000000e+00> : vector<32x32xf32>
    %46 = tpu.matmul %44, %45, %cst_46 {dimension_numbers = #tpu.dot_dimension_numbers<[1], [0], [0], [1], [0, 0, 1, 1], [], []>} : vector<32x16xf32>, vector<16x32xf32>, vector<32x32xf32> -> vector<32x32xf32>
    %47 = arith.addf %40, %46 : vector<32x32xf32>
    %c6 = arith.constant 6 : index
    %c0_47 = arith.constant 0 : index
    %c0_48 = arith.constant 0 : index
    %48 = vector.load %arg5[%c6, %c0_47, %c0_48] : memref<16x128x32xf32, #tpu.memory_space<vmem>>, vector<1x128x32xf32>
    %49 = vector.shape_cast %48 : vector<1x128x32xf32> to vector<128x32xf32>
    %c6_49 = arith.constant 6 : index
    %c0_50 = arith.constant 0 : index
    %c0_51 = arith.constant 0 : index
    %50 = vector.load %arg1[%c6_49, %c0_50, %c0_51] : memref<16x32x16xf32, #tpu.memory_space<vmem>>, vector<1x32x16xf32>
    %51 = vector.shape_cast %50 : vector<1x32x16xf32> to vector<32x16xf32>
    %cst_52 = arith.constant dense<0.000000e+00> : vector<16x32xf32>
    %52 = tpu.matmul %5, %49, %cst_52 {dimension_numbers = #tpu.dot_dimension_numbers<[1], [0], [0], [1], [0, 0, 1, 1], [], []>} : vector<16x128xf32>, vector<128x32xf32>, vector<16x32xf32> -> vector<16x32xf32>
    %cst_53 = arith.constant dense<0.000000e+00> : vector<32x32xf32>
    %53 = tpu.matmul %51, %52, %cst_53 {dimension_numbers = #tpu.dot_dimension_numbers<[1], [0], [0], [1], [0, 0, 1, 1], [], []>} : vector<32x16xf32>, vector<16x32xf32>, vector<32x32xf32> -> vector<32x32xf32>
    %54 = arith.addf %47, %53 : vector<32x32xf32>
    %c7 = arith.constant 7 : index
    %c0_54 = arith.constant 0 : index
    %c0_55 = arith.constant 0 : index
    %55 = vector.load %arg5[%c7, %c0_54, %c0_55] : memref<16x128x32xf32, #tpu.memory_space<vmem>>, vector<1x128x32xf32>
    %56 = vector.shape_cast %55 : vector<1x128x32xf32> to vector<128x32xf32>
    %c7_56 = arith.constant 7 : index
    %c0_57 = arith.constant 0 : index
    %c0_58 = arith.constant 0 : index
    %57 = vector.load %arg1[%c7_56, %c0_57, %c0_58] : memref<16x32x16xf32, #tpu.memory_space<vmem>>, vector<1x32x16xf32>
    %58 = vector.shape_cast %57 : vector<1x32x16xf32> to vector<32x16xf32>
    %cst_59 = arith.constant dense<0.000000e+00> : vector<16x32xf32>
    %59 = tpu.matmul %5, %56, %cst_59 {dimension_numbers = #tpu.dot_dimension_numbers<[1], [0], [0], [1], [0, 0, 1, 1], [], []>} : vector<16x128xf32>, vector<128x32xf32>, vector<16x32xf32> -> vector<16x32xf32>
    %cst_60 = arith.constant dense<0.000000e+00> : vector<32x32xf32>
    %60 = tpu.matmul %58, %59, %cst_60 {dimension_numbers = #tpu.dot_dimension_numbers<[1], [0], [0], [1], [0, 0, 1, 1], [], []>} : vector<32x16xf32>, vector<16x32xf32>, vector<32x32xf32> -> vector<32x32xf32>
    %61 = arith.addf %54, %60 : vector<32x32xf32>
    %c8 = arith.constant 8 : index
    %c0_61 = arith.constant 0 : index
    %c0_62 = arith.constant 0 : index
    %62 = vector.load %arg5[%c8, %c0_61, %c0_62] : memref<16x128x32xf32, #tpu.memory_space<vmem>>, vector<1x128x32xf32>
    %63 = vector.shape_cast %62 : vector<1x128x32xf32> to vector<128x32xf32>
    %c8_63 = arith.constant 8 : index
    %c0_64 = arith.constant 0 : index
    %c0_65 = arith.constant 0 : index
    %64 = vector.load %arg1[%c8_63, %c0_64, %c0_65] : memref<16x32x16xf32, #tpu.memory_space<vmem>>, vector<1x32x16xf32>
    %65 = vector.shape_cast %64 : vector<1x32x16xf32> to vector<32x16xf32>
    %cst_66 = arith.constant dense<0.000000e+00> : vector<16x32xf32>
    %66 = tpu.matmul %5, %63, %cst_66 {dimension_numbers = #tpu.dot_dimension_numbers<[1], [0], [0], [1], [0, 0, 1, 1], [], []>} : vector<16x128xf32>, vector<128x32xf32>, vector<16x32xf32> -> vector<16x32xf32>
    %cst_67 = arith.constant dense<0.000000e+00> : vector<32x32xf32>
    %67 = tpu.matmul %65, %66, %cst_67 {dimension_numbers = #tpu.dot_dimension_numbers<[1], [0], [0], [1], [0, 0, 1, 1], [], []>} : vector<32x16xf32>, vector<16x32xf32>, vector<32x32xf32> -> vector<32x32xf32>
    %68 = arith.addf %61, %67 : vector<32x32xf32>
    %c9 = arith.constant 9 : index
    %c0_68 = arith.constant 0 : index
    %c0_69 = arith.constant 0 : index
    %69 = vector.load %arg5[%c9, %c0_68, %c0_69] : memref<16x128x32xf32, #tpu.memory_space<vmem>>, vector<1x128x32xf32>
    %70 = vector.shape_cast %69 : vector<1x128x32xf32> to vector<128x32xf32>
    %c9_70 = arith.constant 9 : index
    %c0_71 = arith.constant 0 : index
    %c0_72 = arith.constant 0 : index
    %71 = vector.load %arg1[%c9_70, %c0_71, %c0_72] : memref<16x32x16xf32, #tpu.memory_space<vmem>>, vector<1x32x16xf32>
    %72 = vector.shape_cast %71 : vector<1x32x16xf32> to vector<32x16xf32>
    %cst_73 = arith.constant dense<0.000000e+00> : vector<16x32xf32>
    %73 = tpu.matmul %5, %70, %cst_73 {dimension_numbers = #tpu.dot_dimension_numbers<[1], [0], [0], [1], [0, 0, 1, 1], [], []>} : vector<16x128xf32>, vector<128x32xf32>, vector<16x32xf32> -> vector<16x32xf32>
    %cst_74 = arith.constant dense<0.000000e+00> : vector<32x32xf32>
    %74 = tpu.matmul %72, %73, %cst_74 {dimension_numbers = #tpu.dot_dimension_numbers<[1], [0], [0], [1], [0, 0, 1, 1], [], []>} : vector<32x16xf32>, vector<16x32xf32>, vector<32x32xf32> -> vector<32x32xf32>
    %75 = arith.addf %68, %74 : vector<32x32xf32>
    %c10 = arith.constant 10 : index
    %c0_75 = arith.constant 0 : index
    %c0_76 = arith.constant 0 : index
    %76 = vector.load %arg5[%c10, %c0_75, %c0_76] : memref<16x128x32xf32, #tpu.memory_space<vmem>>, vector<1x128x32xf32>
    %77 = vector.shape_cast %76 : vector<1x128x32xf32> to vector<128x32xf32>
    %c10_77 = arith.constant 10 : index
    %c0_78 = arith.constant 0 : index
    %c0_79 = arith.constant 0 : index
    %78 = vector.load %arg1[%c10_77, %c0_78, %c0_79] : memref<16x32x16xf32, #tpu.memory_space<vmem>>, vector<1x32x16xf32>
    %79 = vector.shape_cast %78 : vector<1x32x16xf32> to vector<32x16xf32>
    %cst_80 = arith.constant dense<0.000000e+00> : vector<16x32xf32>
    %80 = tpu.matmul %5, %77, %cst_80 {dimension_numbers = #tpu.dot_dimension_numbers<[1], [0], [0], [1], [0, 0, 1, 1], [], []>} : vector<16x128xf32>, vector<128x32xf32>, vector<16x32xf32> -> vector<16x32xf32>
    %cst_81 = arith.constant dense<0.000000e+00> : vector<32x32xf32>
    %81 = tpu.matmul %79, %80, %cst_81 {dimension_numbers = #tpu.dot_dimension_numbers<[1], [0], [0], [1], [0, 0, 1, 1], [], []>} : vector<32x16xf32>, vector<16x32xf32>, vector<32x32xf32> -> vector<32x32xf32>
    %82 = arith.addf %75, %81 : vector<32x32xf32>
    %c11 = arith.constant 11 : index
    %c0_82 = arith.constant 0 : index
    %c0_83 = arith.constant 0 : index
    %83 = vector.load %arg5[%c11, %c0_82, %c0_83] : memref<16x128x32xf32, #tpu.memory_space<vmem>>, vector<1x128x32xf32>
    %84 = vector.shape_cast %83 : vector<1x128x32xf32> to vector<128x32xf32>
    %c11_84 = arith.constant 11 : index
    %c0_85 = arith.constant 0 : index
    %c0_86 = arith.constant 0 : index
    %85 = vector.load %arg1[%c11_84, %c0_85, %c0_86] : memref<16x32x16xf32, #tpu.memory_space<vmem>>, vector<1x32x16xf32>
    %86 = vector.shape_cast %85 : vector<1x32x16xf32> to vector<32x16xf32>
    %cst_87 = arith.constant dense<0.000000e+00> : vector<16x32xf32>
    %87 = tpu.matmul %5, %84, %cst_87 {dimension_numbers = #tpu.dot_dimension_numbers<[1], [0], [0], [1], [0, 0, 1, 1], [], []>} : vector<16x128xf32>, vector<128x32xf32>, vector<16x32xf32> -> vector<16x32xf32>
    %cst_88 = arith.constant dense<0.000000e+00> : vector<32x32xf32>
    %88 = tpu.matmul %86, %87, %cst_88 {dimension_numbers = #tpu.dot_dimension_numbers<[1], [0], [0], [1], [0, 0, 1, 1], [], []>} : vector<32x16xf32>, vector<16x32xf32>, vector<32x32xf32> -> vector<32x32xf32>
    %89 = arith.addf %82, %88 : vector<32x32xf32>
    %c12 = arith.constant 12 : index
    %c0_89 = arith.constant 0 : index
    %c0_90 = arith.constant 0 : index
    %90 = vector.load %arg5[%c12, %c0_89, %c0_90] : memref<16x128x32xf32, #tpu.memory_space<vmem>>, vector<1x128x32xf32>
    %91 = vector.shape_cast %90 : vector<1x128x32xf32> to vector<128x32xf32>
    %c12_91 = arith.constant 12 : index
    %c0_92 = arith.constant 0 : index
    %c0_93 = arith.constant 0 : index
    %92 = vector.load %arg1[%c12_91, %c0_92, %c0_93] : memref<16x32x16xf32, #tpu.memory_space<vmem>>, vector<1x32x16xf32>
    %93 = vector.shape_cast %92 : vector<1x32x16xf32> to vector<32x16xf32>
    %cst_94 = arith.constant dense<0.000000e+00> : vector<16x32xf32>
    %94 = tpu.matmul %5, %91, %cst_94 {dimension_numbers = #tpu.dot_dimension_numbers<[1], [0], [0], [1], [0, 0, 1, 1], [], []>} : vector<16x128xf32>, vector<128x32xf32>, vector<16x32xf32> -> vector<16x32xf32>
    %cst_95 = arith.constant dense<0.000000e+00> : vector<32x32xf32>
    %95 = tpu.matmul %93, %94, %cst_95 {dimension_numbers = #tpu.dot_dimension_numbers<[1], [0], [0], [1], [0, 0, 1, 1], [], []>} : vector<32x16xf32>, vector<16x32xf32>, vector<32x32xf32> -> vector<32x32xf32>
    %96 = arith.addf %89, %95 : vector<32x32xf32>
    %c13 = arith.constant 13 : index
    %c0_96 = arith.constant 0 : index
    %c0_97 = arith.constant 0 : index
    %97 = vector.load %arg5[%c13, %c0_96, %c0_97] : memref<16x128x32xf32, #tpu.memory_space<vmem>>, vector<1x128x32xf32>
    %98 = vector.shape_cast %97 : vector<1x128x32xf32> to vector<128x32xf32>
    %c13_98 = arith.constant 13 : index
    %c0_99 = arith.constant 0 : index
    %c0_100 = arith.constant 0 : index
    %99 = vector.load %arg1[%c13_98, %c0_99, %c0_100] : memref<16x32x16xf32, #tpu.memory_space<vmem>>, vector<1x32x16xf32>
    %100 = vector.shape_cast %99 : vector<1x32x16xf32> to vector<32x16xf32>
    %cst_101 = arith.constant dense<0.000000e+00> : vector<16x32xf32>
    %101 = tpu.matmul %5, %98, %cst_101 {dimension_numbers = #tpu.dot_dimension_numbers<[1], [0], [0], [1], [0, 0, 1, 1], [], []>} : vector<16x128xf32>, vector<128x32xf32>, vector<16x32xf32> -> vector<16x32xf32>
    %cst_102 = arith.constant dense<0.000000e+00> : vector<32x32xf32>
    %102 = tpu.matmul %100, %101, %cst_102 {dimension_numbers = #tpu.dot_dimension_numbers<[1], [0], [0], [1], [0, 0, 1, 1], [], []>} : vector<32x16xf32>, vector<16x32xf32>, vector<32x32xf32> -> vector<32x32xf32>
    %103 = arith.addf %96, %102 : vector<32x32xf32>
    %c14 = arith.constant 14 : index
    %c0_103 = arith.constant 0 : index
    %c0_104 = arith.constant 0 : index
    %104 = vector.load %arg5[%c14, %c0_103, %c0_104] : memref<16x128x32xf32, #tpu.memory_space<vmem>>, vector<1x128x32xf32>
    %105 = vector.shape_cast %104 : vector<1x128x32xf32> to vector<128x32xf32>
    %c14_105 = arith.constant 14 : index
    %c0_106 = arith.constant 0 : index
    %c0_107 = arith.constant 0 : index
    %106 = vector.load %arg1[%c14_105, %c0_106, %c0_107] : memref<16x32x16xf32, #tpu.memory_space<vmem>>, vector<1x32x16xf32>
    %107 = vector.shape_cast %106 : vector<1x32x16xf32> to vector<32x16xf32>
    %cst_108 = arith.constant dense<0.000000e+00> : vector<16x32xf32>
    %108 = tpu.matmul %5, %105, %cst_108 {dimension_numbers = #tpu.dot_dimension_numbers<[1], [0], [0], [1], [0, 0, 1, 1], [], []>} : vector<16x128xf32>, vector<128x32xf32>, vector<16x32xf32> -> vector<16x32xf32>
    %cst_109 = arith.constant dense<0.000000e+00> : vector<32x32xf32>
    %109 = tpu.matmul %107, %108, %cst_109 {dimension_numbers = #tpu.dot_dimension_numbers<[1], [0], [0], [1], [0, 0, 1, 1], [], []>} : vector<32x16xf32>, vector<16x32xf32>, vector<32x32xf32> -> vector<32x32xf32>
    %110 = arith.addf %103, %109 : vector<32x32xf32>
    %c15 = arith.constant 15 : index
    %c0_110 = arith.constant 0 : index
    %c0_111 = arith.constant 0 : index
    %111 = vector.load %arg5[%c15, %c0_110, %c0_111] : memref<16x128x32xf32, #tpu.memory_space<vmem>>, vector<1x128x32xf32>
    %112 = vector.shape_cast %111 : vector<1x128x32xf32> to vector<128x32xf32>
    %c15_112 = arith.constant 15 : index
    %c0_113 = arith.constant 0 : index
    %c0_114 = arith.constant 0 : index
    %113 = vector.load %arg1[%c15_112, %c0_113, %c0_114] : memref<16x32x16xf32, #tpu.memory_space<vmem>>, vector<1x32x16xf32>
    %114 = vector.shape_cast %113 : vector<1x32x16xf32> to vector<32x16xf32>
    %cst_115 = arith.constant dense<0.000000e+00> : vector<16x32xf32>
    %115 = tpu.matmul %5, %112, %cst_115 {dimension_numbers = #tpu.dot_dimension_numbers<[1], [0], [0], [1], [0, 0, 1, 1], [], []>} : vector<16x128xf32>, vector<128x32xf32>, vector<16x32xf32> -> vector<16x32xf32>
    %cst_116 = arith.constant dense<0.000000e+00> : vector<32x32xf32>
    %116 = tpu.matmul %114, %115, %cst_116 {dimension_numbers = #tpu.dot_dimension_numbers<[1], [0], [0], [1], [0, 0, 1, 1], [], []>} : vector<32x16xf32>, vector<16x32xf32>, vector<32x32xf32> -> vector<32x32xf32>
    %117 = arith.addf %110, %116 : vector<32x32xf32>
    %118 = vector.broadcast %6 : vector<32x1xf32> to vector<32x32xf32>
    %119 = arith.addf %117, %118 : vector<32x32xf32>
    %c0_117 = arith.constant 0 : index
    %c0_118 = arith.constant 0 : index
    %120 = vector.load %arg3[%c0_117, %c0_118] : memref<32x1xf32, #tpu.memory_space<vmem>>, vector<32x1xf32>
    %c0_119 = arith.constant 0 : index
    %c0_120 = arith.constant 0 : index
    %121 = vector.load %arg4[%c0_119, %c0_120] : memref<32x1xf32, #tpu.memory_space<vmem>>, vector<32x1xf32>
    %cst_121 = arith.constant dense<0.000000e+00> : vector<32xf32>
    %122 = vector.multi_reduction <add>, %119, %cst_121 [1] : vector<32x32xf32> to vector<32xf32>
    %123 = vector.shape_cast %122 : vector<32xf32> to vector<32x1xf32>
    %cst_122 = arith.constant 3.125000e-02 : f32
    %124 = vector.broadcast %cst_122 : f32 to vector<32x1xf32>
    %125 = arith.mulf %123, %124 : vector<32x1xf32>
    %126 = arith.mulf %119, %119 : vector<32x32xf32>
    %cst_123 = arith.constant dense<0.000000e+00> : vector<32xf32>
    %127 = vector.multi_reduction <add>, %126, %cst_123 [1] : vector<32x32xf32> to vector<32xf32>
    %128 = vector.shape_cast %127 : vector<32xf32> to vector<32x1xf32>
    %cst_124 = arith.constant 3.125000e-02 : f32
    %129 = vector.broadcast %cst_124 : f32 to vector<32x1xf32>
    %130 = arith.mulf %128, %129 : vector<32x1xf32>
    %131 = arith.mulf %125, %125 : vector<32x1xf32>
    %132 = arith.subf %130, %131 : vector<32x1xf32>
    %133 = vector.broadcast %125 : vector<32x1xf32> to vector<32x32xf32>
    %134 = arith.subf %119, %133 : vector<32x32xf32>
    %cst_125 = arith.constant 9.99999974E-6 : f32
    %135 = vector.broadcast %cst_125 : f32 to vector<32x1xf32>
    %136 = arith.addf %132, %135 : vector<32x1xf32>
    %137 = math.rsqrt %136 : vector<32x1xf32>
    %138 = vector.broadcast %137 : vector<32x1xf32> to vector<32x32xf32>
    %139 = arith.mulf %134, %138 : vector<32x32xf32>
    %140 = vector.broadcast %120 : vector<32x1xf32> to vector<32x32xf32>
    %141 = arith.mulf %139, %140 : vector<32x32xf32>
    %142 = vector.broadcast %121 : vector<32x1xf32> to vector<32x32xf32>
    %143 = arith.addf %141, %142 : vector<32x32xf32>
    %cst_126 = arith.constant 0.000000e+00 : f32
    %144 = vector.broadcast %cst_126 : f32 to vector<32x32xf32>
    %145 = arith.cmpf oge, %143, %144 : vector<32x32xf32>
    %cst_127 = arith.constant 2.000000e-01 : f32
    %146 = vector.broadcast %cst_127 : f32 to vector<32x32xf32>
    %147 = arith.mulf %146, %143 : vector<32x32xf32>
    %148 = arith.select %145, %143, %147 : vector<32x32xi1>, vector<32x32xf32>
    %c0_128 = arith.constant 0 : index
    %c0_129 = arith.constant 0 : index
    %149 = vector.load %arg7[%c0_128, %c0_129] : memref<32x1xf32, #tpu.memory_space<vmem>>, vector<32x1xf32>
    %c0_130 = arith.constant 0 : index
    %c0_131 = arith.constant 0 : index
    %c0_132 = arith.constant 0 : index
    %150 = vector.load %arg10[%c0_130, %c0_131, %c0_132] : memref<4x32x8xf32, #tpu.memory_space<vmem>>, vector<1x32x8xf32>
    %151 = vector.shape_cast %150 : vector<1x32x8xf32> to vector<32x8xf32>
    %c0_133 = arith.constant 0 : index
    %c0_134 = arith.constant 0 : index
    %c0_135 = arith.constant 0 : index
    %152 = vector.load %arg6[%c0_133, %c0_134, %c0_135] : memref<4x32x32xf32, #tpu.memory_space<vmem>>, vector<1x32x32xf32>
    %153 = vector.shape_cast %152 : vector<1x32x32xf32> to vector<32x32xf32>
    %cst_136 = arith.constant dense<0.000000e+00> : vector<32x8xf32>
    %154 = tpu.matmul %148, %151, %cst_136 {dimension_numbers = #tpu.dot_dimension_numbers<[1], [0], [0], [1], [0, 0, 1, 1], [], []>} : vector<32x32xf32>, vector<32x8xf32>, vector<32x8xf32> -> vector<32x8xf32>
    %cst_137 = arith.constant dense<0.000000e+00> : vector<32x8xf32>
    %155 = tpu.matmul %153, %154, %cst_137 {dimension_numbers = #tpu.dot_dimension_numbers<[1], [0], [0], [1], [0, 0, 1, 1], [], []>} : vector<32x32xf32>, vector<32x8xf32>, vector<32x8xf32> -> vector<32x8xf32>
    %c1_138 = arith.constant 1 : index
    %c0_139 = arith.constant 0 : index
    %c0_140 = arith.constant 0 : index
    %156 = vector.load %arg10[%c1_138, %c0_139, %c0_140] : memref<4x32x8xf32, #tpu.memory_space<vmem>>, vector<1x32x8xf32>
    %157 = vector.shape_cast %156 : vector<1x32x8xf32> to vector<32x8xf32>
    %c1_141 = arith.constant 1 : index
    %c0_142 = arith.constant 0 : index
    %c0_143 = arith.constant 0 : index
    %158 = vector.load %arg6[%c1_141, %c0_142, %c0_143] : memref<4x32x32xf32, #tpu.memory_space<vmem>>, vector<1x32x32xf32>
    %159 = vector.shape_cast %158 : vector<1x32x32xf32> to vector<32x32xf32>
    %cst_144 = arith.constant dense<0.000000e+00> : vector<32x8xf32>
    %160 = tpu.matmul %148, %157, %cst_144 {dimension_numbers = #tpu.dot_dimension_numbers<[1], [0], [0], [1], [0, 0, 1, 1], [], []>} : vector<32x32xf32>, vector<32x8xf32>, vector<32x8xf32> -> vector<32x8xf32>
    %cst_145 = arith.constant dense<0.000000e+00> : vector<32x8xf32>
    %161 = tpu.matmul %159, %160, %cst_145 {dimension_numbers = #tpu.dot_dimension_numbers<[1], [0], [0], [1], [0, 0, 1, 1], [], []>} : vector<32x32xf32>, vector<32x8xf32>, vector<32x8xf32> -> vector<32x8xf32>
    %162 = arith.addf %155, %161 : vector<32x8xf32>
    %c2_146 = arith.constant 2 : index
    %c0_147 = arith.constant 0 : index
    %c0_148 = arith.constant 0 : index
    %163 = vector.load %arg10[%c2_146, %c0_147, %c0_148] : memref<4x32x8xf32, #tpu.memory_space<vmem>>, vector<1x32x8xf32>
    %164 = vector.shape_cast %163 : vector<1x32x8xf32> to vector<32x8xf32>
    %c2_149 = arith.constant 2 : index
    %c0_150 = arith.constant 0 : index
    %c0_151 = arith.constant 0 : index
    %165 = vector.load %arg6[%c2_149, %c0_150, %c0_151] : memref<4x32x32xf32, #tpu.memory_space<vmem>>, vector<1x32x32xf32>
    %166 = vector.shape_cast %165 : vector<1x32x32xf32> to vector<32x32xf32>
    %cst_152 = arith.constant dense<0.000000e+00> : vector<32x8xf32>
    %167 = tpu.matmul %148, %164, %cst_152 {dimension_numbers = #tpu.dot_dimension_numbers<[1], [0], [0], [1], [0, 0, 1, 1], [], []>} : vector<32x32xf32>, vector<32x8xf32>, vector<32x8xf32> -> vector<32x8xf32>
    %cst_153 = arith.constant dense<0.000000e+00> : vector<32x8xf32>
    %168 = tpu.matmul %166, %167, %cst_153 {dimension_numbers = #tpu.dot_dimension_numbers<[1], [0], [0], [1], [0, 0, 1, 1], [], []>} : vector<32x32xf32>, vector<32x8xf32>, vector<32x8xf32> -> vector<32x8xf32>
    %169 = arith.addf %162, %168 : vector<32x8xf32>
    %c3_154 = arith.constant 3 : index
    %c0_155 = arith.constant 0 : index
    %c0_156 = arith.constant 0 : index
    %170 = vector.load %arg10[%c3_154, %c0_155, %c0_156] : memref<4x32x8xf32, #tpu.memory_space<vmem>>, vector<1x32x8xf32>
    %171 = vector.shape_cast %170 : vector<1x32x8xf32> to vector<32x8xf32>
    %c3_157 = arith.constant 3 : index
    %c0_158 = arith.constant 0 : index
    %c0_159 = arith.constant 0 : index
    %172 = vector.load %arg6[%c3_157, %c0_158, %c0_159] : memref<4x32x32xf32, #tpu.memory_space<vmem>>, vector<1x32x32xf32>
    %173 = vector.shape_cast %172 : vector<1x32x32xf32> to vector<32x32xf32>
    %cst_160 = arith.constant dense<0.000000e+00> : vector<32x8xf32>
    %174 = tpu.matmul %148, %171, %cst_160 {dimension_numbers = #tpu.dot_dimension_numbers<[1], [0], [0], [1], [0, 0, 1, 1], [], []>} : vector<32x32xf32>, vector<32x8xf32>, vector<32x8xf32> -> vector<32x8xf32>
    %cst_161 = arith.constant dense<0.000000e+00> : vector<32x8xf32>
    %175 = tpu.matmul %173, %174, %cst_161 {dimension_numbers = #tpu.dot_dimension_numbers<[1], [0], [0], [1], [0, 0, 1, 1], [], []>} : vector<32x32xf32>, vector<32x8xf32>, vector<32x8xf32> -> vector<32x8xf32>
    %176 = arith.addf %169, %175 : vector<32x8xf32>
    %177 = vector.broadcast %149 : vector<32x1xf32> to vector<32x8xf32>
    %178 = arith.addf %176, %177 : vector<32x8xf32>
    %c0_162 = arith.constant 0 : index
    %c0_163 = arith.constant 0 : index
    %179 = vector.load %arg8[%c0_162, %c0_163] : memref<32x1xf32, #tpu.memory_space<vmem>>, vector<32x1xf32>
    %c0_164 = arith.constant 0 : index
    %c0_165 = arith.constant 0 : index
    %180 = vector.load %arg9[%c0_164, %c0_165] : memref<32x1xf32, #tpu.memory_space<vmem>>, vector<32x1xf32>
    %cst_166 = arith.constant dense<0.000000e+00> : vector<32xf32>
    %181 = vector.multi_reduction <add>, %178, %cst_166 [1] : vector<32x8xf32> to vector<32xf32>
    %182 = vector.shape_cast %181 : vector<32xf32> to vector<32x1xf32>
    %cst_167 = arith.constant 1.250000e-01 : f32
    %183 = vector.broadcast %cst_167 : f32 to vector<32x1xf32>
    %184 = arith.mulf %182, %183 : vector<32x1xf32>
    %185 = arith.mulf %178, %178 : vector<32x8xf32>
    %cst_168 = arith.constant dense<0.000000e+00> : vector<32xf32>
    %186 = vector.multi_reduction <add>, %185, %cst_168 [1] : vector<32x8xf32> to vector<32xf32>
    %187 = vector.shape_cast %186 : vector<32xf32> to vector<32x1xf32>
    %cst_169 = arith.constant 1.250000e-01 : f32
    %188 = vector.broadcast %cst_169 : f32 to vector<32x1xf32>
    %189 = arith.mulf %187, %188 : vector<32x1xf32>
    %190 = arith.mulf %184, %184 : vector<32x1xf32>
    %191 = arith.subf %189, %190 : vector<32x1xf32>
    %192 = vector.broadcast %184 : vector<32x1xf32> to vector<32x8xf32>
    %193 = arith.subf %178, %192 : vector<32x8xf32>
    %cst_170 = arith.constant 9.99999974E-6 : f32
    %194 = vector.broadcast %cst_170 : f32 to vector<32x1xf32>
    %195 = arith.addf %191, %194 : vector<32x1xf32>
    %196 = math.rsqrt %195 : vector<32x1xf32>
    %197 = vector.broadcast %196 : vector<32x1xf32> to vector<32x8xf32>
    %198 = arith.mulf %193, %197 : vector<32x8xf32>
    %199 = vector.broadcast %179 : vector<32x1xf32> to vector<32x8xf32>
    %200 = arith.mulf %198, %199 : vector<32x8xf32>
    %201 = vector.broadcast %180 : vector<32x1xf32> to vector<32x8xf32>
    %202 = arith.addf %200, %201 : vector<32x8xf32>
    %cst_171 = arith.constant 0.000000e+00 : f32
    %203 = vector.broadcast %cst_171 : f32 to vector<32x8xf32>
    %204 = arith.maximumf %202, %203 : vector<32x8xf32>
    %c0_172 = arith.constant 0 : index
    %c0_173 = arith.constant 0 : index
    %205 = vector.load %arg15[%c0_172, %c0_173] : memref<8x32xf32, #tpu.memory_space<vmem>>, vector<8x32xf32>
    %cst_174 = arith.constant dense<0.000000e+00> : vector<32x32xf32>
    %206 = tpu.matmul %204, %205, %cst_174 {dimension_numbers = #tpu.dot_dimension_numbers<[1], [0], [0], [1], [0, 0, 1, 1], [], []>} : vector<32x8xf32>, vector<8x32xf32>, vector<32x32xf32> -> vector<32x32xf32>
    %c0_175 = arith.constant 0 : index
    %c0_176 = arith.constant 0 : index
    %207 = vector.load %arg11[%c0_175, %c0_176] : memref<32x32xf32, #tpu.memory_space<vmem>>, vector<32x32xf32>
    %cst_177 = arith.constant dense<0.000000e+00> : vector<32x32xf32>
    %208 = tpu.matmul %207, %206, %cst_177 {dimension_numbers = #tpu.dot_dimension_numbers<[1], [0], [0], [1], [0, 0, 1, 1], [], []>} : vector<32x32xf32>, vector<32x32xf32>, vector<32x32xf32> -> vector<32x32xf32>
    %c0_178 = arith.constant 0 : index
    %c0_179 = arith.constant 0 : index
    %209 = vector.load %arg12[%c0_178, %c0_179] : memref<32x1xf32, #tpu.memory_space<vmem>>, vector<32x1xf32>
    %210 = vector.broadcast %209 : vector<32x1xf32> to vector<32x32xf32>
    %211 = arith.addf %208, %210 : vector<32x32xf32>
    %c0_180 = arith.constant 0 : index
    %c0_181 = arith.constant 0 : index
    %212 = vector.load %arg13[%c0_180, %c0_181] : memref<32x1xf32, #tpu.memory_space<vmem>>, vector<32x1xf32>
    %c0_182 = arith.constant 0 : index
    %c0_183 = arith.constant 0 : index
    %213 = vector.load %arg14[%c0_182, %c0_183] : memref<32x1xf32, #tpu.memory_space<vmem>>, vector<32x1xf32>
    %cst_184 = arith.constant dense<0.000000e+00> : vector<32xf32>
    %214 = vector.multi_reduction <add>, %211, %cst_184 [1] : vector<32x32xf32> to vector<32xf32>
    %215 = vector.shape_cast %214 : vector<32xf32> to vector<32x1xf32>
    %cst_185 = arith.constant 3.125000e-02 : f32
    %216 = vector.broadcast %cst_185 : f32 to vector<32x1xf32>
    %217 = arith.mulf %215, %216 : vector<32x1xf32>
    %218 = arith.mulf %211, %211 : vector<32x32xf32>
    %cst_186 = arith.constant dense<0.000000e+00> : vector<32xf32>
    %219 = vector.multi_reduction <add>, %218, %cst_186 [1] : vector<32x32xf32> to vector<32xf32>
    %220 = vector.shape_cast %219 : vector<32xf32> to vector<32x1xf32>
    %cst_187 = arith.constant 3.125000e-02 : f32
    %221 = vector.broadcast %cst_187 : f32 to vector<32x1xf32>
    %222 = arith.mulf %220, %221 : vector<32x1xf32>
    %223 = arith.mulf %217, %217 : vector<32x1xf32>
    %224 = arith.subf %222, %223 : vector<32x1xf32>
    %225 = vector.broadcast %217 : vector<32x1xf32> to vector<32x32xf32>
    %226 = arith.subf %211, %225 : vector<32x32xf32>
    %cst_188 = arith.constant 9.99999974E-6 : f32
    %227 = vector.broadcast %cst_188 : f32 to vector<32x1xf32>
    %228 = arith.addf %224, %227 : vector<32x1xf32>
    %229 = math.rsqrt %228 : vector<32x1xf32>
    %230 = vector.broadcast %229 : vector<32x1xf32> to vector<32x32xf32>
    %231 = arith.mulf %226, %230 : vector<32x32xf32>
    %232 = vector.broadcast %212 : vector<32x1xf32> to vector<32x32xf32>
    %233 = arith.mulf %231, %232 : vector<32x32xf32>
    %234 = vector.broadcast %213 : vector<32x1xf32> to vector<32x32xf32>
    %235 = arith.addf %233, %234 : vector<32x32xf32>
    %cst_189 = arith.constant 0.000000e+00 : f32
    %236 = vector.broadcast %cst_189 : f32 to vector<32x32xf32>
    %237 = arith.maximumf %235, %236 : vector<32x32xf32>
    %cst_190 = arith.constant 0.000000e+00 : f32
    %238 = vector.broadcast %cst_190 : f32 to vector<32x32xf32>
    %239 = arith.maximumf %143, %238 : vector<32x32xf32>
    %c0_191 = arith.constant 0 : index
    %c0_192 = arith.constant 0 : index
    %240 = vector.load %arg17[%c0_191, %c0_192] : memref<16x1xf32, #tpu.memory_space<vmem>>, vector<16x1xf32>
    %c0_193 = arith.constant 0 : index
    %c0_194 = arith.constant 0 : index
    %c0_195 = arith.constant 0 : index
    %241 = vector.load %arg20[%c0_193, %c0_194, %c0_195] : memref<9x32x128xf32, #tpu.memory_space<vmem>>, vector<1x32x128xf32>
    %242 = vector.shape_cast %241 : vector<1x32x128xf32> to vector<32x128xf32>
    %c0_196 = arith.constant 0 : index
    %c0_197 = arith.constant 0 : index
    %c0_198 = arith.constant 0 : index
    %243 = vector.load %arg16[%c0_196, %c0_197, %c0_198] : memref<9x16x64xf32, #tpu.memory_space<vmem>>, vector<1x16x64xf32>
    %244 = vector.shape_cast %243 : vector<1x16x64xf32> to vector<16x64xf32>
    %cst_199 = arith.constant dense<0.000000e+00> : vector<32x128xf32>
    %245 = tpu.matmul %237, %242, %cst_199 {dimension_numbers = #tpu.dot_dimension_numbers<[1], [0], [0], [1], [0, 0, 1, 1], [], []>} : vector<32x32xf32>, vector<32x128xf32>, vector<32x128xf32> -> vector<32x128xf32>
    %246 = vector.extract_strided_slice %244 {offsets = [0, 0], sizes = [16, 32], strides = [1, 1]} : vector<16x64xf32> to vector<16x32xf32>
    %cst_200 = arith.constant dense<0.000000e+00> : vector<16x128xf32>
    %247 = tpu.matmul %246, %245, %cst_200 {dimension_numbers = #tpu.dot_dimension_numbers<[1], [0], [0], [1], [0, 0, 1, 1], [], []>} : vector<16x32xf32>, vector<32x128xf32>, vector<16x128xf32> -> vector<16x128xf32>
    %cst_201 = arith.constant dense<0.000000e+00> : vector<32x128xf32>
    %248 = tpu.matmul %239, %242, %cst_201 {dimension_numbers = #tpu.dot_dimension_numbers<[1], [0], [0], [1], [0, 0, 1, 1], [], []>} : vector<32x32xf32>, vector<32x128xf32>, vector<32x128xf32> -> vector<32x128xf32>
    %249 = vector.extract_strided_slice %244 {offsets = [0, 32], sizes = [16, 32], strides = [1, 1]} : vector<16x64xf32> to vector<16x32xf32>
    %cst_202 = arith.constant dense<0.000000e+00> : vector<16x128xf32>
    %250 = tpu.matmul %249, %248, %cst_202 {dimension_numbers = #tpu.dot_dimension_numbers<[1], [0], [0], [1], [0, 0, 1, 1], [], []>} : vector<16x32xf32>, vector<32x128xf32>, vector<16x128xf32> -> vector<16x128xf32>
    %251 = arith.addf %247, %250 : vector<16x128xf32>
    %c1_203 = arith.constant 1 : index
    %c0_204 = arith.constant 0 : index
    %c0_205 = arith.constant 0 : index
    %252 = vector.load %arg20[%c1_203, %c0_204, %c0_205] : memref<9x32x128xf32, #tpu.memory_space<vmem>>, vector<1x32x128xf32>
    %253 = vector.shape_cast %252 : vector<1x32x128xf32> to vector<32x128xf32>
    %c1_206 = arith.constant 1 : index
    %c0_207 = arith.constant 0 : index
    %c0_208 = arith.constant 0 : index
    %254 = vector.load %arg16[%c1_206, %c0_207, %c0_208] : memref<9x16x64xf32, #tpu.memory_space<vmem>>, vector<1x16x64xf32>
    %255 = vector.shape_cast %254 : vector<1x16x64xf32> to vector<16x64xf32>
    %cst_209 = arith.constant dense<0.000000e+00> : vector<32x128xf32>
    %256 = tpu.matmul %237, %253, %cst_209 {dimension_numbers = #tpu.dot_dimension_numbers<[1], [0], [0], [1], [0, 0, 1, 1], [], []>} : vector<32x32xf32>, vector<32x128xf32>, vector<32x128xf32> -> vector<32x128xf32>
    %257 = vector.extract_strided_slice %255 {offsets = [0, 0], sizes = [16, 32], strides = [1, 1]} : vector<16x64xf32> to vector<16x32xf32>
    %cst_210 = arith.constant dense<0.000000e+00> : vector<16x128xf32>
    %258 = tpu.matmul %257, %256, %cst_210 {dimension_numbers = #tpu.dot_dimension_numbers<[1], [0], [0], [1], [0, 0, 1, 1], [], []>} : vector<16x32xf32>, vector<32x128xf32>, vector<16x128xf32> -> vector<16x128xf32>
    %259 = arith.addf %251, %258 : vector<16x128xf32>
    %cst_211 = arith.constant dense<0.000000e+00> : vector<32x128xf32>
    %260 = tpu.matmul %239, %253, %cst_211 {dimension_numbers = #tpu.dot_dimension_numbers<[1], [0], [0], [1], [0, 0, 1, 1], [], []>} : vector<32x32xf32>, vector<32x128xf32>, vector<32x128xf32> -> vector<32x128xf32>
    %261 = vector.extract_strided_slice %255 {offsets = [0, 32], sizes = [16, 32], strides = [1, 1]} : vector<16x64xf32> to vector<16x32xf32>
    %cst_212 = arith.constant dense<0.000000e+00> : vector<16x128xf32>
    %262 = tpu.matmul %261, %260, %cst_212 {dimension_numbers = #tpu.dot_dimension_numbers<[1], [0], [0], [1], [0, 0, 1, 1], [], []>} : vector<16x32xf32>, vector<32x128xf32>, vector<16x128xf32> -> vector<16x128xf32>
    %263 = arith.addf %259, %262 : vector<16x128xf32>
    %c2_213 = arith.constant 2 : index
    %c0_214 = arith.constant 0 : index
    %c0_215 = arith.constant 0 : index
    %264 = vector.load %arg20[%c2_213, %c0_214, %c0_215] : memref<9x32x128xf32, #tpu.memory_space<vmem>>, vector<1x32x128xf32>
    %265 = vector.shape_cast %264 : vector<1x32x128xf32> to vector<32x128xf32>
    %c2_216 = arith.constant 2 : index
    %c0_217 = arith.constant 0 : index
    %c0_218 = arith.constant 0 : index
    %266 = vector.load %arg16[%c2_216, %c0_217, %c0_218] : memref<9x16x64xf32, #tpu.memory_space<vmem>>, vector<1x16x64xf32>
    %267 = vector.shape_cast %266 : vector<1x16x64xf32> to vector<16x64xf32>
    %cst_219 = arith.constant dense<0.000000e+00> : vector<32x128xf32>
    %268 = tpu.matmul %237, %265, %cst_219 {dimension_numbers = #tpu.dot_dimension_numbers<[1], [0], [0], [1], [0, 0, 1, 1], [], []>} : vector<32x32xf32>, vector<32x128xf32>, vector<32x128xf32> -> vector<32x128xf32>
    %269 = vector.extract_strided_slice %267 {offsets = [0, 0], sizes = [16, 32], strides = [1, 1]} : vector<16x64xf32> to vector<16x32xf32>
    %cst_220 = arith.constant dense<0.000000e+00> : vector<16x128xf32>
    %270 = tpu.matmul %269, %268, %cst_220 {dimension_numbers = #tpu.dot_dimension_numbers<[1], [0], [0], [1], [0, 0, 1, 1], [], []>} : vector<16x32xf32>, vector<32x128xf32>, vector<16x128xf32> -> vector<16x128xf32>
    %271 = arith.addf %263, %270 : vector<16x128xf32>
    %cst_221 = arith.constant dense<0.000000e+00> : vector<32x128xf32>
    %272 = tpu.matmul %239, %265, %cst_221 {dimension_numbers = #tpu.dot_dimension_numbers<[1], [0], [0], [1], [0, 0, 1, 1], [], []>} : vector<32x32xf32>, vector<32x128xf32>, vector<32x128xf32> -> vector<32x128xf32>
    %273 = vector.extract_strided_slice %267 {offsets = [0, 32], sizes = [16, 32], strides = [1, 1]} : vector<16x64xf32> to vector<16x32xf32>
    %cst_222 = arith.constant dense<0.000000e+00> : vector<16x128xf32>
    %274 = tpu.matmul %273, %272, %cst_222 {dimension_numbers = #tpu.dot_dimension_numbers<[1], [0], [0], [1], [0, 0, 1, 1], [], []>} : vector<16x32xf32>, vector<32x128xf32>, vector<16x128xf32> -> vector<16x128xf32>
    %275 = arith.addf %271, %274 : vector<16x128xf32>
    %c3_223 = arith.constant 3 : index
    %c0_224 = arith.constant 0 : index
    %c0_225 = arith.constant 0 : index
    %276 = vector.load %arg20[%c3_223, %c0_224, %c0_225] : memref<9x32x128xf32, #tpu.memory_space<vmem>>, vector<1x32x128xf32>
    %277 = vector.shape_cast %276 : vector<1x32x128xf32> to vector<32x128xf32>
    %c3_226 = arith.constant 3 : index
    %c0_227 = arith.constant 0 : index
    %c0_228 = arith.constant 0 : index
    %278 = vector.load %arg16[%c3_226, %c0_227, %c0_228] : memref<9x16x64xf32, #tpu.memory_space<vmem>>, vector<1x16x64xf32>
    %279 = vector.shape_cast %278 : vector<1x16x64xf32> to vector<16x64xf32>
    %cst_229 = arith.constant dense<0.000000e+00> : vector<32x128xf32>
    %280 = tpu.matmul %237, %277, %cst_229 {dimension_numbers = #tpu.dot_dimension_numbers<[1], [0], [0], [1], [0, 0, 1, 1], [], []>} : vector<32x32xf32>, vector<32x128xf32>, vector<32x128xf32> -> vector<32x128xf32>
    %281 = vector.extract_strided_slice %279 {offsets = [0, 0], sizes = [16, 32], strides = [1, 1]} : vector<16x64xf32> to vector<16x32xf32>
    %cst_230 = arith.constant dense<0.000000e+00> : vector<16x128xf32>
    %282 = tpu.matmul %281, %280, %cst_230 {dimension_numbers = #tpu.dot_dimension_numbers<[1], [0], [0], [1], [0, 0, 1, 1], [], []>} : vector<16x32xf32>, vector<32x128xf32>, vector<16x128xf32> -> vector<16x128xf32>
    %283 = arith.addf %275, %282 : vector<16x128xf32>
    %cst_231 = arith.constant dense<0.000000e+00> : vector<32x128xf32>
    %284 = tpu.matmul %239, %277, %cst_231 {dimension_numbers = #tpu.dot_dimension_numbers<[1], [0], [0], [1], [0, 0, 1, 1], [], []>} : vector<32x32xf32>, vector<32x128xf32>, vector<32x128xf32> -> vector<32x128xf32>
    %285 = vector.extract_strided_slice %279 {offsets = [0, 32], sizes = [16, 32], strides = [1, 1]} : vector<16x64xf32> to vector<16x32xf32>
    %cst_232 = arith.constant dense<0.000000e+00> : vector<16x128xf32>
    %286 = tpu.matmul %285, %284, %cst_232 {dimension_numbers = #tpu.dot_dimension_numbers<[1], [0], [0], [1], [0, 0, 1, 1], [], []>} : vector<16x32xf32>, vector<32x128xf32>, vector<16x128xf32> -> vector<16x128xf32>
    %287 = arith.addf %283, %286 : vector<16x128xf32>
    %c4_233 = arith.constant 4 : index
    %c0_234 = arith.constant 0 : index
    %c0_235 = arith.constant 0 : index
    %288 = vector.load %arg20[%c4_233, %c0_234, %c0_235] : memref<9x32x128xf32, #tpu.memory_space<vmem>>, vector<1x32x128xf32>
    %289 = vector.shape_cast %288 : vector<1x32x128xf32> to vector<32x128xf32>
    %c4_236 = arith.constant 4 : index
    %c0_237 = arith.constant 0 : index
    %c0_238 = arith.constant 0 : index
    %290 = vector.load %arg16[%c4_236, %c0_237, %c0_238] : memref<9x16x64xf32, #tpu.memory_space<vmem>>, vector<1x16x64xf32>
    %291 = vector.shape_cast %290 : vector<1x16x64xf32> to vector<16x64xf32>
    %cst_239 = arith.constant dense<0.000000e+00> : vector<32x128xf32>
    %292 = tpu.matmul %237, %289, %cst_239 {dimension_numbers = #tpu.dot_dimension_numbers<[1], [0], [0], [1], [0, 0, 1, 1], [], []>} : vector<32x32xf32>, vector<32x128xf32>, vector<32x128xf32> -> vector<32x128xf32>
    %293 = vector.extract_strided_slice %291 {offsets = [0, 0], sizes = [16, 32], strides = [1, 1]} : vector<16x64xf32> to vector<16x32xf32>
    %cst_240 = arith.constant dense<0.000000e+00> : vector<16x128xf32>
    %294 = tpu.matmul %293, %292, %cst_240 {dimension_numbers = #tpu.dot_dimension_numbers<[1], [0], [0], [1], [0, 0, 1, 1], [], []>} : vector<16x32xf32>, vector<32x128xf32>, vector<16x128xf32> -> vector<16x128xf32>
    %295 = arith.addf %287, %294 : vector<16x128xf32>
    %cst_241 = arith.constant dense<0.000000e+00> : vector<32x128xf32>
    %296 = tpu.matmul %239, %289, %cst_241 {dimension_numbers = #tpu.dot_dimension_numbers<[1], [0], [0], [1], [0, 0, 1, 1], [], []>} : vector<32x32xf32>, vector<32x128xf32>, vector<32x128xf32> -> vector<32x128xf32>
    %297 = vector.extract_strided_slice %291 {offsets = [0, 32], sizes = [16, 32], strides = [1, 1]} : vector<16x64xf32> to vector<16x32xf32>
    %cst_242 = arith.constant dense<0.000000e+00> : vector<16x128xf32>
    %298 = tpu.matmul %297, %296, %cst_242 {dimension_numbers = #tpu.dot_dimension_numbers<[1], [0], [0], [1], [0, 0, 1, 1], [], []>} : vector<16x32xf32>, vector<32x128xf32>, vector<16x128xf32> -> vector<16x128xf32>
    %299 = arith.addf %295, %298 : vector<16x128xf32>
    %c5_243 = arith.constant 5 : index
    %c0_244 = arith.constant 0 : index
    %c0_245 = arith.constant 0 : index
    %300 = vector.load %arg20[%c5_243, %c0_244, %c0_245] : memref<9x32x128xf32, #tpu.memory_space<vmem>>, vector<1x32x128xf32>
    %301 = vector.shape_cast %300 : vector<1x32x128xf32> to vector<32x128xf32>
    %c5_246 = arith.constant 5 : index
    %c0_247 = arith.constant 0 : index
    %c0_248 = arith.constant 0 : index
    %302 = vector.load %arg16[%c5_246, %c0_247, %c0_248] : memref<9x16x64xf32, #tpu.memory_space<vmem>>, vector<1x16x64xf32>
    %303 = vector.shape_cast %302 : vector<1x16x64xf32> to vector<16x64xf32>
    %cst_249 = arith.constant dense<0.000000e+00> : vector<32x128xf32>
    %304 = tpu.matmul %237, %301, %cst_249 {dimension_numbers = #tpu.dot_dimension_numbers<[1], [0], [0], [1], [0, 0, 1, 1], [], []>} : vector<32x32xf32>, vector<32x128xf32>, vector<32x128xf32> -> vector<32x128xf32>
    %305 = vector.extract_strided_slice %303 {offsets = [0, 0], sizes = [16, 32], strides = [1, 1]} : vector<16x64xf32> to vector<16x32xf32>
    %cst_250 = arith.constant dense<0.000000e+00> : vector<16x128xf32>
    %306 = tpu.matmul %305, %304, %cst_250 {dimension_numbers = #tpu.dot_dimension_numbers<[1], [0], [0], [1], [0, 0, 1, 1], [], []>} : vector<16x32xf32>, vector<32x128xf32>, vector<16x128xf32> -> vector<16x128xf32>
    %307 = arith.addf %299, %306 : vector<16x128xf32>
    %cst_251 = arith.constant dense<0.000000e+00> : vector<32x128xf32>
    %308 = tpu.matmul %239, %301, %cst_251 {dimension_numbers = #tpu.dot_dimension_numbers<[1], [0], [0], [1], [0, 0, 1, 1], [], []>} : vector<32x32xf32>, vector<32x128xf32>, vector<32x128xf32> -> vector<32x128xf32>
    %309 = vector.extract_strided_slice %303 {offsets = [0, 32], sizes = [16, 32], strides = [1, 1]} : vector<16x64xf32> to vector<16x32xf32>
    %cst_252 = arith.constant dense<0.000000e+00> : vector<16x128xf32>
    %310 = tpu.matmul %309, %308, %cst_252 {dimension_numbers = #tpu.dot_dimension_numbers<[1], [0], [0], [1], [0, 0, 1, 1], [], []>} : vector<16x32xf32>, vector<32x128xf32>, vector<16x128xf32> -> vector<16x128xf32>
    %311 = arith.addf %307, %310 : vector<16x128xf32>
    %c6_253 = arith.constant 6 : index
    %c0_254 = arith.constant 0 : index
    %c0_255 = arith.constant 0 : index
    %312 = vector.load %arg20[%c6_253, %c0_254, %c0_255] : memref<9x32x128xf32, #tpu.memory_space<vmem>>, vector<1x32x128xf32>
    %313 = vector.shape_cast %312 : vector<1x32x128xf32> to vector<32x128xf32>
    %c6_256 = arith.constant 6 : index
    %c0_257 = arith.constant 0 : index
    %c0_258 = arith.constant 0 : index
    %314 = vector.load %arg16[%c6_256, %c0_257, %c0_258] : memref<9x16x64xf32, #tpu.memory_space<vmem>>, vector<1x16x64xf32>
    %315 = vector.shape_cast %314 : vector<1x16x64xf32> to vector<16x64xf32>
    %cst_259 = arith.constant dense<0.000000e+00> : vector<32x128xf32>
    %316 = tpu.matmul %237, %313, %cst_259 {dimension_numbers = #tpu.dot_dimension_numbers<[1], [0], [0], [1], [0, 0, 1, 1], [], []>} : vector<32x32xf32>, vector<32x128xf32>, vector<32x128xf32> -> vector<32x128xf32>
    %317 = vector.extract_strided_slice %315 {offsets = [0, 0], sizes = [16, 32], strides = [1, 1]} : vector<16x64xf32> to vector<16x32xf32>
    %cst_260 = arith.constant dense<0.000000e+00> : vector<16x128xf32>
    %318 = tpu.matmul %317, %316, %cst_260 {dimension_numbers = #tpu.dot_dimension_numbers<[1], [0], [0], [1], [0, 0, 1, 1], [], []>} : vector<16x32xf32>, vector<32x128xf32>, vector<16x128xf32> -> vector<16x128xf32>
    %319 = arith.addf %311, %318 : vector<16x128xf32>
    %cst_261 = arith.constant dense<0.000000e+00> : vector<32x128xf32>
    %320 = tpu.matmul %239, %313, %cst_261 {dimension_numbers = #tpu.dot_dimension_numbers<[1], [0], [0], [1], [0, 0, 1, 1], [], []>} : vector<32x32xf32>, vector<32x128xf32>, vector<32x128xf32> -> vector<32x128xf32>
    %321 = vector.extract_strided_slice %315 {offsets = [0, 32], sizes = [16, 32], strides = [1, 1]} : vector<16x64xf32> to vector<16x32xf32>
    %cst_262 = arith.constant dense<0.000000e+00> : vector<16x128xf32>
    %322 = tpu.matmul %321, %320, %cst_262 {dimension_numbers = #tpu.dot_dimension_numbers<[1], [0], [0], [1], [0, 0, 1, 1], [], []>} : vector<16x32xf32>, vector<32x128xf32>, vector<16x128xf32> -> vector<16x128xf32>
    %323 = arith.addf %319, %322 : vector<16x128xf32>
    %c7_263 = arith.constant 7 : index
    %c0_264 = arith.constant 0 : index
    %c0_265 = arith.constant 0 : index
    %324 = vector.load %arg20[%c7_263, %c0_264, %c0_265] : memref<9x32x128xf32, #tpu.memory_space<vmem>>, vector<1x32x128xf32>
    %325 = vector.shape_cast %324 : vector<1x32x128xf32> to vector<32x128xf32>
    %c7_266 = arith.constant 7 : index
    %c0_267 = arith.constant 0 : index
    %c0_268 = arith.constant 0 : index
    %326 = vector.load %arg16[%c7_266, %c0_267, %c0_268] : memref<9x16x64xf32, #tpu.memory_space<vmem>>, vector<1x16x64xf32>
    %327 = vector.shape_cast %326 : vector<1x16x64xf32> to vector<16x64xf32>
    %cst_269 = arith.constant dense<0.000000e+00> : vector<32x128xf32>
    %328 = tpu.matmul %237, %325, %cst_269 {dimension_numbers = #tpu.dot_dimension_numbers<[1], [0], [0], [1], [0, 0, 1, 1], [], []>} : vector<32x32xf32>, vector<32x128xf32>, vector<32x128xf32> -> vector<32x128xf32>
    %329 = vector.extract_strided_slice %327 {offsets = [0, 0], sizes = [16, 32], strides = [1, 1]} : vector<16x64xf32> to vector<16x32xf32>
    %cst_270 = arith.constant dense<0.000000e+00> : vector<16x128xf32>
    %330 = tpu.matmul %329, %328, %cst_270 {dimension_numbers = #tpu.dot_dimension_numbers<[1], [0], [0], [1], [0, 0, 1, 1], [], []>} : vector<16x32xf32>, vector<32x128xf32>, vector<16x128xf32> -> vector<16x128xf32>
    %331 = arith.addf %323, %330 : vector<16x128xf32>
    %cst_271 = arith.constant dense<0.000000e+00> : vector<32x128xf32>
    %332 = tpu.matmul %239, %325, %cst_271 {dimension_numbers = #tpu.dot_dimension_numbers<[1], [0], [0], [1], [0, 0, 1, 1], [], []>} : vector<32x32xf32>, vector<32x128xf32>, vector<32x128xf32> -> vector<32x128xf32>
    %333 = vector.extract_strided_slice %327 {offsets = [0, 32], sizes = [16, 32], strides = [1, 1]} : vector<16x64xf32> to vector<16x32xf32>
    %cst_272 = arith.constant dense<0.000000e+00> : vector<16x128xf32>
    %334 = tpu.matmul %333, %332, %cst_272 {dimension_numbers = #tpu.dot_dimension_numbers<[1], [0], [0], [1], [0, 0, 1, 1], [], []>} : vector<16x32xf32>, vector<32x128xf32>, vector<16x128xf32> -> vector<16x128xf32>
    %335 = arith.addf %331, %334 : vector<16x128xf32>
    %c8_273 = arith.constant 8 : index
    %c0_274 = arith.constant 0 : index
    %c0_275 = arith.constant 0 : index
    %336 = vector.load %arg20[%c8_273, %c0_274, %c0_275] : memref<9x32x128xf32, #tpu.memory_space<vmem>>, vector<1x32x128xf32>
    %337 = vector.shape_cast %336 : vector<1x32x128xf32> to vector<32x128xf32>
    %c8_276 = arith.constant 8 : index
    %c0_277 = arith.constant 0 : index
    %c0_278 = arith.constant 0 : index
    %338 = vector.load %arg16[%c8_276, %c0_277, %c0_278] : memref<9x16x64xf32, #tpu.memory_space<vmem>>, vector<1x16x64xf32>
    %339 = vector.shape_cast %338 : vector<1x16x64xf32> to vector<16x64xf32>
    %cst_279 = arith.constant dense<0.000000e+00> : vector<32x128xf32>
    %340 = tpu.matmul %237, %337, %cst_279 {dimension_numbers = #tpu.dot_dimension_numbers<[1], [0], [0], [1], [0, 0, 1, 1], [], []>} : vector<32x32xf32>, vector<32x128xf32>, vector<32x128xf32> -> vector<32x128xf32>
    %341 = vector.extract_strided_slice %339 {offsets = [0, 0], sizes = [16, 32], strides = [1, 1]} : vector<16x64xf32> to vector<16x32xf32>
    %cst_280 = arith.constant dense<0.000000e+00> : vector<16x128xf32>
    %342 = tpu.matmul %341, %340, %cst_280 {dimension_numbers = #tpu.dot_dimension_numbers<[1], [0], [0], [1], [0, 0, 1, 1], [], []>} : vector<16x32xf32>, vector<32x128xf32>, vector<16x128xf32> -> vector<16x128xf32>
    %343 = arith.addf %335, %342 : vector<16x128xf32>
    %cst_281 = arith.constant dense<0.000000e+00> : vector<32x128xf32>
    %344 = tpu.matmul %239, %337, %cst_281 {dimension_numbers = #tpu.dot_dimension_numbers<[1], [0], [0], [1], [0, 0, 1, 1], [], []>} : vector<32x32xf32>, vector<32x128xf32>, vector<32x128xf32> -> vector<32x128xf32>
    %345 = vector.extract_strided_slice %339 {offsets = [0, 32], sizes = [16, 32], strides = [1, 1]} : vector<16x64xf32> to vector<16x32xf32>
    %cst_282 = arith.constant dense<0.000000e+00> : vector<16x128xf32>
    %346 = tpu.matmul %345, %344, %cst_282 {dimension_numbers = #tpu.dot_dimension_numbers<[1], [0], [0], [1], [0, 0, 1, 1], [], []>} : vector<16x32xf32>, vector<32x128xf32>, vector<16x128xf32> -> vector<16x128xf32>
    %347 = arith.addf %343, %346 : vector<16x128xf32>
    %348 = vector.broadcast %240 : vector<16x1xf32> to vector<16x128xf32>
    %349 = arith.addf %347, %348 : vector<16x128xf32>
    %c0_283 = arith.constant 0 : index
    %c0_284 = arith.constant 0 : index
    %350 = vector.load %arg18[%c0_283, %c0_284] : memref<16x1xf32, #tpu.memory_space<vmem>>, vector<16x1xf32>
    %c0_285 = arith.constant 0 : index
    %c0_286 = arith.constant 0 : index
    %351 = vector.load %arg19[%c0_285, %c0_286] : memref<16x1xf32, #tpu.memory_space<vmem>>, vector<16x1xf32>
    %cst_287 = arith.constant dense<0.000000e+00> : vector<16xf32>
    %352 = vector.multi_reduction <add>, %349, %cst_287 [1] : vector<16x128xf32> to vector<16xf32>
    %353 = vector.shape_cast %352 : vector<16xf32> to vector<16x1xf32>
    %cst_288 = arith.constant 7.812500e-03 : f32
    %354 = vector.broadcast %cst_288 : f32 to vector<16x1xf32>
    %355 = arith.mulf %353, %354 : vector<16x1xf32>
    %356 = arith.mulf %349, %349 : vector<16x128xf32>
    %cst_289 = arith.constant dense<0.000000e+00> : vector<16xf32>
    %357 = vector.multi_reduction <add>, %356, %cst_289 [1] : vector<16x128xf32> to vector<16xf32>
    %358 = vector.shape_cast %357 : vector<16xf32> to vector<16x1xf32>
    %cst_290 = arith.constant 7.812500e-03 : f32
    %359 = vector.broadcast %cst_290 : f32 to vector<16x1xf32>
    %360 = arith.mulf %358, %359 : vector<16x1xf32>
    %361 = arith.mulf %355, %355 : vector<16x1xf32>
    %362 = arith.subf %360, %361 : vector<16x1xf32>
    %363 = vector.broadcast %355 : vector<16x1xf32> to vector<16x128xf32>
    %364 = arith.subf %349, %363 : vector<16x128xf32>
    %cst_291 = arith.constant 9.99999974E-6 : f32
    %365 = vector.broadcast %cst_291 : f32 to vector<16x1xf32>
    %366 = arith.addf %362, %365 : vector<16x1xf32>
    %367 = math.rsqrt %366 : vector<16x1xf32>
    %368 = vector.broadcast %367 : vector<16x1xf32> to vector<16x128xf32>
    %369 = arith.mulf %364, %368 : vector<16x128xf32>
    %370 = vector.broadcast %350 : vector<16x1xf32> to vector<16x128xf32>
    %371 = arith.mulf %369, %370 : vector<16x128xf32>
    %372 = vector.broadcast %351 : vector<16x1xf32> to vector<16x128xf32>
    %373 = arith.addf %371, %372 : vector<16x128xf32>
    %c0_292 = arith.constant 0 : index
    %c0_293 = arith.constant 0 : index
    %374 = vector.load %arg21[%c0_292, %c0_293] : memref<16x128xf32, #tpu.memory_space<vmem>>, vector<16x128xf32>
    tpu.vector_store %arg21[%c0_292, %c0_293], %373 {strides = array<i32>} : memref<16x128xf32, #tpu.memory_space<vmem>>, vector<16x128xf32>,
    return
  }
}

module attributes {stable_mosaic.version = 11 : i64} {
  func.func @_gemm_bn_kernel(%arg0: memref<8x288xf32, #tpu.memory_space<vmem>>, %arg1: memref<8x1xf32, #tpu.memory_space<vmem>>, %arg2: memref<8x1xf32, #tpu.memory_space<vmem>>, %arg3: memref<8x1xf32, #tpu.memory_space<vmem>>, %arg4: memref<288x512xf32, #tpu.memory_space<vmem>>, %arg5: memref<8x512xf32, #tpu.memory_space<vmem>>) attributes {dimension_semantics = [], scalar_prefetch = 0 : i64, scratch_operands = 0 : i64, tpu.core_type = #tpu.core_type<tc>} {
    %c0 = arith.constant 0 : index
    %c0_0 = arith.constant 0 : index
    %0 = vector.load %arg4[%c0, %c0_0] : memref<288x512xf32, #tpu.memory_space<vmem>>, vector<288x512xf32>
    %c0_1 = arith.constant 0 : index
    %c0_2 = arith.constant 0 : index
    %1 = vector.load %arg0[%c0_1, %c0_2] : memref<8x288xf32, #tpu.memory_space<vmem>>, vector<8x288xf32>
    %cst = arith.constant dense<0.000000e+00> : vector<8x512xf32>
    %2 = tpu.matmul %1, %0, %cst {dimension_numbers = #tpu.dot_dimension_numbers<[1], [0], [0], [1], [0, 0, 1, 1], [], []>} : vector<8x288xf32>, vector<288x512xf32>, vector<8x512xf32> -> vector<8x512xf32>
    %c0_3 = arith.constant 0 : index
    %c0_4 = arith.constant 0 : index
    %3 = vector.load %arg1[%c0_3, %c0_4] : memref<8x1xf32, #tpu.memory_space<vmem>>, vector<8x1xf32>
    %4 = vector.broadcast %3 : vector<8x1xf32> to vector<8x512xf32>
    %5 = arith.addf %2, %4 : vector<8x512xf32>
    %c0_5 = arith.constant 0 : index
    %c0_6 = arith.constant 0 : index
    %6 = vector.load %arg2[%c0_5, %c0_6] : memref<8x1xf32, #tpu.memory_space<vmem>>, vector<8x1xf32>
    %c0_7 = arith.constant 0 : index
    %c0_8 = arith.constant 0 : index
    %7 = vector.load %arg3[%c0_7, %c0_8] : memref<8x1xf32, #tpu.memory_space<vmem>>, vector<8x1xf32>
    %cst_9 = arith.constant dense<0.000000e+00> : vector<8xf32>
    %8 = vector.multi_reduction <add>, %5, %cst_9 [1] : vector<8x512xf32> to vector<8xf32>
    %9 = vector.shape_cast %8 : vector<8xf32> to vector<8x1xf32>
    %cst_10 = arith.constant 0.001953125 : f32
    %10 = vector.broadcast %cst_10 : f32 to vector<8x1xf32>
    %11 = arith.mulf %9, %10 : vector<8x1xf32>
    %12 = arith.mulf %5, %5 : vector<8x512xf32>
    %cst_11 = arith.constant dense<0.000000e+00> : vector<8xf32>
    %13 = vector.multi_reduction <add>, %12, %cst_11 [1] : vector<8x512xf32> to vector<8xf32>
    %14 = vector.shape_cast %13 : vector<8xf32> to vector<8x1xf32>
    %cst_12 = arith.constant 0.001953125 : f32
    %15 = vector.broadcast %cst_12 : f32 to vector<8x1xf32>
    %16 = arith.mulf %14, %15 : vector<8x1xf32>
    %17 = arith.mulf %11, %11 : vector<8x1xf32>
    %18 = arith.subf %16, %17 : vector<8x1xf32>
    %19 = vector.broadcast %11 : vector<8x1xf32> to vector<8x512xf32>
    %20 = arith.subf %5, %19 : vector<8x512xf32>
    %cst_13 = arith.constant 9.99999974E-6 : f32
    %21 = vector.broadcast %cst_13 : f32 to vector<8x1xf32>
    %22 = arith.addf %18, %21 : vector<8x1xf32>
    %23 = math.rsqrt %22 : vector<8x1xf32>
    %24 = vector.broadcast %23 : vector<8x1xf32> to vector<8x512xf32>
    %25 = arith.mulf %20, %24 : vector<8x512xf32>
    %26 = vector.broadcast %6 : vector<8x1xf32> to vector<8x512xf32>
    %27 = arith.mulf %25, %26 : vector<8x512xf32>
    %28 = vector.broadcast %7 : vector<8x1xf32> to vector<8x512xf32>
    %29 = arith.addf %27, %28 : vector<8x512xf32>
    %c0_14 = arith.constant 0 : index
    %c0_15 = arith.constant 0 : index
    %30 = vector.load %arg5[%c0_14, %c0_15] : memref<8x512xf32, #tpu.memory_space<vmem>>, vector<8x512xf32>
    tpu.vector_store %arg5[%c0_14, %c0_15], %29 {strides = array<i32>} : memref<8x512xf32, #tpu.memory_space<vmem>>, vector<8x512xf32>,
    return
  }
}

module attributes {stable_mosaic.version = 11 : i64} {
  func.func @_gemm_bn_kernel(%arg0: memref<4x144xf32, #tpu.memory_space<vmem>>, %arg1: memref<4x1xf32, #tpu.memory_space<vmem>>, %arg2: memref<4x1xf32, #tpu.memory_space<vmem>>, %arg3: memref<4x1xf32, #tpu.memory_space<vmem>>, %arg4: memref<144x2048xf32, #tpu.memory_space<vmem>>, %arg5: memref<4x2048xf32, #tpu.memory_space<vmem>>) attributes {dimension_semantics = [], scalar_prefetch = 0 : i64, scratch_operands = 0 : i64, tpu.core_type = #tpu.core_type<tc>} {
    %c0 = arith.constant 0 : index
    %c0_0 = arith.constant 0 : index
    %0 = vector.load %arg4[%c0, %c0_0] : memref<144x2048xf32, #tpu.memory_space<vmem>>, vector<144x2048xf32>
    %c0_1 = arith.constant 0 : index
    %c0_2 = arith.constant 0 : index
    %1 = vector.load %arg0[%c0_1, %c0_2] : memref<4x144xf32, #tpu.memory_space<vmem>>, vector<4x144xf32>
    %cst = arith.constant dense<0.000000e+00> : vector<4x2048xf32>
    %2 = tpu.matmul %1, %0, %cst {dimension_numbers = #tpu.dot_dimension_numbers<[1], [0], [0], [1], [0, 0, 1, 1], [], []>} : vector<4x144xf32>, vector<144x2048xf32>, vector<4x2048xf32> -> vector<4x2048xf32>
    %c0_3 = arith.constant 0 : index
    %c0_4 = arith.constant 0 : index
    %3 = vector.load %arg1[%c0_3, %c0_4] : memref<4x1xf32, #tpu.memory_space<vmem>>, vector<4x1xf32>
    %4 = vector.broadcast %3 : vector<4x1xf32> to vector<4x2048xf32>
    %5 = arith.addf %2, %4 : vector<4x2048xf32>
    %c0_5 = arith.constant 0 : index
    %c0_6 = arith.constant 0 : index
    %6 = vector.load %arg2[%c0_5, %c0_6] : memref<4x1xf32, #tpu.memory_space<vmem>>, vector<4x1xf32>
    %c0_7 = arith.constant 0 : index
    %c0_8 = arith.constant 0 : index
    %7 = vector.load %arg3[%c0_7, %c0_8] : memref<4x1xf32, #tpu.memory_space<vmem>>, vector<4x1xf32>
    %cst_9 = arith.constant dense<0.000000e+00> : vector<4xf32>
    %8 = vector.multi_reduction <add>, %5, %cst_9 [1] : vector<4x2048xf32> to vector<4xf32>
    %9 = vector.shape_cast %8 : vector<4xf32> to vector<4x1xf32>
    %cst_10 = arith.constant 4.8828125E-4 : f32
    %10 = vector.broadcast %cst_10 : f32 to vector<4x1xf32>
    %11 = arith.mulf %9, %10 : vector<4x1xf32>
    %12 = arith.mulf %5, %5 : vector<4x2048xf32>
    %cst_11 = arith.constant dense<0.000000e+00> : vector<4xf32>
    %13 = vector.multi_reduction <add>, %12, %cst_11 [1] : vector<4x2048xf32> to vector<4xf32>
    %14 = vector.shape_cast %13 : vector<4xf32> to vector<4x1xf32>
    %cst_12 = arith.constant 4.8828125E-4 : f32
    %15 = vector.broadcast %cst_12 : f32 to vector<4x1xf32>
    %16 = arith.mulf %14, %15 : vector<4x1xf32>
    %17 = arith.mulf %11, %11 : vector<4x1xf32>
    %18 = arith.subf %16, %17 : vector<4x1xf32>
    %19 = vector.broadcast %11 : vector<4x1xf32> to vector<4x2048xf32>
    %20 = arith.subf %5, %19 : vector<4x2048xf32>
    %cst_13 = arith.constant 9.99999974E-6 : f32
    %21 = vector.broadcast %cst_13 : f32 to vector<4x1xf32>
    %22 = arith.addf %18, %21 : vector<4x1xf32>
    %23 = math.rsqrt %22 : vector<4x1xf32>
    %24 = vector.broadcast %23 : vector<4x1xf32> to vector<4x2048xf32>
    %25 = arith.mulf %20, %24 : vector<4x2048xf32>
    %26 = vector.broadcast %6 : vector<4x1xf32> to vector<4x2048xf32>
    %27 = arith.mulf %25, %26 : vector<4x2048xf32>
    %28 = vector.broadcast %7 : vector<4x1xf32> to vector<4x2048xf32>
    %29 = arith.addf %27, %28 : vector<4x2048xf32>
    %c0_14 = arith.constant 0 : index
    %c0_15 = arith.constant 0 : index
    %30 = vector.load %arg5[%c0_14, %c0_15] : memref<4x2048xf32, #tpu.memory_space<vmem>>, vector<4x2048xf32>
    tpu.vector_store %arg5[%c0_14, %c0_15], %29 {strides = array<i32>} : memref<4x2048xf32, #tpu.memory_space<vmem>>, vector<4x2048xf32>,
    return
  }
}

module attributes {stable_mosaic.version = 11 : i64} {
  func.func @_gemm_kernel(%arg0: memref<8x72xf32, #tpu.memory_space<vmem>>, %arg1: memref<8x1xf32, #tpu.memory_space<vmem>>, %arg2: memref<72x2048xf32, #tpu.memory_space<vmem>>, %arg3: memref<8x2048xf32, #tpu.memory_space<vmem>>) attributes {dimension_semantics = [], scalar_prefetch = 0 : i64, scratch_operands = 0 : i64, tpu.core_type = #tpu.core_type<tc>} {
    %c0 = arith.constant 0 : index
    %c0_0 = arith.constant 0 : index
    %0 = vector.load %arg2[%c0, %c0_0] : memref<72x2048xf32, #tpu.memory_space<vmem>>, vector<72x2048xf32>
    %cst = arith.constant 0.000000e+00 : f32
    %1 = vector.broadcast %cst : f32 to vector<72x2048xf32>
    %2 = arith.maximumf %0, %1 : vector<72x2048xf32>
    %c0_1 = arith.constant 0 : index
    %c0_2 = arith.constant 0 : index
    %3 = vector.load %arg0[%c0_1, %c0_2] : memref<8x72xf32, #tpu.memory_space<vmem>>, vector<8x72xf32>
    %cst_3 = arith.constant dense<0.000000e+00> : vector<8x2048xf32>
    %4 = tpu.matmul %3, %2, %cst_3 {dimension_numbers = #tpu.dot_dimension_numbers<[1], [0], [0], [1], [0, 0, 1, 1], [], []>} : vector<8x72xf32>, vector<72x2048xf32>, vector<8x2048xf32> -> vector<8x2048xf32>
    %c0_4 = arith.constant 0 : index
    %c0_5 = arith.constant 0 : index
    %5 = vector.load %arg1[%c0_4, %c0_5] : memref<8x1xf32, #tpu.memory_space<vmem>>, vector<8x1xf32>
    %6 = vector.broadcast %5 : vector<8x1xf32> to vector<8x2048xf32>
    %7 = arith.addf %4, %6 : vector<8x2048xf32>
    %c0_6 = arith.constant 0 : index
    %c0_7 = arith.constant 0 : index
    %8 = vector.load %arg3[%c0_6, %c0_7] : memref<8x2048xf32, #tpu.memory_space<vmem>>, vector<8x2048xf32>
    tpu.vector_store %arg3[%c0_6, %c0_7], %7 {strides = array<i32>} : memref<8x2048xf32, #tpu.memory_space<vmem>>, vector<8x2048xf32>,
    return
  }
}

</mosaic_0001>

<bundles_post_ra>
// kernel: unet_forward.7
= control target key start
LH: loop header
LB: loop body
LE: loop exit
PB: predicated region body
PF: predicated region fallthrough
CT: control target
= control target key end

     0   :  { %v776_v3 = vmov 0.0   ;;  %v777_v8 = vmov 0   ;;  %vm85_vm0 = vcmask 261120   ;;  %s1046_s2 = inlined_call_operand.vmem [shape: f32[32,2048], index: 2, kind: input, shape index: {}]   ;;  %s1047_s0 = inlined_call_operand.vmem [shape: f32[4,32], index: 0, kind: input, shape index: {}]   ;;  %s1048_s1 = inlined_call_operand.vmem [shape: f32[4,1], index: 1, kind: input, shape index: {}]   ;;  %s1049_s3 = inlined_call_operand.vmem [shape: f32[4,2048], index: 3, kind: output, shape index: {}]  }
   0x1   :  { %v15_v0 = vld [vmem:[%s1046_s2 + $0x8] sm:$0xff]  ;;  %v17_v2 = vld [vmem:[%s1046_s2 + $0x18] sm:$0xff]  ;;  %153 = vmatprep.mubr.f32.mxu0 %v776_v3  ;;  %224 = vmatprep.mubr.f32.mxu1 %v776_v3  ;;  %v14_v6 = vld [vmem:[%s1046_s2] sm:$0xff] }
   0x2   :  { %v31_v1 = vld [vmem:[%s1046_s2 + $0x88] sm:$0xff]  ;;  %v33_v5 = vld [vmem:[%s1046_s2 + $0x98] sm:$0xff]  ;;  %v30_v7 = vld [vmem:[%s1046_s2 + $0x80] sm:$0xff]  ;;  %775 = vset.pattern.permute.xlu0 %v777_v8 }
   0x3   :  { %v709_v4 = vpack.c.bf16 %v31_v1, %v15_v0  ;;  %v717_v9 = vpack.c.bf16 %v33_v5, %v17_v2  ;;  %v711_v10 = vpack.c.bf16 %v30_v7, %v14_v6  ;;  %v16_v11 = vld [vmem:[%s1046_s2 + $0x10] sm:$0xff]  ;;  %v47_v13 = vld [vmem:[%s1046_s2 + $0x108] sm:$0xff]  ;;  %v49_v16 = vld [vmem:[%s1046_s2 + $0x118] sm:$0xff] }
   0x4   :  { %v32_v12 = vld [vmem:[%s1046_s2 + $0x90] sm:$0xff]  ;;  %v63_v15 = vld [vmem:[%s1046_s2 + $0x188] sm:$0xff]  ;;  %v65_v17 = vld [vmem:[%s1046_s2 + $0x198] sm:$0xff] }
   0x5   :  { %710 = vmatprep.subr.bf16.mxu0 %v709_v4  ;;  %v719_v14 = vpack.c.bf16 %v32_v12, %v16_v11  ;;  %718 = vmatprep.subr.bf16.mxu1 %v717_v9  ;;  %v713_v18 = vpack.c.bf16 %v63_v15, %v47_v13  ;;  %v721_v19 = vpack.c.bf16 %v65_v17, %v49_v16  ;;  %v46_v20 = vld [vmem:[%s1046_s2 + $0x100] sm:$0xff]  ;;  %v48_v22 = vld [vmem:[%s1046_s2 + $0x110] sm:$0xff]  ;;  %v19_v25 = vld [vmem:[%s1046_s2 + $0x28] sm:$0xff] }
   0x6   :  { %712 = vmatpush1.bf16.msra.mxu0 %v711_v10  ;;  %v62_v21 = vld [vmem:[%s1046_s2 + $0x180] sm:$0xff]  ;;  %v64_v24 = vld [vmem:[%s1046_s2 + $0x190] sm:$0xff]  ;;  %v35_v28 = vld [vmem:[%s1046_s2 + $0xa8] sm:$0xff] }
   0x7   :  { %720 = vmatpush1.bf16.msra.mxu1 %v719_v14  ;;  %v715_v23 = vpack.c.bf16 %v62_v21, %v46_v20  ;;  %714 = vmatprep.subr.bf16.mxu0 %v713_v18  ;;  %v723_v26 = vpack.c.bf16 %v64_v24, %v48_v22  ;;  %v854_v27 = vld [vmem:[%s1047_s0] sm:$0xf]  ;;  %v21_v29 = vld [vmem:[%s1046_s2 + $0x38] sm:$0xff]  ;;  %v725_v31 = vpack.c.bf16 %v35_v28, %v19_v25  ;;  %v20_v35 = vld [vmem:[%s1046_s2 + $0x30] sm:$0xff] }
   0x8   :  { %722 = vmatprep.subr.bf16.mxu1 %v721_v19  ;;  %v37_v30 = vld [vmem:[%s1046_s2 + $0xb8] sm:$0xff]  ;;  %v18_v33 = vld [vmem:[%s1046_s2 + $0x20] sm:$0xff]  ;;  %v36_v37 = vld [vmem:[%s1046_s2 + $0xb0] sm:$0xff] }
   0x9   :  { %v733_v32 = vpack.c.bf16 %v37_v30, %v21_v29  ;;  %v34_v34 = vld [vmem:[%s1046_s2 + $0xa0] sm:$0xff]  ;;  %v51_v38 = vld [vmem:[%s1046_s2 + $0x128] sm:$0xff]  ;;  %v735_v40 = vpack.c.bf16 %v36_v37, %v20_v35  ;;  %v53_v42 = vld [vmem:[%s1046_s2 + $0x138] sm:$0xff] }
   0xa   :  { %716 = vmatpush1.bf16.msra.mxu0 %v715_v23  ;;  %v727_v36 = vpack.c.bf16 %v34_v34, %v18_v33  ;;  %v67_v39 = vld [vmem:[%s1046_s2 + $0x1a8] sm:$0xff]  ;;  %v69_v43 = vld [vmem:[%s1046_s2 + $0x1b8] sm:$0xff]  ;;  %v50_v44 = vld [vmem:[%s1046_s2 + $0x120] sm:$0xff] }
   0xb   :  { %724 = vmatpush1.bf16.msra.mxu1 %v723_v26  ;;  %726 = vmatprep.subr.bf16.mxu0 %v725_v31  ;;  %v729_v41 = vpack.c.bf16 %v67_v39, %v51_v38  ;;  %v737_v45 = vpack.c.bf16 %v69_v43, %v53_v42  ;;  %v66_v46 = vld [vmem:[%s1046_s2 + $0x1a0] sm:$0xff]  ;;  %v52_v47 = vld [vmem:[%s1046_s2 + $0x130] sm:$0xff]  ;;  %v23_v49 = vld [vmem:[%s1046_s2 + $0x48] sm:$0xff] }
   0xc   :  { %734 = vmatprep.subr.bf16.mxu1 %v733_v32  ;;  %v68_v48 = vld [vmem:[%s1046_s2 + $0x1b0] sm:$0xff]  ;;  %v39_v50 = vld [vmem:[%s1046_s2 + $0xc8] sm:$0xff]  ;;  %v25_v51 = vld [vmem:[%s1046_s2 + $0x58] sm:$0xff]  ;;  %v731_v52 = vpack.c.bf16 %v66_v46, %v50_v44 }
   0xd   :  { %701 = vmatmul.mubr.msk.f32.vlgmr.msra.gmra.mrb[0].mxu0 %vm85_vm0, %v854_v27  ;;  %v41_v53 = vld [vmem:[%s1046_s2 + $0xd8] sm:$0xff]  ;;  %v739_v54 = vpack.c.bf16 %v68_v48, %v52_v47  ;;  %v741_v55 = vpack.c.bf16 %v39_v50, %v23_v49  ;;  %v22_v56 = vld [vmem:[%s1046_s2 + $0x40] sm:$0xff]  ;;  %v24_v58 = vld [vmem:[%s1046_s2 + $0x50] sm:$0xff] }
   0xe   :  { %702 = vmatmul.mubr.msk.f32.vlgmr.msra.gmra.mrb[0].mxu1 %vm85_vm0, %v854_v27  ;;  %728 = vmatpush1.bf16.msra.mxu0 %v727_v36  ;;  %v38_v57 = vld [vmem:[%s1046_s2 + $0xc0] sm:$0xff]  ;;  %v749_v59 = vpack.c.bf16 %v41_v53, %v25_v51  ;;  %v40_v60 = vld [vmem:[%s1046_s2 + $0xd0] sm:$0xff]  ;;  %v55_v61 = vld [vmem:[%s1046_s2 + $0x148] sm:$0xff] }
   0xf   :  { %736 = vmatpush1.bf16.msra.mxu1 %v735_v40  ;;  %730 = vmatprep.subr.bf16.mxu0 %v729_v41  ;;  %v71_v62 = vld [vmem:[%s1046_s2 + $0x1c8] sm:$0xff]  ;;  %v57_v63 = vld [vmem:[%s1046_s2 + $0x158] sm:$0xff]  ;;  %v743_v1 = vpack.c.bf16 %v38_v57, %v22_v56  ;;  %v751_v2 = vpack.c.bf16 %v40_v60, %v24_v58  ;;  %v54_v5 = vld [vmem:[%s1046_s2 + $0x140] sm:$0xff] }
  0x10   :  { %738 = vmatprep.subr.bf16.mxu1 %v737_v45  ;;  %295 = vmatprep.mubr.f32.mxu0 %v776_v3  ;;  %v73_v0 = vld [vmem:[%s1046_s2 + $0x1d8] sm:$0xff]  ;;  %v745_v4 = vpack.c.bf16 %v71_v62, %v55_v61  ;;  %v70_v6 = vld [vmem:[%s1046_s2 + $0x1c0] sm:$0xff]  ;;  %v56_v7 = vld [vmem:[%s1046_s2 + $0x150] sm:$0xff] }
  0x11   :  { %366 = vmatprep.mubr.f32.mxu1 %v776_v3  ;;  %v753_v8 = vpack.c.bf16 %v73_v0, %v57_v63  ;;  %v72_v9 = vld [vmem:[%s1046_s2 + $0x1d0] sm:$0xff]  ;;  %v27_v10 = vld [vmem:[%s1046_s2 + $0x68] sm:$0xff]  ;;  %v29_v12 = vld [vmem:[%s1046_s2 + $0x78] sm:$0xff]  ;;  %v747_v14 = vpack.c.bf16 %v70_v6, %v54_v5 }
  0x12   :  { %732 = vmatpush1.bf16.msra.mxu0 %v731_v52  ;;  %v43_v11 = vld [vmem:[%s1046_s2 + $0xe8] sm:$0xff]  ;;  %v45_v13 = vld [vmem:[%s1046_s2 + $0xf8] sm:$0xff]  ;;  %v26_v15 = vld [vmem:[%s1046_s2 + $0x60] sm:$0xff]  ;;  %v755_v16 = vpack.c.bf16 %v72_v9, %v56_v7 }
  0x13   :  { %740 = vmatpush1.bf16.msra.mxu1 %v739_v54  ;;  %742 = vmatprep.subr.bf16.mxu0 %v741_v55  ;;  %v757_v17 = vpack.c.bf16 %v43_v11, %v27_v10  ;;  %v42_v18 = vld [vmem:[%s1046_s2 + $0xe0] sm:$0xff]  ;;  %v28_v19 = vld [vmem:[%s1046_s2 + $0x70] sm:$0xff]  ;;  %v765_v21 = vpack.c.bf16 %v45_v13, %v29_v12  ;;  %v59_v23 = vld [vmem:[%s1046_s2 + $0x168] sm:$0xff] }
  0x14   :  { %750 = vmatprep.subr.bf16.mxu1 %v749_v59  ;;  %v79_v20 = vld [vmem:[%s1048_s1] sm:$0xf]  ;;  %v44_v22 = vld [vmem:[%s1046_s2 + $0xf0] sm:$0xff]  ;;  %v75_v24 = vld [vmem:[%s1046_s2 + $0x1e8] sm:$0xff]  ;;  %v759_v28 = vpack.c.bf16 %v42_v18, %v26_v15 }
  0x15   :  { %703 = vmatmul.mubr.msk.f32.vlgmr.msra.gmra.mrb[2].mxu0 %vm85_vm0, %v854_v27  ;;  %v61_v25 = vld [vmem:[%s1046_s2 + $0x178] sm:$0xff]  ;;  %82 = vperm.xlu0 %775, %v79_v20   ;;  %v767_v29 = vpack.c.bf16 %v44_v22, %v28_v19  ;;  %v761_v30 = vpack.c.bf16 %v75_v24, %v59_v23  ;;  %v58_v31 = vld [vmem:[%s1046_s2 + $0x160] sm:$0xff]  ;;  %v60_v34 = vld [vmem:[%s1046_s2 + $0x170] sm:$0xff] }
  0x16   :  { %704 = vmatmul.mubr.msk.f32.vlgmr.msra.gmra.mrb[2].mxu1 %vm85_vm0, %v854_v27  ;;  %744 = vmatpush1.bf16.msra.mxu0 %v743_v1  ;;  %v77_v26 = vld [vmem:[%s1046_s2 + $0x1f8] sm:$0xff]  ;;  %v74_v32 = vld [vmem:[%s1046_s2 + $0x1e0] sm:$0xff]  ;;  %v76_v35 = vld [vmem:[%s1046_s2 + $0x1f0] sm:$0xff] }
  0x17   :  { %752 = vmatpush1.bf16.msra.mxu1 %v751_v2  ;;  %746 = vmatprep.subr.bf16.mxu0 %v745_v4  ;;  %v769_v33 = vpack.c.bf16 %v77_v26, %v61_v25  ;;  %v763_v36 = vpack.c.bf16 %v74_v32, %v58_v31  ;;  %v771_v37 = vpack.c.bf16 %v76_v35, %v60_v34 }
  0x18   :  { %754 = vmatprep.subr.bf16.mxu1 %v753_v8  ;;  %437 = vmatprep.mubr.f32.mxu0 %v776_v3 }
  0x19   :  { %508 = vmatprep.mubr.f32.mxu1 %v776_v3 }
  0x1a   :  { %748 = vmatpush1.bf16.msra.mxu0 %v747_v14 }
  0x1b   :  { %756 = vmatpush1.bf16.msra.mxu1 %v755_v16  ;;  %758 = vmatprep.subr.bf16.mxu0 %v757_v17 }
  0x1c   :  { %766 = vmatprep.subr.bf16.mxu1 %v765_v21 }
  0x1d   :  { %705 = vmatmul.mubr.msk.f32.vlgmr.msra.gmra.mrb[4].mxu0 %vm85_vm0, %v854_v27 }
  0x1e   :  { %706 = vmatmul.mubr.msk.f32.vlgmr.msra.gmra.mrb[4].mxu1 %vm85_vm0, %v854_v27  ;;  %760 = vmatpush1.bf16.msra.mxu0 %v759_v28 }
  0x1f   :  { %768 = vmatpush1.bf16.msra.mxu1 %v767_v29  ;;  %762 = vmatprep.subr.bf16.mxu0 %v761_v30 }
  0x20   :  { %770 = vmatprep.subr.bf16.mxu1 %v769_v33  ;;  %579 = vmatprep.mubr.f32.mxu0 %v776_v3 }
  0x21   :  { %650 = vmatprep.mubr.f32.mxu1 %v776_v3 }
  0x22   :  { %764 = vmatpush1.bf16.msra.mxu0 %v763_v36 }
  0x23   :  { %772 = vmatpush1.bf16.msra.mxu1 %v771_v37 }
  0x25   :  { %707 = vmatmul.mubr.msk.f32.vlgmr.msra.gmra.mrb[6].mxu0 %vm85_vm0, %v854_v27 }
  0x26   :  { %708 = vmatmul.mubr.msk.f32.vlgmr.msra.gmra.mrb[6].mxu1 %vm85_vm0, %v854_v27 }
  0x94   :  { %v83_v38 = vpop.permute.xlu0 %82 }
  0xe0   :  { %v155_v39 = vpop.f32.mrb[0].mxu0 }
  0xe1   :  { %v226_v40 = vpop.f32.mrb[0].mxu1  ;;  %v156_v41 = vadd.f32 %v155_v39, %v83_v38  ;;  %v157_v42 = vpop.f32.mrb[1].mxu0 }
  0xe2   :  { %v158_v43 = vadd.f32 %v157_v42, %v83_v38  ;;  %v227_v44 = vadd.f32 %v226_v40, %v83_v38  ;;  %v228_v45 = vpop.f32.mrb[1].mxu1 }
  0xe3   :  { %v229_v46 = vadd.f32 %v228_v45, %v83_v38 }
  0xe4   :  { %v673_v47 = vcombine.low %v156_v41, %v158_v43 }
  0xe5   :  { %v674_v48 = vcombine.low %v227_v44, %v229_v46 }
  0xe6   :  { %689 = vst [vmem:[%s1049_s3] sm:$0xff] %v673_v47 }
  0xe7   :  { %690 = vst [vmem:[%s1049_s3 + $0x8] sm:$0xff] %v674_v48 }
  0xe8   :  { %v297_v3 = vpop.f32.mrb[2].mxu0 }
  0xe9   :  { %v298_v27 = vadd.f32 %v297_v3, %v83_v38  ;;  %v368_v49 = vpop.f32.mrb[2].mxu1  ;;  %v299_v50 = vpop.f32.mrb[3].mxu0 }
  0xea   :  { %v369_v51 = vadd.f32 %v368_v49, %v83_v38  ;;  %v300_v52 = vadd.f32 %v299_v50, %v83_v38  ;;  %v370_v53 = vpop.f32.mrb[3].mxu1 }
  0xeb   :  { %v371_v54 = vadd.f32 %v370_v53, %v83_v38 }
  0xec   :  { %v675_v55 = vcombine.low %v298_v27, %v300_v52 }
  0xed   :  { %v676_v56 = vcombine.low %v369_v51, %v371_v54 }
  0xee   :  { %691 = vst [vmem:[%s1049_s3 + $0x10] sm:$0xff] %v675_v55 }
  0xef   :  { %692 = vst [vmem:[%s1049_s3 + $0x18] sm:$0xff] %v676_v56 }
  0xf0   :  { %v439_v57 = vpop.f32.mrb[4].mxu0 }
  0xf1   :  { %v440_v58 = vadd.f32 %v439_v57, %v83_v38  ;;  %v510_v59 = vpop.f32.mrb[4].mxu1  ;;  %v441_v60 = vpop.f32.mrb[5].mxu0 }
  0xf2   :  { %v511_v61 = vadd.f32 %v510_v59, %v83_v38  ;;  %v442_v62 = vadd.f32 %v441_v60, %v83_v38  ;;  %v512_v63 = vpop.f32.mrb[5].mxu1 }
  0xf3   :  { %v513_v0 = vadd.f32 %v512_v63, %v83_v38 }
  0xf4   :  { %v677_v1 = vcombine.low %v440_v58, %v442_v62 }
  0xf5   :  { %v678_v2 = vcombine.low %v511_v61, %v513_v0 }
  0xf6   :  { %693 = vst [vmem:[%s1049_s3 + $0x20] sm:$0xff] %v677_v1 }
  0xf7   :  { %694 = vst [vmem:[%s1049_s3 + $0x28] sm:$0xff] %v678_v2 }
  0xf8   :  { %v581_v4 = vpop.f32.mrb[6].mxu0 }
  0xf9   :  { %v582_v5 = vadd.f32 %v581_v4, %v83_v38  ;;  %v652_v6 = vpop.f32.mrb[6].mxu1  ;;  %v583_v7 = vpop.f32.mrb[7].mxu0 }
  0xfa   :  { %v653_v8 = vadd.f32 %v652_v6, %v83_v38  ;;  %v584_v9 = vadd.f32 %v583_v7, %v83_v38  ;;  %v654_v10 = vpop.f32.mrb[7].mxu1 }
  0xfb   :  { %v655_v11 = vadd.f32 %v654_v10, %v83_v38 }
  0xfc   :  { %v679_v12 = vcombine.low %v582_v5, %v584_v9 }
  0xfd   :  { %v680_v13 = vcombine.low %v653_v8, %v655_v11 }
  0xfe   :  { %695 = vst [vmem:[%s1049_s3 + $0x30] sm:$0xff] %v679_v12 }
  0xff   :  { %696 = vst [vmem:[%s1049_s3 + $0x38] sm:$0xff] %v680_v13 }

// kernel: unet_forward.8
= control target key start
LH: loop header
LB: loop body
LE: loop exit
PB: predicated region body
PF: predicated region fallthrough
CT: control target
= control target key end

     0   :  { %v397_v3 = vmov 0.0   ;;  %v398_v6 = vmov 0   ;;  %s560_s4 = inlined_call_operand.vmem [shape: f32[64,512], index: 4, kind: input, shape index: {}]   ;;  %s561_s1 = inlined_call_operand.vmem [shape: f32[8,1], index: 1, kind: input, shape index: {}]   ;;  %s562_s2 = inlined_call_operand.vmem [shape: f32[8,1], index: 2, kind: input, shape index: {}]   ;;  %s563_s0 = inlined_call_operand.vmem [shape: f32[8,64], index: 0, kind: input, shape index: {}]   ;;  %s564_s3 = inlined_call_operand.vmem [shape: f32[8,1], index: 3, kind: input, shape index: {}]   ;;  %s565_s5 = inlined_call_operand.vmem [shape: f32[8,512], index: 5, kind: output, shape index: {}]  }
   0x1   :  { %v21_v0 = vld [vmem:[%s560_s4 + $0x8] sm:$0xff]  ;;  %v23_v2 = vld [vmem:[%s560_s4 + $0x18] sm:$0xff]  ;;  %223 = vmatprep.mubr.f32.mxu0 %v397_v3  ;;  %294 = vmatprep.mubr.f32.mxu1 %v397_v3  ;;  %v20_v9 = vld [vmem:[%s560_s4] sm:$0xff] }
   0x2   :  { %v25_v1 = vld [vmem:[%s560_s4 + $0x28] sm:$0xff]  ;;  %vm53_vm0 = vcmp.ge.f32.partialorder %v21_v0, 0.0  ;;  %v85_v4 = vmul.f32 0.2, %v21_v0  ;;  %393 = vset.pattern.permute.xlu0 %v398_v6  ;;  %394 = vset.pattern.permute.xlu1 %v398_v6  ;;  %v27_v7 = vld [vmem:[%s560_s4 + $0x38] sm:$0xff]  ;;  %vm55_vm2 = vcmp.ge.f32.partialorder %v23_v2, 0.0 }
   0x3   :  { %vm57_vm1 = vcmp.ge.f32.partialorder %v25_v1, 0.0  ;;  %v89_v5 = vmul.f32 0.2, %v25_v1  ;;  %v87_v8 = vmul.f32 0.2, %v23_v2  ;;  %v24_v10 = vld [vmem:[%s560_s4 + $0x20] sm:$0xff] }
   0x4   :  { %v117_v11 = vsel %vm53_vm0, %v21_v0, %v85_v4  ;;  %vm59_vm3 = vcmp.ge.f32.partialorder %v27_v7, 0.0  ;;  %v91_v13 = vmul.f32 0.2, %v27_v7  ;;  %v22_v14 = vld [vmem:[%s560_s4 + $0x10] sm:$0xff]  ;;  %vm52_vm4 = vcmp.ge.f32.partialorder %v20_v9, 0.0  ;;  %v29_v18 = vld [vmem:[%s560_s4 + $0x48] sm:$0xff] }
   0x5   :  { %v121_v12 = vsel %vm57_vm1, %v25_v1, %v89_v5  ;;  %v26_v15 = vld [vmem:[%s560_s4 + $0x30] sm:$0xff]  ;;  %v119_v17 = vsel %vm55_vm2, %v23_v2, %v87_v8  ;;  %vm56_vm5 = vcmp.ge.f32.partialorder %v24_v10, 0.0  ;;  %v33_v19 = vld [vmem:[%s560_s4 + $0x68] sm:$0xff]  ;;  %v84_v21 = vmul.f32 0.2, %v20_v9  ;;  %v31_v23 = vld [vmem:[%s560_s4 + $0x58] sm:$0xff] }
   0x6   :  { %v359_v16 = vpack.c.bf16 %v121_v12, %v117_v11  ;;  %v123_v20 = vsel %vm59_vm3, %v27_v7, %v91_v13  ;;  %v88_v22 = vmul.f32 0.2, %v24_v10  ;;  %vm54_vm6 = vcmp.ge.f32.partialorder %v22_v14, 0.0  ;;  %v35_v27 = vld [vmem:[%s560_s4 + $0x78] sm:$0xff]  ;;  %v28_v30 = vld [vmem:[%s560_s4 + $0x40] sm:$0xff]  ;;  %v30_v38 = vld [vmem:[%s560_s4 + $0x50] sm:$0xff] }
   0x7   :  { %v375_v24 = vpack.c.bf16 %v123_v20, %v119_v17  ;;  %vm58_vm7 = vcmp.ge.f32.partialorder %v26_v15, 0.0  ;;  %v86_v25 = vmul.f32 0.2, %v22_v14  ;;  %v90_v26 = vmul.f32 0.2, %v26_v15  ;;  %v32_v35 = vld [vmem:[%s560_s4 + $0x60] sm:$0xff] }
   0x8   :  { %360 = vmatprep.subr.bf16.mxu0 %v359_v16  ;;  %v116_v28 = vsel %vm52_vm4, %v20_v9, %v84_v21  ;;  %v120_v29 = vsel %vm56_vm5, %v24_v10, %v88_v22  ;;  %vm61_vm8 = vcmp.ge.f32.partialorder %v29_v18, 0.0  ;;  %vm65_vm9 = vcmp.ge.f32.partialorder %v33_v19, 0.0  ;;  %v34_v42 = vld [vmem:[%s560_s4 + $0x70] sm:$0xff]  ;;  %v37_v46 = vld [vmem:[%s560_s4 + $0x88] sm:$0xff]  ;;  %v39_v51 = vld [vmem:[%s560_s4 + $0x98] sm:$0xff] }
   0x9   :  { %376 = vmatprep.subr.bf16.mxu1 %v375_v24  ;;  %v361_v31 = vpack.c.bf16 %v120_v29, %v116_v28  ;;  %v118_v32 = vsel %vm54_vm6, %v22_v14, %v86_v25  ;;  %v122_v33 = vsel %vm58_vm7, %v26_v15, %v90_v26  ;;  %v93_v34 = vmul.f32 0.2, %v29_v18  ;;  %v41_v50 = vld [vmem:[%s560_s4 + $0xa8] sm:$0xff]  ;;  %v43_v55 = vld [vmem:[%s560_s4 + $0xb8] sm:$0xff]  ;;  %v36_v56 = vld [vmem:[%s560_s4 + $0x80] sm:$0xff] }
   0xa   :  { %v377_v36 = vpack.c.bf16 %v122_v33, %v118_v32  ;;  %v97_v37 = vmul.f32 0.2, %v33_v19  ;;  %vm63_vm10 = vcmp.ge.f32.partialorder %v31_v23, 0.0  ;;  %vm67_vm11 = vcmp.ge.f32.partialorder %v35_v27, 0.0  ;;  %v40_v60 = vld [vmem:[%s560_s4 + $0xa0] sm:$0xff]  ;;  %v38_v2 = vld [vmem:[%s560_s4 + $0x90] sm:$0xff] }
   0xb   :  { %362 = vmatpush1.bf16.msra.mxu0 %v361_v31  ;;  %v125_v39 = vsel %vm61_vm8, %v29_v18, %v93_v34  ;;  %v95_v40 = vmul.f32 0.2, %v31_v23  ;;  %v99_v41 = vmul.f32 0.2, %v35_v27  ;;  %vm60_vm12 = vcmp.ge.f32.partialorder %v28_v30, 0.0  ;;  %v149_v3 = vld [vmem:[%s561_s1] sm:$0xff] }
   0xc   :  { %378 = vmatpush1.bf16.msra.mxu1 %v377_v36  ;;  %v129_v43 = vsel %vm65_vm9, %v33_v19, %v97_v37  ;;  %vm64_vm13 = vcmp.ge.f32.partialorder %v32_v35, 0.0  ;;  %v92_v44 = vmul.f32 0.2, %v28_v30  ;;  %v96_v45 = vmul.f32 0.2, %v32_v35  ;;  %v42_v8 = vld [vmem:[%s560_s4 + $0xb0] sm:$0xff]  ;;  %152 = vperm.xlu0 %393, %v149_v3  }
   0xd   :  { %v363_v47 = vpack.c.bf16 %v129_v43, %v125_v39  ;;  %v127_v48 = vsel %vm63_vm10, %v31_v23, %v95_v40  ;;  %v131_v49 = vsel %vm67_vm11, %v35_v27, %v99_v41  ;;  %vm62_vm14 = vcmp.ge.f32.partialorder %v30_v38, 0.0  ;;  %v301_v9 = vld [vmem:[%s562_s2] sm:$0xff]  ;;  %v45_v12 = vld [vmem:[%s560_s4 + $0xc8] sm:$0xff]  ;;  %v47_v17 = vld [vmem:[%s560_s4 + $0xd8] sm:$0xff] }
   0xe   :  { %v379_v52 = vpack.c.bf16 %v131_v49, %v127_v48  ;;  %v124_v53 = vsel %vm60_vm12, %v28_v30, %v92_v44  ;;  %v128_v54 = vsel %vm64_vm13, %v32_v35, %v96_v45  ;;  %vm66_vm15 = vcmp.ge.f32.partialorder %v34_v42, 0.0  ;;  %v49_v13 = vld [vmem:[%s560_s4 + $0xe8] sm:$0xff]  ;;  %333 = vperm.xlu1 %394, %v301_v9   ;;  %v51_v21 = vld [vmem:[%s560_s4 + $0xf8] sm:$0xff]  ;;  %v44_v24 = vld [vmem:[%s560_s4 + $0xc0] sm:$0xff] }
   0xf   :  { %364 = vmatprep.subr.bf16.mxu0 %v363_v47  ;;  %v365_v57 = vpack.c.bf16 %v128_v54, %v124_v53  ;;  %v94_v58 = vmul.f32 0.2, %v30_v38  ;;  %v98_v59 = vmul.f32 0.2, %v34_v42  ;;  %vm69_vm0 = vcmp.ge.f32.partialorder %v37_v46, 0.0  ;;  %v48_v29 = vld [vmem:[%s560_s4 + $0xe0] sm:$0xff] }
  0x10   :  { %380 = vmatprep.subr.bf16.mxu1 %v379_v52  ;;  %vm73_vm1 = vcmp.ge.f32.partialorder %v41_v50, 0.0  ;;  %v101_v61 = vmul.f32 0.2, %v37_v46  ;;  %v105_v62 = vmul.f32 0.2, %v41_v50  ;;  %vm71_vm2 = vcmp.ge.f32.partialorder %v39_v51, 0.0 }
  0x11   :  { %366 = vmatpush1.bf16.msra.mxu0 %v365_v57  ;;  %v126_v63 = vsel %vm62_vm14, %v30_v38, %v94_v58  ;;  %v130_v0 = vsel %vm66_vm15, %v34_v42, %v98_v59  ;;  %vm75_vm3 = vcmp.ge.f32.partialorder %v43_v55, 0.0  ;;  %v103_v1 = vmul.f32 0.2, %v39_v51  ;;  %v46_v32 = vld [vmem:[%s560_s4 + $0xd0] sm:$0xff] }
  0x12   :  { %v381_v4 = vpack.c.bf16 %v130_v0, %v126_v63  ;;  %v133_v5 = vsel %vm69_vm0, %v37_v46, %v101_v61  ;;  %v137_v6 = vsel %vm73_vm1, %v41_v50, %v105_v62  ;;  %v107_v7 = vmul.f32 0.2, %v43_v55  ;;  %v50_v36 = vld [vmem:[%s560_s4 + $0xf0] sm:$0xff] }
  0x13   :  { %v367_v10 = vpack.c.bf16 %v137_v6, %v133_v5  ;;  %v135_v11 = vsel %vm71_vm2, %v39_v51, %v103_v1  ;;  %vm68_vm4 = vcmp.ge.f32.partialorder %v36_v56, 0.0  ;;  %vm72_vm5 = vcmp.ge.f32.partialorder %v40_v60, 0.0  ;;  %v148_v51 = vld [vmem:[%s563_s0] sm:$0xff] }
  0x14   :  { %382 = vmatpush1.bf16.msra.mxu1 %v381_v4  ;;  %v139_v14 = vsel %vm75_vm3, %v43_v55, %v107_v7  ;;  %v100_v15 = vmul.f32 0.2, %v36_v56  ;;  %v104_v16 = vmul.f32 0.2, %v40_v60  ;;  %vm70_vm6 = vcmp.ge.f32.partialorder %v38_v2, 0.0 }
  0x15   :  { %368 = vmatprep.subr.bf16.mxu0 %v367_v10  ;;  %v383_v18 = vpack.c.bf16 %v139_v14, %v135_v11  ;;  %vm74_vm7 = vcmp.ge.f32.partialorder %v42_v8, 0.0  ;;  %v102_v19 = vmul.f32 0.2, %v38_v2  ;;  %v106_v20 = vmul.f32 0.2, %v42_v8 }
  0x16   :  { %v132_v22 = vsel %vm68_vm4, %v36_v56, %v100_v15  ;;  %v136_v23 = vsel %vm72_vm5, %v40_v60, %v104_v16  ;;  %vm77_vm8 = vcmp.ge.f32.partialorder %v45_v12, 0.0  ;;  %vm81_vm9 = vcmp.ge.f32.partialorder %v49_v13, 0.0 }
  0x17   :  { %384 = vmatprep.subr.bf16.mxu1 %v383_v18  ;;  %v369_v25 = vpack.c.bf16 %v136_v23, %v132_v22  ;;  %v134_v26 = vsel %vm70_vm6, %v38_v2, %v102_v19  ;;  %v138_v27 = vsel %vm74_vm7, %v42_v8, %v106_v20  ;;  %v109_v28 = vmul.f32 0.2, %v45_v12  ;;  %v302_v8 = vld [vmem:[%s564_s3] sm:$0xff] }
  0x18   :  { %v385_v30 = vpack.c.bf16 %v138_v27, %v134_v26  ;;  %v113_v31 = vmul.f32 0.2, %v49_v13  ;;  %vm79_vm10 = vcmp.ge.f32.partialorder %v47_v17, 0.0  ;;  %vm83_vm11 = vcmp.ge.f32.partialorder %v51_v21, 0.0 }
  0x19   :  { %370 = vmatpush1.bf16.msra.mxu0 %v369_v25  ;;  %v141_v33 = vsel %vm77_vm8, %v45_v12, %v109_v28  ;;  %v111_v34 = vmul.f32 0.2, %v47_v17  ;;  %v115_v35 = vmul.f32 0.2, %v51_v21  ;;  %vm76_vm12 = vcmp.ge.f32.partialorder %v44_v24, 0.0 }
  0x1a   :  { %386 = vmatpush1.bf16.msra.mxu1 %v385_v30  ;;  %v145_v37 = vsel %vm81_vm9, %v49_v13, %v113_v31  ;;  %vm80_vm13 = vcmp.ge.f32.partialorder %v48_v29, 0.0  ;;  %v108_v38 = vmul.f32 0.2, %v44_v24  ;;  %v112_v39 = vmul.f32 0.2, %v48_v29 }
  0x1b   :  { %v371_v40 = vpack.c.bf16 %v145_v37, %v141_v33  ;;  %v143_v41 = vsel %vm79_vm10, %v47_v17, %v111_v34  ;;  %v147_v42 = vsel %vm83_vm11, %v51_v21, %v115_v35  ;;  %vm78_vm14 = vcmp.ge.f32.partialorder %v46_v32, 0.0 }
  0x1c   :  { %v387_v43 = vpack.c.bf16 %v147_v42, %v143_v41  ;;  %v140_v44 = vsel %vm76_vm12, %v44_v24, %v108_v38  ;;  %v144_v45 = vsel %vm80_vm13, %v48_v29, %v112_v39  ;;  %vm82_vm15 = vcmp.ge.f32.partialorder %v50_v36, 0.0 }
  0x1d   :  { %372 = vmatprep.subr.bf16.mxu0 %v371_v40  ;;  %v373_v46 = vpack.c.bf16 %v144_v45, %v140_v44  ;;  %v110_v47 = vmul.f32 0.2, %v46_v32  ;;  %v114_v48 = vmul.f32 0.2, %v50_v36  ;;  %vm155_vm0 = vcmask 523264  }
  0x1e   :  { %388 = vmatprep.subr.bf16.mxu1 %v387_v43 }
  0x1f   :  { %374 = vmatpush1.bf16.msra.mxu0 %v373_v46  ;;  %v142_v49 = vsel %vm78_vm14, %v46_v32, %v110_v47  ;;  %v146_v50 = vsel %vm82_vm15, %v50_v36, %v114_v48 }
  0x20   :  { %v389_v52 = vpack.c.bf16 %v146_v50, %v142_v49 }
  0x22   :  { %390 = vmatpush1.bf16.msra.mxu1 %v389_v52  ;;  %357 = vmatmul.mubr.msk.f32.vlgmr.msra.gmra.mrb[0].mxu0 %vm155_vm0, %v148_v51 }
  0x25   :  { %358 = vmatmul.mubr.msk.f32.vlgmr.msra.gmra.mrb[0].mxu1 %vm155_vm0, %v148_v51 }
  0x8b   :  { %v153_v53 = vpop.permute.xlu0 %152 }
  0x8d   :  { %v334_v9 = vpop.permute.xlu1 %333 }
  0xf5   :  { %v225_v54 = vpop.f32.mrb[0].mxu0 }
  0xf6   :  { %v226_v55 = vadd.f32 %v225_v54, %v153_v53  ;;  %v227_v56 = vpop.f32.mrb[1].mxu0 }
  0xf7   :  { %v228_v57 = vadd.f32 %v227_v56, %v153_v53 }
  0xf8   :  { %v309_v58 = vmul.f32 %v226_v55, %v226_v55  ;;  %v296_v59 = vpop.f32.mrb[0].mxu1 }
  0xf9   :  { %v297_v60 = vadd.f32 %v296_v59, %v153_v53  ;;  %v303_v61 = vadd.f32 %v228_v57, %v226_v55  ;;  %v310_v62 = vmul.f32 %v228_v57, %v228_v57  ;;  %v298_v63 = vpop.f32.mrb[1].mxu1 }
  0xfa   :  { %v299_v0 = vadd.f32 %v298_v63, %v153_v53 }
  0xfb   :  { %v311_v1 = vmul.f32 %v297_v60, %v297_v60  ;;  %v304_v2 = vadd.f32 %v303_v61, %v297_v60  ;;  %v313_v3 = vadd.f32 %v310_v62, %v309_v58 }
  0xfc   :  { %v312_v5 = vmul.f32 %v299_v0, %v299_v0 }
  0xfd   :  { %v305_v4 = vadd.f32 %v304_v2, %v299_v0  ;;  %v314_v6 = vadd.f32 %v313_v3, %v311_v1 }
  0xff   :  { %306 = vadd.xlane.f32.xlu0 %v305_v4  ;;  %v315_v7 = vadd.f32 %v314_v6, %v312_v5 }
 0x101   :  { %316 = vadd.xlane.f32.xlu1 %v315_v7 }
 0x112   :  { %342 = vperm.xlu1 %394, %v302_v8  }
 0x18c   :  { %v307_v10 = vpop.xlane.xlu0 %306 }
 0x18d   :  { %v308_v11 = vmul.f32 0.001953125, %v307_v10 }
 0x18e   :  { %v317_v12 = vpop.xlane.xlu1 %316 }
 0x18f   :  { %v318_v13 = vmul.f32 0.001953125, %v317_v12  ;;  %v319_v14 = vmul.f32 %v308_v11, %v308_v11  ;;  %v321_v17 = vsub.f32 %v226_v55, %v308_v11  ;;  %v322_v18 = vsub.f32 %v228_v57, %v308_v11 }
 0x190   :  { %v323_v19 = vsub.f32 %v297_v60, %v308_v11  ;;  %v324_v20 = vsub.f32 %v299_v0, %v308_v11 }
 0x191   :  { %v320_v15 = vsub.f32 %v318_v13, %v319_v14 }
 0x192   :  { %v343_v30 = vpop.permute.xlu1 %342 }
 0x193   :  { %v325_v16 = vadd.f32 1e-05, %v320_v15 }
 0x195   :  { %395 = vrsqrt.f32 %v325_v16 }
 0x19f   :  { %v396_v21 = vpop.eup %395 }
 0x1a0   :  { %v327_v22 = vmul.f32 %v396_v21, %v321_v17  ;;  %v328_v23 = vmul.f32 %v396_v21, %v322_v18  ;;  %v329_v24 = vmul.f32 %v396_v21, %v323_v19  ;;  %v330_v25 = vmul.f32 %v396_v21, %v324_v20 }
 0x1a2   :  { %v336_v26 = vmul.f32 %v334_v9, %v327_v22  ;;  %v337_v27 = vmul.f32 %v334_v9, %v328_v23  ;;  %v338_v28 = vmul.f32 %v334_v9, %v329_v24  ;;  %v339_v29 = vmul.f32 %v334_v9, %v330_v25 }
 0x1a4   :  { %v345_v31 = vadd.f32 %v343_v30, %v336_v26  ;;  %v346_v32 = vadd.f32 %v343_v30, %v337_v27  ;;  %v347_v33 = vadd.f32 %v343_v30, %v338_v28  ;;  %v348_v34 = vadd.f32 %v343_v30, %v339_v29 }
 0x1a6   :  { %349 = vst [vmem:[%s565_s5] sm:$0xff] %v345_v31  ;;  %350 = vst [vmem:[%s565_s5 + $0x8] sm:$0xff] %v346_v32 }
 0x1a7   :  { %351 = vst [vmem:[%s565_s5 + $0x10] sm:$0xff] %v347_v33  ;;  %352 = vst [vmem:[%s565_s5 + $0x18] sm:$0xff] %v348_v34 }

// kernel: unet_forward.9
= control target key start
LH: loop header
LB: loop body
LE: loop exit
PB: predicated region body
PF: predicated region fallthrough
CT: control target
= control target key end

     0   :  { %v325_v3 = vmov 0   ;;  %s437_s4 = inlined_call_operand.vmem [shape: f32[128,128], index: 4, kind: input, shape index: {}]   ;;  %s438_s0 = inlined_call_operand.vmem [shape: f32[16,128], index: 0, kind: input, shape index: {}]   ;;  %s439_s1 = inlined_call_operand.vmem [shape: f32[16,1], index: 1, kind: input, shape index: {}]   ;;  %s440_s2 = inlined_call_operand.vmem [shape: f32[16,1], index: 2, kind: input, shape index: {}]   ;;  %s441_s3 = inlined_call_operand.vmem [shape: f32[16,1], index: 3, kind: input, shape index: {}]   ;;  %s442_s5 = inlined_call_operand.vmem [shape: f32[16,128], index: 5, kind: output, shape index: {}]  }
   0x1   :  { %v20_v0 = vld [vmem:[%s437_s4] sm:$0xff]  ;;  %v21_v1 = vld [vmem:[%s437_s4 + $0x8] sm:$0xff]  ;;  %v22_v2 = vld [vmem:[%s437_s4 + $0x10] sm:$0xff]  ;;  %319 = vset.pattern.permute.xlu0 %v325_v3  ;;  %320 = vset.pattern.permute.xlu1 %v325_v3 }
   0x2   :  { %vm36_vm0 = vcmp.ge.f32.partialorder %v20_v0, 0.0  ;;  %vm37_vm1 = vcmp.ge.f32.partialorder %v21_v1, 0.0  ;;  %v52_v4 = vmul.f32 0.2, %v20_v0  ;;  %v53_v5 = vmul.f32 0.2, %v21_v1 }
   0x3   :  { %v23_v6 = vld [vmem:[%s437_s4 + $0x18] sm:$0xff]  ;;  %vm38_vm2 = vcmp.ge.f32.partialorder %v22_v2, 0.0  ;;  %v54_v7 = vmul.f32 0.2, %v22_v2  ;;  %v24_v8 = vld [vmem:[%s437_s4 + $0x20] sm:$0xff]  ;;  %v25_v9 = vld [vmem:[%s437_s4 + $0x28] sm:$0xff] }
   0x4   :  { %v68_v10 = vsel %vm36_vm0, %v20_v0, %v52_v4  ;;  %v69_v11 = vsel %vm37_vm1, %v21_v1, %v53_v5  ;;  %vm39_vm3 = vcmp.ge.f32.partialorder %v23_v6, 0.0  ;;  %v55_v12 = vmul.f32 0.2, %v23_v6  ;;  %v26_v13 = vld [vmem:[%s437_s4 + $0x30] sm:$0xff]  ;;  %v27_v14 = vld [vmem:[%s437_s4 + $0x38] sm:$0xff]  ;;  %v28_v20 = vld [vmem:[%s437_s4 + $0x40] sm:$0xff] }
   0x5   :  { %v286_v15 = vpack.c.bf16 %v69_v11, %v68_v10  ;;  %v70_v16 = vsel %vm38_vm2, %v22_v2, %v54_v7  ;;  %vm40_vm4 = vcmp.ge.f32.partialorder %v24_v8, 0.0  ;;  %vm41_vm5 = vcmp.ge.f32.partialorder %v25_v9, 0.0  ;;  %v29_v24 = vld [vmem:[%s437_s4 + $0x48] sm:$0xff]  ;;  %v84_v27 = vld [vmem:[%s438_s0] sm:$0xff]  ;;  %v30_v34 = vld [vmem:[%s437_s4 + $0x50] sm:$0xff] }
   0x6   :  { %v71_v17 = vsel %vm39_vm3, %v23_v6, %v55_v12  ;;  %v56_v18 = vmul.f32 0.2, %v24_v8  ;;  %v57_v19 = vmul.f32 0.2, %v25_v9  ;;  %vm42_vm6 = vcmp.ge.f32.partialorder %v26_v13, 0.0  ;;  %283 = vmatprep.mubr.f32.mxu0 %v84_v27  ;;  %v86_v29 = vld [vmem:[%s439_s1] sm:$0xff] }
   0x7   :  { %287 = vmatprep.subr.bf16.mxu0 %v286_v15  ;;  %v290_v21 = vpack.c.bf16 %v71_v17, %v70_v16  ;;  %vm43_vm7 = vcmp.ge.f32.partialorder %v27_v14, 0.0  ;;  %v58_v22 = vmul.f32 0.2, %v26_v13  ;;  %v59_v23 = vmul.f32 0.2, %v27_v14  ;;  %90 = vperm.xlu0 %319, %v86_v29   ;;  %v31_v35 = vld [vmem:[%s437_s4 + $0x58] sm:$0xff] }
   0x8   :  { %289 = vmatpush3.bf16.msra.mxu0 %v286_v15  ;;  %v72_v25 = vsel %vm40_vm4, %v24_v8, %v56_v18  ;;  %v73_v26 = vsel %vm41_vm5, %v25_v9, %v57_v19  ;;  %v60_v32 = vmul.f32 0.2, %v28_v20  ;;  %v61_v33 = vmul.f32 0.2, %v29_v24  ;;  %v87_v36 = vld [vmem:[%s439_s1 + $0x8] sm:$0xff]  ;;  %v32_v42 = vld [vmem:[%s437_s4 + $0x60] sm:$0xff] }
   0x9   :  { %291 = vmatprep.subr.bf16.mxu0 %v290_v21  ;;  %v294_v28 = vpack.c.bf16 %v73_v26, %v72_v25  ;;  %v74_v30 = vsel %vm42_vm6, %v26_v13, %v58_v22  ;;  %v75_v31 = vsel %vm43_vm7, %v27_v14, %v59_v23  ;;  %vm44_vm8 = vcmp.ge.f32.partialorder %v28_v20, 0.0  ;;  %v33_v43 = vld [vmem:[%s437_s4 + $0x68] sm:$0xff]  ;;  %v34_v49 = vld [vmem:[%s437_s4 + $0x70] sm:$0xff]  ;;  %v35_v50 = vld [vmem:[%s437_s4 + $0x78] sm:$0xff] }
   0xa   :  { %vm45_vm9 = vcmp.ge.f32.partialorder %v29_v24, 0.0  ;;  %v298_v37 = vpack.c.bf16 %v75_v31, %v74_v30  ;;  %v76_v38 = vsel %vm44_vm8, %v28_v20, %v60_v32  ;;  %v62_v40 = vmul.f32 0.2, %v30_v34  ;;  %v85_v60 = vld [vmem:[%s438_s0 + $0x8] sm:$0xff]  ;;  %v173_v5 = vld [vmem:[%s440_s2] sm:$0xff] }
   0xb   :  { %v77_v39 = vsel %vm45_vm9, %v29_v24, %v61_v33  ;;  %v63_v41 = vmul.f32 0.2, %v31_v35  ;;  %95 = vperm.xlu0 %319, %v87_v36   ;;  %vm46_vm10 = vcmp.ge.f32.partialorder %v30_v34, 0.0  ;;  %vm47_vm11 = vcmp.ge.f32.partialorder %v31_v35, 0.0  ;;  %v174_v6 = vld [vmem:[%s440_s2 + $0x8] sm:$0xff]  ;;  %v175_v7 = vld [vmem:[%s441_s3] sm:$0xff] }
   0xc   :  { %293 = vmatpush3.bf16.msra.mxu0 %v290_v21  ;;  %v302_v44 = vpack.c.bf16 %v77_v39, %v76_v38  ;;  %v78_v45 = vsel %vm46_vm10, %v30_v34, %v62_v40  ;;  %v64_v47 = vmul.f32 0.2, %v32_v42  ;;  %v65_v48 = vmul.f32 0.2, %v33_v43  ;;  %v176_v8 = vld [vmem:[%s441_s3 + $0x8] sm:$0xff] }
   0xd   :  { %295 = vmatprep.subr.bf16.mxu0 %v294_v28  ;;  %v79_v46 = vsel %vm47_vm11, %v31_v35, %v63_v41  ;;  %vm48_vm12 = vcmp.ge.f32.partialorder %v32_v42, 0.0  ;;  %vm49_vm13 = vcmp.ge.f32.partialorder %v33_v43, 0.0  ;;  %v66_v54 = vmul.f32 0.2, %v34_v49 }
   0xe   :  { %v306_v51 = vpack.c.bf16 %v79_v46, %v78_v45  ;;  %v80_v52 = vsel %vm48_vm12, %v32_v42, %v64_v47  ;;  %v81_v53 = vsel %vm49_vm13, %v33_v43, %v65_v48  ;;  %v67_v55 = vmul.f32 0.2, %v35_v50 }
   0xf   :  { %vm50_vm14 = vcmp.ge.f32.partialorder %v34_v49, 0.0  ;;  %vm51_vm15 = vcmp.ge.f32.partialorder %v35_v50, 0.0  ;;  %v310_v56 = vpack.c.bf16 %v81_v53, %v80_v52 }
  0x10   :  { %297 = vmatpush3.bf16.msra.mxu0 %v294_v28  ;;  %v82_v57 = vsel %vm50_vm14, %v34_v49, %v66_v54  ;;  %v83_v58 = vsel %vm51_vm15, %v35_v50, %v67_v55 }
  0x11   :  { %299 = vmatprep.subr.bf16.mxu0 %v298_v37  ;;  %v314_v59 = vpack.c.bf16 %v83_v58, %v82_v57 }
  0x14   :  { %301 = vmatpush3.bf16.msra.mxu0 %v298_v37 }
  0x15   :  { %303 = vmatprep.subr.bf16.mxu0 %v302_v44 }
  0x18   :  { %305 = vmatpush3.bf16.msra.mxu0 %v302_v44 }
  0x19   :  { %307 = vmatprep.subr.bf16.mxu0 %v306_v51 }
  0x1c   :  { %309 = vmatpush3.bf16.msra.mxu0 %v306_v51 }
  0x1d   :  { %311 = vmatprep.subr.bf16.mxu0 %v310_v56 }
  0x20   :  { %313 = vmatpush3.bf16.msra.mxu0 %v310_v56 }
  0x21   :  { %315 = vmatprep.subr.bf16.mxu0 %v314_v59 }
  0x24   :  { %317 = vmatpush3.bf16.msra.mxu0 %v314_v59 }
  0x27   :  { %284 = vmatmul.mubr.f32.vlgmr.msra.gmra.mrb[0].mxu0 %v85_v60 }
  0x86   :  { %v91_v61 = vpop.permute.xlu0 %90 }
  0x8a   :  { %v96_v62 = vpop.permute.xlu0 %95 }
  0xfa   :  { %v285_v63 = vpop.f32.mrb[0].mxu0 }
  0xfb   :  { %v170_v0 = vadd.f32 %v285_v63, %v96_v62  ;;  %v164_v1 = vpop.f32.mrb[1].mxu0 }
  0xfc   :  { %v165_v2 = vadd.f32 %v164_v1, %v91_v61 }
  0xfd   :  { %179 = vadd.xlane.f32.xlu1 %v170_v0  ;;  %v184_v4 = vmul.f32 %v170_v0, %v170_v0 }
  0xfe   :  { %v183_v3 = vmul.f32 %v165_v2, %v165_v2 }
 0x100   :  { %185 = vadd.xlane.f32.xlu0 %v183_v3 }
 0x101   :  { %177 = vadd.xlane.f32.xlu1 %v165_v2 }
 0x105   :  { %187 = vadd.xlane.f32.xlu1 %v184_v4 }
 0x116   :  { %205 = vperm.xlu1 %320, %v173_v5  }
 0x11a   :  { %210 = vperm.xlu1 %320, %v174_v6  }
 0x11e   :  { %217 = vperm.xlu1 %320, %v175_v7  }
 0x122   :  { %222 = vperm.xlu1 %320, %v176_v8  }
 0x18a   :  { %v180_v9 = vpop.xlane.xlu1 %179 }
 0x18b   :  { %v182_v12 = vmul.f32 0.0078125, %v180_v9 }
 0x18d   :  { %v186_v10 = vpop.xlane.xlu0 %185  ;;  %v192_v17 = vmul.f32 %v182_v12, %v182_v12  ;;  %v196_v28 = vsub.f32 %v170_v0, %v182_v12 }
 0x18e   :  { %v178_v11 = vpop.xlane.xlu1 %177  ;;  %v189_v14 = vmul.f32 0.0078125, %v186_v10 }
 0x18f   :  { %v181_v13 = vmul.f32 0.0078125, %v178_v11 }
 0x191   :  { %v191_v15 = vmul.f32 %v181_v13, %v181_v13  ;;  %v195_v25 = vsub.f32 %v165_v2, %v181_v13 }
 0x192   :  { %v188_v16 = vpop.xlane.xlu1 %187 }
 0x193   :  { %v193_v18 = vsub.f32 %v189_v14, %v191_v15  ;;  %v190_v19 = vmul.f32 0.0078125, %v188_v16 }
 0x195   :  { %v197_v20 = vadd.f32 1e-05, %v193_v18  ;;  %v194_v21 = vsub.f32 %v190_v19, %v192_v17 }
 0x196   :  { %v206_v22 = vpop.permute.xlu1 %205 }
 0x197   :  { %321 = vrsqrt.f32 %v197_v20  ;;  %v198_v23 = vadd.f32 1e-05, %v194_v21 }
 0x199   :  { %323 = vrsqrt.f32 %v198_v23 }
 0x19a   :  { %v211_v24 = vpop.permute.xlu1 %210 }
 0x19e   :  { %v218_v27 = vpop.permute.xlu1 %217 }
 0x1a1   :  { %v322_v26 = vpop.eup %321 }
 0x1a2   :  { %v201_v29 = vmul.f32 %v322_v26, %v195_v25  ;;  %v223_v35 = vpop.permute.xlu1 %222 }
 0x1a3   :  { %v324_v30 = vpop.eup %323 }
 0x1a4   :  { %v213_v31 = vmul.f32 %v206_v22, %v201_v29  ;;  %v202_v32 = vmul.f32 %v324_v30, %v196_v28 }
 0x1a6   :  { %v214_v33 = vmul.f32 %v211_v24, %v202_v32  ;;  %v225_v34 = vadd.f32 %v218_v27, %v213_v31 }
 0x1a8   :  { %227 = vst [vmem:[%s442_s5] sm:$0xff] %v225_v34  ;;  %v226_v36 = vadd.f32 %v223_v35, %v214_v33 }
 0x1aa   :  { %228 = vst [vmem:[%s442_s5 + $0x8] sm:$0xff] %v226_v36 }

// kernel: unet_forward.10
= control target key start
LH: loop header
LB: loop body
LE: loop exit
PB: predicated region body
PF: predicated region fallthrough
CT: control target
= control target key end

     0   :  { %vm272_vm2 = vcmask 130048   ;;  %vm3271_vm3 = vcmask 261120   ;;  %vm4214_vm8 = vcmask 64512   ;;  %s13680_s5 = inlined_call_operand.vmem [shape: f32[16,128,32], index: 5, kind: input, shape index: {}]   ;;  %s13681_s0 = inlined_call_operand.vmem [shape: f32[16,128], index: 0, kind: input, shape index: {}]   ;;  %s13682_s1 = inlined_call_operand.vmem [shape: f32[16,32,16], index: 1, kind: input, shape index: {}]   ;;  %s13683_s2 = inlined_call_operand.vmem [shape: f32[32,1], index: 2, kind: input, shape index: {}]   ;;  %s13684_s3 = inlined_call_operand.vmem [shape: f32[32,1], index: 3, kind: input, shape index: {}]   ;;  %s13685_s4 = inlined_call_operand.vmem [shape: f32[32,1], index: 4, kind: input, shape index: {}]   ;;  %s13686_s7 = inlined_call_operand.vmem [shape: f32[32,1], index: 7, kind: input, shape index: {}]   ;;  %s13687_s8 = inlined_call_operand.vmem [shape: f32[32,1], index: 8, kind: input, shape index: {}]   ;;  %s13688_s9 = inlined_call_operand.vmem [shape: f32[32,1], index: 9, kind: input, shape index: {}]   ;;  %s13689_s10 = inlined_call_operand.vmem [shape: f32[4,32,8], index: 10, kind: input, shape index: {}]   ;;  %s13690_s6 = inlined_call_operand.vmem [shape: f32[4,32,32], index: 6, kind: input, shape index: {}]   ;;  %s13691_s12 = inlined_call_operand.vmem [shape: f32[32,1], index: 12, kind: input, shape index: {}]   ;;  %s13692_s13 = inlined_call_operand.vmem [shape: f32[32,1], index: 13, kind: input, shape index: {}]   ;;  %s13693_s14 = inlined_call_operand.vmem [shape: f32[32,1], index: 14, kind: input, shape index: {}]   ;;  %s13694_s15 = inlined_call_operand.vmem [shape: f32[8,32], index: 15, kind: input, shape index: {}]   ;;  %s13695_s11 = inlined_call_operand.vmem [shape: f32[32,32], index: 11, kind: input, shape index: {}]   ;;  %s13696_s20 = inlined_call_operand.vmem [shape: f32[9,32,128], index: 20, kind: input, shape index: {}]   ;;  %s13697_s16 = inlined_call_operand.vmem [shape: f32[9,16,64], index: 16, kind: input, shape index: {}]   ;;  %s13698_s17 = inlined_call_operand.vmem [shape: f32[16,1], index: 17, kind: input, shape index: {}]   ;;  %s13699_s18 = inlined_call_operand.vmem [shape: f32[16,1], index: 18, kind: input, shape index: {}]   ;;  %s13700_s19 = inlined_call_operand.vmem [shape: f32[16,1], index: 19, kind: input, shape index: {}]   ;;  %s13701_s21 = inlined_call_operand.vmem [shape: f32[16,128], index: 21, kind: output, shape index: {}]  }
   0x1   :  { %13708 = sst [smem:[#allocation2_spill]] %s13680_s5 }
   0x2   :  { %13709 = sst [smem:[#allocation3_spill]] %s13681_s0  ;;  %s13714_s26 = sld [smem:[#allocation2_spill]] }
   0x3   :  { %13710 = sst [smem:[#allocation4_spill]] %s13682_s1  ;;  %s13715_s27 = sld [smem:[#allocation3_spill]] }
   0x4   :  { %13711 = sst [smem:[#allocation5_spill]] %s13683_s2  ;;  %s13716_s5 = sld [smem:[#allocation4_spill]] }
   0x5   :  { %13712 = sst [smem:[#allocation6_spill]] %s13684_s3  ;;  %s13717_s24 = sld [smem:[#allocation5_spill]] }
   0x6   :  { %13713 = sst [smem:[#allocation7_spill]] %s13685_s4  ;;  %s13718_s30 = sld [smem:[#allocation6_spill]] }
   0x7   :  { %s13719_s25 = sld [smem:[#allocation7_spill]]  ;;  %s11556_s2 = smov 96  }
   0x8   :  { %v7880_v0 = vld [vmem:[%s13714_s26 + $0x80] sm:$0xff]  ;;  %v7881_v1 = vld [vmem:[%s13714_s26 + $0x88] sm:$0xff]  ;;  %v7882_v2 = vld [vmem:[%s13714_s26 + $0x90] sm:$0xff] }
   0x9   :  { %v10513_v3 = vpack.c.bf16 %v7881_v1, %v7880_v0  ;;  %v7883_v4 = vld [vmem:[%s13714_s26 + $0x98] sm:$0xff]  ;;  %v7884_v6 = vld [vmem:[%s13714_s26 + $0xa0] sm:$0xff]  ;;  %v7885_v7 = vld [vmem:[%s13714_s26 + $0xa8] sm:$0xff] }
   0xa   :  { %v10517_v5 = vpack.c.bf16 %v7883_v4, %v7882_v2  ;;  %v80_v8 = vld [vmem:[%s13714_s26] sm:$0xff]  ;;  %v81_v9 = vld [vmem:[%s13714_s26 + $0x8] sm:$0xff]  ;;  %v10521_v10 = vpack.c.bf16 %v7885_v7, %v7884_v6  ;;  %v82_v12 = vld [vmem:[%s13714_s26 + $0x10] sm:$0xff] }
   0xb   :  { %10514 = vmatprep.subr.bf16.mxu1 %v10513_v3  ;;  %v10481_v11 = vpack.c.bf16 %v81_v9, %v80_v8  ;;  %v83_v13 = vld [vmem:[%s13714_s26 + $0x18] sm:$0xff]  ;;  %v7886_v14 = vld [vmem:[%s13714_s26 + $0xb0] sm:$0xff]  ;;  %v84_v17 = vld [vmem:[%s13714_s26 + $0x20] sm:$0xff] }
   0xc   :  { %10516 = vmatpush3.bf16.msra.mxu1 %v10513_v3  ;;  %v7887_v15 = vld [vmem:[%s13714_s26 + $0xb8] sm:$0xff]  ;;  %v10485_v16 = vpack.c.bf16 %v83_v13, %v82_v12  ;;  %v85_v18 = vld [vmem:[%s13714_s26 + $0x28] sm:$0xff]  ;;  %v68_v19 = vld [vmem:[%s13715_s27] sm:$0xff] }
   0xd   :  { %10518 = vmatprep.subr.bf16.mxu1 %v10517_v5  ;;  %10482 = vmatprep.subr.bf16.mxu0 %v10481_v11  ;;  %vm70_vm0 = vcmp.ge.f32.partialorder %v68_v19, 0.0  ;;  %v72_v20 = vmul.f32 0.2, %v68_v19  ;;  %v10525_v21 = vpack.c.bf16 %v7887_v15, %v7886_v14  ;;  %v7888_v22 = vld [vmem:[%s13714_s26 + $0xc0] sm:$0xff]  ;;  %v10489_v23 = vpack.c.bf16 %v85_v18, %v84_v17  ;;  %v7889_v24 = vld [vmem:[%s13714_s26 + $0xc8] sm:$0xff]  ;;  %v86_v26 = vld [vmem:[%s13714_s26 + $0x30] sm:$0xff] }
   0xe   :  { %10484 = vmatpush3.bf16.msra.mxu0 %v10481_v11  ;;  %v87_v27 = vld [vmem:[%s13714_s26 + $0x38] sm:$0xff]  ;;  %v10529_v28 = vpack.c.bf16 %v7889_v24, %v7888_v22  ;;  %v7890_v29 = vld [vmem:[%s13714_s26 + $0xd0] sm:$0xff]  ;;  %v88_v32 = vld [vmem:[%s13714_s26 + $0x40] sm:$0xff] }
   0xf   :  { %10486 = vmatprep.subr.bf16.mxu0 %v10485_v16  ;;  %v11718_v25 = vsel %vm70_vm0, %v68_v19, %v72_v20  ;;  %v10493_v30 = vpack.c.bf16 %v87_v27, %v86_v26  ;;  %v7891_v31 = vld [vmem:[%s13714_s26 + $0xd8] sm:$0xff]  ;;  %v89_v33 = vld [vmem:[%s13714_s26 + $0x48] sm:$0xff]  ;;  %v7892_v35 = vld [vmem:[%s13714_s26 + $0xe0] sm:$0xff] }
  0x10   :  { %10520 = vmatpush3.bf16.msra.mxu1 %v10517_v5  ;;  %9244 = vmatprep.mubr.f32.mxu1 %v11718_v25  ;;  %v10533_v34 = vpack.c.bf16 %v7891_v31, %v7890_v29  ;;  %v10497_v36 = vpack.c.bf16 %v89_v33, %v88_v32  ;;  %v7893_v37 = vld [vmem:[%s13714_s26 + $0xe8] sm:$0xff]  ;;  %v90_v38 = vld [vmem:[%s13714_s26 + $0x50] sm:$0xff]  ;;  %v91_v39 = vld [vmem:[%s13714_s26 + $0x58] sm:$0xff] }
  0x11   :  { %10522 = vmatprep.subr.bf16.mxu1 %v10521_v10  ;;  %9209 = vmatprep.mubr.f32.mxu0 %v11718_v25  ;;  %v10537_v40 = vpack.c.bf16 %v7893_v37, %v7892_v35  ;;  %v7894_v41 = vld [vmem:[%s13714_s26 + $0xf0] sm:$0xff]  ;;  %v10501_v42 = vpack.c.bf16 %v91_v39, %v90_v38  ;;  %v7895_v43 = vld [vmem:[%s13714_s26 + $0xf8] sm:$0xff]  ;;  %v92_v44 = vld [vmem:[%s13714_s26 + $0x60] sm:$0xff] }
  0x12   :  { %10488 = vmatpush3.bf16.msra.mxu0 %v10485_v16  ;;  %v93_v45 = vld [vmem:[%s13714_s26 + $0x68] sm:$0xff]  ;;  %v10541_v46 = vpack.c.bf16 %v7895_v43, %v7894_v41  ;;  %v7908_v48 = vld [vmem:[%s13714_s26 + $0x100] sm:$0xff]  ;;  %v94_v51 = vld [vmem:[%s13714_s26 + $0x70] sm:$0xff] }
  0x13   :  { %10490 = vmatprep.subr.bf16.mxu0 %v10489_v23  ;;  %v69_v47 = vld [vmem:[%s13715_s27 + $0x8] sm:$0xff]  ;;  %v10505_v49 = vpack.c.bf16 %v93_v45, %v92_v44  ;;  %v95_v52 = vld [vmem:[%s13714_s26 + $0x78] sm:$0xff]  ;;  %v7910_v56 = vld [vmem:[%s13714_s26 + $0x110] sm:$0xff] }
  0x14   :  { %10524 = vmatpush3.bf16.msra.mxu1 %v10521_v10  ;;  %v7909_v50 = vld [vmem:[%s13714_s26 + $0x108] sm:$0xff]  ;;  %v73_v53 = vmul.f32 0.2, %v69_v47  ;;  %vm71_vm1 = vcmp.ge.f32.partialorder %v69_v47, 0.0  ;;  %v10509_v55 = vpack.c.bf16 %v95_v52, %v94_v51  ;;  %v7911_v57 = vld [vmem:[%s13714_s26 + $0x118] sm:$0xff]  ;;  %v7912_v60 = vld [vmem:[%s13714_s26 + $0x120] sm:$0xff] }
  0x15   :  { %10526 = vmatprep.subr.bf16.mxu1 %v10525_v21  ;;  %v10553_v54 = vpack.c.bf16 %v7909_v50, %v7908_v48  ;;  %v10557_v59 = vpack.c.bf16 %v7911_v57, %v7910_v56  ;;  %v7913_v61 = vld [vmem:[%s13714_s26 + $0x128] sm:$0xff]  ;;  %v7914_v63 = vld [vmem:[%s13714_s26 + $0x130] sm:$0xff]  ;;  %v7915_v0 = vld [vmem:[%s13714_s26 + $0x138] sm:$0xff] }
  0x16   :  { %10492 = vmatpush3.bf16.msra.mxu0 %v10489_v23  ;;  %v11785_v58 = vsel %vm71_vm1, %v69_v47, %v73_v53  ;;  %v10561_v62 = vpack.c.bf16 %v7913_v61, %v7912_v60  ;;  %v10565_v1 = vpack.c.bf16 %v7915_v0, %v7914_v63  ;;  %v7916_v2 = vld [vmem:[%s13714_s26 + $0x140] sm:$0xff]  ;;  %v7917_v3 = vld [vmem:[%s13714_s26 + $0x148] sm:$0xff]  ;;  %v7918_v5 = vld [vmem:[%s13714_s26 + $0x150] sm:$0xff] }
  0x17   :  { %10494 = vmatprep.subr.bf16.mxu0 %v10493_v30  ;;  %v10569_v4 = vpack.c.bf16 %v7917_v3, %v7916_v2  ;;  %v7919_v6 = vld [vmem:[%s13714_s26 + $0x158] sm:$0xff]  ;;  %v7920_v8 = vld [vmem:[%s13714_s26 + $0x160] sm:$0xff]  ;;  %v7921_v9 = vld [vmem:[%s13714_s26 + $0x168] sm:$0xff] }
  0x18   :  { %10528 = vmatpush3.bf16.msra.mxu1 %v10525_v21  ;;  %v10573_v7 = vpack.c.bf16 %v7919_v6, %v7918_v5  ;;  %v10577_v10 = vpack.c.bf16 %v7921_v9, %v7920_v8  ;;  %v7922_v11 = vld [vmem:[%s13714_s26 + $0x170] sm:$0xff]  ;;  %v7923_v12 = vld [vmem:[%s13714_s26 + $0x178] sm:$0xff]  ;;  %v7896_v14 = vld [vmem:[%s13716_s5 + $0x20] sm:$0xff] }
  0x19   :  { %10530 = vmatprep.subr.bf16.mxu1 %v10529_v28  ;;  %v10581_v13 = vpack.c.bf16 %v7923_v12, %v7922_v11  ;;  %v7956_v15 = vld [vmem:[%s13714_s26 + $0x200] sm:$0xff]  ;;  %v7957_v16 = vld [vmem:[%s13714_s26 + $0x208] sm:$0xff]  ;;  %v7958_v18 = vld [vmem:[%s13714_s26 + $0x210] sm:$0xff] }
  0x1a   :  { %10496 = vmatpush3.bf16.msra.mxu0 %v10493_v30  ;;  %v10625_v17 = vpack.c.bf16 %v7957_v16, %v7956_v15  ;;  %v7959_v19 = vld [vmem:[%s13714_s26 + $0x218] sm:$0xff]  ;;  %v7960_v21 = vld [vmem:[%s13714_s26 + $0x220] sm:$0xff]  ;;  %v7961_v22 = vld [vmem:[%s13714_s26 + $0x228] sm:$0xff] }
  0x1b   :  { %10498 = vmatprep.subr.bf16.mxu0 %v10497_v36  ;;  %v10629_v20 = vpack.c.bf16 %v7959_v19, %v7958_v18  ;;  %v10633_v23 = vpack.c.bf16 %v7961_v22, %v7960_v21  ;;  %v7962_v24 = vld [vmem:[%s13714_s26 + $0x230] sm:$0xff]  ;;  %v7963_v26 = vld [vmem:[%s13714_s26 + $0x238] sm:$0xff]  ;;  %v7965_v29 = vld [vmem:[%s13714_s26 + $0x248] sm:$0xff] }
  0x1c   :  { %10532 = vmatpush3.bf16.msra.mxu1 %v10529_v28  ;;  %v10637_v27 = vpack.c.bf16 %v7963_v26, %v7962_v24  ;;  %v7964_v28 = vld [vmem:[%s13714_s26 + $0x240] sm:$0xff]  ;;  %v7966_v31 = vld [vmem:[%s13714_s26 + $0x250] sm:$0xff]  ;;  %v7967_v32 = vld [vmem:[%s13714_s26 + $0x258] sm:$0xff] }
  0x1d   :  { %10534 = vmatprep.subr.bf16.mxu1 %v10533_v34  ;;  %v10641_v30 = vpack.c.bf16 %v7965_v29, %v7964_v28  ;;  %v10645_v33 = vpack.c.bf16 %v7967_v32, %v7966_v31  ;;  %v7969_v35 = vld [vmem:[%s13714_s26 + $0x268] sm:$0xff]  ;;  %v7970_v37 = vld [vmem:[%s13714_s26 + $0x270] sm:$0xff]  ;;  %v7971_v38 = vld [vmem:[%s13714_s26 + $0x278] sm:$0xff] }
  0x1e   :  { %10500 = vmatpush3.bf16.msra.mxu0 %v10497_v36  ;;  %v10653_v39 = vpack.c.bf16 %v7971_v38, %v7970_v37  ;;  %v8005_v41 = vld [vmem:[%s13714_s26 + $0x308] sm:$0xff]  ;;  %v7898_v50 = vld [vmem:[%s13716_s5 + $0x30] sm:$0xff]  ;;  %v7899_v51 = vld [vmem:[%s13716_s5 + $0x38] sm:$0xff] }
  0x1f   :  { %10502 = vmatprep.subr.bf16.mxu0 %v10501_v42  ;;  %v7897_v48 = vld [vmem:[%s13716_s5 + $0x28] sm:$0xff]  ;;  %v96_v52 = vld [vmem:[%s13716_s5] sm:$0xff]  ;;  %v7934_v0 = vld [vmem:[%s13714_s26 + $0x190] sm:$0xff] }
  0x20   :  { %10536 = vmatpush3.bf16.msra.mxu1 %v10533_v34  ;;  %v7968_v34 = vld [vmem:[%s13714_s26 + $0x260] sm:$0xff]  ;;  %v97_v53 = vld [vmem:[%s13716_s5 + $0x8] sm:$0xff]  ;;  %v7938_v9 = vld [vmem:[%s13714_s26 + $0x1b0] sm:$0xff] }
  0x21   :  { %10538 = vmatprep.subr.bf16.mxu1 %v10537_v40  ;;  %v10649_v36 = vpack.c.bf16 %v7969_v35, %v7968_v34  ;;  %v7924_v56 = vld [vmem:[%s13716_s5 + $0x40] sm:$0xff]  ;;  %v7925_v2 = vld [vmem:[%s13716_s5 + $0x48] sm:$0xff]  ;;  %v7942_v15 = vld [vmem:[%s13714_s26 + $0x1d0] sm:$0xff] }
  0x22   :  { %10504 = vmatpush3.bf16.msra.mxu0 %v10501_v42  ;;  %v7932_v57 = vld [vmem:[%s13714_s26 + $0x180] sm:$0xff]  ;;  %v7937_v6 = vld [vmem:[%s13714_s26 + $0x1a8] sm:$0xff]  ;;  %v7943_v16 = vld [vmem:[%s13714_s26 + $0x1d8] sm:$0xff] }
  0x23   :  { %10506 = vmatprep.subr.bf16.mxu0 %v10505_v49  ;;  %v7936_v5 = vld [vmem:[%s13714_s26 + $0x1a0] sm:$0xff]  ;;  %v7945_v19 = vld [vmem:[%s13714_s26 + $0x1e8] sm:$0xff]  ;;  %v7946_v21 = vld [vmem:[%s13714_s26 + $0x1f0] sm:$0xff] }
  0x24   :  { %10540 = vmatpush3.bf16.msra.mxu1 %v10537_v40  ;;  %v8004_v40 = vld [vmem:[%s13714_s26 + $0x300] sm:$0xff]  ;;  %v10597_v8 = vpack.c.bf16 %v7937_v6, %v7936_v5  ;;  %v7947_v22 = vld [vmem:[%s13714_s26 + $0x1f8] sm:$0xff]  ;;  %v8006_v24 = vld [vmem:[%s13714_s26 + $0x310] sm:$0xff] }
  0x25   :  { %10542 = vmatprep.subr.bf16.mxu1 %v10541_v46  ;;  %v10697_v42 = vpack.c.bf16 %v8005_v41, %v8004_v40  ;;  %v7940_v12 = vld [vmem:[%s13714_s26 + $0x1c0] sm:$0xff]  ;;  %v8007_v26 = vld [vmem:[%s13714_s26 + $0x318] sm:$0xff]  ;;  %v8009_v29 = vld [vmem:[%s13714_s26 + $0x328] sm:$0xff] }
  0x26   :  { %10508 = vmatpush3.bf16.msra.mxu0 %v10505_v49  ;;  %v7944_v18 = vld [vmem:[%s13714_s26 + $0x1e0] sm:$0xff]  ;;  %v8011_v35 = vld [vmem:[%s13714_s26 + $0x338] sm:$0xff]  ;;  %v8014_v41 = vld [vmem:[%s13714_s26 + $0x350] sm:$0xff] }
  0x27   :  { %10510 = vmatprep.subr.bf16.mxu0 %v10509_v55  ;;  %v8008_v28 = vld [vmem:[%s13714_s26 + $0x320] sm:$0xff]  ;;  %v8041_v6 = vld [vmem:[%s13714_s26 + $0x3e8] sm:$0xff] }
  0x28   :  { %10544 = vmatpush3.bf16.msra.mxu1 %v10541_v46  ;;  %v7948_v32 = vld [vmem:[%s13716_s5 + $0x60] sm:$0xff] }
  0x29   :  { %10554 = vmatprep.subr.bf16.mxu1 %v10553_v54  ;;  %v8012_v38 = vld [vmem:[%s13714_s26 + $0x340] sm:$0xff] }
  0x2a   :  { %10512 = vmatpush3.bf16.msra.mxu0 %v10509_v55  ;;  %v99_v55 = vld [vmem:[%s13716_s5 + $0x18] sm:$0xff]  ;;  %v8040_v5 = vld [vmem:[%s13714_s26 + $0x3e0] sm:$0xff] }
  0x2b   :  { %9245 = vmatmul.mubr.f32.vlgmr.msra.gmra.mrb[0].mxu1 %v11785_v58 }
  0x2c   :  { %10556 = vmatpush3.bf16.msra.mxu1 %v10553_v54  ;;  %9299 = vmatprep.mubr.f32.mxu1 %v11718_v25  ;;  %v98_v54 = vld [vmem:[%s13716_s5 + $0x10] sm:$0xff] }
  0x2d   :  { %10558 = vmatprep.subr.bf16.mxu1 %v10557_v59  ;;  %9210 = vmatmul.mubr.f32.vlgmr.msra.gmra.mrb[0].mxu0 %v11785_v58 }
  0x2e   :  { %9251 = vmatprep.mubr.msk.f32.mxu0 %vm272_vm2, %v7896_v14 }
  0x30   :  { %10560 = vmatpush3.bf16.msra.mxu1 %v10557_v59  ;;  %v7933_v59 = vld [vmem:[%s13714_s26 + $0x188] sm:$0xff] }
  0x31   :  { %10562 = vmatprep.subr.bf16.mxu1 %v10561_v62  ;;  %v10589_v63 = vpack.c.bf16 %v7933_v59, %v7932_v57  ;;  %v8033_v57 = vld [vmem:[%s13714_s26 + $0x3a8] sm:$0xff] }
  0x34   :  { %10564 = vmatpush3.bf16.msra.mxu1 %v10561_v62 }
  0x35   :  { %10566 = vmatprep.subr.bf16.mxu1 %v10565_v1 }
  0x38   :  { %10568 = vmatpush3.bf16.msra.mxu1 %v10565_v1  ;;  %v7935_v1 = vld [vmem:[%s13714_s26 + $0x198] sm:$0xff] }
  0x39   :  { %10570 = vmatprep.subr.bf16.mxu1 %v10569_v4  ;;  %v10593_v3 = vpack.c.bf16 %v7935_v1, %v7934_v0  ;;  %v8037_v0 = vld [vmem:[%s13714_s26 + $0x3c8] sm:$0xff] }
  0x3c   :  { %10572 = vmatpush3.bf16.msra.mxu1 %v10569_v4  ;;  %v7926_v4 = vld [vmem:[%s13716_s5 + $0x50] sm:$0xff] }
  0x3d   :  { %10574 = vmatprep.subr.bf16.mxu1 %v10573_v7 }
  0x40   :  { %10576 = vmatpush3.bf16.msra.mxu1 %v10573_v7  ;;  %v7927_v7 = vld [vmem:[%s13716_s5 + $0x58] sm:$0xff] }
  0x41   :  { %10578 = vmatprep.subr.bf16.mxu1 %v10577_v10 }
  0x44   :  { %10580 = vmatpush3.bf16.msra.mxu1 %v10577_v10  ;;  %v7939_v10 = vld [vmem:[%s13714_s26 + $0x1b8] sm:$0xff] }
  0x45   :  { %10582 = vmatprep.subr.bf16.mxu1 %v10581_v13  ;;  %v10601_v11 = vpack.c.bf16 %v7939_v10, %v7938_v9  ;;  %v8043_v9 = vld [vmem:[%s13714_s26 + $0x3f8] sm:$0xff] }
  0x48   :  { %10584 = vmatpush3.bf16.msra.mxu1 %v10581_v13  ;;  %v7941_v13 = vld [vmem:[%s13714_s26 + $0x1c8] sm:$0xff] }
  0x49   :  { %10626 = vmatprep.subr.bf16.mxu1 %v10625_v17  ;;  %v10605_v14 = vpack.c.bf16 %v7941_v13, %v7940_v12 }
  0x4b   :  { %9300 = vmatmul.mubr.f32.vlgmr.msra.gmra.mrb[2].mxu1 %v11785_v58 }
  0x4c   :  { %9389 = vmatprep.mubr.f32.mxu1 %v11718_v25  ;;  %10628 = vmatpush3.bf16.msra.mxu1 %v10625_v17  ;;  %v10609_v17 = vpack.c.bf16 %v7943_v16, %v7942_v15  ;;  %v7981_v15 = vld [vmem:[%s13714_s26 + $0x288] sm:$0xff] }
  0x4d   :  { %10630 = vmatprep.subr.bf16.mxu1 %v10629_v20  ;;  %v7949_v16 = vld [vmem:[%s13716_s5 + $0x68] sm:$0xff] }
  0x50   :  { %10632 = vmatpush3.bf16.msra.mxu1 %v10629_v20  ;;  %v10613_v20 = vpack.c.bf16 %v7945_v19, %v7944_v18  ;;  %v7951_v19 = vld [vmem:[%s13716_s5 + $0x78] sm:$0xff] }
  0x51   :  { %10634 = vmatprep.subr.bf16.mxu1 %v10633_v23 }
  0x54   :  { %10636 = vmatpush3.bf16.msra.mxu1 %v10633_v23  ;;  %v10617_v23 = vpack.c.bf16 %v7947_v22, %v7946_v21  ;;  %v7982_v21 = vld [vmem:[%s13714_s26 + $0x290] sm:$0xff]  ;;  %v7983_v22 = vld [vmem:[%s13714_s26 + $0x298] sm:$0xff] }
  0x55   :  { %10638 = vmatprep.subr.bf16.mxu1 %v10637_v27 }
  0x58   :  { %10640 = vmatpush3.bf16.msra.mxu1 %v10637_v27  ;;  %v10701_v27 = vpack.c.bf16 %v8007_v26, %v8006_v24  ;;  %v10665_v24 = vpack.c.bf16 %v7983_v22, %v7982_v21  ;;  %v7974_v26 = vld [vmem:[%s13716_s5 + $0x90] sm:$0xff]  ;;  %v7999_v22 = vld [vmem:[%s13716_s5 + $0xb8] sm:$0xff] }
  0x59   :  { %10642 = vmatprep.subr.bf16.mxu1 %v10641_v30  ;;  %v7998_v21 = vld [vmem:[%s13716_s5 + $0xb0] sm:$0xff] }
  0x5c   :  { %10644 = vmatpush3.bf16.msra.mxu1 %v10641_v30  ;;  %v10705_v30 = vpack.c.bf16 %v8009_v29, %v8008_v28  ;;  %v7985_v28 = vld [vmem:[%s13714_s26 + $0x2a8] sm:$0xff]  ;;  %v7975_v29 = vld [vmem:[%s13716_s5 + $0x98] sm:$0xff] }
  0x5d   :  { %10646 = vmatprep.subr.bf16.mxu1 %v10645_v33 }
  0x60   :  { %10648 = vmatpush3.bf16.msra.mxu1 %v10645_v33  ;;  %v8010_v33 = vld [vmem:[%s13714_s26 + $0x330] sm:$0xff] }
  0x61   :  { %10650 = vmatprep.subr.bf16.mxu1 %v10649_v36  ;;  %v10709_v37 = vpack.c.bf16 %v8011_v35, %v8010_v33  ;;  %v7989_v35 = vld [vmem:[%s13714_s26 + $0x2c8] sm:$0xff] }
  0x64   :  { %10652 = vmatpush3.bf16.msra.mxu1 %v10649_v36 }
  0x65   :  { %10654 = vmatprep.subr.bf16.mxu1 %v10653_v39 }
  0x68   :  { %10656 = vmatpush3.bf16.msra.mxu1 %v10653_v39  ;;  %v8013_v39 = vld [vmem:[%s13714_s26 + $0x348] sm:$0xff] }
  0x69   :  { %10698 = vmatprep.subr.bf16.mxu1 %v10697_v42  ;;  %v10713_v40 = vpack.c.bf16 %v8013_v39, %v8012_v38  ;;  %v7991_v38 = vld [vmem:[%s13714_s26 + $0x2d8] sm:$0xff] }
  0x6b   :  { %9390 = vmatmul.mubr.f32.vlgmr.msra.gmra.mrb[4].mxu1 %v11785_v58 }
  0x6c   :  { %10700 = vmatpush3.bf16.msra.mxu1 %v10697_v42  ;;  %9479 = vmatprep.mubr.f32.mxu1 %v11718_v25  ;;  %v8015_v42 = vld [vmem:[%s13714_s26 + $0x358] sm:$0xff] }
  0x6d   :  { %10702 = vmatprep.subr.bf16.mxu1 %v10701_v27 }
  0x70   :  { %10704 = vmatpush3.bf16.msra.mxu1 %v10701_v27  ;;  %v7984_v27 = vld [vmem:[%s13714_s26 + $0x2a0] sm:$0xff] }
  0x71   :  { %10706 = vmatprep.subr.bf16.mxu1 %v10705_v30 }
  0x74   :  { %10708 = vmatpush3.bf16.msra.mxu1 %v10705_v30  ;;  %v10669_v30 = vpack.c.bf16 %v7985_v28, %v7984_v27  ;;  %v8021_v27 = vld [vmem:[%s13716_s5 + $0xc8] sm:$0xff]  ;;  %v8022_v28 = vld [vmem:[%s13716_s5 + $0xd0] sm:$0xff] }
  0x75   :  { %10710 = vmatprep.subr.bf16.mxu1 %v10709_v37 }
  0x78   :  { %10712 = vmatpush3.bf16.msra.mxu1 %v10709_v37  ;;  %v7990_v37 = vld [vmem:[%s13714_s26 + $0x2d0] sm:$0xff] }
  0x79   :  { %10714 = vmatprep.subr.bf16.mxu1 %v10713_v40  ;;  %v10681_v39 = vpack.c.bf16 %v7991_v38, %v7990_v37  ;;  %v8056_v37 = vld [vmem:[%s13714_s26 + $0x420] sm:$0xff]  ;;  %v8057_v38 = vld [vmem:[%s13714_s26 + $0x428] sm:$0xff] }
  0x7c   :  { %10716 = vmatpush3.bf16.msra.mxu1 %v10713_v40  ;;  %v7992_v40 = vld [vmem:[%s13714_s26 + $0x2e0] sm:$0xff] }
  0xfe   :  { %v9246_v43 = vpop.f32.mrb[0].mxu1 }
  0xff   :  { %v263_v44 = vpop.f32.mrb[1].mxu1 }
 0x100   :  { %v10545_v45 = vpack.c.bf16 %v9246_v43, %v263_v44  ;;  %v9211_v46 = vpop.f32.mrb[0].mxu0  ;;  %v10717_v43 = vpack.c.bf16 %v8015_v42, %v8014_v41  ;;  %v8016_v44 = vld [vmem:[%s13714_s26 + $0x360] sm:$0xff]  ;;  %v7993_v41 = vld [vmem:[%s13714_s26 + $0x2e8] sm:$0xff] }
 0x101   :  { %v166_v47 = vpop.f32.mrb[1].mxu0  ;;  %v10685_v42 = vpack.c.bf16 %v7993_v41, %v7992_v40  ;;  %v10777_v40 = vpack.c.bf16 %v8057_v38, %v8056_v37  ;;  %v8058_v41 = vld [vmem:[%s13714_s26 + $0x430] sm:$0xff]  ;;  %v8160_v37 = vld [vmem:[%s13714_s26 + $0x660] sm:$0xff]  ;;  %v8161_v38 = vld [vmem:[%s13714_s26 + $0x668] sm:$0xff] }
 0x102   :  { %10546 = vmatprep.subr.bf16.mxu0 %v10545_v45  ;;  %v10549_v49 = vpack.c.bf16 %v9211_v46, %v166_v47  ;;  %10718 = vmatprep.subr.bf16.mxu1 %v10717_v43  ;;  %v8018_v47 = vld [vmem:[%s13714_s26 + $0x370] sm:$0xff] }
 0x103   :  { %10548 = vmatpush3.bf16.msra.mxu0 %v10545_v45  ;;  %10720 = vmatpush3.bf16.msra.mxu1 %v10717_v43  ;;  %v8017_v45 = vld [vmem:[%s13714_s26 + $0x368] sm:$0xff]  ;;  %v7994_v43 = vld [vmem:[%s13714_s26 + $0x2f0] sm:$0xff] }
 0x104   :  { %10550 = vmatprep.subr.bf16.mxu0 %v10549_v49  ;;  %v10721_v46 = vpack.c.bf16 %v8017_v45, %v8016_v44  ;;  %v7995_v44 = vld [vmem:[%s13714_s26 + $0x2f8] sm:$0xff] }
 0x105   :  { %v10689_v45 = vpack.c.bf16 %v7995_v44, %v7994_v43  ;;  %v8060_v44 = vld [vmem:[%s13714_s26 + $0x440] sm:$0xff] }
 0x106   :  { %9252 = vmatmul.mubr.msk.f32.vlgmr.msra.gmra.mrb[2].mxu0 %vm272_vm2, %v7897_v48  ;;  %10722 = vmatprep.subr.bf16.mxu1 %v10721_v46  ;;  %v8019_v48 = vld [vmem:[%s13714_s26 + $0x378] sm:$0xff] }
 0x107   :  { %10552 = vmatpush3.bf16.msra.mxu0 %v10549_v49  ;;  %9254 = vmatprep.mubr.msk.f32.mxu0 %vm272_vm2, %v7898_v50  ;;  %v10725_v49 = vpack.c.bf16 %v8019_v48, %v8018_v47  ;;  %v8028_v50 = vld [vmem:[%s13714_s26 + $0x380] sm:$0xff] }
 0x108   :  { %10724 = vmatpush3.bf16.msra.mxu1 %v10721_v46 }
 0x109   :  { %10726 = vmatprep.subr.bf16.mxu1 %v10725_v49 }
 0x10a   :  { %9255 = vmatmul.mubr.msk.f32.gmra.mrb[4].mxu0 %vm272_vm2, %v7899_v51  ;;  %v8029_v51 = vld [vmem:[%s13714_s26 + $0x388] sm:$0xff] }
 0x10b   :  { %9261 = vmatprep.mubr.msk.f32.mxu0 %vm272_vm2, %v96_v52  ;;  %v10733_v52 = vpack.c.bf16 %v8029_v51, %v8028_v50 }
 0x10c   :  { %10728 = vmatpush3.bf16.msra.mxu1 %v10725_v49  ;;  %v7996_v49 = vld [vmem:[%s13716_s5 + $0xa0] sm:$0xff] }
 0x10d   :  { %10734 = vmatprep.subr.bf16.mxu1 %v10733_v52 }
 0x10e   :  { %9262 = vmatmul.mubr.msk.f32.vlgmr.msra.gmra.mrb[2].mxu0 %vm272_vm2, %v97_v53  ;;  %v8030_v53 = vld [vmem:[%s13714_s26 + $0x390] sm:$0xff] }
 0x10f   :  { %9264 = vmatprep.mubr.msk.f32.mxu0 %vm272_vm2, %v98_v54  ;;  %9480 = vmatmul.mubr.f32.vlgmr.msra.gmra.mrb[6].mxu1 %v11785_v58  ;;  %v8031_v54 = vld [vmem:[%s13714_s26 + $0x398] sm:$0xff] }
 0x110   :  { %10736 = vmatpush3.bf16.msra.mxu1 %v10733_v52  ;;  %9524 = vmatprep.mubr.f32.mxu1 %v11718_v25 }
 0x112   :  { %9265 = vmatmul.mubr.msk.f32.gmra.mrb[4].mxu0 %vm272_vm2, %v99_v55  ;;  %v10737_v55 = vpack.c.bf16 %v8031_v54, %v8030_v53  ;;  %v8076_v53 = vld [vmem:[%s13714_s26 + $0x480] sm:$0xff]  ;;  %v8077_v54 = vld [vmem:[%s13714_s26 + $0x488] sm:$0xff] }
 0x113   :  { %9306 = vmatprep.mubr.msk.f32.mxu0 %vm272_vm2, %v7924_v56  ;;  %v8032_v56 = vld [vmem:[%s13714_s26 + $0x3a0] sm:$0xff] }
 0x114   :  { %10738 = vmatprep.subr.bf16.mxu1 %v10737_v55  ;;  %v10741_v59 = vpack.c.bf16 %v8033_v57, %v8032_v56  ;;  %v8078_v56 = vld [vmem:[%s13714_s26 + $0x490] sm:$0xff]  ;;  %v8079_v57 = vld [vmem:[%s13714_s26 + $0x498] sm:$0xff] }
 0x115   :  { %10740 = vmatpush3.bf16.msra.mxu1 %v10737_v55  ;;  %v10805_v55 = vpack.c.bf16 %v8077_v54, %v8076_v53  ;;  %v8066_v53 = vld [vmem:[%s13714_s26 + $0x470] sm:$0xff]  ;;  %v8067_v54 = vld [vmem:[%s13714_s26 + $0x478] sm:$0xff] }
 0x116   :  { %10742 = vmatprep.subr.bf16.mxu1 %v10741_v59 }
 0x119   :  { %10744 = vmatpush3.bf16.msra.mxu1 %v10741_v59  ;;  %v10809_v59 = vpack.c.bf16 %v8079_v57, %v8078_v56  ;;  %v8126_v56 = vld [vmem:[%s13714_s26 + $0x590] sm:$0xff]  ;;  %v8127_v57 = vld [vmem:[%s13714_s26 + $0x598] sm:$0xff] }
 0x11e   :  { %v9301_v60 = vpop.f32.mrb[2].mxu1 }
 0x11f   :  { %v555_v61 = vpop.f32.mrb[3].mxu1 }
 0x120   :  { %v10585_v62 = vpack.c.bf16 %v9301_v60, %v555_v61  ;;  %v8034_v60 = vld [vmem:[%s13714_s26 + $0x3b0] sm:$0xff]  ;;  %v8035_v61 = vld [vmem:[%s13714_s26 + $0x3b8] sm:$0xff] }
 0x122   :  { %10586 = vmatprep.subr.bf16.mxu0 %v10585_v62 }
 0x123   :  { %10588 = vmatpush3.bf16.msra.mxu0 %v10585_v62  ;;  %v10745_v62 = vpack.c.bf16 %v8035_v61, %v8034_v60  ;;  %v8080_v60 = vld [vmem:[%s13714_s26 + $0x4a0] sm:$0xff]  ;;  %v8081_v61 = vld [vmem:[%s13714_s26 + $0x4a8] sm:$0xff] }
 0x124   :  { %10590 = vmatprep.subr.bf16.mxu0 %v10589_v63 }
 0x125   :  { %10746 = vmatprep.subr.bf16.mxu1 %v10745_v62 }
 0x126   :  { %9307 = vmatmul.mubr.msk.f32.vlgmr.msra.gmra.mrb[2].mxu0 %vm272_vm2, %v7925_v2  ;;  %10748 = vmatpush3.bf16.msra.mxu1 %v10745_v62  ;;  %v8038_v2 = vld [vmem:[%s13714_s26 + $0x3d0] sm:$0xff]  ;;  %v10813_v62 = vpack.c.bf16 %v8081_v61, %v8080_v60  ;;  %v8128_v60 = vld [vmem:[%s13714_s26 + $0x5a0] sm:$0xff]  ;;  %v8129_v61 = vld [vmem:[%s13714_s26 + $0x5a8] sm:$0xff] }
 0x127   :  { %10592 = vmatpush3.bf16.msra.mxu0 %v10589_v63  ;;  %9309 = vmatprep.mubr.msk.f32.mxu0 %vm272_vm2, %v7926_v4  ;;  %v8036_v63 = vld [vmem:[%s13714_s26 + $0x3c0] sm:$0xff] }
 0x128   :  { %10594 = vmatprep.subr.bf16.mxu0 %v10593_v3  ;;  %v10749_v1 = vpack.c.bf16 %v8037_v0, %v8036_v63  ;;  %v8082_v63 = vld [vmem:[%s13714_s26 + $0x4b0] sm:$0xff]  ;;  %v8083_v0 = vld [vmem:[%s13714_s26 + $0x4b8] sm:$0xff] }
 0x12a   :  { %9310 = vmatmul.mubr.msk.f32.gmra.mrb[4].mxu0 %vm272_vm2, %v7927_v7  ;;  %10750 = vmatprep.subr.bf16.mxu1 %v10749_v1  ;;  %v8042_v7 = vld [vmem:[%s13714_s26 + $0x3f0] sm:$0xff] }
 0x12b   :  { %10596 = vmatpush3.bf16.msra.mxu0 %v10593_v3  ;;  %9344 = vmatprep.mubr.f32.mxu0 %v11718_v25  ;;  %v8039_v3 = vld [vmem:[%s13714_s26 + $0x3d8] sm:$0xff]  ;;  %v10761_v10 = vpack.c.bf16 %v8043_v9, %v8042_v7  ;;  %v8089_v9 = vld [vmem:[%s13714_s26 + $0x4e8] sm:$0xff] }
 0x12c   :  { %10598 = vmatprep.subr.bf16.mxu0 %v10597_v8  ;;  %10752 = vmatpush3.bf16.msra.mxu1 %v10749_v1  ;;  %v10753_v4 = vpack.c.bf16 %v8039_v3, %v8038_v2  ;;  %v10817_v1 = vpack.c.bf16 %v8083_v0, %v8082_v63  ;;  %v8084_v2 = vld [vmem:[%s13714_s26 + $0x4c0] sm:$0xff]  ;;  %v8085_v3 = vld [vmem:[%s13714_s26 + $0x4c8] sm:$0xff] }
 0x12d   :  { %v8068_v0 = vld [vmem:[%s13716_s5 + $0x100] sm:$0xff] }
 0x12e   :  { %10754 = vmatprep.subr.bf16.mxu1 %v10753_v4 }
 0x12f   :  { %10600 = vmatpush3.bf16.msra.mxu0 %v10597_v8  ;;  %v10757_v8 = vpack.c.bf16 %v8041_v6, %v8040_v5  ;;  %v8086_v5 = vld [vmem:[%s13714_s26 + $0x4d0] sm:$0xff]  ;;  %v8087_v6 = vld [vmem:[%s13714_s26 + $0x4d8] sm:$0xff] }
 0x130   :  { %10602 = vmatprep.subr.bf16.mxu0 %v10601_v11  ;;  %10756 = vmatpush3.bf16.msra.mxu1 %v10753_v4  ;;  %v10821_v4 = vpack.c.bf16 %v8085_v3, %v8084_v2  ;;  %v10825_v7 = vpack.c.bf16 %v8087_v6, %v8086_v5  ;;  %v8131_v3 = vld [vmem:[%s13714_s26 + $0x5b8] sm:$0xff]  ;;  %v8132_v6 = vld [vmem:[%s13714_s26 + $0x5c0] sm:$0xff] }
 0x131   :  { %10758 = vmatprep.subr.bf16.mxu1 %v10757_v8 }
 0x133   :  { %10604 = vmatpush3.bf16.msra.mxu0 %v10601_v11 }
 0x134   :  { %10606 = vmatprep.subr.bf16.mxu0 %v10605_v14  ;;  %10760 = vmatpush3.bf16.msra.mxu1 %v10757_v8  ;;  %v8088_v8 = vld [vmem:[%s13714_s26 + $0x4e0] sm:$0xff] }
 0x135   :  { %10762 = vmatprep.subr.bf16.mxu1 %v10761_v10 }
 0x137   :  { %10608 = vmatpush3.bf16.msra.mxu0 %v10605_v14  ;;  %v7980_v14 = vld [vmem:[%s13714_s26 + $0x280] sm:$0xff] }
 0x138   :  { %10610 = vmatprep.subr.bf16.mxu0 %v10609_v17  ;;  %10764 = vmatpush3.bf16.msra.mxu1 %v10761_v10  ;;  %v10661_v18 = vpack.c.bf16 %v7981_v15, %v7980_v14  ;;  %v10829_v10 = vpack.c.bf16 %v8089_v9, %v8088_v8  ;;  %v8124_v14 = vld [vmem:[%s13714_s26 + $0x580] sm:$0xff]  ;;  %v8125_v15 = vld [vmem:[%s13714_s26 + $0x588] sm:$0xff]  ;;  %v8134_v9 = vld [vmem:[%s13714_s26 + $0x5d0] sm:$0xff] }
 0x139   :  { %10806 = vmatprep.subr.bf16.mxu1 %v10805_v55 }
 0x13b   :  { %10612 = vmatpush3.bf16.msra.mxu0 %v10609_v17  ;;  %9525 = vmatmul.mubr.f32.vlgmr.msra.gmra.mrb[8].mxu1 %v11785_v58  ;;  %v7950_v17 = vld [vmem:[%s13716_s5 + $0x70] sm:$0xff] }
 0x13c   :  { %10614 = vmatprep.subr.bf16.mxu0 %v10613_v20  ;;  %9614 = vmatprep.mubr.f32.mxu1 %v11718_v25 }
 0x13d   :  { %10808 = vmatpush3.bf16.msra.mxu1 %v10805_v55  ;;  %v10797_v55 = vpack.c.bf16 %v8067_v54, %v8066_v53  ;;  %v8102_v53 = vld [vmem:[%s13714_s26 + $0x510] sm:$0xff]  ;;  %v8103_v54 = vld [vmem:[%s13714_s26 + $0x518] sm:$0xff] }
 0x13e   :  { %v9391_v31 = vpop.f32.mrb[4].mxu1  ;;  %10810 = vmatprep.subr.bf16.mxu1 %v10809_v59 }
 0x13f   :  { %10616 = vmatpush3.bf16.msra.mxu0 %v10613_v20  ;;  %v951_v34 = vpop.f32.mrb[5].mxu1  ;;  %v7972_v20 = vld [vmem:[%s13716_s5 + $0x80] sm:$0xff] }
 0x140   :  { %10618 = vmatprep.subr.bf16.mxu0 %v10617_v23  ;;  %v12004_v36 = vpack.c.bf16 %v9391_v31, %v951_v34  ;;  %v7986_v31 = vld [vmem:[%s13714_s26 + $0x2b0] sm:$0xff]  ;;  %v7988_v34 = vld [vmem:[%s13714_s26 + $0x2c0] sm:$0xff] }
 0x141   :  { %10812 = vmatpush3.bf16.msra.mxu1 %v10809_v59  ;;  %v10881_v59 = vpack.c.bf16 %v8127_v57, %v8126_v56  ;;  %v10845_v56 = vpack.c.bf16 %v8103_v54, %v8102_v53  ;;  %v8094_v57 = vld [vmem:[%s13716_s5 + $0x130] sm:$0xff]  ;;  %v8172_v53 = vld [vmem:[%s13714_s26 + $0x680] sm:$0xff]  ;;  %v8173_v54 = vld [vmem:[%s13714_s26 + $0x688] sm:$0xff] }
 0x142   :  { %10814 = vmatprep.subr.bf16.mxu1 %v10813_v62 }
 0x143   :  { %10620 = vmatpush3.bf16.msra.mxu0 %v10617_v23  ;;  %v7973_v23 = vld [vmem:[%s13716_s5 + $0x88] sm:$0xff] }
 0x145   :  { %10816 = vmatpush3.bf16.msra.mxu1 %v10813_v62  ;;  %v10885_v62 = vpack.c.bf16 %v8129_v61, %v8128_v60  ;;  %v8105_v60 = vld [vmem:[%s13714_s26 + $0x528] sm:$0xff]  ;;  %v8095_v61 = vld [vmem:[%s13716_s5 + $0x138] sm:$0xff] }
 0x146   :  { %9345 = vmatmul.mubr.f32.vlgmr.msra.gmra.mrb[6].mxu0 %v11785_v58  ;;  %10818 = vmatprep.subr.bf16.mxu1 %v10817_v1 }
 0x147   :  { %9351 = vmatprep.mubr.msk.f32.mxu0 %vm272_vm2, %v7948_v32  ;;  %v7987_v32 = vld [vmem:[%s13714_s26 + $0x2b8] sm:$0xff] }
 0x148   :  { %v10673_v33 = vpack.c.bf16 %v7987_v32, %v7986_v31  ;;  %v8044_v31 = vld [vmem:[%s13716_s5 + $0xe0] sm:$0xff]  ;;  %v8054_v32 = vld [vmem:[%s13714_s26 + $0x410] sm:$0xff] }
 0x149   :  { %10820 = vmatpush3.bf16.msra.mxu1 %v10817_v1  ;;  %v8130_v1 = vld [vmem:[%s13714_s26 + $0x5b0] sm:$0xff] }
 0x14a   :  { %10822 = vmatprep.subr.bf16.mxu1 %v10821_v4  ;;  %v10889_v5 = vpack.c.bf16 %v8131_v3, %v8130_v1  ;;  %v8109_v3 = vld [vmem:[%s13714_s26 + $0x548] sm:$0xff] }
 0x14d   :  { %10824 = vmatpush3.bf16.msra.mxu1 %v10821_v4 }
 0x14e   :  { %10826 = vmatprep.subr.bf16.mxu1 %v10825_v7 }
 0x151   :  { %10828 = vmatpush3.bf16.msra.mxu1 %v10825_v7  ;;  %v8133_v7 = vld [vmem:[%s13714_s26 + $0x5c8] sm:$0xff] }
 0x152   :  { %10830 = vmatprep.subr.bf16.mxu1 %v10829_v10  ;;  %v10893_v8 = vpack.c.bf16 %v8133_v7, %v8132_v6  ;;  %v8111_v6 = vld [vmem:[%s13714_s26 + $0x558] sm:$0xff] }
 0x155   :  { %10832 = vmatpush3.bf16.msra.mxu1 %v10829_v10  ;;  %v8135_v10 = vld [vmem:[%s13714_s26 + $0x5d8] sm:$0xff] }
 0x1e2   :  { %v9481_v46 = vpop.f32.mrb[6].mxu1 }
 0x1e3   :  { %v1347_v47 = vpop.f32.mrb[7].mxu1 }
 0x1e4   :  { %v10729_v48 = vpack.c.bf16 %v9481_v46, %v1347_v47  ;;  %v8062_v47 = vld [vmem:[%s13714_s26 + $0x450] sm:$0xff] }
 0x20e   :  { %v9526_v50 = vpop.f32.mrb[8].mxu1 }
 0x20f   :  { %v1545_v51 = vpop.f32.mrb[9].mxu1 }
 0x210   :  { %v12166_v52 = vpack.c.bf16 %v9526_v50, %v1545_v51  ;;  %v8064_v50 = vld [vmem:[%s13714_s26 + $0x460] sm:$0xff]  ;;  %v8065_v51 = vld [vmem:[%s13714_s26 + $0x468] sm:$0xff] }
 0x219   :  { %v9346_v11 = vpop.f32.mrb[6].mxu0 }
 0x21a   :  { %v753_v12 = vpop.f32.mrb[7].mxu0 }
 0x21b   :  { %v10621_v13 = vpack.c.bf16 %v9346_v11, %v753_v12  ;;  %v8090_v11 = vld [vmem:[%s13714_s26 + $0x4f0] sm:$0xff]  ;;  %v8091_v12 = vld [vmem:[%s13714_s26 + $0x4f8] sm:$0xff] }
 0x21d   :  { %10622 = vmatprep.subr.bf16.mxu0 %v10621_v13 }
 0x21e   :  { %10624 = vmatpush3.bf16.msra.mxu0 %v10621_v13  ;;  %v10833_v13 = vpack.c.bf16 %v8091_v12, %v8090_v11  ;;  %v10897_v11 = vpack.c.bf16 %v8135_v10, %v8134_v9  ;;  %v8136_v12 = vld [vmem:[%s13714_s26 + $0x5e0] sm:$0xff]  ;;  %v8113_v9 = vld [vmem:[%s13714_s26 + $0x568] sm:$0xff] }
 0x21f   :  { %10658 = vmatprep.subr.bf16.mxu0 %v12004_v36 }
 0x220   :  { %10834 = vmatprep.subr.bf16.mxu1 %v10833_v13 }
 0x221   :  { %9352 = vmatmul.mubr.msk.f32.vlgmr.msra.gmra.mrb[2].mxu0 %vm272_vm2, %v7949_v16  ;;  %v10877_v16 = vpack.c.bf16 %v8125_v15, %v8124_v14  ;;  %10836 = vmatpush3.bf16.msra.mxu1 %v10833_v13  ;;  %v8137_v13 = vld [vmem:[%s13714_s26 + $0x5e8] sm:$0xff]  ;;  %v8138_v15 = vld [vmem:[%s13714_s26 + $0x5f0] sm:$0xff] }
 0x222   :  { %10660 = vmatpush3.bf16.msra.mxu0 %v12004_v36  ;;  %9354 = vmatprep.mubr.msk.f32.mxu0 %vm272_vm2, %v7950_v17  ;;  %v10677_v36 = vpack.c.bf16 %v7989_v35, %v7988_v34  ;;  %v8045_v34 = vld [vmem:[%s13716_s5 + $0xe8] sm:$0xff]  ;;  %v10901_v14 = vpack.c.bf16 %v8137_v13, %v8136_v12  ;;  %v8115_v12 = vld [vmem:[%s13714_s26 + $0x578] sm:$0xff] }
 0x223   :  { %10662 = vmatprep.subr.bf16.mxu0 %v10661_v18  ;;  %10878 = vmatprep.subr.bf16.mxu1 %v10877_v16 }
 0x224   :  { %9615 = vmatmul.mubr.f32.vlgmr.msra.gmra.mrb[10].mxu1 %v11785_v58 }
 0x225   :  { %9355 = vmatmul.mubr.msk.f32.gmra.mrb[4].mxu0 %vm272_vm2, %v7951_v19  ;;  %10880 = vmatpush3.bf16.msra.mxu1 %v10877_v16  ;;  %v8139_v16 = vld [vmem:[%s13714_s26 + $0x5f8] sm:$0xff] }
 0x226   :  { %9396 = vmatprep.mubr.msk.f32.mxu0 %vm272_vm2, %v7972_v20  ;;  %9704 = vmatprep.mubr.f32.mxu1 %v11718_v25  ;;  %v7997_v20 = vld [vmem:[%s13716_s5 + $0xa8] sm:$0xff] }
 0x227   :  { %10882 = vmatprep.subr.bf16.mxu1 %v10881_v59 }
 0x229   :  { %9397 = vmatmul.mubr.msk.f32.vlgmr.msra.gmra.mrb[2].mxu0 %vm272_vm2, %v7973_v23  ;;  %v8020_v23 = vld [vmem:[%s13716_s5 + $0xc0] sm:$0xff]  ;;  %10884 = vmatpush3.bf16.msra.mxu1 %v10881_v59 }
 0x22a   :  { %10664 = vmatpush3.bf16.msra.mxu0 %v10661_v18  ;;  %9399 = vmatprep.mubr.msk.f32.mxu0 %vm272_vm2, %v7974_v26  ;;  %v8053_v26 = vld [vmem:[%s13714_s26 + $0x408] sm:$0xff]  ;;  %v8104_v59 = vld [vmem:[%s13714_s26 + $0x520] sm:$0xff] }
 0x22b   :  { %10666 = vmatprep.subr.bf16.mxu0 %v10665_v24  ;;  %10886 = vmatprep.subr.bf16.mxu1 %v10885_v62 }
 0x22d   :  { %9400 = vmatmul.mubr.msk.f32.gmra.mrb[4].mxu0 %vm272_vm2, %v7975_v29  ;;  %10888 = vmatpush3.bf16.msra.mxu1 %v10885_v62  ;;  %v10849_v62 = vpack.c.bf16 %v8105_v60, %v8104_v59  ;;  %v8143_v59 = vld [vmem:[%s13716_s5 + $0x178] sm:$0xff]  ;;  %v8164_v60 = vld [vmem:[%s13716_s5 + $0x180] sm:$0xff] }
 0x22e   :  { %10668 = vmatpush3.bf16.msra.mxu0 %v10665_v24  ;;  %9434 = vmatprep.mubr.f32.mxu0 %v11718_v25  ;;  %v8052_v24 = vld [vmem:[%s13714_s26 + $0x400] sm:$0xff] }
 0x22f   :  { %10670 = vmatprep.subr.bf16.mxu0 %v10669_v30  ;;  %v10769_v29 = vpack.c.bf16 %v8053_v26, %v8052_v24  ;;  %10890 = vmatprep.subr.bf16.mxu1 %v10889_v5  ;;  %v8152_v24 = vld [vmem:[%s13714_s26 + $0x620] sm:$0xff]  ;;  %v8153_v26 = vld [vmem:[%s13714_s26 + $0x628] sm:$0xff] }
 0x231   :  { %10892 = vmatpush3.bf16.msra.mxu1 %v10889_v5  ;;  %v8110_v5 = vld [vmem:[%s13714_s26 + $0x550] sm:$0xff] }
 0x232   :  { %10672 = vmatpush3.bf16.msra.mxu0 %v10669_v30  ;;  %v8023_v30 = vld [vmem:[%s13716_s5 + $0xd8] sm:$0xff]  ;;  %10894 = vmatprep.subr.bf16.mxu1 %v10893_v8  ;;  %v10861_v7 = vpack.c.bf16 %v8111_v6, %v8110_v5  ;;  %v8178_v6 = vld [vmem:[%s13714_s26 + $0x6b0] sm:$0xff] }
 0x233   :  { %10674 = vmatprep.subr.bf16.mxu0 %v10673_v33 }
 0x235   :  { %10896 = vmatpush3.bf16.msra.mxu1 %v10893_v8  ;;  %v8112_v8 = vld [vmem:[%s13714_s26 + $0x560] sm:$0xff] }
 0x236   :  { %10676 = vmatpush3.bf16.msra.mxu0 %v10673_v33  ;;  %v8055_v33 = vld [vmem:[%s13714_s26 + $0x418] sm:$0xff]  ;;  %10898 = vmatprep.subr.bf16.mxu1 %v10897_v11  ;;  %v10865_v10 = vpack.c.bf16 %v8113_v9, %v8112_v8  ;;  %v8180_v9 = vld [vmem:[%s13714_s26 + $0x6c0] sm:$0xff] }
 0x237   :  { %10678 = vmatprep.subr.bf16.mxu0 %v10677_v36  ;;  %v10773_v35 = vpack.c.bf16 %v8055_v33, %v8054_v32  ;;  %v8157_v32 = vld [vmem:[%s13714_s26 + $0x648] sm:$0xff] }
 0x239   :  { %10900 = vmatpush3.bf16.msra.mxu1 %v10897_v11  ;;  %v8114_v11 = vld [vmem:[%s13714_s26 + $0x570] sm:$0xff] }
 0x23a   :  { %10680 = vmatpush3.bf16.msra.mxu0 %v10677_v36  ;;  %v8046_v36 = vld [vmem:[%s13716_s5 + $0xf0] sm:$0xff]  ;;  %10902 = vmatprep.subr.bf16.mxu1 %v10901_v14  ;;  %v10869_v13 = vpack.c.bf16 %v8115_v12, %v8114_v11 }
 0x23b   :  { %10682 = vmatprep.subr.bf16.mxu0 %v10681_v39  ;;  %v8182_v12 = vld [vmem:[%s13714_s26 + $0x6d0] sm:$0xff] }
 0x23d   :  { %10904 = vmatpush3.bf16.msra.mxu1 %v10901_v14 }
 0x23e   :  { %10684 = vmatpush3.bf16.msra.mxu0 %v10681_v39  ;;  %v8047_v39 = vld [vmem:[%s13716_s5 + $0xf8] sm:$0xff] }
 0x23f   :  { %10686 = vmatprep.subr.bf16.mxu0 %v10685_v42 }
 0x242   :  { %10688 = vmatpush3.bf16.msra.mxu0 %v10685_v42  ;;  %v8059_v42 = vld [vmem:[%s13714_s26 + $0x438] sm:$0xff] }
 0x243   :  { %10690 = vmatprep.subr.bf16.mxu0 %v10689_v45  ;;  %v10781_v43 = vpack.c.bf16 %v8059_v42, %v8058_v41  ;;  %v8163_v41 = vld [vmem:[%s13714_s26 + $0x678] sm:$0xff] }
 0x246   :  { %10692 = vmatpush3.bf16.msra.mxu0 %v10689_v45  ;;  %v8061_v45 = vld [vmem:[%s13714_s26 + $0x448] sm:$0xff] }
 0x247   :  { %v10785_v46 = vpack.c.bf16 %v8061_v45, %v8060_v44 }
 0x249   :  { %9435 = vmatmul.mubr.f32.vlgmr.msra.gmra.mrb[8].mxu0 %v11785_v58 }
 0x24a   :  { %9441 = vmatprep.mubr.msk.f32.mxu0 %vm272_vm2, %v7996_v49 }
 0x2f7   :  { %v9616_v63 = vpop.f32.mrb[10].mxu1 }
 0x2f8   :  { %v1941_v2 = vpop.f32.mrb[11].mxu1 }
 0x2f9   :  { %v12342_v4 = vpack.c.bf16 %v9616_v63, %v1941_v2  ;;  %v8106_v63 = vld [vmem:[%s13714_s26 + $0x530] sm:$0xff]  ;;  %v8108_v2 = vld [vmem:[%s13714_s26 + $0x540] sm:$0xff] }
 0x31c   :  { %v9436_v17 = vpop.f32.mrb[8].mxu0 }
 0x31d   :  { %v1149_v18 = vpop.f32.mrb[9].mxu0 }
 0x31e   :  { %v10693_v19 = vpack.c.bf16 %v9436_v17, %v1149_v18  ;;  %v10905_v17 = vpack.c.bf16 %v8139_v16, %v8138_v15  ;;  %v8148_v18 = vld [vmem:[%s13714_s26 + $0x600] sm:$0xff] }
 0x320   :  { %10694 = vmatprep.subr.bf16.mxu0 %v10693_v19  ;;  %10906 = vmatprep.subr.bf16.mxu1 %v10905_v17 }
 0x321   :  { %10696 = vmatpush3.bf16.msra.mxu0 %v10693_v19  ;;  %10908 = vmatpush3.bf16.msra.mxu1 %v10905_v17  ;;  %v8149_v19 = vld [vmem:[%s13714_s26 + $0x608] sm:$0xff]  ;;  %v8116_v17 = vld [vmem:[%s13716_s5 + $0x140] sm:$0xff] }
 0x322   :  { %10730 = vmatprep.subr.bf16.mxu0 %v10729_v48 }
 0x324   :  { %9442 = vmatmul.mubr.msk.f32.vlgmr.msra.gmra.mrb[2].mxu0 %vm272_vm2, %v7997_v20  ;;  %v10913_v20 = vpack.c.bf16 %v8149_v19, %v8148_v18  ;;  %9705 = vmatmul.mubr.f32.vlgmr.msra.gmra.mrb[12].mxu1 %v11785_v58 }
 0x325   :  { %10732 = vmatpush3.bf16.msra.mxu0 %v10729_v48  ;;  %9444 = vmatprep.mubr.msk.f32.mxu0 %vm272_vm2, %v7998_v21  ;;  %v8063_v48 = vld [vmem:[%s13714_s26 + $0x458] sm:$0xff]  ;;  %v8150_v21 = vld [vmem:[%s13714_s26 + $0x610] sm:$0xff] }
 0x326   :  { %10766 = vmatprep.subr.bf16.mxu0 %v12166_v52  ;;  %v10789_v49 = vpack.c.bf16 %v8063_v48, %v8062_v47  ;;  %10914 = vmatprep.subr.bf16.mxu1 %v10913_v20  ;;  %v8101_v47 = vld [vmem:[%s13714_s26 + $0x508] sm:$0xff] }
 0x327   :  { %10916 = vmatpush3.bf16.msra.mxu1 %v10913_v20  ;;  %9749 = vmatprep.mubr.f32.mxu1 %v11718_v25  ;;  %v8069_v48 = vld [vmem:[%s13716_s5 + $0x108] sm:$0xff] }
 0x328   :  { %9445 = vmatmul.mubr.msk.f32.gmra.mrb[4].mxu0 %vm272_vm2, %v7999_v22  ;;  %v8151_v22 = vld [vmem:[%s13714_s26 + $0x618] sm:$0xff] }
 0x329   :  { %9486 = vmatprep.mubr.msk.f32.mxu0 %vm272_vm2, %v8020_v23  ;;  %v10917_v23 = vpack.c.bf16 %v8151_v22, %v8150_v21  ;;  %v8196_v21 = vld [vmem:[%s13714_s26 + $0x700] sm:$0xff]  ;;  %v8197_v22 = vld [vmem:[%s13714_s26 + $0x708] sm:$0xff] }
 0x32b   :  { %10918 = vmatprep.subr.bf16.mxu1 %v10917_v23 }
 0x32c   :  { %9487 = vmatmul.mubr.msk.f32.vlgmr.msra.gmra.mrb[2].mxu0 %vm272_vm2, %v8021_v27  ;;  %10920 = vmatpush3.bf16.msra.mxu1 %v10917_v23  ;;  %v10921_v27 = vpack.c.bf16 %v8153_v26, %v8152_v24  ;;  %v10985_v23 = vpack.c.bf16 %v8197_v22, %v8196_v21  ;;  %v8198_v24 = vld [vmem:[%s13714_s26 + $0x710] sm:$0xff]  ;;  %v8199_v26 = vld [vmem:[%s13714_s26 + $0x718] sm:$0xff]  ;;  %v8188_v22 = vld [vmem:[%s13716_s5 + $0x1a0] sm:$0xff] }
 0x32d   :  { %10768 = vmatpush3.bf16.msra.mxu0 %v12166_v52  ;;  %9489 = vmatprep.mubr.msk.f32.mxu0 %vm272_vm2, %v8022_v28  ;;  %v10793_v52 = vpack.c.bf16 %v8065_v51, %v8064_v50  ;;  %v8154_v28 = vld [vmem:[%s13714_s26 + $0x630] sm:$0xff]  ;;  %v8071_v51 = vld [vmem:[%s13716_s5 + $0x118] sm:$0xff] }
 0x32e   :  { %10770 = vmatprep.subr.bf16.mxu0 %v10769_v29  ;;  %10922 = vmatprep.subr.bf16.mxu1 %v10921_v27 }
 0x330   :  { %9490 = vmatmul.mubr.msk.f32.gmra.mrb[4].mxu0 %vm272_vm2, %v8023_v30  ;;  %10924 = vmatpush3.bf16.msra.mxu1 %v10921_v27  ;;  %v10989_v27 = vpack.c.bf16 %v8199_v26, %v8198_v24 }
 0x331   :  { %9531 = vmatprep.mubr.msk.f32.mxu0 %vm272_vm2, %v8044_v31  ;;  %v8156_v31 = vld [vmem:[%s13714_s26 + $0x640] sm:$0xff] }
 0x332   :  { %v10929_v33 = vpack.c.bf16 %v8157_v32, %v8156_v31  ;;  %v8202_v31 = vld [vmem:[%s13714_s26 + $0x730] sm:$0xff]  ;;  %v8203_v32 = vld [vmem:[%s13714_s26 + $0x738] sm:$0xff] }
 0x334   :  { %9532 = vmatmul.mubr.msk.f32.vlgmr.msra.gmra.mrb[2].mxu0 %vm272_vm2, %v8045_v34  ;;  %v8158_v34 = vld [vmem:[%s13714_s26 + $0x650] sm:$0xff] }
 0x335   :  { %10772 = vmatpush3.bf16.msra.mxu0 %v10769_v29  ;;  %9534 = vmatprep.mubr.msk.f32.mxu0 %vm272_vm2, %v8046_v36  ;;  %v8155_v29 = vld [vmem:[%s13714_s26 + $0x638] sm:$0xff] }
 0x336   :  { %10774 = vmatprep.subr.bf16.mxu0 %v10773_v35  ;;  %v10925_v30 = vpack.c.bf16 %v8155_v29, %v8154_v28  ;;  %v8200_v28 = vld [vmem:[%s13714_s26 + $0x720] sm:$0xff]  ;;  %v8201_v29 = vld [vmem:[%s13714_s26 + $0x728] sm:$0xff] }
 0x338   :  { %9535 = vmatmul.mubr.msk.f32.gmra.mrb[4].mxu0 %vm272_vm2, %v8047_v39  ;;  %10926 = vmatprep.subr.bf16.mxu1 %v10925_v30  ;;  %v8162_v39 = vld [vmem:[%s13714_s26 + $0x670] sm:$0xff] }
 0x339   :  { %10776 = vmatpush3.bf16.msra.mxu0 %v10773_v35  ;;  %9569 = vmatprep.mubr.f32.mxu0 %v11718_v25  ;;  %v8159_v35 = vld [vmem:[%s13714_s26 + $0x658] sm:$0xff]  ;;  %v10941_v42 = vpack.c.bf16 %v8163_v41, %v8162_v39  ;;  %v8209_v41 = vld [vmem:[%s13714_s26 + $0x768] sm:$0xff] }
 0x33a   :  { %10778 = vmatprep.subr.bf16.mxu0 %v10777_v40  ;;  %10928 = vmatpush3.bf16.msra.mxu1 %v10925_v30  ;;  %v10933_v36 = vpack.c.bf16 %v8159_v35, %v8158_v34  ;;  %v10993_v30 = vpack.c.bf16 %v8201_v29, %v8200_v28  ;;  %v8204_v34 = vld [vmem:[%s13714_s26 + $0x740] sm:$0xff]  ;;  %v8205_v35 = vld [vmem:[%s13714_s26 + $0x748] sm:$0xff] }
 0x33b   :  { %10930 = vmatprep.subr.bf16.mxu1 %v10929_v33  ;;  %v8220_v29 = vld [vmem:[%s13714_s26 + $0x780] sm:$0xff] }
 0x33d   :  { %10780 = vmatpush3.bf16.msra.mxu0 %v10777_v40  ;;  %v10937_v40 = vpack.c.bf16 %v8161_v38, %v8160_v37  ;;  %v8206_v37 = vld [vmem:[%s13714_s26 + $0x750] sm:$0xff]  ;;  %v8207_v38 = vld [vmem:[%s13714_s26 + $0x758] sm:$0xff] }
 0x33e   :  { %10782 = vmatprep.subr.bf16.mxu0 %v10781_v43  ;;  %10932 = vmatpush3.bf16.msra.mxu1 %v10929_v33  ;;  %v10997_v33 = vpack.c.bf16 %v8203_v32, %v8202_v31  ;;  %v11005_v39 = vpack.c.bf16 %v8207_v38, %v8206_v37  ;;  %v8189_v31 = vld [vmem:[%s13716_s5 + $0x1a8] sm:$0xff]  ;;  %v8190_v32 = vld [vmem:[%s13716_s5 + $0x1b0] sm:$0xff]  ;;  %v8223_v37 = vld [vmem:[%s13714_s26 + $0x798] sm:$0xff] }
 0x33f   :  { %10934 = vmatprep.subr.bf16.mxu1 %v10933_v36  ;;  %v8213_v38 = vld [vmem:[%s13716_s5 + $0x1c8] sm:$0xff] }
 0x341   :  { %10784 = vmatpush3.bf16.msra.mxu0 %v10781_v43 }
 0x342   :  { %10786 = vmatprep.subr.bf16.mxu0 %v10785_v46  ;;  %10936 = vmatpush3.bf16.msra.mxu1 %v10933_v36  ;;  %v11001_v36 = vpack.c.bf16 %v8205_v35, %v8204_v34  ;;  %v8191_v34 = vld [vmem:[%s13716_s5 + $0x1b8] sm:$0xff]  ;;  %v8212_v35 = vld [vmem:[%s13716_s5 + $0x1c0] sm:$0xff] }
 0x343   :  { %10938 = vmatprep.subr.bf16.mxu1 %v10937_v40 }
 0x345   :  { %10788 = vmatpush3.bf16.msra.mxu0 %v10785_v46  ;;  %v8100_v46 = vld [vmem:[%s13714_s26 + $0x500] sm:$0xff] }
 0x346   :  { %10790 = vmatprep.subr.bf16.mxu0 %v10789_v49  ;;  %10940 = vmatpush3.bf16.msra.mxu1 %v10937_v40  ;;  %v10841_v50 = vpack.c.bf16 %v8101_v47, %v8100_v46  ;;  %v8208_v40 = vld [vmem:[%s13714_s26 + $0x760] sm:$0xff] }
 0x347   :  { %10942 = vmatprep.subr.bf16.mxu1 %v10941_v42 }
 0x349   :  { %10792 = vmatpush3.bf16.msra.mxu0 %v10789_v49  ;;  %v8070_v49 = vld [vmem:[%s13716_s5 + $0x110] sm:$0xff] }
 0x34a   :  { %10794 = vmatprep.subr.bf16.mxu0 %v10793_v52  ;;  %10944 = vmatpush3.bf16.msra.mxu1 %v10941_v42  ;;  %v11009_v42 = vpack.c.bf16 %v8209_v41, %v8208_v40  ;;  %v8214_v40 = vld [vmem:[%s13716_s5 + $0x1d0] sm:$0xff]  ;;  %v8224_v41 = vld [vmem:[%s13714_s26 + $0x7a0] sm:$0xff] }
 0x34b   :  { %10986 = vmatprep.subr.bf16.mxu1 %v10985_v23 }
 0x34d   :  { %10796 = vmatpush3.bf16.msra.mxu0 %v10793_v52  ;;  %9750 = vmatmul.mubr.f32.vlgmr.msra.gmra.mrb[14].mxu1 %v11785_v58  ;;  %v8092_v52 = vld [vmem:[%s13716_s5 + $0x120] sm:$0xff] }
 0x34e   :  { %10798 = vmatprep.subr.bf16.mxu0 %v10797_v55  ;;  %9839 = vmatprep.mubr.f32.mxu1 %v11718_v25 }
 0x34f   :  { %10988 = vmatpush3.bf16.msra.mxu1 %v10985_v23 }
 0x350   :  { %10990 = vmatprep.subr.bf16.mxu1 %v10989_v27 }
 0x351   :  { %10800 = vmatpush3.bf16.msra.mxu0 %v10797_v55  ;;  %v8093_v55 = vld [vmem:[%s13716_s5 + $0x128] sm:$0xff] }
 0x353   :  { %10992 = vmatpush3.bf16.msra.mxu1 %v10989_v27 }
 0x354   :  { %9570 = vmatmul.mubr.f32.vlgmr.msra.gmra.mrb[10].mxu0 %v11785_v58  ;;  %10994 = vmatprep.subr.bf16.mxu1 %v10993_v30 }
 0x355   :  { %9576 = vmatprep.mubr.msk.f32.mxu0 %vm272_vm2, %v8068_v0  ;;  %v8107_v0 = vld [vmem:[%s13714_s26 + $0x538] sm:$0xff] }
 0x356   :  { %v10853_v1 = vpack.c.bf16 %v8107_v0, %v8106_v63  ;;  %v8165_v63 = vld [vmem:[%s13716_s5 + $0x188] sm:$0xff] }
 0x357   :  { %10996 = vmatpush3.bf16.msra.mxu1 %v10993_v30  ;;  %v8221_v30 = vld [vmem:[%s13714_s26 + $0x788] sm:$0xff] }
 0x358   :  { %10998 = vmatprep.subr.bf16.mxu1 %v10997_v33 }
 0x35b   :  { %11000 = vmatpush3.bf16.msra.mxu1 %v10997_v33  ;;  %v11021_v33 = vpack.c.bf16 %v8221_v30, %v8220_v29 }
 0x35c   :  { %11002 = vmatprep.subr.bf16.mxu1 %v11001_v36 }
 0x35f   :  { %11004 = vmatpush3.bf16.msra.mxu1 %v11001_v36  ;;  %v8222_v36 = vld [vmem:[%s13714_s26 + $0x790] sm:$0xff] }
 0x360   :  { %11006 = vmatprep.subr.bf16.mxu1 %v11005_v39 }
 0x363   :  { %11008 = vmatpush3.bf16.msra.mxu1 %v11005_v39  ;;  %v11025_v39 = vpack.c.bf16 %v8223_v37, %v8222_v36 }
 0x364   :  { %11010 = vmatprep.subr.bf16.mxu1 %v11009_v42 }
 0x367   :  { %11012 = vmatpush3.bf16.msra.mxu1 %v11009_v42  ;;  %v8225_v42 = vld [vmem:[%s13714_s26 + $0x7a8] sm:$0xff] }
 0x3f7   :  { %v9706_v14 = vpop.f32.mrb[12].mxu1 }
 0x3f8   :  { %v2337_v15 = vpop.f32.mrb[13].mxu1 }
 0x3f9   :  { %v10909_v16 = vpack.c.bf16 %v9706_v14, %v2337_v15  ;;  %v8184_v15 = vld [vmem:[%s13714_s26 + $0x6e0] sm:$0xff] }
 0x420   :  { %v9751_v18 = vpop.f32.mrb[14].mxu1 }
 0x421   :  { %v2535_v19 = vpop.f32.mrb[15].mxu1 }
 0x422   :  { %v12504_v20 = vpack.c.bf16 %v9751_v18, %v2535_v19  ;;  %v8186_v18 = vld [vmem:[%s13714_s26 + $0x6f0] sm:$0xff]  ;;  %v8187_v19 = vld [vmem:[%s13714_s26 + $0x6f8] sm:$0xff] }
 0x427   :  { %v9571_v43 = vpop.f32.mrb[10].mxu0 }
 0x428   :  { %v1743_v44 = vpop.f32.mrb[11].mxu0 }
 0x429   :  { %v10801_v45 = vpack.c.bf16 %v9571_v43, %v1743_v44  ;;  %v8210_v43 = vld [vmem:[%s13714_s26 + $0x770] sm:$0xff]  ;;  %v8211_v44 = vld [vmem:[%s13714_s26 + $0x778] sm:$0xff] }
 0x42b   :  { %10802 = vmatprep.subr.bf16.mxu0 %v10801_v45 }
 0x42c   :  { %10804 = vmatpush3.bf16.msra.mxu0 %v10801_v45  ;;  %v11013_v45 = vpack.c.bf16 %v8211_v44, %v8210_v43  ;;  %v8215_v43 = vld [vmem:[%s13716_s5 + $0x1d8] sm:$0xff]  ;;  %v11029_v44 = vpack.c.bf16 %v8225_v42, %v8224_v41  ;;  %v4206_v41 = vld [vmem:[%s13687_s8] sm:$0xff]  ;;  %v3269_v42 = vld [vmem:[%s13719_s25 + $0x10] sm:$0xff] }
 0x42d   :  { %10838 = vmatprep.subr.bf16.mxu0 %v12342_v4 }
 0x42e   :  { %11014 = vmatprep.subr.bf16.mxu1 %v11013_v45 }
 0x42f   :  { %9577 = vmatmul.mubr.msk.f32.vlgmr.msra.gmra.mrb[2].mxu0 %vm272_vm2, %v8069_v48  ;;  %11016 = vmatpush3.bf16.msra.mxu1 %v11013_v45  ;;  %v8226_v45 = vld [vmem:[%s13714_s26 + $0x7b0] sm:$0xff] }
 0x430   :  { %10840 = vmatpush3.bf16.msra.mxu0 %v12342_v4  ;;  %9579 = vmatprep.mubr.msk.f32.mxu0 %vm272_vm2, %v8070_v49  ;;  %v10857_v4 = vpack.c.bf16 %v8109_v3, %v8108_v2  ;;  %v8117_v49 = vld [vmem:[%s13716_s5 + $0x148] sm:$0xff]  ;;  %v8176_v2 = vld [vmem:[%s13714_s26 + $0x6a0] sm:$0xff] }
 0x431   :  { %10842 = vmatprep.subr.bf16.mxu0 %v10841_v50  ;;  %v8177_v3 = vld [vmem:[%s13714_s26 + $0x6a8] sm:$0xff] }
 0x432   :  { %9840 = vmatmul.mubr.f32.vlgmr.msra.gmra.mrb[16].mxu1 %v11785_v58  ;;  %v10957_v5 = vpack.c.bf16 %v8177_v3, %v8176_v2  ;;  %v3263_v2 = vld [vmem:[%s13718_s30] sm:$0xff]  ;;  %v3265_v3 = vld [vmem:[%s13718_s30 + $0x10] sm:$0xff] }
 0x433   :  { %9580 = vmatmul.mubr.msk.f32.gmra.mrb[4].mxu0 %vm272_vm2, %v8071_v51  ;;  %v8119_v51 = vld [vmem:[%s13716_s5 + $0x158] sm:$0xff] }
 0x434   :  { %9621 = vmatprep.mubr.msk.f32.mxu0 %vm272_vm2, %v8092_v52  ;;  %v8140_v52 = vld [vmem:[%s13716_s5 + $0x160] sm:$0xff] }
 0x437   :  { %9622 = vmatmul.mubr.msk.f32.vlgmr.msra.gmra.mrb[2].mxu0 %vm272_vm2, %v8093_v55  ;;  %v8141_v55 = vld [vmem:[%s13716_s5 + $0x168] sm:$0xff] }
 0x438   :  { %10844 = vmatpush3.bf16.msra.mxu0 %v10841_v50  ;;  %9624 = vmatprep.mubr.msk.f32.mxu0 %vm272_vm2, %v8094_v57  ;;  %v8118_v50 = vld [vmem:[%s13716_s5 + $0x150] sm:$0xff]  ;;  %v10949_v57 = vpack.c.bf16 %v8173_v54, %v8172_v53  ;;  %v8232_v53 = vld [vmem:[%s13714_s26 + $0x7e0] sm:$0xff]  ;;  %v8233_v54 = vld [vmem:[%s13714_s26 + $0x7e8] sm:$0xff] }
 0x439   :  { %10846 = vmatprep.subr.bf16.mxu0 %v10845_v56 }
 0x43b   :  { %9625 = vmatmul.mubr.msk.f32.gmra.mrb[4].mxu0 %vm272_vm2, %v8095_v61  ;;  %v8174_v61 = vld [vmem:[%s13714_s26 + $0x690] sm:$0xff] }
 0x43c   :  { %10848 = vmatpush3.bf16.msra.mxu0 %v10845_v56  ;;  %9659 = vmatprep.mubr.f32.mxu0 %v11718_v25  ;;  %v8142_v56 = vld [vmem:[%s13716_s5 + $0x170] sm:$0xff] }
 0x43d   :  { %10850 = vmatprep.subr.bf16.mxu0 %v10849_v62 }
 0x440   :  { %10852 = vmatpush3.bf16.msra.mxu0 %v10849_v62  ;;  %v8175_v62 = vld [vmem:[%s13714_s26 + $0x698] sm:$0xff] }
 0x441   :  { %10854 = vmatprep.subr.bf16.mxu0 %v10853_v1  ;;  %v10953_v0 = vpack.c.bf16 %v8175_v62, %v8174_v61  ;;  %v11555_v61 = vmov 0   ;;  %v76_v62 = vld [vmem:[%s13717_s24] sm:$0xff] }
 0x442   :  { %11525 = vset.pattern.permute.xlu0 %v11555_v61  ;;  %11526 = vset.pattern.permute.xlu1 %v11555_v61  ;;  %v8248_v61 = vld [vmem:[%s13689_s10 + $0x20] sm:$0xff] }
 0x443   :  { %3241 = vperm.xlu0 %11525, %v76_v62   ;;  %v8249_v62 = vld [vmem:[%s13689_s10 + $0x28] sm:$0xff] }
 0x444   :  { %10856 = vmatpush3.bf16.msra.mxu0 %v10853_v1  ;;  %v8166_v1 = vld [vmem:[%s13716_s5 + $0x190] sm:$0xff] }
 0x445   :  { %10858 = vmatprep.subr.bf16.mxu0 %v10857_v4 }
 0x448   :  { %10860 = vmatpush3.bf16.msra.mxu0 %v10857_v4  ;;  %v8167_v4 = vld [vmem:[%s13716_s5 + $0x198] sm:$0xff] }
 0x449   :  { %10862 = vmatprep.subr.bf16.mxu0 %v10861_v7 }
 0x44c   :  { %10864 = vmatpush3.bf16.msra.mxu0 %v10861_v7  ;;  %v8179_v7 = vld [vmem:[%s13714_s26 + $0x6b8] sm:$0xff] }
 0x44d   :  { %10866 = vmatprep.subr.bf16.mxu0 %v10865_v10  ;;  %v10961_v8 = vpack.c.bf16 %v8179_v7, %v8178_v6  ;;  %v3266_v6 = vld [vmem:[%s13718_s30 + $0x18] sm:$0xff] }
 0x450   :  { %10868 = vmatpush3.bf16.msra.mxu0 %v10865_v10  ;;  %v8181_v10 = vld [vmem:[%s13714_s26 + $0x6c8] sm:$0xff] }
 0x451   :  { %10870 = vmatprep.subr.bf16.mxu0 %v10869_v13  ;;  %v10965_v11 = vpack.c.bf16 %v8181_v10, %v8180_v9  ;;  %v8237_v10 = vld [vmem:[%s13716_s5 + $0x1e8] sm:$0xff] }
 0x454   :  { %10872 = vmatpush3.bf16.msra.mxu0 %v10869_v13  ;;  %v8183_v13 = vld [vmem:[%s13714_s26 + $0x6d8] sm:$0xff] }
 0x455   :  { %v10969_v14 = vpack.c.bf16 %v8183_v13, %v8182_v12  ;;  %v8239_v12 = vld [vmem:[%s13716_s5 + $0x1f8] sm:$0xff] }
 0x457   :  { %9660 = vmatmul.mubr.f32.vlgmr.msra.gmra.mrb[12].mxu0 %v11785_v58 }
 0x458   :  { %9666 = vmatprep.mubr.msk.f32.mxu0 %vm272_vm2, %v8116_v17 }
 0x4c2   :  { %v3242_v13 = vpop.permute.xlu0 %3241 }
 0x505   :  { %v9841_v21 = vpop.f32.mrb[16].mxu1 }
 0x506   :  { %v2931_v23 = vpop.f32.mrb[17].mxu1 }
 0x507   :  { %v11017_v24 = vpack.c.bf16 %v9841_v21, %v2931_v23 }
 0x52a   :  { %v9661_v46 = vpop.f32.mrb[12].mxu0 }
 0x52b   :  { %v2139_v47 = vpop.f32.mrb[13].mxu0 }
 0x52c   :  { %v10873_v48 = vpack.c.bf16 %v9661_v46, %v2139_v47  ;;  %v8227_v46 = vld [vmem:[%s13714_s26 + $0x7b8] sm:$0xff] }
 0x52d   :  { %v11033_v47 = vpack.c.bf16 %v8227_v46, %v8226_v45  ;;  %v3396_v45 = vld [vmem:[%s13689_s10] sm:$0xff]  ;;  %v3397_v46 = vld [vmem:[%s13689_s10 + $0x8] sm:$0xff] }
 0x52e   :  { %10874 = vmatprep.subr.bf16.mxu0 %v10873_v48 }
 0x52f   :  { %10876 = vmatpush3.bf16.msra.mxu0 %v10873_v48  ;;  %v8228_v48 = vld [vmem:[%s13714_s26 + $0x7c0] sm:$0xff] }
 0x530   :  { %10910 = vmatprep.subr.bf16.mxu0 %v10909_v16 }
 0x532   :  { %9667 = vmatmul.mubr.msk.f32.vlgmr.msra.gmra.mrb[2].mxu0 %vm272_vm2, %v8117_v49  ;;  %v8229_v49 = vld [vmem:[%s13714_s26 + $0x7c8] sm:$0xff] }
 0x533   :  { %10912 = vmatpush3.bf16.msra.mxu0 %v10909_v16  ;;  %9669 = vmatprep.mubr.msk.f32.mxu0 %vm272_vm2, %v8118_v50  ;;  %v8185_v16 = vld [vmem:[%s13714_s26 + $0x6e8] sm:$0xff]  ;;  %v11037_v50 = vpack.c.bf16 %v8229_v49, %v8228_v48  ;;  %v11057_v48 = vpack.c.bf16 %v3397_v46, %v3396_v45 }
 0x534   :  { %10946 = vmatprep.subr.bf16.mxu0 %v12504_v20  ;;  %v10973_v17 = vpack.c.bf16 %v8185_v16, %v8184_v15  ;;  %v8285_v49 = vld [vmem:[%s13689_s10 + $0x68] sm:$0xff] }
 0x535   :  { %11058 = vmatprep.subr.bf16.mxu1 %v11057_v48 }
 0x536   :  { %9670 = vmatmul.mubr.msk.f32.gmra.mrb[4].mxu0 %vm272_vm2, %v8119_v51  ;;  %v8230_v51 = vld [vmem:[%s13714_s26 + $0x7d0] sm:$0xff]  ;;  %11060 = vmatpush3.bf16.msra.mxu1 %v11057_v48 }
 0x537   :  { %9711 = vmatprep.mubr.msk.f32.mxu0 %vm272_vm2, %v8140_v52 }
 0x53a   :  { %9712 = vmatmul.mubr.msk.f32.vlgmr.msra.gmra.mrb[2].mxu0 %vm272_vm2, %v8141_v55  ;;  %v11045_v55 = vpack.c.bf16 %v8233_v54, %v8232_v53  ;;  %v3399_v53 = vld [vmem:[%s13689_s10 + $0x18] sm:$0xff]  ;;  %v8286_v54 = vld [vmem:[%s13689_s10 + $0x70] sm:$0xff] }
 0x53b   :  { %10948 = vmatpush3.bf16.msra.mxu0 %v12504_v20  ;;  %9714 = vmatprep.mubr.msk.f32.mxu0 %vm272_vm2, %v8142_v56  ;;  %v10977_v20 = vpack.c.bf16 %v8187_v19, %v8186_v18  ;;  %v8234_v56 = vld [vmem:[%s13714_s26 + $0x7f0] sm:$0xff] }
 0x53c   :  { %10950 = vmatprep.subr.bf16.mxu0 %v10949_v57 }
 0x53e   :  { %9715 = vmatmul.mubr.msk.f32.gmra.mrb[4].mxu0 %vm272_vm2, %v8143_v59 }
 0x53f   :  { %9756 = vmatprep.mubr.msk.f32.mxu0 %vm272_vm2, %v8164_v60  ;;  %v8236_v60 = vld [vmem:[%s13716_s5 + $0x1e0] sm:$0xff] }
 0x542   :  { %9757 = vmatmul.mubr.msk.f32.vlgmr.msra.gmra.mrb[2].mxu0 %vm272_vm2, %v8165_v63  ;;  %v78_v63 = vld [vmem:[%s13717_s24 + $0x10] sm:$0xff] }
 0x543   :  { %10952 = vmatpush3.bf16.msra.mxu0 %v10949_v57  ;;  %9759 = vmatprep.mubr.msk.f32.mxu0 %vm272_vm2, %v8166_v1  ;;  %v8235_v57 = vld [vmem:[%s13714_s26 + $0x7f8] sm:$0xff]  ;;  %v3264_v1 = vld [vmem:[%s13718_s30 + $0x8] sm:$0xff] }
 0x544   :  { %10954 = vmatprep.subr.bf16.mxu0 %v10953_v0  ;;  %v11049_v59 = vpack.c.bf16 %v8235_v57, %v8234_v56  ;;  %3251 = vperm.xlu1 %11526, %v78_v63   ;;  %v8287_v56 = vld [vmem:[%s13689_s10 + $0x78] sm:$0xff]  ;;  %v4208_v63 = vld [vmem:[%s13687_s8 + $0x10] sm:$0xff] }
 0x545   :  { %v11109_v57 = vpack.c.bf16 %v8287_v56, %v8286_v54  ;;  %v8250_v54 = vld [vmem:[%s13689_s10 + $0x30] sm:$0xff] }
 0x546   :  { %9760 = vmatmul.mubr.msk.f32.gmra.mrb[4].mxu0 %vm272_vm2, %v8167_v4  ;;  %v3267_v4 = vld [vmem:[%s13719_s25] sm:$0xff] }
 0x547   :  { %10956 = vmatpush3.bf16.msra.mxu0 %v10953_v0  ;;  %9794 = vmatprep.mubr.f32.mxu0 %v11718_v25  ;;  %v79_v0 = vld [vmem:[%s13717_s24 + $0x18] sm:$0xff] }
 0x548   :  { %10958 = vmatprep.subr.bf16.mxu0 %v10957_v5  ;;  %3256 = vperm.xlu1 %11526, %v79_v0  }
 0x54b   :  { %10960 = vmatpush3.bf16.msra.mxu0 %v10957_v5  ;;  %v3268_v5 = vld [vmem:[%s13719_s25 + $0x8] sm:$0xff] }
 0x54c   :  { %10962 = vmatprep.subr.bf16.mxu0 %v10961_v8  ;;  %3334 = vperm.xlu1 %11526, %v3263_v2  }
 0x54f   :  { %10964 = vmatpush3.bf16.msra.mxu0 %v10961_v8 }
 0x550   :  { %10966 = vmatprep.subr.bf16.mxu0 %v10965_v11  ;;  %3358 = vperm.xlu1 %11526, %v3267_v4  }
 0x553   :  { %10968 = vmatpush3.bf16.msra.mxu0 %v10965_v11  ;;  %v8238_v11 = vld [vmem:[%s13716_s5 + $0x1f0] sm:$0xff] }
 0x554   :  { %10970 = vmatprep.subr.bf16.mxu0 %v10969_v14  ;;  %3363 = vperm.xlu1 %11526, %v3268_v5  }
 0x557   :  { %10972 = vmatpush3.bf16.msra.mxu0 %v10969_v14 }
 0x558   :  { %10974 = vmatprep.subr.bf16.mxu0 %v10973_v17  ;;  %3349 = vperm.xlu1 %11526, %v3266_v6  }
 0x55b   :  { %10976 = vmatpush3.bf16.msra.mxu0 %v10973_v17 }
 0x55c   :  { %10978 = vmatprep.subr.bf16.mxu0 %v10977_v20 }
 0x55f   :  { %10980 = vmatpush3.bf16.msra.mxu0 %v10977_v20 }
 0x562   :  { %9795 = vmatmul.mubr.f32.vlgmr.msra.gmra.mrb[14].mxu0 %v11785_v58 }
 0x563   :  { %9801 = vmatprep.mubr.msk.f32.mxu0 %vm272_vm2, %v8188_v22 }
 0x5c3   :  { %v3252_v23 = vpop.permute.xlu1 %3251 }
 0x635   :  { %v9796_v26 = vpop.f32.mrb[14].mxu0 }
 0x636   :  { %v2733_v27 = vpop.f32.mrb[15].mxu0 }
 0x637   :  { %v10981_v28 = vpack.c.bf16 %v9796_v26, %v2733_v27 }
 0x639   :  { %10982 = vmatprep.subr.bf16.mxu0 %v10981_v28 }
 0x63a   :  { %10984 = vmatpush3.bf16.msra.mxu0 %v10981_v28 }
 0x63b   :  { %11018 = vmatprep.subr.bf16.mxu0 %v11017_v24 }
 0x63d   :  { %9802 = vmatmul.mubr.msk.f32.vlgmr.msra.gmra.mrb[2].mxu0 %vm272_vm2, %v8189_v31  ;;  %v3257_v31 = vpop.permute.xlu1 %3256 }
 0x63e   :  { %11020 = vmatpush3.bf16.msra.mxu0 %v11017_v24  ;;  %9804 = vmatprep.mubr.msk.f32.mxu0 %vm272_vm2, %v8190_v32 }
 0x63f   :  { %11022 = vmatprep.subr.bf16.mxu0 %v11021_v33 }
 0x641   :  { %9805 = vmatmul.mubr.msk.f32.gmra.mrb[4].mxu0 %vm272_vm2, %v8191_v34  ;;  %v3335_v0 = vpop.permute.xlu1 %3334 }
 0x642   :  { %9846 = vmatprep.mubr.msk.f32.mxu0 %vm272_vm2, %v8212_v35 }
 0x645   :  { %9847 = vmatmul.mubr.msk.f32.vlgmr.msra.gmra.mrb[2].mxu0 %vm272_vm2, %v8213_v38  ;;  %v3270_v38 = vld [vmem:[%s13719_s25 + $0x18] sm:$0xff] }
 0x646   :  { %11024 = vmatpush3.bf16.msra.mxu0 %v11021_v33  ;;  %9849 = vmatprep.mubr.msk.f32.mxu0 %vm272_vm2, %v8214_v40  ;;  %v3395_v40 = vld [vmem:[%s13686_s7 + $0x18] sm:$0xff] }
 0x647   :  { %11026 = vmatprep.subr.bf16.mxu0 %v11025_v39 }
 0x649   :  { %9850 = vmatmul.mubr.msk.f32.gmra.mrb[4].mxu0 %vm272_vm2, %v8215_v43  ;;  %v4210_v43 = vld [vmem:[%s13688_s9] sm:$0xff] }
 0x64a   :  { %11028 = vmatpush3.bf16.msra.mxu0 %v11025_v39  ;;  %9884 = vmatprep.mubr.f32.mxu0 %v11718_v25  ;;  %v8231_v25 = vld [vmem:[%s13714_s26 + $0x7d8] sm:$0xff]  ;;  %v3393_v39 = vld [vmem:[%s13686_s7 + $0x8] sm:$0xff] }
 0x64b   :  { %11030 = vmatprep.subr.bf16.mxu0 %v11029_v44  ;;  %v11041_v52 = vpack.c.bf16 %v8231_v25, %v8230_v51  ;;  %v4211_v51 = vld [vmem:[%s13688_s9 + $0x8] sm:$0xff]  ;;  %v3394_v25 = vld [vmem:[%s13686_s7 + $0x10] sm:$0xff] }
 0x64e   :  { %11032 = vmatpush3.bf16.msra.mxu0 %v11029_v44  ;;  %v3392_v44 = vld [vmem:[%s13686_s7] sm:$0xff] }
 0x64f   :  { %11034 = vmatprep.subr.bf16.mxu0 %v11033_v47 }
 0x652   :  { %11036 = vmatpush3.bf16.msra.mxu0 %v11033_v47  ;;  %v8284_v47 = vld [vmem:[%s13689_s10 + $0x60] sm:$0xff] }
 0x653   :  { %11038 = vmatprep.subr.bf16.mxu0 %v11037_v50 }
 0x656   :  { %11040 = vmatpush3.bf16.msra.mxu0 %v11037_v50  ;;  %v11105_v50 = vpack.c.bf16 %v8285_v49, %v8284_v47 }
 0x657   :  { %11042 = vmatprep.subr.bf16.mxu0 %v11041_v52 }
 0x65a   :  { %11044 = vmatpush3.bf16.msra.mxu0 %v11041_v52  ;;  %v3398_v52 = vld [vmem:[%s13689_s10 + $0x10] sm:$0xff] }
 0x65b   :  { %11046 = vmatprep.subr.bf16.mxu0 %v11045_v55 }
 0x65e   :  { %11048 = vmatpush3.bf16.msra.mxu0 %v11045_v55  ;;  %v11061_v55 = vpack.c.bf16 %v3399_v53, %v3398_v52 }
 0x65f   :  { %11050 = vmatprep.subr.bf16.mxu0 %v11049_v59 }
 0x660   :  { %11062 = vmatprep.subr.bf16.mxu1 %v11061_v55 }
 0x661   :  { %11064 = vmatpush3.bf16.msra.mxu1 %v11061_v55  ;;  %v8251_v55 = vld [vmem:[%s13689_s10 + $0x38] sm:$0xff] }
 0x662   :  { %11052 = vmatpush3.bf16.msra.mxu0 %v11049_v59  ;;  %v4209_v59 = vld [vmem:[%s13687_s8 + $0x18] sm:$0xff] }
 0x665   :  { %9885 = vmatmul.mubr.f32.vlgmr.msra.gmra.mrb[16].mxu0 %v11785_v58  ;;  %v77_v58 = vld [vmem:[%s13717_s24 + $0x8] sm:$0xff] }
 0x666   :  { %9891 = vmatprep.mubr.msk.f32.mxu0 %vm272_vm2, %v8236_v60  ;;  %3246 = vperm.xlu0 %11525, %v77_v58   ;;  %v4207_v60 = vld [vmem:[%s13687_s8 + $0x8] sm:$0xff]  ;;  %v12873_v58 = vpack.c.bf16 %v8249_v62, %v8248_v61  ;;  %v11069_v61 = vpack.c.bf16 %v8251_v55, %v8250_v54 }
 0x668   :  { %11066 = vmatprep.subr.bf16.mxu1 %v12873_v58 }
 0x66a   :  { %3339 = vperm.xlu0 %11525, %v3264_v1   ;;  %v3359_v1 = vpop.permute.xlu1 %3358 }
 0x66e   :  { %3344 = vperm.xlu0 %11525, %v3265_v3   ;;  %v3364_v2 = vpop.permute.xlu1 %3363 }
 0x672   :  { %v12876_v4 = vpop.permute.xlu1 %3349 }
 0x6e5   :  { %v3247_v14 = vpop.permute.xlu0 %3246 }
 0x6e9   :  { %v3340_v3 = vpop.permute.xlu0 %3339 }
 0x6ed   :  { %v3345_v5 = vpop.permute.xlu0 %3344 }
 0x738   :  { %v9886_v7 = vpop.f32.mrb[16].mxu0 }
 0x739   :  { %v3129_v8 = vpop.f32.mrb[17].mxu0 }
 0x73a   :  { %v11053_v9 = vpack.c.bf16 %v9886_v7, %v3129_v8 }
 0x73c   :  { %11054 = vmatprep.subr.bf16.mxu0 %v11053_v9 }
 0x73d   :  { %11056 = vmatpush3.bf16.msra.mxu0 %v11053_v9 }
 0x73e   :  { %11106 = vmatprep.subr.bf16.mxu0 %v11105_v50 }
 0x740   :  { %9892 = vmatmul.mubr.msk.f32.vlgmr.msra.gmra.mrb[2].mxu0 %vm272_vm2, %v8237_v10 }
 0x741   :  { %9894 = vmatprep.mubr.msk.f32.mxu0 %vm272_vm2, %v8238_v11  ;;  %11108 = vmatpush3.bf16.msra.mxu0 %v11105_v50 }
 0x742   :  { %11110 = vmatprep.subr.bf16.mxu0 %v11109_v57 }
 0x744   :  { %9895 = vmatmul.mubr.msk.f32.gmra.mrb[4].mxu0 %vm272_vm2, %v8239_v12 }
 0x745   :  { %11112 = vmatpush3.bf16.msra.mxu0 %v11109_v57 }
 0x813   :  { %v9893_v15 = vpop.f32.mrb[2].mxu0 }
 0x814   :  { %v12779_v16 = vadd.f32 %v9893_v15, %v3247_v14  ;;  %v3216_v17 = vpop.f32.mrb[3].mxu0 }
 0x815   :  { %v12781_v18 = vadd.f32 %v3242_v13, %v3216_v17 }
 0x816   :  { %v3275_v19 = vsel %vm3271_vm3, %v12779_v16, 0.0  ;;  %v3289_v22 = vmul.f32 %v12779_v16, %v12779_v16 }
 0x817   :  { %3276 = vadd.xlane.f32.xlu1 %v3275_v19  ;;  %v9896_v20 = vpop.f32.mrb[4].mxu0  ;;  %v3272_v21 = vsel %vm3271_vm3, %v12781_v18, 0.0  ;;  %v3288_v29 = vmul.f32 %v12781_v18, %v12781_v18 }
 0x818   :  { %3273 = vadd.xlane.f32.xlu0 %v3272_v21  ;;  %v3226_v24 = vpop.f32.mrb[5].mxu0  ;;  %v3295_v27 = vsel %vm3271_vm3, %v3289_v22, 0.0  ;;  %v12798_v32 = vadd.f32 %v9896_v20, %v3257_v31 }
 0x819   :  { %v12789_v26 = vadd.f32 %v3252_v23, %v3226_v24  ;;  %v3292_v33 = vsel %vm3271_vm3, %v3288_v29, 0.0 }
 0x81a   :  { %v3281_v35 = vsel %vm3271_vm3, %v12798_v32, 0.0  ;;  %v3291_v36 = vmul.f32 %v12798_v32, %v12798_v32 }
 0x81b   :  { %v3278_v28 = vsel %vm3271_vm3, %v12789_v26, 0.0  ;;  %v3290_v30 = vmul.f32 %v12789_v26, %v12789_v26 }
 0x81c   :  { %3296 = vadd.xlane.f32.xlu0 %v3295_v27  ;;  %3279 = vadd.xlane.f32.xlu1 %v3278_v28  ;;  %v3301_v37 = vsel %vm3271_vm3, %v3291_v36, 0.0 }
 0x81d   :  { %v3298_v34 = vsel %vm3271_vm3, %v3290_v30, 0.0 }
 0x820   :  { %3293 = vadd.xlane.f32.xlu0 %v3292_v33  ;;  %3299 = vadd.xlane.f32.xlu1 %v3298_v34 }
 0x824   :  { %3282 = vadd.xlane.f32.xlu0 %v3281_v35 }
 0x828   :  { %3302 = vadd.xlane.f32.xlu0 %v3301_v37 }
 0x831   :  { %3373 = vperm.xlu1 %11526, %v3270_v38  }
 0x835   :  { %4189 = vperm.xlu1 %11526, %v3393_v39  }
 0x839   :  { %4199 = vperm.xlu1 %11526, %v3395_v40  }
 0x83d   :  { %4277 = vperm.xlu1 %11526, %v4206_v41  }
 0x83e   :  { %3368 = vperm.xlu0 %11525, %v3269_v42  }
 0x841   :  { %4301 = vperm.xlu1 %11526, %v4210_v43  }
 0x842   :  { %4184 = vperm.xlu0 %11525, %v3392_v44  }
 0x845   :  { %4306 = vperm.xlu1 %11526, %v4211_v51  }
 0x846   :  { %4194 = vperm.xlu0 %11525, %v3394_v25  }
 0x849   :  { %4292 = vperm.xlu1 %11526, %v4209_v59  }
 0x84a   :  { %4282 = vperm.xlu0 %11525, %v4207_v60  }
 0x84e   :  { %4287 = vperm.xlu0 %11525, %v4208_v63  }
 0x8a4   :  { %v3277_v6 = vpop.xlane.xlu1 %3276 }
 0x8a5   :  { %v3274_v7 = vpop.xlane.xlu0 %3273  ;;  %v3285_v8 = vmul.f32 0.03125, %v3277_v6 }
 0x8a6   :  { %v3284_v9 = vmul.f32 0.03125, %v3274_v7 }
 0x8a7   :  { %v3309_v12 = vmul.f32 %v3285_v8, %v3285_v8  ;;  %v3317_v38 = vsub.f32 %v12779_v16, %v3285_v8 }
 0x8a8   :  { %v3308_v17 = vmul.f32 %v3284_v9, %v3284_v9  ;;  %v3316_v42 = vsub.f32 %v12781_v18, %v3284_v9 }
 0x8a9   :  { %v3297_v10 = vpop.xlane.xlu0 %3296  ;;  %v3280_v11 = vpop.xlane.xlu1 %3279 }
 0x8aa   :  { %v3305_v13 = vmul.f32 0.03125, %v3297_v10  ;;  %v3286_v14 = vmul.f32 0.03125, %v3280_v11 }
 0x8ac   :  { %v3313_v15 = vsub.f32 %v3305_v13, %v3309_v12  ;;  %v3310_v22 = vmul.f32 %v3286_v14, %v3286_v14  ;;  %v3318_v45 = vsub.f32 %v12789_v26, %v3286_v14 }
 0x8ad   :  { %v3294_v19 = vpop.xlane.xlu0 %3293  ;;  %v3300_v20 = vpop.xlane.xlu1 %3299 }
 0x8ae   :  { %v3321_v21 = vadd.f32 1e-05, %v3313_v15  ;;  %v3304_v23 = vmul.f32 0.03125, %v3294_v19  ;;  %v3306_v24 = vmul.f32 0.03125, %v3300_v20 }
 0x8b0   :  { %11527 = vrsqrt.f32 %v3321_v21  ;;  %v3312_v27 = vsub.f32 %v3304_v23, %v3308_v17  ;;  %v3314_v28 = vsub.f32 %v3306_v24, %v3310_v22  ;;  %v8253_v24 = vld [vmem:[%s13690_s6 + $0x28] sm:$0xff] }
 0x8b1   :  { %v3283_v29 = vpop.xlane.xlu0 %3282 }
 0x8b2   :  { %v3320_v30 = vadd.f32 1e-05, %v3312_v27  ;;  %v3322_v31 = vadd.f32 1e-05, %v3314_v28  ;;  %v3287_v33 = vmul.f32 0.03125, %v3283_v29  ;;  %v8254_v27 = vld [vmem:[%s13690_s6 + $0x30] sm:$0xff] }
 0x8b3   :  { %v8268_v28 = vld [vmem:[%s13689_s10 + $0x40] sm:$0xff]  ;;  %v8269_v29 = vld [vmem:[%s13689_s10 + $0x48] sm:$0xff] }
 0x8b4   :  { %11529 = vrsqrt.f32 %v3320_v30  ;;  %v3311_v35 = vmul.f32 %v3287_v33, %v3287_v33  ;;  %v3319_v18 = vsub.f32 %v12798_v32, %v3287_v33  ;;  %v8255_v30 = vld [vmem:[%s13690_s6 + $0x38] sm:$0xff]  ;;  %v11089_v33 = vpack.c.bf16 %v8269_v29, %v8268_v28  ;;  %v4551_v28 = vld [vmem:[%s13692_s13 + $0x8] sm:$0xff]  ;;  %v4552_v29 = vld [vmem:[%s13692_s13 + $0x10] sm:$0xff] }
 0x8b5   :  { %11531 = vrsqrt.f32 %v3322_v31  ;;  %v3303_v34 = vpop.xlane.xlu0 %3302  ;;  %v3400_v31 = vld [vmem:[%s13690_s6] sm:$0xff] }
 0x8b6   :  { %v3307_v36 = vmul.f32 0.03125, %v3303_v34  ;;  %v8270_v34 = vld [vmem:[%s13689_s10 + $0x50] sm:$0xff] }
 0x8b8   :  { %v3315_v37 = vsub.f32 %v3307_v36, %v3311_v35  ;;  %v8271_v35 = vld [vmem:[%s13689_s10 + $0x58] sm:$0xff]  ;;  %v3401_v36 = vld [vmem:[%s13690_s6 + $0x8] sm:$0xff] }
 0x8ba   :  { %v11528_v39 = vpop.eup %11527  ;;  %v3323_v40 = vadd.f32 1e-05, %v3315_v37  ;;  %v3402_v37 = vld [vmem:[%s13690_s6 + $0x10] sm:$0xff] }
 0x8bb   :  { %v3329_v41 = vmul.f32 %v11528_v39, %v3317_v38  ;;  %v11093_v38 = vpack.c.bf16 %v8271_v35, %v8270_v34  ;;  %v3403_v39 = vld [vmem:[%s13690_s6 + $0x18] sm:$0xff] }
 0x8bc   :  { %11533 = vrsqrt.f32 %v3323_v40  ;;  %v8272_v40 = vld [vmem:[%s13690_s6 + $0x40] sm:$0xff] }
 0x8bd   :  { %v3353_v43 = vmul.f32 %v3340_v3, %v3329_v41  ;;  %v3369_v25 = vpop.permute.xlu0 %3368 }
 0x8be   :  { %v11530_v44 = vpop.eup %11529 }
 0x8bf   :  { %v11532_v46 = vpop.eup %11531  ;;  %v3328_v47 = vmul.f32 %v11530_v44, %v3316_v42  ;;  %v12881_v49 = vadd.f32 %v3364_v2, %v3353_v43 }
 0x8c0   :  { %v3330_v48 = vmul.f32 %v11532_v46, %v3318_v45 }
 0x8c1   :  { %v3352_v50 = vmul.f32 %v3335_v0, %v3328_v47  ;;  %v3385_v53 = vmul.f32 0.2, %v12881_v49  ;;  %vm3381_vm5 = vcmp.ge.f32.partialorder %v12881_v49, 0.0  ;;  %v3374_v0 = vpop.permute.xlu1 %3373  ;;  %v8273_v47 = vld [vmem:[%s13690_s6 + $0x48] sm:$0xff] }
 0x8c2   :  { %v3354_v51 = vmul.f32 %v3345_v5, %v3330_v48  ;;  %v8274_v48 = vld [vmem:[%s13690_s6 + $0x50] sm:$0xff] }
 0x8c3   :  { %v12883_v52 = vadd.f32 %v3359_v1, %v3352_v50  ;;  %v12908_v60 = vsel %vm3381_vm5, %v12881_v49, %v3385_v53  ;;  %v8275_v50 = vld [vmem:[%s13690_s6 + $0x58] sm:$0xff]  ;;  %v8290_v53 = vld [vmem:[%s13690_s6 + $0x70] sm:$0xff] }
 0x8c4   :  { %v12885_v16 = vadd.f32 %v3369_v25, %v3354_v51  ;;  %v8288_v51 = vld [vmem:[%s13690_s6 + $0x60] sm:$0xff]  ;;  %v8289_v25 = vld [vmem:[%s13690_s6 + $0x68] sm:$0xff] }
 0x8c5   :  { %vm3380_vm4 = vcmp.ge.f32.partialorder %v12883_v52, 0.0  ;;  %v3384_v26 = vmul.f32 0.2, %v12883_v52  ;;  %v4190_v54 = vpop.permute.xlu1 %4189 }
 0x8c6   :  { %v11534_v56 = vpop.eup %11533  ;;  %vm3382_vm6 = vcmp.ge.f32.partialorder %v12885_v16, 0.0  ;;  %v3386_v57 = vmul.f32 0.2, %v12885_v16 }
 0x8c7   :  { %v3331_v32 = vmul.f32 %v11534_v56, %v3319_v18  ;;  %v12901_v59 = vsel %vm3380_vm4, %v12883_v52, %v3384_v26  ;;  %v8291_v18 = vld [vmem:[%s13690_s6 + $0x78] sm:$0xff]  ;;  %v4185_v26 = vpop.permute.xlu0 %4184 }
 0x8c8   :  { %9905 = vmatprep.mubr.msk.f32.mxu1 %vm3271_vm3, %v12901_v59  ;;  %9989 = vmatprep.mubr.msk.f32.mxu0 %vm3271_vm3, %v12901_v59  ;;  %v12915_v62 = vsel %vm3382_vm6, %v12885_v16, %v3386_v57 }
 0x8c9   :  { %9906 = vmatmul.mubr.msk.f32.vlgmr.msra.gmra.mrb[18].mxu1 %vm3271_vm3, %v12908_v60  ;;  %9990 = vmatmul.mubr.msk.f32.vlgmr.msra.gmra.mrb[18].mxu0 %vm3271_vm3, %v12908_v60  ;;  %v3355_v63 = vmul.f32 %v12876_v4, %v3331_v32 }
 0x8ca   :  { %9908 = vmatprep.mubr.msk.f32.mxu1 %vm3271_vm3, %v12915_v62  ;;  %9992 = vmatprep.mubr.msk.f32.mxu0 %vm3271_vm3, %v12915_v62 }
 0x8cb   :  { %11068 = vmatpush3.bf16.msra.mxu1 %v12873_v58  ;;  %v12923_v1 = vadd.f32 %v3374_v0, %v3355_v63  ;;  %v8252_v58 = vld [vmem:[%s13690_s6 + $0x20] sm:$0xff]  ;;  %v4195_v63 = vpop.permute.xlu0 %4194 }
 0x8cc   :  { %11070 = vmatprep.subr.bf16.mxu1 %v11069_v61 }
 0x8cd   :  { %vm3383_vm7 = vcmp.ge.f32.partialorder %v12923_v1, 0.0  ;;  %v3387_v2 = vmul.f32 0.2, %v12923_v1 }
 0x8cf   :  { %v12928_v3 = vsel %vm3383_vm7, %v12923_v1, %v3387_v2  ;;  %11072 = vmatpush3.bf16.msra.mxu1 %v11069_v61  ;;  %v4283_v34 = vpop.permute.xlu0 %4282 }
 0x8d0   :  { %9909 = vmatmul.mubr.msk.f32.gmra.mrb[20].mxu1 %vm3271_vm3, %v12928_v3  ;;  %9993 = vmatmul.mubr.msk.f32.gmra.mrb[20].mxu0 %vm3271_vm3, %v12928_v3 }
 0x8d1   :  { %9919 = vmatprep.mubr.msk.f32.mxu1 %vm3271_vm3, %v12901_v59 }
 0x8d4   :  { %9920 = vmatmul.mubr.msk.f32.vlgmr.msra.gmra.mrb[22].mxu1 %vm3271_vm3, %v12908_v60 }
 0x8d5   :  { %9922 = vmatprep.mubr.msk.f32.mxu1 %vm3271_vm3, %v12915_v62 }
 0x8d8   :  { %9923 = vmatmul.mubr.msk.f32.gmra.mrb[24].mxu1 %vm3271_vm3, %v12928_v3 }
 0x8d9   :  { %9933 = vmatprep.mubr.msk.f32.mxu1 %vm3271_vm3, %v8252_v58 }
 0x99c   :  { %v9907_v4 = vpop.f32.mrb[18].mxu1  ;;  %v9991_v5 = vpop.f32.mrb[18].mxu0 }
 0x99d   :  { %v3482_v6 = vpop.f32.mrb[19].mxu1  ;;  %v4062_v7 = vpop.f32.mrb[19].mxu0 }
 0x99e   :  { %v11081_v8 = vpack.c.bf16 %v9907_v4, %v3482_v6  ;;  %v12946_v9 = vpack.c.bf16 %v9991_v5, %v4062_v7  ;;  %v4200_v6 = vpop.permute.xlu1 %4199 }
 0x9a3   :  { %v9910_v10 = vpop.f32.mrb[20].mxu1  ;;  %v9994_v11 = vpop.f32.mrb[20].mxu0 }
 0x9a4   :  { %v3492_v12 = vpop.f32.mrb[21].mxu1  ;;  %v4072_v13 = vpop.f32.mrb[21].mxu0 }
 0x9a5   :  { %v11085_v14 = vpack.c.bf16 %v9910_v10, %v3492_v12  ;;  %v12948_v15 = vpack.c.bf16 %v9994_v11, %v4072_v13  ;;  %v4213_v13 = vld [vmem:[%s13688_s9 + $0x18] sm:$0xff] }
 0x9a7   :  { %v9921_v17 = vpop.f32.mrb[22].mxu1 }
 0x9a8   :  { %v3577_v19 = vpop.f32.mrb[23].mxu1 }
 0x9a9   :  { %v11073_v20 = vpack.c.bf16 %v9921_v17, %v3577_v19  ;;  %v4550_v17 = vld [vmem:[%s13692_s13] sm:$0xff]  ;;  %v4212_v19 = vld [vmem:[%s13688_s9 + $0x10] sm:$0xff] }
 0x9ab   :  { %v9924_v21 = vpop.f32.mrb[24].mxu1  ;;  %11074 = vmatprep.subr.bf16.mxu1 %v11073_v20 }
 0x9ac   :  { %v3587_v22 = vpop.f32.mrb[25].mxu1  ;;  %11076 = vmatpush3.bf16.msra.mxu1 %v11073_v20  ;;  %v4554_v20 = vld [vmem:[%s13693_s14] sm:$0xff] }
 0x9ad   :  { %v11077_v23 = vpack.c.bf16 %v9924_v21, %v3587_v22  ;;  %v4429_v21 = vld [vmem:[%s13691_s12] sm:$0xff]  ;;  %v4555_v22 = vld [vmem:[%s13693_s14 + $0x8] sm:$0xff] }
 0x9af   :  { %11078 = vmatprep.subr.bf16.mxu1 %v11077_v23 }
 0x9b0   :  { %11080 = vmatpush3.bf16.msra.mxu1 %v11077_v23  ;;  %v4431_v23 = vld [vmem:[%s13691_s12 + $0x10] sm:$0xff] }
 0x9b1   :  { %11082 = vmatprep.subr.bf16.mxu1 %v11081_v8 }
 0x9b3   :  { %9934 = vmatmul.mubr.msk.f32.vlgmr.msra.gmra.mrb[26].mxu1 %vm3271_vm3, %v8253_v24  ;;  %v4553_v24 = vld [vmem:[%s13692_s13 + $0x18] sm:$0xff] }
 0x9b4   :  { %11084 = vmatpush3.bf16.msra.mxu1 %v11081_v8  ;;  %9936 = vmatprep.mubr.msk.f32.mxu1 %vm3271_vm3, %v8254_v27  ;;  %v4327_v27 = vld [vmem:[%s13694_s15] sm:$0xff] }
 0x9b5   :  { %11086 = vmatprep.subr.bf16.mxu1 %v11085_v14  ;;  %10009 = vmatprep.subr.mxu0 %v4327_v27 }
 0x9b6   :  { %10010 = vmatpush3.msra.mxu0 %v4327_v27 }
 0x9b7   :  { %9937 = vmatmul.mubr.msk.f32.gmra.mrb[28].mxu1 %vm3271_vm3, %v8255_v30  ;;  %v4278_v30 = vpop.permute.xlu1 %4277 }
 0x9b8   :  { %11088 = vmatpush3.bf16.msra.mxu1 %v11085_v14  ;;  %9947 = vmatprep.mubr.msk.f32.mxu1 %vm3271_vm3, %v3400_v31  ;;  %v4430_v14 = vld [vmem:[%s13691_s12 + $0x8] sm:$0xff] }
 0x9b9   :  { %11090 = vmatprep.subr.bf16.mxu1 %v11089_v33 }
 0x9bb   :  { %9948 = vmatmul.mubr.msk.f32.vlgmr.msra.gmra.mrb[26].mxu1 %vm3271_vm3, %v3401_v36  ;;  %v4302_v31 = vpop.permute.xlu1 %4301  ;;  %v4288_v36 = vpop.permute.xlu0 %4287 }
 0x9bc   :  { %11092 = vmatpush3.bf16.msra.mxu1 %v11089_v33  ;;  %9950 = vmatprep.mubr.msk.f32.mxu1 %vm3271_vm3, %v3402_v37 }
 0x9bd   :  { %11094 = vmatprep.subr.bf16.mxu1 %v11093_v38 }
 0x9bf   :  { %9951 = vmatmul.mubr.msk.f32.gmra.mrb[28].mxu1 %vm3271_vm3, %v3403_v39  ;;  %v4307_v33 = vpop.permute.xlu1 %4306 }
 0x9c0   :  { %11096 = vmatpush3.bf16.msra.mxu1 %v11093_v38  ;;  %9961 = vmatprep.mubr.msk.f32.mxu1 %vm3271_vm3, %v12901_v59 }
 0x9c3   :  { %9962 = vmatmul.mubr.msk.f32.vlgmr.msra.gmra.mrb[30].mxu1 %vm3271_vm3, %v12908_v60  ;;  %v4293_v35 = vpop.permute.xlu1 %4292 }
 0x9c4   :  { %9964 = vmatprep.mubr.msk.f32.mxu1 %vm3271_vm3, %v12915_v62 }
 0x9c7   :  { %9965 = vmatmul.mubr.msk.f32.gmra.mrb[32].mxu1 %vm3271_vm3, %v12928_v3 }
 0x9c8   :  { %9975 = vmatprep.mubr.msk.f32.mxu1 %vm3271_vm3, %v8272_v40 }
 0xa96   :  { %v9963_v41 = vpop.f32.mrb[30].mxu1 }
 0xa97   :  { %v3866_v42 = vpop.f32.mrb[31].mxu1 }
 0xa98   :  { %v11097_v43 = vpack.c.bf16 %v9963_v41, %v3866_v42 }
 0xa9a   :  { %v9966_v44 = vpop.f32.mrb[32].mxu1  ;;  %11098 = vmatprep.subr.bf16.mxu1 %v11097_v43 }
 0xa9b   :  { %v3876_v45 = vpop.f32.mrb[33].mxu1  ;;  %11100 = vmatpush3.bf16.msra.mxu1 %v11097_v43 }
 0xa9c   :  { %v11101_v46 = vpack.c.bf16 %v9966_v44, %v3876_v45 }
 0xa9e   :  { %11102 = vmatprep.subr.bf16.mxu1 %v11101_v46 }
 0xa9f   :  { %11104 = vmatpush3.bf16.msra.mxu1 %v11101_v46 }
 0xaa0   :  { %11114 = vmatprep.subr.bf16.mxu1 %v12946_v9 }
 0xaa2   :  { %9976 = vmatmul.mubr.msk.f32.vlgmr.msra.gmra.mrb[26].mxu1 %vm3271_vm3, %v8273_v47 }
 0xaa3   :  { %11116 = vmatpush3.bf16.msra.mxu1 %v12946_v9  ;;  %9978 = vmatprep.mubr.msk.f32.mxu1 %vm3271_vm3, %v8274_v48 }
 0xaa4   :  { %11118 = vmatprep.subr.bf16.mxu1 %v12948_v15 }
 0xaa6   :  { %9979 = vmatmul.mubr.msk.f32.gmra.mrb[28].mxu1 %vm3271_vm3, %v8275_v50 }
 0xaa7   :  { %11120 = vmatpush3.bf16.msra.mxu1 %v12948_v15  ;;  %10003 = vmatprep.mubr.msk.f32.mxu1 %vm3271_vm3, %v8288_v51  ;;  %v4432_v15 = vld [vmem:[%s13691_s12 + $0x18] sm:$0xff] }
 0xaaa   :  { %10004 = vmatmul.mubr.msk.f32.vlgmr.msra.gmra.mrb[26].mxu1 %vm3271_vm3, %v8289_v25 }
 0xaab   :  { %10006 = vmatprep.mubr.msk.f32.mxu1 %vm3271_vm3, %v8290_v53 }
 0xaae   :  { %10007 = vmatmul.mubr.msk.f32.gmra.mrb[28].mxu1 %vm3271_vm3, %v8291_v18 }
 0xb7d   :  { %v10005_v55 = vpop.f32.mrb[26].mxu1 }
 0xb7e   :  { %v13034_v56 = vadd.f32 %v10005_v55, %v4190_v54  ;;  %v4159_v57 = vpop.f32.mrb[27].mxu1 }
 0xb7f   :  { %v13036_v32 = vadd.f32 %v4185_v26, %v4159_v57 }
 0xb80   :  { %v4218_v59 = vsel %vm4214_vm8, %v13034_v56, 0.0  ;;  %v4232_v62 = vmul.f32 %v13034_v56, %v13034_v56 }
 0xb81   :  { %v10008_v60 = vpop.f32.mrb[28].mxu1  ;;  %4219 = vadd.xlane.f32.xlu1 %v4218_v59  ;;  %v4215_v61 = vsel %vm4214_vm8, %v13036_v32, 0.0  ;;  %v4231_v4 = vmul.f32 %v13036_v32, %v13036_v32 }
 0xb82   :  { %4216 = vadd.xlane.f32.xlu0 %v4215_v61  ;;  %v4169_v0 = vpop.f32.mrb[29].mxu1  ;;  %v4238_v3 = vsel %vm4214_vm8, %v4232_v62, 0.0  ;;  %v13053_v7 = vadd.f32 %v10008_v60, %v4200_v6 }
 0xb83   :  { %v13044_v2 = vadd.f32 %v4195_v63, %v4169_v0  ;;  %v4235_v8 = vsel %vm4214_vm8, %v4231_v4, 0.0 }
 0xb84   :  { %v4224_v10 = vsel %vm4214_vm8, %v13053_v7, 0.0  ;;  %v4234_v11 = vmul.f32 %v13053_v7, %v13053_v7 }
 0xb85   :  { %v4221_v58 = vsel %vm4214_vm8, %v13044_v2, 0.0  ;;  %v4233_v5 = vmul.f32 %v13044_v2, %v13044_v2 }
 0xb86   :  { %4239 = vadd.xlane.f32.xlu0 %v4238_v3  ;;  %4222 = vadd.xlane.f32.xlu1 %v4221_v58  ;;  %v4244_v12 = vsel %vm4214_vm8, %v4234_v11, 0.0 }
 0xb87   :  { %v4241_v9 = vsel %vm4214_vm8, %v4233_v5, 0.0 }
 0xb8a   :  { %4236 = vadd.xlane.f32.xlu0 %v4235_v8  ;;  %4242 = vadd.xlane.f32.xlu1 %v4241_v9 }
 0xb8e   :  { %4225 = vadd.xlane.f32.xlu0 %v4224_v10 }
 0xb92   :  { %4245 = vadd.xlane.f32.xlu0 %v4244_v12 }
 0xb9b   :  { %4316 = vperm.xlu1 %11526, %v4213_v13  }
 0xb9f   :  { %4440 = vperm.xlu1 %11526, %v4430_v14  }
 0xba3   :  { %4450 = vperm.xlu1 %11526, %v4432_v15  }
 0xba7   :  { %4620 = vperm.xlu1 %11526, %v4550_v17  }
 0xba8   :  { %4311 = vperm.xlu0 %11525, %v4212_v19  }
 0xbab   :  { %4644 = vperm.xlu1 %11526, %v4554_v20  }
 0xbac   :  { %4435 = vperm.xlu0 %11525, %v4429_v21  }
 0xbaf   :  { %4649 = vperm.xlu1 %11526, %v4555_v22  }
 0xbb0   :  { %4445 = vperm.xlu0 %11525, %v4431_v23  }
 0xbb3   :  { %4635 = vperm.xlu1 %11526, %v4553_v24  }
 0xbb4   :  { %4625 = vperm.xlu0 %11525, %v4551_v28  }
 0xbb8   :  { %4630 = vperm.xlu0 %11525, %v4552_v29  }
 0xc0e   :  { %v4220_v37 = vpop.xlane.xlu1 %4219 }
 0xc0f   :  { %v4217_v38 = vpop.xlane.xlu0 %4216  ;;  %v4228_v39 = vmul.f32 0.125, %v4220_v37 }
 0xc10   :  { %v4227_v40 = vmul.f32 0.125, %v4217_v38 }
 0xc11   :  { %v4252_v43 = vmul.f32 %v4228_v39, %v4228_v39  ;;  %v4260_v3 = vsub.f32 %v13034_v56, %v4228_v39 }
 0xc12   :  { %v4251_v47 = vmul.f32 %v4227_v40, %v4227_v40  ;;  %v4259_v6 = vsub.f32 %v13036_v32, %v4227_v40 }
 0xc13   :  { %v4240_v41 = vpop.xlane.xlu0 %4239  ;;  %v4223_v42 = vpop.xlane.xlu1 %4222 }
 0xc14   :  { %v4248_v44 = vmul.f32 0.125, %v4240_v41  ;;  %v4229_v45 = vmul.f32 0.125, %v4223_v42 }
 0xc16   :  { %v4256_v46 = vsub.f32 %v4248_v44, %v4252_v43  ;;  %v4253_v25 = vmul.f32 %v4229_v45, %v4229_v45  ;;  %v4261_v10 = vsub.f32 %v13044_v2, %v4229_v45  ;;  %v4426_v44 = vld [vmem:[%s13695_s11 + $0x8] sm:$0xff]  ;;  %v4427_v45 = vld [vmem:[%s13695_s11 + $0x10] sm:$0xff] }
 0xc17   :  { %v4237_v48 = vpop.xlane.xlu0 %4236  ;;  %v4243_v50 = vpop.xlane.xlu1 %4242 }
 0xc18   :  { %v4264_v51 = vadd.f32 1e-05, %v4256_v46  ;;  %v4247_v53 = vmul.f32 0.125, %v4237_v48  ;;  %v4249_v18 = vmul.f32 0.125, %v4243_v50  ;;  %v4428_v46 = vld [vmem:[%s13695_s11 + $0x18] sm:$0xff]  ;;  %v13143_v48 = vmax.f32 %v12881_v49, 0.0 }
 0xc19   :  { %v13146_v50 = vmax.f32 %v12885_v16, 0.0 }
 0xc1a   :  { %11535 = vrsqrt.f32 %v4264_v51  ;;  %v4255_v26 = vsub.f32 %v4247_v53, %v4251_v47  ;;  %v4257_v54 = vsub.f32 %v4249_v18, %v4253_v25  ;;  %v13137_v47 = vmax.f32 %v12883_v52, 0.0 }
 0xc1b   :  { %v4226_v55 = vpop.xlane.xlu0 %4225  ;;  %v4317_v28 = vpop.permute.xlu1 %4316  ;;  %v13153_v52 = vmax.f32 %v12923_v1, 0.0 }
 0xc1c   :  { %v4263_v57 = vadd.f32 1e-05, %v4255_v26  ;;  %v4265_v59 = vadd.f32 1e-05, %v4257_v54  ;;  %v4230_v60 = vmul.f32 0.125, %v4226_v55 }
 0xc1e   :  { %11537 = vrsqrt.f32 %v4263_v57  ;;  %v4254_v62 = vmul.f32 %v4230_v60, %v4230_v60  ;;  %v4262_v56 = vsub.f32 %v13053_v7, %v4230_v60  ;;  %v4425_v7 = vld [vmem:[%s13695_s11] sm:$0xff] }
 0xc1f   :  { %11539 = vrsqrt.f32 %v4265_v59  ;;  %v4246_v61 = vpop.xlane.xlu0 %4245  ;;  %v4441_v25 = vpop.permute.xlu1 %4440 }
 0xc20   :  { %v4250_v63 = vmul.f32 0.125, %v4246_v61 }
 0xc22   :  { %v4258_v0 = vsub.f32 %v4250_v63, %v4254_v62 }
 0xc24   :  { %v11536_v58 = vpop.eup %11535  ;;  %v4266_v4 = vadd.f32 1e-05, %v4258_v0 }
 0xc25   :  { %v4272_v5 = vmul.f32 %v11536_v58, %v4260_v3 }
 0xc26   :  { %11541 = vrsqrt.f32 %v4266_v4 }
 0xc27   :  { %v4296_v9 = vmul.f32 %v4283_v34, %v4272_v5  ;;  %v4312_v19 = vpop.permute.xlu0 %4311  ;;  %v4451_v5 = vpop.permute.xlu1 %4450 }
 0xc28   :  { %v11538_v8 = vpop.eup %11537 }
 0xc29   :  { %v11540_v11 = vpop.eup %11539  ;;  %v4271_v12 = vmul.f32 %v11538_v8, %v4259_v6  ;;  %v4320_v17 = vadd.f32 %v4307_v33, %v4296_v9  ;;  %v4677_v33 = vld [vmem:[%s13696_s20 + $0x8] sm:$0xff] }
 0xc2a   :  { %v4273_v13 = vmul.f32 %v11540_v11, %v4261_v10 }
 0xc2b   :  { %v4295_v14 = vmul.f32 %v4278_v30, %v4271_v12  ;;  %v4324_v24 = vmax.f32 %v4320_v17, 0.0  ;;  %v4436_v51 = vpop.permute.xlu0 %4435  ;;  %v4557_v17 = vld [vmem:[%s13693_s14 + $0x18] sm:$0xff] }
 0xc2c   :  { %v4297_v15 = vmul.f32 %v4288_v36, %v4273_v13  ;;  %v4679_v36 = vld [vmem:[%s13696_s20 + $0x18] sm:$0xff] }
 0xc2d   :  { %v4319_v20 = vadd.f32 %v4302_v31, %v4295_v14  ;;  %v4676_v31 = vld [vmem:[%s13696_s20] sm:$0xff] }
 0xc2e   :  { %v4321_v21 = vadd.f32 %v4312_v19, %v4297_v15  ;;  %v11129_v34 = vpack.c.bf16 %v4677_v33, %v4676_v31  ;;  %v13196_v19 = vld [vmem:[%s13697_s16 + $0x8] sm:$0xff]  ;;  %v13267_v31 = vld [vmem:[%s13697_s16 + $0x58] sm:$0xff]  ;;  %v13273_v33 = vld [vmem:[%s13697_s16 + $0x20] sm:$0xff] }
 0xc2f   :  { %v4323_v22 = vmax.f32 %v4319_v20, 0.0  ;;  %v4446_v57 = vpop.permute.xlu0 %4445  ;;  %v13203_v20 = vld [vmem:[%s13697_s16 + $0x18] sm:$0xff] }
 0xc30   :  { %v11542_v23 = vpop.eup %11541  ;;  %v4325_v27 = vmax.f32 %v4321_v21, 0.0  ;;  %11130 = vmatprep.subr.bf16.mxu1 %v11129_v34  ;;  %v13210_v21 = vld [vmem:[%s13697_s16 + $0x28] sm:$0xff] }
 0xc31   :  { %10011 = vmatprep.mubr.msk.f32.mxu0 %vm4214_vm8, %v4323_v22  ;;  %v4274_v32 = vmul.f32 %v11542_v23, %v4262_v56  ;;  %11132 = vmatpush3.bf16.msra.mxu1 %v11129_v34  ;;  %v4556_v56 = vld [vmem:[%s13693_s14 + $0x10] sm:$0xff]  ;;  %v13220_v22 = vld [vmem:[%s13697_s16 + $0x38] sm:$0xff]  ;;  %v8320_v23 = vld [vmem:[%s13696_s20 + $0x20] sm:$0xff] }
 0xc32   :  { %10012 = vmatmul.mubr.msk.f32.vlgmr.msra.gmra.mrb[22].mxu0 %vm4214_vm8, %v4324_v24  ;;  %v8321_v24 = vld [vmem:[%s13696_s20 + $0x28] sm:$0xff] }
 0xc33   :  { %10014 = vmatprep.mubr.msk.f32.mxu0 %vm4214_vm8, %v4325_v27  ;;  %v4298_v2 = vmul.f32 %v4293_v35, %v4274_v32  ;;  %v4678_v35 = vld [vmem:[%s13696_s20 + $0x10] sm:$0xff]  ;;  %v13231_v27 = vld [vmem:[%s13697_s16] sm:$0xff]  ;;  %v13233_v32 = vpack.c.bf16 %v8321_v24, %v8320_v23 }
 0xc34   :  { %v11133_v37 = vpack.c.bf16 %v4679_v36, %v4678_v35  ;;  %v13288_v35 = vld [vmem:[%s13697_s16 + $0x30] sm:$0xff]  ;;  %v13297_v36 = vld [vmem:[%s13697_s16 + $0x78] sm:$0xff] }
 0xc35   :  { %v4322_v29 = vadd.f32 %v4317_v28, %v4298_v2  ;;  %v13243_v2 = vld [vmem:[%s13697_s16 + $0x48] sm:$0xff]  ;;  %v8322_v28 = vld [vmem:[%s13696_s20 + $0x30] sm:$0xff] }
 0xc36   :  { %11134 = vmatprep.subr.bf16.mxu1 %v11133_v37 }
 0xc37   :  { %v4326_v30 = vmax.f32 %v4322_v29, 0.0  ;;  %11136 = vmatpush3.bf16.msra.mxu1 %v11133_v37  ;;  %v8323_v29 = vld [vmem:[%s13696_s20 + $0x38] sm:$0xff] }
 0xc39   :  { %10015 = vmatmul.mubr.msk.f32.gmra.mrb[24].mxu0 %vm4214_vm8, %v4326_v30  ;;  %v13255_v30 = vld [vmem:[%s13697_s16 + $0x10] sm:$0xff] }
 0xc3a   :  { %10025 = vmatprep.mubr.msk.f32.mxu0 %vm3271_vm3, %v4425_v7  ;;  %v13257_v7 = vpack.c.bf16 %v8323_v29, %v8322_v28 }
 0xd05   :  { %v10013_v38 = vpop.f32.mrb[22].mxu0 }
 0xd06   :  { %v4406_v39 = vpop.f32.mrb[23].mxu0 }
 0xd07   :  { %v11121_v40 = vpack.c.bf16 %v10013_v38, %v4406_v39  ;;  %v13311_v38 = vld [vmem:[%s13697_s16 + $0x88] sm:$0xff]  ;;  %v13316_v39 = vld [vmem:[%s13697_s16 + $0x50] sm:$0xff] }
 0xd09   :  { %11122 = vmatprep.subr.bf16.mxu0 %v11121_v40 }
 0xd0a   :  { %11124 = vmatpush3.bf16.msra.mxu0 %v11121_v40  ;;  %v4675_v40 = vld [vmem:[%s13698_s17 + $0x8] sm:$0xff] }
 0xd0c   :  { %v10016_v41 = vpop.f32.mrb[24].mxu0 }
 0xd0d   :  { %v4416_v42 = vpop.f32.mrb[25].mxu0 }
 0xd0e   :  { %v11125_v43 = vpack.c.bf16 %v10016_v41, %v4416_v42  ;;  %v13328_v41 = vld [vmem:[%s13697_s16 + $0x60] sm:$0xff] }
 0xd0f   :  { %v7820_v42 = vld [vmem:[%s13699_s18] sm:$0xff] }
 0xd10   :  { %11126 = vmatprep.subr.bf16.mxu0 %v11125_v43 }
 0xd11   :  { %11128 = vmatpush3.bf16.msra.mxu0 %v11125_v43  ;;  %v13338_v43 = vld [vmem:[%s13697_s16 + $0x70] sm:$0xff] }
 0xd12   :  { %11138 = vmatprep.subr.bf16.mxu0 %v11129_v34 }
 0xd14   :  { %10026 = vmatmul.mubr.msk.f32.vlgmr.msra.gmra.mrb[26].mxu0 %vm3271_vm3, %v4426_v44  ;;  %v13345_v44 = vld [vmem:[%s13697_s16 + $0x80] sm:$0xff] }
 0xd15   :  { %11140 = vmatpush3.bf16.msra.mxu0 %v11129_v34  ;;  %10028 = vmatprep.mubr.msk.f32.mxu0 %vm3271_vm3, %v4427_v45  ;;  %v13283_v34 = vld [vmem:[%s13697_s16 + $0x68] sm:$0xff]  ;;  %v4674_v45 = vld [vmem:[%s13698_s17] sm:$0xff] }
 0xd16   :  { %11142 = vmatprep.subr.bf16.mxu0 %v11133_v37 }
 0xd18   :  { %10029 = vmatmul.mubr.msk.f32.gmra.mrb[28].mxu0 %vm3271_vm3, %v4428_v46  ;;  %v4621_v46 = vpop.permute.xlu1 %4620 }
 0xd19   :  { %11144 = vmatpush3.bf16.msra.mxu0 %v11133_v37  ;;  %10053 = vmatprep.mubr.msk.f32.mxu0 %vm3271_vm3, %v13137_v47  ;;  %v13302_v37 = vld [vmem:[%s13697_s16 + $0x40] sm:$0xff] }
 0xd1a   :  { %11162 = vmatprep.subr.bf16.mxu0 %v13233_v32 }
 0xd1c   :  { %10054 = vmatmul.mubr.msk.f32.vlgmr.msra.gmra.mrb[30].mxu0 %vm3271_vm3, %v13143_v48 }
 0xd1d   :  { %10056 = vmatprep.mubr.msk.f32.mxu0 %vm3271_vm3, %v13146_v50  ;;  %11164 = vmatpush3.bf16.msra.mxu0 %v13233_v32 }
 0xd1e   :  { %11166 = vmatprep.subr.bf16.mxu0 %v13257_v7 }
 0xd20   :  { %10057 = vmatmul.mubr.msk.f32.gmra.mrb[32].mxu0 %vm3271_vm3, %v13153_v52 }
 0xd21   :  { %11168 = vmatpush3.bf16.msra.mxu0 %v13257_v7 }
 0xd22   :  { %11178 = vmatprep.subr.bf16.mxu0 %v13233_v32 }
 0xde7   :  { %v10027_v53 = vpop.f32.mrb[26].mxu0 }
 0xde8   :  { %v13157_v49 = vadd.f32 %v10027_v53, %v4441_v25  ;;  %v4531_v18 = vpop.f32.mrb[27].mxu0  ;;  %v4626_v53 = vpop.permute.xlu0 %4625 }
 0xde9   :  { %v13159_v16 = vadd.f32 %v4531_v18, %v4436_v51  ;;  %v4645_v51 = vpop.permute.xlu1 %4644 }
 0xdea   :  { %v4561_v26 = vsel %vm3271_vm3, %v13157_v49, 0.0  ;;  %v4575_v55 = vmul.f32 %v13157_v49, %v13157_v49 }
 0xdeb   :  { %v10030_v54 = vpop.f32.mrb[28].mxu0  ;;  %4562 = vadd.xlane.f32.xlu1 %v4561_v26  ;;  %v4558_v1 = vsel %vm3271_vm3, %v13159_v16, 0.0  ;;  %v4574_v0 = vmul.f32 %v13159_v16, %v13159_v16 }
 0xdec   :  { %v4541_v59 = vpop.f32.mrb[29].mxu0  ;;  %4559 = vadd.xlane.f32.xlu0 %v4558_v1  ;;  %v4581_v62 = vsel %vm3271_vm3, %v4575_v55, 0.0  ;;  %v13178_v6 = vadd.f32 %v10030_v54, %v4451_v5  ;;  %v4631_v26 = vpop.permute.xlu0 %4630 }
 0xded   :  { %v13167_v60 = vadd.f32 %v4541_v59, %v4446_v57  ;;  %v4578_v9 = vsel %vm3271_vm3, %v4574_v0, 0.0  ;;  %v4650_v25 = vpop.permute.xlu1 %4649 }
 0xdee   :  { %v4567_v13 = vsel %vm3271_vm3, %v13178_v6, 0.0  ;;  %v4577_v14 = vmul.f32 %v13178_v6, %v13178_v6 }
 0xdef   :  { %v10055_v61 = vpop.f32.mrb[30].mxu0  ;;  %v4564_v63 = vsel %vm3271_vm3, %v13167_v60, 0.0  ;;  %v4576_v3 = vmul.f32 %v13167_v60, %v13167_v60 }
 0xdf0   :  { %v4857_v58 = vpop.f32.mrb[31].mxu0  ;;  %4582 = vadd.xlane.f32.xlu0 %v4581_v62  ;;  %4565 = vadd.xlane.f32.xlu1 %v4564_v63  ;;  %v4587_v15 = vsel %vm3271_vm3, %v4577_v14, 0.0 }
 0xdf1   :  { %v13176_v4 = vpack.c.bf16 %v10055_v61, %v4857_v58  ;;  %v4584_v10 = vsel %vm3271_vm3, %v4576_v3, 0.0  ;;  %v4636_v18 = vpop.permute.xlu1 %4635 }
 0xdf3   :  { %v10058_v8 = vpop.f32.mrb[32].mxu0  ;;  %11146 = vmatprep.subr.bf16.mxu1 %v13176_v4 }
 0xdf4   :  { %v4867_v11 = vpop.f32.mrb[33].mxu0  ;;  %4579 = vadd.xlane.f32.xlu0 %v4578_v9  ;;  %4585 = vadd.xlane.f32.xlu1 %v4584_v10 }
 0xdf5   :  { %v13183_v12 = vpack.c.bf16 %v10058_v8, %v4867_v11 }
 0xdf8   :  { %4568 = vadd.xlane.f32.xlu0 %v4567_v13 }
 0xdfc   :  { %4588 = vadd.xlane.f32.xlu0 %v4587_v15 }
 0xe05   :  { %4659 = vperm.xlu1 %11526, %v4557_v17  }
 0xe09   :  { %4880 = vrot.lane.b32.xlu1 %v13196_v19, %s11556_s2 }
 0xe0d   :  { %5303 = vrot.lane.b32.xlu1 %v13203_v20, %s11556_s2 }
 0xe11   :  { %5649 = vrot.lane.b32.xlu1 %v13210_v21, %s11556_s2 }
 0xe12   :  { %4654 = vperm.xlu0 %11525, %v4556_v56  }
 0xe15   :  { %5995 = vrot.lane.b32.xlu1 %v13220_v22, %s11556_s2 }
 0xe16   :  { %4878 = vrot.lane.b32.xlu0 %v13231_v27, %s11556_s2 }
 0xe19   :  { %6341 = vrot.lane.b32.xlu1 %v13243_v2, %s11556_s2 }
 0xe1a   :  { %5301 = vrot.lane.b32.xlu0 %v13255_v30, %s11556_s2 }
 0xe1d   :  { %6687 = vrot.lane.b32.xlu1 %v13267_v31, %s11556_s2 }
 0xe1e   :  { %5647 = vrot.lane.b32.xlu0 %v13273_v33, %s11556_s2 }
 0xe21   :  { %7033 = vrot.lane.b32.xlu1 %v13283_v34, %s11556_s2 }
 0xe22   :  { %5993 = vrot.lane.b32.xlu0 %v13288_v35, %s11556_s2 }
 0xe25   :  { %7379 = vrot.lane.b32.xlu1 %v13297_v36, %s11556_s2 }
 0xe26   :  { %6339 = vrot.lane.b32.xlu0 %v13302_v37, %s11556_s2 }
 0xe29   :  { %7725 = vrot.lane.b32.xlu1 %v13311_v38, %s11556_s2 }
 0xe2a   :  { %6685 = vrot.lane.b32.xlu0 %v13316_v39, %s11556_s2 }
 0xe2d   :  { %7815 = vperm.xlu1 %11526, %v4675_v40  }
 0xe2e   :  { %7031 = vrot.lane.b32.xlu0 %v13328_v41, %s11556_s2 }
 0xe31   :  { %7852 = vperm.xlu1 %11526, %v7820_v42  }
 0xe32   :  { %7377 = vrot.lane.b32.xlu0 %v13338_v43, %s11556_s2 }
 0xe36   :  { %7723 = vrot.lane.b32.xlu0 %v13345_v44, %s11556_s2 }
 0xe3a   :  { %7810 = vperm.xlu0 %11525, %v4674_v45  }
 0xe78   :  { %v4563_v54 = vpop.xlane.xlu1 %4562 }
 0xe79   :  { %v4560_v1 = vpop.xlane.xlu0 %4559  ;;  %v4571_v55 = vmul.f32 0.03125, %v4563_v54 }
 0xe7a   :  { %v4570_v57 = vmul.f32 0.03125, %v4560_v1 }
 0xe7b   :  { %v4595_v62 = vmul.f32 %v4571_v55, %v4571_v55  ;;  %v4603_v45 = vsub.f32 %v13157_v49, %v4571_v55 }
 0xe7c   :  { %v4594_v58 = vmul.f32 %v4570_v57, %v4570_v57 }
 0xe7d   :  { %v4583_v59 = vpop.xlane.xlu0 %4582  ;;  %v4566_v61 = vpop.xlane.xlu1 %4565 }
 0xe7e   :  { %v4591_v63 = vmul.f32 0.03125, %v4583_v59  ;;  %v4572_v0 = vmul.f32 0.03125, %v4566_v61  ;;  %v4602_v61 = vsub.f32 %v13159_v16, %v4570_v57  ;;  %v8341_v57 = vld [vmem:[%s13696_s20 + $0x58] sm:$0xff] }
 0xe80   :  { %v4599_v3 = vsub.f32 %v4591_v63, %v4595_v62  ;;  %v4596_v10 = vmul.f32 %v4572_v0, %v4572_v0 }
 0xe81   :  { %v4580_v5 = vpop.xlane.xlu0 %4579  ;;  %v4586_v8 = vpop.xlane.xlu1 %4585 }
 0xe82   :  { %v4607_v9 = vadd.f32 1e-05, %v4599_v3  ;;  %v4590_v11 = vmul.f32 0.03125, %v4580_v5  ;;  %v4592_v13 = vmul.f32 0.03125, %v4586_v8  ;;  %v4604_v3 = vsub.f32 %v13167_v60, %v4572_v0 }
 0xe84   :  { %11543 = vrsqrt.f32 %v4607_v9  ;;  %v4598_v14 = vsub.f32 %v4590_v11, %v4594_v58  ;;  %v4600_v15 = vsub.f32 %v4592_v13, %v4596_v10 }
 0xe85   :  { %v4569_v17 = vpop.xlane.xlu0 %4568 }
 0xe86   :  { %v4606_v56 = vadd.f32 1e-05, %v4598_v14  ;;  %v4608_v23 = vadd.f32 1e-05, %v4600_v15  ;;  %v4573_v24 = vmul.f32 0.03125, %v4569_v17 }
 0xe88   :  { %11545 = vrsqrt.f32 %v4606_v56  ;;  %v4597_v29 = vmul.f32 %v4573_v24, %v4573_v24  ;;  %v4605_v55 = vsub.f32 %v13178_v6, %v4573_v24  ;;  %v4660_v6 = vpop.permute.xlu1 %4659  ;;  %v8358_v24 = vld [vmem:[%s13696_s20 + $0x70] sm:$0xff] }
 0xe89   :  { %11547 = vrsqrt.f32 %v4608_v23  ;;  %v4589_v28 = vpop.xlane.xlu0 %4588  ;;  %v8357_v23 = vld [vmem:[%s13696_s20 + $0x68] sm:$0xff] }
 0xe8a   :  { %v4593_v40 = vmul.f32 0.03125, %v4589_v28  ;;  %v8359_v28 = vld [vmem:[%s13696_s20 + $0x78] sm:$0xff] }
 0xe8c   :  { %v4601_v42 = vsub.f32 %v4593_v40, %v4597_v29  ;;  %v4881_v0 = vpop.permute.xlu1 %4880  ;;  %v11229_v29 = vpack.c.bf16 %v8359_v28, %v8358_v24  ;;  %v8374_v40 = vld [vmem:[%s13696_s20 + $0x80] sm:$0xff] }
 0xe8e   :  { %v11544_v54 = vpop.eup %11543  ;;  %v4609_v1 = vadd.f32 1e-05, %v4601_v42  ;;  %v8375_v42 = vld [vmem:[%s13696_s20 + $0x88] sm:$0xff] }
 0xe8f   :  { %v4615_v59 = vmul.f32 %v11544_v54, %v4603_v45  ;;  %v11257_v45 = vpack.c.bf16 %v8375_v42, %v8374_v40  ;;  %v8376_v54 = vld [vmem:[%s13696_s20 + $0x90] sm:$0xff] }
 0xe90   :  { %11549 = vrsqrt.f32 %v4609_v1  ;;  %v8377_v1 = vld [vmem:[%s13696_s20 + $0x98] sm:$0xff] }
 0xe91   :  { %v4639_v63 = vmul.f32 %v4626_v53, %v4615_v59  ;;  %v4655_v14 = vpop.permute.xlu0 %4654  ;;  %v11261_v59 = vpack.c.bf16 %v8377_v1, %v8376_v54 }
 0xe92   :  { %v11546_v62 = vpop.eup %11545 }
 0xe93   :  { %v11548_v58 = vpop.eup %11547  ;;  %v4614_v5 = vmul.f32 %v11546_v62, %v4602_v61  ;;  %v4663_v10 = vadd.f32 %v4650_v25, %v4639_v63  ;;  %v8392_v61 = vld [vmem:[%s13696_s20 + $0xa0] sm:$0xff]  ;;  %v8393_v62 = vld [vmem:[%s13696_s20 + $0xa8] sm:$0xff] }
 0xe94   :  { %v4616_v8 = vmul.f32 %v11548_v58, %v4604_v3  ;;  %v11289_v63 = vpack.c.bf16 %v8393_v62, %v8392_v61  ;;  %v8394_v3 = vld [vmem:[%s13696_s20 + $0xb0] sm:$0xff]  ;;  %v8395_v58 = vld [vmem:[%s13696_s20 + $0xb8] sm:$0xff] }
 0xe95   :  { %v4638_v9 = vmul.f32 %v4621_v46, %v4614_v5  ;;  %v13358_v56 = vmax.f32 %v4663_v10, 0.0  ;;  %v8338_v46 = vld [vmem:[%s13696_s20 + $0x40] sm:$0xff]  ;;  %v11293_v5 = vpack.c.bf16 %v8395_v58, %v8394_v3 }
 0xe96   :  { %v4640_v11 = vmul.f32 %v4631_v26, %v4616_v8  ;;  %v8340_v26 = vld [vmem:[%s13696_s20 + $0x50] sm:$0xff]  ;;  %v8410_v8 = vld [vmem:[%s13696_s20 + $0xc0] sm:$0xff] }
 0xe97   :  { %v4662_v13 = vadd.f32 %v4645_v51, %v4638_v9  ;;  %v8339_v51 = vld [vmem:[%s13696_s20 + $0x48] sm:$0xff] }
 0xe98   :  { %v4664_v15 = vadd.f32 %v4655_v14, %v4640_v11  ;;  %v8411_v9 = vld [vmem:[%s13696_s20 + $0xc8] sm:$0xff]  ;;  %v8412_v11 = vld [vmem:[%s13696_s20 + $0xd0] sm:$0xff] }
 0xe99   :  { %v13355_v49 = vmax.f32 %v4662_v13, 0.0  ;;  %v11321_v10 = vpack.c.bf16 %v8411_v9, %v8410_v8  ;;  %v8413_v13 = vld [vmem:[%s13696_s20 + $0xd8] sm:$0xff] }
 0xe9a   :  { %v11550_v17 = vpop.eup %11549  ;;  %v13360_v53 = vmax.f32 %v4664_v15, 0.0  ;;  %v11325_v14 = vpack.c.bf16 %v8413_v13, %v8412_v11  ;;  %v8428_v15 = vld [vmem:[%s13696_s20 + $0xe0] sm:$0xff]  ;;  %v5304_v13 = vpop.permute.xlu1 %5303 }
 0xe9b   :  { %v4617_v16 = vmul.f32 %v11550_v17, %v4605_v55  ;;  %10039 = vmatprep.mubr.msk.f32.mxu1 %vm3271_vm3, %v13355_v49  ;;  %10089 = vmatprep.mubr.msk.f32.mxu0 %vm3271_vm3, %v13355_v49  ;;  %v8429_v55 = vld [vmem:[%s13696_s20 + $0xe8] sm:$0xff] }
 0xe9c   :  { %10040 = vmatmul.mubr.msk.f32.vlgmr.msra.gmra.mrb[34].mxu1 %vm3271_vm3, %v13358_v56  ;;  %10090 = vmatmul.mubr.msk.f32.vlgmr.msra.gmra.mrb[34].mxu0 %vm3271_vm3, %v13358_v56 }
 0xe9d   :  { %v4641_v60 = vmul.f32 %v4636_v18, %v4617_v16  ;;  %11148 = vmatpush3.bf16.msra.mxu1 %v13176_v4  ;;  %10042 = vmatprep.mubr.msk.f32.mxu1 %vm3271_vm3, %v13360_v53  ;;  %v11193_v18 = vpack.c.bf16 %v8339_v51, %v8338_v46  ;;  %v11353_v16 = vpack.c.bf16 %v8429_v55, %v8428_v15 }
 0xe9e   :  { %11150 = vmatprep.subr.bf16.mxu1 %v13183_v12  ;;  %10092 = vmatprep.mubr.msk.f32.mxu0 %vm3271_vm3, %v13360_v53 }
 0xe9f   :  { %v4665_v25 = vadd.f32 %v4660_v6, %v4641_v60  ;;  %11180 = vmatpush3.bf16.msra.mxu0 %v13233_v32  ;;  %v4879_v32 = vpop.permute.xlu0 %4878  ;;  %v8430_v60 = vld [vmem:[%s13696_s20 + $0xf0] sm:$0xff]  ;;  %v8431_v6 = vld [vmem:[%s13696_s20 + $0xf8] sm:$0xff] }
 0xea0   :  { %11182 = vmatprep.subr.bf16.mxu0 %v13257_v7  ;;  %v11357_v46 = vpack.c.bf16 %v8431_v6, %v8430_v60 }
 0xea1   :  { %v13384_v4 = vmax.f32 %v4665_v25, 0.0  ;;  %11152 = vmatpush3.bf16.msra.mxu1 %v13183_v12  ;;  %v11197_v12 = vpack.c.bf16 %v8341_v57, %v8340_v26  ;;  %v8447_v26 = vld [vmem:[%s13696_s20 + $0x108] sm:$0xff] }
 0xea3   :  { %10043 = vmatmul.mubr.msk.f32.gmra.mrb[36].mxu1 %vm3271_vm3, %v13384_v4  ;;  %10093 = vmatmul.mubr.msk.f32.gmra.mrb[36].mxu0 %vm3271_vm3, %v13384_v4  ;;  %v13534_v17 = vpop.permute.xlu0 %5301 }
 0xea4   :  { %11184 = vmatpush3.bf16.msra.mxu0 %v13257_v7  ;;  %10114 = vmatprep.mubr.msk.f32.mxu0 %vm3271_vm3, %v13137_v47  ;;  %v8356_v7 = vld [vmem:[%s13696_s20 + $0x60] sm:$0xff] }
 0xea5   :  { %11194 = vmatprep.subr.bf16.mxu0 %v11193_v18  ;;  %10067 = vmatprep.mubr.msk.f32.mxu1 %vm3271_vm3, %v4879_v32  ;;  %v8448_v32 = vld [vmem:[%s13696_s20 + $0x110] sm:$0xff] }
 0xea7   :  { %10115 = vmatmul.mubr.msk.f32.vlgmr.msra.gmra.mrb[38].mxu0 %vm3271_vm3, %v13143_v48  ;;  %10068 = vmatmul.mubr.msk.f32.vlgmr.msra.gmra.mrb[38].mxu1 %vm3271_vm3, %v4881_v0  ;;  %v13546_v51 = vpop.permute.xlu0 %5647 }
 0xea8   :  { %10117 = vmatprep.mubr.msk.f32.mxu0 %vm3271_vm3, %v13146_v50  ;;  %11196 = vmatpush3.bf16.msra.mxu0 %v11193_v18 }
 0xea9   :  { %11198 = vmatprep.subr.bf16.mxu0 %v11197_v12  ;;  %10078 = vmatprep.mubr.msk.f32.mxu1 %vm3271_vm3, %v13231_v27  ;;  %v11225_v27 = vpack.c.bf16 %v8357_v23, %v8356_v7 }
 0xeab   :  { %10118 = vmatmul.mubr.msk.f32.gmra.mrb[40].mxu0 %vm3271_vm3, %v13153_v52  ;;  %v13556_v25 = vpop.permute.xlu0 %5993 }
 0xeac   :  { %11200 = vmatpush3.bf16.msra.mxu0 %v11197_v12  ;;  %10139 = vmatprep.mubr.msk.f32.mxu0 %vm3271_vm3, %v13355_v49 }
 0xead   :  { %11210 = vmatprep.subr.bf16.mxu0 %v11193_v18 }
 0xeaf   :  { %10140 = vmatmul.mubr.msk.f32.vlgmr.msra.gmra.mrb[42].mxu0 %vm3271_vm3, %v13358_v56  ;;  %v13574_v0 = vpop.permute.xlu0 %6339 }
 0xeb0   :  { %10142 = vmatprep.mubr.msk.f32.mxu0 %vm3271_vm3, %v13360_v53  ;;  %11212 = vmatpush3.bf16.msra.mxu0 %v11193_v18  ;;  %v8446_v18 = vld [vmem:[%s13696_s20 + $0x100] sm:$0xff] }
 0xeb1   :  { %11214 = vmatprep.subr.bf16.mxu0 %v11197_v12  ;;  %v11385_v57 = vpack.c.bf16 %v8447_v26, %v8446_v18 }
 0xeb3   :  { %10143 = vmatmul.mubr.msk.f32.gmra.mrb[44].mxu0 %vm3271_vm3, %v13384_v4  ;;  %v13584_v23 = vpop.permute.xlu0 %6685 }
 0xeb4   :  { %11216 = vmatpush3.bf16.msra.mxu0 %v11197_v12  ;;  %10164 = vmatprep.mubr.msk.f32.mxu0 %vm3271_vm3, %v13137_v47  ;;  %v8449_v12 = vld [vmem:[%s13696_s20 + $0x118] sm:$0xff] }
 0xeb5   :  { %11226 = vmatprep.subr.bf16.mxu0 %v11225_v27  ;;  %v11389_v7 = vpack.c.bf16 %v8449_v12, %v8448_v32 }
 0xeb7   :  { %10165 = vmatmul.mubr.msk.f32.vlgmr.msra.gmra.mrb[46].mxu0 %vm3271_vm3, %v13143_v48 }
 0xeb8   :  { %10167 = vmatprep.mubr.msk.f32.mxu0 %vm3271_vm3, %v13146_v50  ;;  %11228 = vmatpush3.bf16.msra.mxu0 %v11225_v27 }
 0xeb9   :  { %11230 = vmatprep.subr.bf16.mxu0 %v11229_v29 }
 0xebb   :  { %10168 = vmatmul.mubr.msk.f32.gmra.mrb[48].mxu0 %vm3271_vm3, %v13153_v52 }
 0xebc   :  { %11232 = vmatpush3.bf16.msra.mxu0 %v11229_v29  ;;  %10189 = vmatprep.mubr.msk.f32.mxu0 %vm3271_vm3, %v13355_v49 }
 0xebd   :  { %11242 = vmatprep.subr.bf16.mxu0 %v11225_v27 }
 0xebf   :  { %10190 = vmatmul.mubr.msk.f32.vlgmr.msra.gmra.mrb[50].mxu0 %vm3271_vm3, %v13358_v56 }
 0xec0   :  { %10192 = vmatprep.mubr.msk.f32.mxu0 %vm3271_vm3, %v13360_v53  ;;  %11244 = vmatpush3.bf16.msra.mxu0 %v11225_v27  ;;  %v13590_v27 = vpop.permute.xlu0 %7031 }
 0xec1   :  { %11246 = vmatprep.subr.bf16.mxu0 %v11229_v29 }
 0xec3   :  { %10193 = vmatmul.mubr.msk.f32.gmra.mrb[52].mxu0 %vm3271_vm3, %v13384_v4 }
 0xec4   :  { %11248 = vmatpush3.bf16.msra.mxu0 %v11229_v29  ;;  %10214 = vmatprep.mubr.msk.f32.mxu0 %vm3271_vm3, %v13137_v47  ;;  %v13600_v24 = vpop.permute.xlu0 %7377 }
 0xec5   :  { %11258 = vmatprep.subr.bf16.mxu0 %v11257_v45 }
 0xec7   :  { %10215 = vmatmul.mubr.msk.f32.vlgmr.msra.gmra.mrb[54].mxu0 %vm3271_vm3, %v13143_v48 }
 0xec8   :  { %10217 = vmatprep.mubr.msk.f32.mxu0 %vm3271_vm3, %v13146_v50  ;;  %11260 = vmatpush3.bf16.msra.mxu0 %v11257_v45 }
 0xec9   :  { %11262 = vmatprep.subr.bf16.mxu0 %v11261_v59 }
 0xecb   :  { %10218 = vmatmul.mubr.msk.f32.gmra.mrb[56].mxu0 %vm3271_vm3, %v13153_v52 }
 0xecc   :  { %11264 = vmatpush3.bf16.msra.mxu0 %v11261_v59  ;;  %10239 = vmatprep.mubr.msk.f32.mxu0 %vm3271_vm3, %v13355_v49 }
 0xecd   :  { %11274 = vmatprep.subr.bf16.mxu0 %v11257_v45 }
 0xecf   :  { %10240 = vmatmul.mubr.msk.f32.vlgmr.msra.gmra.mrb[58].mxu0 %vm3271_vm3, %v13358_v56 }
 0xed0   :  { %10242 = vmatprep.mubr.msk.f32.mxu0 %vm3271_vm3, %v13360_v53  ;;  %11276 = vmatpush3.bf16.msra.mxu0 %v11257_v45 }
 0xed1   :  { %11278 = vmatprep.subr.bf16.mxu0 %v11261_v59 }
 0xed3   :  { %10243 = vmatmul.mubr.msk.f32.gmra.mrb[60].mxu0 %vm3271_vm3, %v13384_v4 }
 0xed4   :  { %11280 = vmatpush3.bf16.msra.mxu0 %v11261_v59  ;;  %10264 = vmatprep.mubr.msk.f32.mxu0 %vm3271_vm3, %v13137_v47 }
 0xed5   :  { %11290 = vmatprep.subr.bf16.mxu0 %v11289_v63 }
 0xed7   :  { %10265 = vmatmul.mubr.msk.f32.vlgmr.msra.gmra.mrb[62].mxu0 %vm3271_vm3, %v13143_v48 }
 0xed8   :  { %10267 = vmatprep.mubr.msk.f32.mxu0 %vm3271_vm3, %v13146_v50  ;;  %11292 = vmatpush3.bf16.msra.mxu0 %v11289_v63 }
 0xed9   :  { %11294 = vmatprep.subr.bf16.mxu0 %v11293_v5 }
 0xedb   :  { %10268 = vmatmul.mubr.msk.f32.gmra.mrb[64].mxu0 %vm3271_vm3, %v13153_v52 }
 0xedc   :  { %11296 = vmatpush3.bf16.msra.mxu0 %v11293_v5  ;;  %10289 = vmatprep.mubr.msk.f32.mxu0 %vm3271_vm3, %v13355_v49 }
 0xedd   :  { %11306 = vmatprep.subr.bf16.mxu0 %v11289_v63 }
 0xedf   :  { %10290 = vmatmul.mubr.msk.f32.vlgmr.msra.gmra.mrb[66].mxu0 %vm3271_vm3, %v13358_v56 }
 0xee0   :  { %10292 = vmatprep.mubr.msk.f32.mxu0 %vm3271_vm3, %v13360_v53  ;;  %11308 = vmatpush3.bf16.msra.mxu0 %v11289_v63 }
 0xee1   :  { %11310 = vmatprep.subr.bf16.mxu0 %v11293_v5 }
 0xee3   :  { %10293 = vmatmul.mubr.msk.f32.gmra.mrb[68].mxu0 %vm3271_vm3, %v13384_v4 }
 0xee4   :  { %11312 = vmatpush3.bf16.msra.mxu0 %v11293_v5  ;;  %10314 = vmatprep.mubr.msk.f32.mxu0 %vm3271_vm3, %v13137_v47 }
 0xee5   :  { %11322 = vmatprep.subr.bf16.mxu0 %v11321_v10 }
 0xee7   :  { %10315 = vmatmul.mubr.msk.f32.vlgmr.msra.gmra.mrb[70].mxu0 %vm3271_vm3, %v13143_v48 }
 0xee8   :  { %10317 = vmatprep.mubr.msk.f32.mxu0 %vm3271_vm3, %v13146_v50  ;;  %11324 = vmatpush3.bf16.msra.mxu0 %v11321_v10 }
 0xee9   :  { %11326 = vmatprep.subr.bf16.mxu0 %v11325_v14 }
 0xeeb   :  { %10318 = vmatmul.mubr.msk.f32.gmra.mrb[72].mxu0 %vm3271_vm3, %v13153_v52 }
 0xeec   :  { %11328 = vmatpush3.bf16.msra.mxu0 %v11325_v14  ;;  %10339 = vmatprep.mubr.msk.f32.mxu0 %vm3271_vm3, %v13355_v49 }
 0xeed   :  { %11338 = vmatprep.subr.bf16.mxu0 %v11321_v10 }
 0xeef   :  { %10340 = vmatmul.mubr.msk.f32.vlgmr.msra.gmra.mrb[74].mxu0 %vm3271_vm3, %v13358_v56 }
 0xef0   :  { %10342 = vmatprep.mubr.msk.f32.mxu0 %vm3271_vm3, %v13360_v53  ;;  %11340 = vmatpush3.bf16.msra.mxu0 %v11321_v10 }
 0xef1   :  { %11342 = vmatprep.subr.bf16.mxu0 %v11325_v14 }
 0xef3   :  { %10343 = vmatmul.mubr.msk.f32.gmra.mrb[76].mxu0 %vm3271_vm3, %v13384_v4 }
 0xef4   :  { %11344 = vmatpush3.bf16.msra.mxu0 %v11325_v14  ;;  %10364 = vmatprep.mubr.msk.f32.mxu0 %vm3271_vm3, %v13137_v47 }
 0xef5   :  { %11354 = vmatprep.subr.bf16.mxu0 %v11353_v16 }
 0xef7   :  { %10365 = vmatmul.mubr.msk.f32.vlgmr.msra.gmra.mrb[78].mxu0 %vm3271_vm3, %v13143_v48 }
 0xef8   :  { %10367 = vmatprep.mubr.msk.f32.mxu0 %vm3271_vm3, %v13146_v50  ;;  %11356 = vmatpush3.bf16.msra.mxu0 %v11353_v16 }
 0xef9   :  { %11358 = vmatprep.subr.bf16.mxu0 %v11357_v46 }
 0xefb   :  { %10368 = vmatmul.mubr.msk.f32.gmra.mrb[80].mxu0 %vm3271_vm3, %v13153_v52 }
 0xefc   :  { %11360 = vmatpush3.bf16.msra.mxu0 %v11357_v46  ;;  %10389 = vmatprep.mubr.msk.f32.mxu0 %vm3271_vm3, %v13355_v49 }
 0xefd   :  { %11370 = vmatprep.subr.bf16.mxu0 %v11353_v16 }
 0xeff   :  { %10390 = vmatmul.mubr.msk.f32.vlgmr.msra.gmra.mrb[82].mxu0 %vm3271_vm3, %v13358_v56 }
 0xf00   :  { %10392 = vmatprep.mubr.msk.f32.mxu0 %vm3271_vm3, %v13360_v53  ;;  %11372 = vmatpush3.bf16.msra.mxu0 %v11353_v16 }
 0xf01   :  { %11374 = vmatprep.subr.bf16.mxu0 %v11357_v46 }
 0xf03   :  { %10393 = vmatmul.mubr.msk.f32.gmra.mrb[84].mxu0 %vm3271_vm3, %v13384_v4 }
 0xf04   :  { %11376 = vmatpush3.bf16.msra.mxu0 %v11357_v46  ;;  %10414 = vmatprep.mubr.msk.f32.mxu0 %vm3271_vm3, %v13137_v47 }
 0xf05   :  { %11386 = vmatprep.subr.bf16.mxu0 %v11385_v57 }
 0xf07   :  { %10415 = vmatmul.mubr.msk.f32.vlgmr.msra.gmra.mrb[86].mxu0 %vm3271_vm3, %v13143_v48 }
 0xf08   :  { %10417 = vmatprep.mubr.msk.f32.mxu0 %vm3271_vm3, %v13146_v50  ;;  %11388 = vmatpush3.bf16.msra.mxu0 %v11385_v57 }
 0xf09   :  { %11390 = vmatprep.subr.bf16.mxu0 %v11389_v7 }
 0xf0b   :  { %10418 = vmatmul.mubr.msk.f32.gmra.mrb[88].mxu0 %vm3271_vm3, %v13153_v52 }
 0xf0c   :  { %11392 = vmatpush3.bf16.msra.mxu0 %v11389_v7  ;;  %10439 = vmatprep.mubr.msk.f32.mxu0 %vm3271_vm3, %v13355_v49  ;;  %v7724_v49 = vpop.permute.xlu0 %7723 }
 0xf0d   :  { %11402 = vmatprep.subr.bf16.mxu0 %v11385_v57 }
 0xf0f   :  { %10440 = vmatmul.mubr.msk.f32.vlgmr.msra.gmra.mrb[90].mxu0 %vm3271_vm3, %v13358_v56 }
 0xf10   :  { %10442 = vmatprep.mubr.msk.f32.mxu0 %vm3271_vm3, %v13360_v53  ;;  %11404 = vmatpush3.bf16.msra.mxu0 %v11385_v57  ;;  %v5650_v57 = vpop.permute.xlu1 %5649 }
 0xf11   :  { %11406 = vmatprep.subr.bf16.mxu0 %v11389_v7 }
 0xf13   :  { %10443 = vmatmul.mubr.msk.f32.gmra.mrb[92].mxu0 %vm3271_vm3, %v13384_v4 }
 0xf14   :  { %11408 = vmatpush3.bf16.msra.mxu0 %v11389_v7  ;;  %10464 = vmatprep.mubr.msk.f32.mxu0 %vm3271_vm3, %v13137_v47 }
 0xf17   :  { %10465 = vmatmul.mubr.msk.f32.vlgmr.msra.gmra.mrb[94].mxu0 %vm3271_vm3, %v13143_v48 }
 0xf18   :  { %10467 = vmatprep.mubr.msk.f32.mxu0 %vm3271_vm3, %v13146_v50 }
 0xf1b   :  { %10468 = vmatmul.mubr.msk.f32.gmra.mrb[96].mxu0 %vm3271_vm3, %v13153_v52 }
 0xf1c   :  { %10478 = vmatprep.mubr.msk.f32.mxu0 %vm3271_vm3, %v7724_v49 }
 0xf6f   :  { %v10041_v56 = vpop.f32.mrb[34].mxu1  ;;  %v10091_v53 = vpop.f32.mrb[34].mxu0 }
 0xf70   :  { %v4760_v4 = vpop.f32.mrb[35].mxu1  ;;  %v5114_v28 = vpop.f32.mrb[35].mxu0 }
 0xf71   :  { %v11153_v29 = vpack.c.bf16 %v10041_v56, %v4760_v4  ;;  %v11169_v47 = vpack.c.bf16 %v10091_v53, %v5114_v28 }
 0xf73   :  { %11154 = vmatprep.subr.bf16.mxu1 %v11153_v29 }
 0xf74   :  { %11156 = vmatpush3.bf16.msra.mxu1 %v11153_v29 }
 0xf76   :  { %v10044_v40 = vpop.f32.mrb[36].mxu1  ;;  %v10094_v42 = vpop.f32.mrb[36].mxu0 }
 0xf77   :  { %v4770_v48 = vpop.f32.mrb[37].mxu1  ;;  %v5124_v45 = vpop.f32.mrb[37].mxu0 }
 0xf78   :  { %v11157_v54 = vpack.c.bf16 %v10044_v40, %v4770_v48  ;;  %v11173_v50 = vpack.c.bf16 %v10094_v42, %v5124_v45 }
 0xf7a   :  { %11158 = vmatprep.subr.bf16.mxu1 %v11157_v54  ;;  %v10116_v1 = vpop.f32.mrb[38].mxu0 }
 0xf7b   :  { %11160 = vmatpush3.bf16.msra.mxu1 %v11157_v54  ;;  %v5282_v52 = vpop.f32.mrb[39].mxu0 }
 0xf7c   :  { %v11185_v59 = vpack.c.bf16 %v10116_v1, %v5282_v52  ;;  %11170 = vmatprep.subr.bf16.mxu1 %v11169_v47 }
 0xf7e   :  { %10079 = vmatmul.mubr.msk.f32.vlgmr.msra.gmra.mrb[38].mxu1 %vm3271_vm3, %v13196_v19  ;;  %v10119_v61 = vpop.f32.mrb[40].mxu0 }
 0xf7f   :  { %11172 = vmatpush3.bf16.msra.mxu1 %v11169_v47  ;;  %v5292_v62 = vpop.f32.mrb[41].mxu0  ;;  %10103 = vmatprep.mubr.msk.f32.mxu1 %vm3271_vm3, %v13255_v30  ;;  %v5996_v47 = vpop.permute.xlu1 %5995 }
 0xf80   :  { %v11189_v63 = vpack.c.bf16 %v10119_v61, %v5292_v62  ;;  %11174 = vmatprep.subr.bf16.mxu1 %v11173_v50 }
 0xf82   :  { %v10141_v3 = vpop.f32.mrb[42].mxu0 }
 0xf83   :  { %11176 = vmatpush3.bf16.msra.mxu1 %v11173_v50  ;;  %v5460_v58 = vpop.f32.mrb[43].mxu0  ;;  %v6342_v61 = vpop.permute.xlu1 %6341 }
 0xf84   :  { %v11201_v5 = vpack.c.bf16 %v10141_v3, %v5460_v58  ;;  %11186 = vmatprep.subr.bf16.mxu1 %v11185_v59 }
 0xf86   :  { %10104 = vmatmul.mubr.msk.f32.vlgmr.msra.gmra.mrb[38].mxu1 %vm3271_vm3, %v13203_v20  ;;  %v10144_v8 = vpop.f32.mrb[44].mxu0 }
 0xf87   :  { %11188 = vmatpush3.bf16.msra.mxu1 %v11185_v59  ;;  %v5470_v9 = vpop.f32.mrb[45].mxu0  ;;  %10128 = vmatprep.mubr.msk.f32.mxu1 %vm3271_vm3, %v13534_v17 }
 0xf88   :  { %v11205_v19 = vpack.c.bf16 %v10144_v8, %v5470_v9  ;;  %11190 = vmatprep.subr.bf16.mxu1 %v11189_v63 }
 0xf8a   :  { %v10166_v10 = vpop.f32.mrb[46].mxu0 }
 0xf8b   :  { %11192 = vmatpush3.bf16.msra.mxu1 %v11189_v63  ;;  %v5628_v30 = vpop.f32.mrb[47].mxu0 }
 0xf8c   :  { %v11217_v11 = vpack.c.bf16 %v10166_v10, %v5628_v30  ;;  %11202 = vmatprep.subr.bf16.mxu1 %v11201_v5  ;;  %v6688_v30 = vpop.permute.xlu1 %6687 }
 0xf8e   :  { %10129 = vmatmul.mubr.msk.f32.vlgmr.msra.gmra.mrb[38].mxu1 %vm3271_vm3, %v5304_v13  ;;  %v10169_v14 = vpop.f32.mrb[48].mxu0 }
 0xf8f   :  { %11204 = vmatpush3.bf16.msra.mxu1 %v11201_v5  ;;  %v5638_v15 = vpop.f32.mrb[49].mxu0  ;;  %10153 = vmatprep.mubr.msk.f32.mxu1 %vm3271_vm3, %v13273_v33 }
 0xf90   :  { %v11221_v20 = vpack.c.bf16 %v10169_v14, %v5638_v15  ;;  %11206 = vmatprep.subr.bf16.mxu1 %v11205_v19 }
 0xf92   :  { %v10191_v55 = vpop.f32.mrb[50].mxu0 }
 0xf93   :  { %11208 = vmatpush3.bf16.msra.mxu1 %v11205_v19  ;;  %v5806_v17 = vpop.f32.mrb[51].mxu0 }
 0xf94   :  { %v11233_v16 = vpack.c.bf16 %v10191_v55, %v5806_v17  ;;  %11218 = vmatprep.subr.bf16.mxu1 %v11217_v11 }
 0xf96   :  { %10154 = vmatmul.mubr.msk.f32.vlgmr.msra.gmra.mrb[38].mxu1 %vm3271_vm3, %v13210_v21  ;;  %v10194_v60 = vpop.f32.mrb[52].mxu0 }
 0xf97   :  { %11220 = vmatpush3.bf16.msra.mxu1 %v11217_v11  ;;  %v5816_v6 = vpop.f32.mrb[53].mxu0  ;;  %10178 = vmatprep.mubr.msk.f32.mxu1 %vm3271_vm3, %v13546_v51 }
 0xf98   :  { %v11237_v46 = vpack.c.bf16 %v10194_v60, %v5816_v6  ;;  %11222 = vmatprep.subr.bf16.mxu1 %v11221_v20  ;;  %v7034_v6 = vpop.permute.xlu1 %7033 }
 0xf9a   :  { %v10216_v18 = vpop.f32.mrb[54].mxu0 }
 0xf9b   :  { %11224 = vmatpush3.bf16.msra.mxu1 %v11221_v20  ;;  %v5974_v33 = vpop.f32.mrb[55].mxu0 }
 0xf9c   :  { %v11249_v26 = vpack.c.bf16 %v10216_v18, %v5974_v33  ;;  %11234 = vmatprep.subr.bf16.mxu1 %v11233_v16 }
 0xf9e   :  { %10179 = vmatmul.mubr.msk.f32.vlgmr.msra.gmra.mrb[38].mxu1 %vm3271_vm3, %v5650_v57  ;;  %v10219_v32 = vpop.f32.mrb[56].mxu0 }
 0xf9f   :  { %11236 = vmatpush3.bf16.msra.mxu1 %v11233_v16  ;;  %v5984_v12 = vpop.f32.mrb[57].mxu0  ;;  %10203 = vmatprep.mubr.msk.f32.mxu1 %vm3271_vm3, %v13288_v35 }
 0xfa0   :  { %v11253_v21 = vpack.c.bf16 %v10219_v32, %v5984_v12  ;;  %11238 = vmatprep.subr.bf16.mxu1 %v11237_v46 }
 0xfa2   :  { %v10241_v7 = vpop.f32.mrb[58].mxu0 }
 0xfa3   :  { %11240 = vmatpush3.bf16.msra.mxu1 %v11237_v46  ;;  %v6152_v51 = vpop.f32.mrb[59].mxu0 }
 0xfa4   :  { %v11265_v49 = vpack.c.bf16 %v10241_v7, %v6152_v51  ;;  %11250 = vmatprep.subr.bf16.mxu1 %v11249_v26  ;;  %v7380_v51 = vpop.permute.xlu1 %7379 }
 0xfa6   :  { %10204 = vmatmul.mubr.msk.f32.vlgmr.msra.gmra.mrb[38].mxu1 %vm3271_vm3, %v13220_v22  ;;  %v10244_v56 = vpop.f32.mrb[60].mxu0 }
 0xfa7   :  { %11252 = vmatpush3.bf16.msra.mxu1 %v11249_v26  ;;  %v6162_v53 = vpop.f32.mrb[61].mxu0  ;;  %10228 = vmatprep.mubr.msk.f32.mxu1 %vm3271_vm3, %v13556_v25 }
 0xfa8   :  { %v11269_v4 = vpack.c.bf16 %v10244_v56, %v6162_v53  ;;  %11254 = vmatprep.subr.bf16.mxu1 %v11253_v21 }
 0xfaa   :  { %v10266_v28 = vpop.f32.mrb[62].mxu0 }
 0xfab   :  { %11256 = vmatpush3.bf16.msra.mxu1 %v11253_v21  ;;  %v6320_v35 = vpop.f32.mrb[63].mxu0 }
 0xfac   :  { %v11281_v29 = vpack.c.bf16 %v10266_v28, %v6320_v35  ;;  %11266 = vmatprep.subr.bf16.mxu1 %v11265_v49 }
 0xfae   :  { %10229 = vmatmul.mubr.msk.f32.vlgmr.msra.gmra.mrb[38].mxu1 %vm3271_vm3, %v5996_v47  ;;  %v10269_v40 = vpop.f32.mrb[64].mxu0 }
 0xfaf   :  { %11268 = vmatpush3.bf16.msra.mxu1 %v11265_v49  ;;  %v6330_v42 = vpop.f32.mrb[65].mxu0  ;;  %10253 = vmatprep.mubr.msk.f32.mxu1 %vm3271_vm3, %v13302_v37 }
 0xfb0   :  { %v11285_v22 = vpack.c.bf16 %v10269_v40, %v6330_v42  ;;  %11270 = vmatprep.subr.bf16.mxu1 %v11269_v4  ;;  %v7811_v42 = vpop.permute.xlu0 %7810 }
 0xfb2   :  { %v10291_v48 = vpop.f32.mrb[66].mxu0 }
 0xfb3   :  { %11272 = vmatpush3.bf16.msra.mxu1 %v11269_v4  ;;  %v6498_v25 = vpop.f32.mrb[67].mxu0 }
 0xfb4   :  { %v11297_v45 = vpack.c.bf16 %v10291_v48, %v6498_v25  ;;  %11282 = vmatprep.subr.bf16.mxu1 %v11281_v29 }
 0xfb6   :  { %10254 = vmatmul.mubr.msk.f32.vlgmr.msra.gmra.mrb[38].mxu1 %vm3271_vm3, %v13243_v2  ;;  %v10294_v54 = vpop.f32.mrb[68].mxu0 }
 0xfb7   :  { %11284 = vmatpush3.bf16.msra.mxu1 %v11281_v29  ;;  %v6508_v50 = vpop.f32.mrb[69].mxu0  ;;  %10278 = vmatprep.mubr.msk.f32.mxu1 %vm3271_vm3, %v13574_v0 }
 0xfb8   :  { %v11301_v1 = vpack.c.bf16 %v10294_v54, %v6508_v50  ;;  %11286 = vmatprep.subr.bf16.mxu1 %v11285_v22  ;;  %v7821_v54 = vld [vmem:[%s13699_s18 + $0x8] sm:$0xff] }
 0xfba   :  { %v10316_v52 = vpop.f32.mrb[70].mxu0 }
 0xfbb   :  { %11288 = vmatpush3.bf16.msra.mxu1 %v11285_v22  ;;  %v6666_v37 = vpop.f32.mrb[71].mxu0 }
 0xfbc   :  { %v11313_v59 = vpack.c.bf16 %v10316_v52, %v6666_v37  ;;  %11298 = vmatprep.subr.bf16.mxu1 %v11297_v45 }
 0xfbe   :  { %10279 = vmatmul.mubr.msk.f32.vlgmr.msra.gmra.mrb[38].mxu1 %vm3271_vm3, %v6342_v61  ;;  %v10319_v62 = vpop.f32.mrb[72].mxu0 }
 0xfbf   :  { %11300 = vmatpush3.bf16.msra.mxu1 %v11297_v45  ;;  %v6676_v63 = vpop.f32.mrb[73].mxu0  ;;  %10303 = vmatprep.mubr.msk.f32.mxu1 %vm3271_vm3, %v13316_v39  ;;  %v7823_v45 = vld [vmem:[%s13700_s19 + $0x8] sm:$0xff] }
 0xfc0   :  { %v11317_v2 = vpack.c.bf16 %v10319_v62, %v6676_v63  ;;  %11302 = vmatprep.subr.bf16.mxu1 %v11301_v1 }
 0xfc2   :  { %v10341_v3 = vpop.f32.mrb[74].mxu0 }
 0xfc3   :  { %11304 = vmatpush3.bf16.msra.mxu1 %v11301_v1  ;;  %v6844_v0 = vpop.f32.mrb[75].mxu0 }
 0xfc4   :  { %v11329_v58 = vpack.c.bf16 %v10341_v3, %v6844_v0  ;;  %11314 = vmatprep.subr.bf16.mxu1 %v11313_v59 }
 0xfc6   :  { %10304 = vmatmul.mubr.msk.f32.vlgmr.msra.gmra.mrb[38].mxu1 %vm3271_vm3, %v13267_v31  ;;  %v10344_v5 = vpop.f32.mrb[76].mxu0 }
 0xfc7   :  { %11316 = vmatpush3.bf16.msra.mxu1 %v11313_v59  ;;  %v6854_v8 = vpop.f32.mrb[77].mxu0  ;;  %10328 = vmatprep.mubr.msk.f32.mxu1 %vm3271_vm3, %v13584_v23 }
 0xfc8   :  { %v11333_v9 = vpack.c.bf16 %v10344_v5, %v6854_v8  ;;  %11318 = vmatprep.subr.bf16.mxu1 %v11317_v2 }
 0xfca   :  { %v10366_v19 = vpop.f32.mrb[78].mxu0 }
 0xfcb   :  { %11320 = vmatpush3.bf16.msra.mxu1 %v11317_v2  ;;  %v7012_v39 = vpop.f32.mrb[79].mxu0 }
 0xfcc   :  { %v11345_v10 = vpack.c.bf16 %v10366_v19, %v7012_v39  ;;  %11330 = vmatprep.subr.bf16.mxu1 %v11329_v58 }
 0xfce   :  { %10329 = vmatmul.mubr.msk.f32.vlgmr.msra.gmra.mrb[38].mxu1 %vm3271_vm3, %v6688_v30  ;;  %v10369_v11 = vpop.f32.mrb[80].mxu0 }
 0xfcf   :  { %11332 = vmatpush3.bf16.msra.mxu1 %v11329_v58  ;;  %v7022_v13 = vpop.f32.mrb[81].mxu0  ;;  %10353 = vmatprep.mubr.msk.f32.mxu1 %vm3271_vm3, %v13328_v41 }
 0xfd0   :  { %v11349_v31 = vpack.c.bf16 %v10369_v11, %v7022_v13  ;;  %11334 = vmatprep.subr.bf16.mxu1 %v11333_v9 }
 0xfd2   :  { %v10391_v14 = vpop.f32.mrb[82].mxu0 }
 0xfd3   :  { %11336 = vmatpush3.bf16.msra.mxu1 %v11333_v9  ;;  %v7190_v23 = vpop.f32.mrb[83].mxu0 }
 0xfd4   :  { %v11361_v15 = vpack.c.bf16 %v10391_v14, %v7190_v23  ;;  %11346 = vmatprep.subr.bf16.mxu1 %v11345_v10 }
 0xfd6   :  { %10354 = vmatmul.mubr.msk.f32.vlgmr.msra.gmra.mrb[38].mxu1 %vm3271_vm3, %v13283_v34  ;;  %v10394_v20 = vpop.f32.mrb[84].mxu0 }
 0xfd7   :  { %11348 = vmatpush3.bf16.msra.mxu1 %v11345_v10  ;;  %v7200_v55 = vpop.f32.mrb[85].mxu0  ;;  %10378 = vmatprep.mubr.msk.f32.mxu1 %vm3271_vm3, %v13590_v27 }
 0xfd8   :  { %v11365_v17 = vpack.c.bf16 %v10394_v20, %v7200_v55  ;;  %11350 = vmatprep.subr.bf16.mxu1 %v11349_v31 }
 0xfda   :  { %v10416_v16 = vpop.f32.mrb[86].mxu0 }
 0xfdb   :  { %11352 = vmatpush3.bf16.msra.mxu1 %v11349_v31  ;;  %v7358_v41 = vpop.f32.mrb[87].mxu0 }
 0xfdc   :  { %v11377_v60 = vpack.c.bf16 %v10416_v16, %v7358_v41  ;;  %11362 = vmatprep.subr.bf16.mxu1 %v11361_v15 }
 0xfde   :  { %10379 = vmatmul.mubr.msk.f32.vlgmr.msra.gmra.mrb[38].mxu1 %vm3271_vm3, %v7034_v6  ;;  %v10419_v46 = vpop.f32.mrb[88].mxu0 }
 0xfdf   :  { %11364 = vmatpush3.bf16.msra.mxu1 %v11361_v15  ;;  %v7368_v18 = vpop.f32.mrb[89].mxu0  ;;  %10403 = vmatprep.mubr.msk.f32.mxu1 %vm3271_vm3, %v13338_v43 }
 0xfe0   :  { %v11381_v34 = vpack.c.bf16 %v10419_v46, %v7368_v18  ;;  %11366 = vmatprep.subr.bf16.mxu1 %v11365_v17 }
 0xfe2   :  { %v10441_v33 = vpop.f32.mrb[90].mxu0 }
 0xfe3   :  { %11368 = vmatpush3.bf16.msra.mxu1 %v11365_v17  ;;  %v7536_v27 = vpop.f32.mrb[91].mxu0 }
 0xfe4   :  { %v11393_v26 = vpack.c.bf16 %v10441_v33, %v7536_v27  ;;  %11378 = vmatprep.subr.bf16.mxu1 %v11377_v60 }
 0xfe6   :  { %10404 = vmatmul.mubr.msk.f32.vlgmr.msra.gmra.mrb[38].mxu1 %vm3271_vm3, %v13297_v36  ;;  %v10444_v57 = vpop.f32.mrb[92].mxu0 }
 0xfe7   :  { %11380 = vmatpush3.bf16.msra.mxu1 %v11377_v60  ;;  %v7546_v32 = vpop.f32.mrb[93].mxu0  ;;  %10428 = vmatprep.mubr.msk.f32.mxu1 %vm3271_vm3, %v13600_v24  ;;  %v7726_v24 = vpop.permute.xlu1 %7725 }
 0xfe8   :  { %v11397_v12 = vpack.c.bf16 %v10444_v57, %v7546_v32  ;;  %11382 = vmatprep.subr.bf16.mxu1 %v11381_v34 }
 0xfea   :  { %v10466_v21 = vpop.f32.mrb[94].mxu0 }
 0xfeb   :  { %11384 = vmatpush3.bf16.msra.mxu1 %v11381_v34  ;;  %v7704_v43 = vpop.f32.mrb[95].mxu0  ;;  %v7816_v47 = vpop.permute.xlu1 %7815 }
 0xfec   :  { %v11409_v7 = vpack.c.bf16 %v10466_v21, %v7704_v43  ;;  %11394 = vmatprep.subr.bf16.mxu1 %v11393_v26 }
 0xfee   :  { %10429 = vmatmul.mubr.msk.f32.vlgmr.msra.gmra.mrb[38].mxu1 %vm3271_vm3, %v7380_v51  ;;  %v10469_v49 = vpop.f32.mrb[96].mxu0  ;;  %11410 = vmatprep.subr.bf16.mxu0 %v11409_v7 }
 0xfef   :  { %11396 = vmatpush3.bf16.msra.mxu1 %v11393_v26  ;;  %v7714_v36 = vpop.f32.mrb[97].mxu0  ;;  %11412 = vmatpush3.bf16.msra.mxu0 %v11409_v7  ;;  %v7853_v50 = vpop.permute.xlu1 %7852 }
 0xff0   :  { %v11413_v56 = vpack.c.bf16 %v10469_v49, %v7714_v36  ;;  %11398 = vmatprep.subr.bf16.mxu1 %v11397_v12  ;;  %10453 = vmatprep.mubr.msk.f32.mxu1 %vm3271_vm3, %v13345_v44 }
 0xff2   :  { %11414 = vmatprep.subr.bf16.mxu0 %v11413_v56 }
 0xff3   :  { %11400 = vmatpush3.bf16.msra.mxu1 %v11397_v12  ;;  %11416 = vmatpush3.bf16.msra.mxu0 %v11413_v56 }
 0xff6   :  { %10454 = vmatmul.mubr.msk.f32.vlgmr.msra.gmra.mrb[38].mxu1 %vm3271_vm3, %v13311_v38  ;;  %10479 = vmatmul.mubr.msk.f32.vlgmr.msra.gmra.mrb[98].mxu0 %vm3271_vm3, %v7726_v24  ;;  %v7822_v38 = vld [vmem:[%s13700_s19] sm:$0xff] }
0x10c9   :  { %v10455_v53 = vpop.f32.mrb[38].mxu1  ;;  %v10480_v4 = vpop.f32.mrb[98].mxu0 }
0x10ca   :  { %v11417_v28 = vadd.f32 %v10480_v4, %v10455_v53  ;;  %v7627_v35 = vpop.f32.mrb[39].mxu1  ;;  %v7797_v29 = vpop.f32.mrb[99].mxu0 }
0x10cb   :  { %v11418_v40 = vadd.f32 %v7797_v29, %v7627_v35 }
0x10cc   :  { %v7819_v22 = vadd.f32 %v11417_v28, %v7816_v47 }
0x10cd   :  { %v7818_v48 = vadd.f32 %v11418_v40, %v7811_v42 }
0x10ce   :  { %7826 = vadd.xlane.f32.xlu1 %v7819_v22  ;;  %v7831_v44 = vmul.f32 %v7819_v22, %v7819_v22 }
0x10cf   :  { %7824 = vadd.xlane.f32.xlu0 %v7818_v48  ;;  %v7830_v25 = vmul.f32 %v7818_v48, %v7818_v48 }
0x10d3   :  { %7834 = vadd.xlane.f32.xlu0 %v7831_v44 }
0x10d7   :  { %7832 = vadd.xlane.f32.xlu0 %v7830_v25 }
0x10df   :  { %7864 = vperm.xlu1 %11526, %v7822_v38  }
0x10e3   :  { %7869 = vperm.xlu1 %11526, %v7823_v45  }
0x10ed   :  { %7857 = vperm.xlu0 %11525, %v7821_v54  }
0x115b   :  { %v7827_v1 = vpop.xlane.xlu1 %7826 }
0x115c   :  { %v7825_v52 = vpop.xlane.xlu0 %7824  ;;  %v7829_v37 = vmul.f32 0.0078125, %v7827_v1 }
0x115d   :  { %v7828_v62 = vmul.f32 0.0078125, %v7825_v52 }
0x115e   :  { %v7839_v61 = vmul.f32 %v7829_v37, %v7829_v37  ;;  %v7843_v39 = vsub.f32 %v7819_v22, %v7829_v37 }
0x115f   :  { %v7838_v0 = vmul.f32 %v7828_v62, %v7828_v62  ;;  %v7865_v19 = vpop.permute.xlu1 %7864  ;;  %v7842_v13 = vsub.f32 %v7818_v48, %v7828_v62 }
0x1160   :  { %v7835_v59 = vpop.xlane.xlu0 %7834 }
0x1161   :  { %v7837_v63 = vmul.f32 0.0078125, %v7835_v59 }
0x1163   :  { %v7841_v2 = vsub.f32 %v7837_v63, %v7839_v61  ;;  %v7870_v23 = vpop.permute.xlu1 %7869 }
0x1164   :  { %v7833_v3 = vpop.xlane.xlu0 %7832 }
0x1165   :  { %v7845_v58 = vadd.f32 1e-05, %v7841_v2  ;;  %v7836_v5 = vmul.f32 0.0078125, %v7833_v3 }
0x1167   :  { %11551 = vrsqrt.f32 %v7845_v58  ;;  %v7840_v8 = vsub.f32 %v7836_v5, %v7838_v0 }
0x1169   :  { %v7844_v9 = vadd.f32 1e-05, %v7840_v8 }
0x116b   :  { %11553 = vrsqrt.f32 %v7844_v9 }
0x116c   :  { %v7858_v11 = vpop.permute.xlu0 %7857 }
0x1171   :  { %v11552_v10 = vpop.eup %11551 }
0x1172   :  { %v7849_v30 = vmul.f32 %v11552_v10, %v7843_v39 }
0x1174   :  { %v7861_v31 = vmul.f32 %v7858_v11, %v7849_v30 }
0x1175   :  { %v11554_v14 = vpop.eup %11553 }
0x1176   :  { %v7848_v15 = vmul.f32 %v11554_v14, %v7842_v13  ;;  %v7873_v20 = vadd.f32 %v7870_v23, %v7861_v31 }
0x1178   :  { %v7860_v55 = vmul.f32 %v7853_v50, %v7848_v15  ;;  %7875 = vst [vmem:[%s13701_s21 + $0x8] sm:$0xff] %v7873_v20 }
0x117a   :  { %v7872_v17 = vadd.f32 %v7865_v19, %v7860_v55 }
0x117c   :  { %7874 = vst [vmem:[%s13701_s21] sm:$0xff] %v7872_v17 }

// kernel: unet_forward.11
= control target key start
LH: loop header
LB: loop body
LE: loop exit
PB: predicated region body
PF: predicated region fallthrough
CT: control target
= control target key end

     0   :  { %v677_v3 = vmov 0   ;;  %vm173_vm0 = vcmask 261120   ;;  %s1171_s4 = inlined_call_operand.vmem [shape: f32[288,512], index: 4, kind: input, shape index: {}]   ;;  %s1172_s0 = inlined_call_operand.vmem [shape: f32[8,288], index: 0, kind: input, shape index: {}]   ;;  %s1173_s1 = inlined_call_operand.vmem [shape: f32[8,1], index: 1, kind: input, shape index: {}]   ;;  %s1174_s2 = inlined_call_operand.vmem [shape: f32[8,1], index: 2, kind: input, shape index: {}]   ;;  %s1175_s3 = inlined_call_operand.vmem [shape: f32[8,1], index: 3, kind: input, shape index: {}]   ;;  %s1176_s5 = inlined_call_operand.vmem [shape: f32[8,512], index: 5, kind: output, shape index: {}]  }
   0x1   :  { %v21_v0 = vld [vmem:[%s1171_s4 + $0x8] sm:$0xff]  ;;  %v23_v2 = vld [vmem:[%s1171_s4 + $0x18] sm:$0xff]  ;;  %673 = vset.pattern.permute.xlu0 %v677_v3  ;;  %674 = vset.pattern.permute.xlu1 %v677_v3  ;;  %v20_v6 = vld [vmem:[%s1171_s4] sm:$0xff] }
   0x2   :  { %v25_v1 = vld [vmem:[%s1171_s4 + $0x28] sm:$0xff]  ;;  %v27_v5 = vld [vmem:[%s1171_s4 + $0x38] sm:$0xff]  ;;  %v24_v7 = vld [vmem:[%s1171_s4 + $0x20] sm:$0xff] }
   0x3   :  { %v519_v4 = vpack.c.bf16 %v25_v1, %v21_v0  ;;  %v591_v8 = vpack.c.bf16 %v27_v5, %v23_v2  ;;  %v521_v9 = vpack.c.bf16 %v24_v7, %v20_v6  ;;  %v22_v10 = vld [vmem:[%s1171_s4 + $0x10] sm:$0xff]  ;;  %v29_v12 = vld [vmem:[%s1171_s4 + $0x48] sm:$0xff]  ;;  %v31_v15 = vld [vmem:[%s1171_s4 + $0x58] sm:$0xff] }
   0x4   :  { %v26_v11 = vld [vmem:[%s1171_s4 + $0x30] sm:$0xff]  ;;  %v33_v14 = vld [vmem:[%s1171_s4 + $0x68] sm:$0xff]  ;;  %v35_v16 = vld [vmem:[%s1171_s4 + $0x78] sm:$0xff] }
   0x5   :  { %520 = vmatprep.subr.bf16.mxu0 %v519_v4  ;;  %v593_v13 = vpack.c.bf16 %v26_v11, %v22_v10  ;;  %592 = vmatprep.subr.bf16.mxu1 %v591_v8  ;;  %v523_v17 = vpack.c.bf16 %v33_v14, %v29_v12  ;;  %v595_v18 = vpack.c.bf16 %v35_v16, %v31_v15  ;;  %v28_v19 = vld [vmem:[%s1171_s4 + $0x40] sm:$0xff]  ;;  %v30_v21 = vld [vmem:[%s1171_s4 + $0x50] sm:$0xff]  ;;  %v37_v24 = vld [vmem:[%s1171_s4 + $0x88] sm:$0xff] }
   0x6   :  { %522 = vmatpush1.bf16.msra.mxu0 %v521_v9  ;;  %v32_v20 = vld [vmem:[%s1171_s4 + $0x60] sm:$0xff]  ;;  %v34_v23 = vld [vmem:[%s1171_s4 + $0x70] sm:$0xff]  ;;  %v41_v25 = vld [vmem:[%s1171_s4 + $0xa8] sm:$0xff] }
   0x7   :  { %594 = vmatpush1.bf16.msra.mxu1 %v593_v13  ;;  %v525_v22 = vpack.c.bf16 %v32_v20, %v28_v19  ;;  %524 = vmatprep.subr.bf16.mxu0 %v523_v17  ;;  %v597_v26 = vpack.c.bf16 %v34_v23, %v30_v21  ;;  %v527_v27 = vpack.c.bf16 %v41_v25, %v37_v24  ;;  %v39_v28 = vld [vmem:[%s1171_s4 + $0x98] sm:$0xff]  ;;  %v36_v30 = vld [vmem:[%s1171_s4 + $0x80] sm:$0xff]  ;;  %v38_v33 = vld [vmem:[%s1171_s4 + $0x90] sm:$0xff] }
   0x8   :  { %596 = vmatprep.subr.bf16.mxu1 %v595_v18  ;;  %v43_v29 = vld [vmem:[%s1171_s4 + $0xb8] sm:$0xff]  ;;  %v40_v32 = vld [vmem:[%s1171_s4 + $0xa0] sm:$0xff]  ;;  %v42_v34 = vld [vmem:[%s1171_s4 + $0xb0] sm:$0xff] }
   0x9   :  { %v599_v31 = vpack.c.bf16 %v43_v29, %v39_v28  ;;  %v529_v35 = vpack.c.bf16 %v40_v32, %v36_v30  ;;  %v45_v36 = vld [vmem:[%s1171_s4 + $0xc8] sm:$0xff]  ;;  %v47_v38 = vld [vmem:[%s1171_s4 + $0xd8] sm:$0xff]  ;;  %v601_v39 = vpack.c.bf16 %v42_v34, %v38_v33  ;;  %v44_v42 = vld [vmem:[%s1171_s4 + $0xc0] sm:$0xff] }
   0xa   :  { %526 = vmatpush1.bf16.msra.mxu0 %v525_v22  ;;  %v49_v37 = vld [vmem:[%s1171_s4 + $0xe8] sm:$0xff]  ;;  %v51_v41 = vld [vmem:[%s1171_s4 + $0xf8] sm:$0xff]  ;;  %v48_v43 = vld [vmem:[%s1171_s4 + $0xe0] sm:$0xff] }
   0xb   :  { %598 = vmatpush1.bf16.msra.mxu1 %v597_v26  ;;  %528 = vmatprep.subr.bf16.mxu0 %v527_v27  ;;  %v531_v40 = vpack.c.bf16 %v49_v37, %v45_v36  ;;  %v603_v44 = vpack.c.bf16 %v51_v41, %v47_v38  ;;  %v46_v45 = vld [vmem:[%s1171_s4 + $0xd0] sm:$0xff]  ;;  %v53_v47 = vld [vmem:[%s1171_s4 + $0x108] sm:$0xff]  ;;  %v55_v49 = vld [vmem:[%s1171_s4 + $0x118] sm:$0xff]  ;;  %v533_v51 = vpack.c.bf16 %v48_v43, %v44_v42 }
   0xc   :  { %600 = vmatprep.subr.bf16.mxu1 %v599_v31  ;;  %v50_v46 = vld [vmem:[%s1171_s4 + $0xf0] sm:$0xff]  ;;  %v57_v48 = vld [vmem:[%s1171_s4 + $0x128] sm:$0xff]  ;;  %v59_v50 = vld [vmem:[%s1171_s4 + $0x138] sm:$0xff] }
   0xd   :  { %v605_v52 = vpack.c.bf16 %v50_v46, %v46_v45  ;;  %v535_v53 = vpack.c.bf16 %v57_v48, %v53_v47  ;;  %v52_v54 = vld [vmem:[%s1171_s4 + $0x100] sm:$0xff]  ;;  %v54_v56 = vld [vmem:[%s1171_s4 + $0x110] sm:$0xff]  ;;  %v607_v57 = vpack.c.bf16 %v59_v50, %v55_v49  ;;  %v61_v59 = vld [vmem:[%s1171_s4 + $0x148] sm:$0xff] }
   0xe   :  { %530 = vmatpush1.bf16.msra.mxu0 %v529_v35  ;;  %v56_v55 = vld [vmem:[%s1171_s4 + $0x120] sm:$0xff]  ;;  %v58_v58 = vld [vmem:[%s1171_s4 + $0x130] sm:$0xff]  ;;  %v65_v60 = vld [vmem:[%s1171_s4 + $0x168] sm:$0xff] }
   0xf   :  { %602 = vmatpush1.bf16.msra.mxu1 %v601_v39  ;;  %532 = vmatprep.subr.bf16.mxu0 %v531_v40  ;;  %v63_v61 = vld [vmem:[%s1171_s4 + $0x158] sm:$0xff]  ;;  %v537_v63 = vpack.c.bf16 %v56_v55, %v52_v54  ;;  %v609_v0 = vpack.c.bf16 %v58_v58, %v54_v56  ;;  %v539_v1 = vpack.c.bf16 %v65_v60, %v61_v59  ;;  %v60_v2 = vld [vmem:[%s1171_s4 + $0x140] sm:$0xff]  ;;  %v62_v4 = vld [vmem:[%s1171_s4 + $0x150] sm:$0xff] }
  0x10   :  { %604 = vmatprep.subr.bf16.mxu1 %v603_v44  ;;  %v67_v62 = vld [vmem:[%s1171_s4 + $0x178] sm:$0xff]  ;;  %v64_v3 = vld [vmem:[%s1171_s4 + $0x160] sm:$0xff]  ;;  %v66_v6 = vld [vmem:[%s1171_s4 + $0x170] sm:$0xff] }
  0x11   :  { %v611_v5 = vpack.c.bf16 %v67_v62, %v63_v61  ;;  %v69_v7 = vld [vmem:[%s1171_s4 + $0x188] sm:$0xff]  ;;  %v71_v9 = vld [vmem:[%s1171_s4 + $0x198] sm:$0xff]  ;;  %v541_v11 = vpack.c.bf16 %v64_v3, %v60_v2  ;;  %v613_v12 = vpack.c.bf16 %v66_v6, %v62_v4  ;;  %v68_v14 = vld [vmem:[%s1171_s4 + $0x180] sm:$0xff] }
  0x12   :  { %534 = vmatpush1.bf16.msra.mxu0 %v533_v51  ;;  %v73_v8 = vld [vmem:[%s1171_s4 + $0x1a8] sm:$0xff]  ;;  %v75_v10 = vld [vmem:[%s1171_s4 + $0x1b8] sm:$0xff]  ;;  %v72_v15 = vld [vmem:[%s1171_s4 + $0x1a0] sm:$0xff] }
  0x13   :  { %606 = vmatpush1.bf16.msra.mxu1 %v605_v52  ;;  %536 = vmatprep.subr.bf16.mxu0 %v535_v53  ;;  %v543_v13 = vpack.c.bf16 %v73_v8, %v69_v7  ;;  %v70_v16 = vld [vmem:[%s1171_s4 + $0x190] sm:$0xff]  ;;  %v615_v17 = vpack.c.bf16 %v75_v10, %v71_v9  ;;  %v77_v19 = vld [vmem:[%s1171_s4 + $0x1c8] sm:$0xff]  ;;  %v79_v21 = vld [vmem:[%s1171_s4 + $0x1d8] sm:$0xff]  ;;  %v545_v23 = vpack.c.bf16 %v72_v15, %v68_v14 }
  0x14   :  { %608 = vmatprep.subr.bf16.mxu1 %v607_v57  ;;  %v74_v18 = vld [vmem:[%s1171_s4 + $0x1b0] sm:$0xff]  ;;  %v81_v20 = vld [vmem:[%s1171_s4 + $0x1e8] sm:$0xff]  ;;  %v83_v22 = vld [vmem:[%s1171_s4 + $0x1f8] sm:$0xff] }
  0x15   :  { %v617_v24 = vpack.c.bf16 %v74_v18, %v70_v16  ;;  %v547_v25 = vpack.c.bf16 %v81_v20, %v77_v19  ;;  %v76_v26 = vld [vmem:[%s1171_s4 + $0x1c0] sm:$0xff]  ;;  %v78_v28 = vld [vmem:[%s1171_s4 + $0x1d0] sm:$0xff]  ;;  %v619_v29 = vpack.c.bf16 %v83_v22, %v79_v21  ;;  %v85_v31 = vld [vmem:[%s1171_s4 + $0x208] sm:$0xff] }
  0x16   :  { %538 = vmatpush1.bf16.msra.mxu0 %v537_v63  ;;  %v80_v27 = vld [vmem:[%s1171_s4 + $0x1e0] sm:$0xff]  ;;  %v82_v30 = vld [vmem:[%s1171_s4 + $0x1f0] sm:$0xff]  ;;  %v89_v32 = vld [vmem:[%s1171_s4 + $0x228] sm:$0xff] }
  0x17   :  { %610 = vmatpush1.bf16.msra.mxu1 %v609_v0  ;;  %540 = vmatprep.subr.bf16.mxu0 %v539_v1  ;;  %v87_v33 = vld [vmem:[%s1171_s4 + $0x218] sm:$0xff]  ;;  %v549_v35 = vpack.c.bf16 %v80_v27, %v76_v26  ;;  %v621_v36 = vpack.c.bf16 %v82_v30, %v78_v28  ;;  %v551_v37 = vpack.c.bf16 %v89_v32, %v85_v31  ;;  %v84_v38 = vld [vmem:[%s1171_s4 + $0x200] sm:$0xff]  ;;  %v86_v40 = vld [vmem:[%s1171_s4 + $0x210] sm:$0xff] }
  0x18   :  { %612 = vmatprep.subr.bf16.mxu1 %v611_v5  ;;  %v91_v34 = vld [vmem:[%s1171_s4 + $0x238] sm:$0xff]  ;;  %v88_v39 = vld [vmem:[%s1171_s4 + $0x220] sm:$0xff]  ;;  %v90_v42 = vld [vmem:[%s1171_s4 + $0x230] sm:$0xff] }
  0x19   :  { %v623_v41 = vpack.c.bf16 %v91_v34, %v87_v33  ;;  %v93_v43 = vld [vmem:[%s1171_s4 + $0x248] sm:$0xff]  ;;  %v95_v45 = vld [vmem:[%s1171_s4 + $0x258] sm:$0xff]  ;;  %v553_v47 = vpack.c.bf16 %v88_v39, %v84_v38  ;;  %v625_v48 = vpack.c.bf16 %v90_v42, %v86_v40  ;;  %v92_v50 = vld [vmem:[%s1171_s4 + $0x240] sm:$0xff] }
  0x1a   :  { %542 = vmatpush1.bf16.msra.mxu0 %v541_v11  ;;  %v97_v44 = vld [vmem:[%s1171_s4 + $0x268] sm:$0xff]  ;;  %v99_v46 = vld [vmem:[%s1171_s4 + $0x278] sm:$0xff]  ;;  %v96_v51 = vld [vmem:[%s1171_s4 + $0x260] sm:$0xff] }
  0x1b   :  { %614 = vmatpush1.bf16.msra.mxu1 %v613_v12  ;;  %544 = vmatprep.subr.bf16.mxu0 %v543_v13  ;;  %v555_v49 = vpack.c.bf16 %v97_v44, %v93_v43  ;;  %v94_v52 = vld [vmem:[%s1171_s4 + $0x250] sm:$0xff]  ;;  %v627_v53 = vpack.c.bf16 %v99_v46, %v95_v45  ;;  %v101_v55 = vld [vmem:[%s1171_s4 + $0x288] sm:$0xff]  ;;  %v103_v57 = vld [vmem:[%s1171_s4 + $0x298] sm:$0xff]  ;;  %v557_v59 = vpack.c.bf16 %v96_v51, %v92_v50 }
  0x1c   :  { %616 = vmatprep.subr.bf16.mxu1 %v615_v17  ;;  %v98_v54 = vld [vmem:[%s1171_s4 + $0x270] sm:$0xff]  ;;  %v105_v56 = vld [vmem:[%s1171_s4 + $0x2a8] sm:$0xff]  ;;  %v107_v58 = vld [vmem:[%s1171_s4 + $0x2b8] sm:$0xff] }
  0x1d   :  { %v629_v60 = vpack.c.bf16 %v98_v54, %v94_v52  ;;  %v559_v61 = vpack.c.bf16 %v105_v56, %v101_v55  ;;  %v100_v62 = vld [vmem:[%s1171_s4 + $0x280] sm:$0xff]  ;;  %v102_v0 = vld [vmem:[%s1171_s4 + $0x290] sm:$0xff]  ;;  %v631_v1 = vpack.c.bf16 %v107_v58, %v103_v57  ;;  %v109_v3 = vld [vmem:[%s1171_s4 + $0x2c8] sm:$0xff] }
  0x1e   :  { %546 = vmatpush1.bf16.msra.mxu0 %v545_v23  ;;  %v104_v63 = vld [vmem:[%s1171_s4 + $0x2a0] sm:$0xff]  ;;  %v106_v2 = vld [vmem:[%s1171_s4 + $0x2b0] sm:$0xff]  ;;  %v113_v4 = vld [vmem:[%s1171_s4 + $0x2e8] sm:$0xff] }
  0x1f   :  { %618 = vmatpush1.bf16.msra.mxu1 %v617_v24  ;;  %548 = vmatprep.subr.bf16.mxu0 %v547_v25  ;;  %v111_v5 = vld [vmem:[%s1171_s4 + $0x2d8] sm:$0xff]  ;;  %v561_v7 = vpack.c.bf16 %v104_v63, %v100_v62  ;;  %v108_v8 = vld [vmem:[%s1171_s4 + $0x2c0] sm:$0xff]  ;;  %v633_v9 = vpack.c.bf16 %v106_v2, %v102_v0  ;;  %v563_v10 = vpack.c.bf16 %v113_v4, %v109_v3  ;;  %v110_v12 = vld [vmem:[%s1171_s4 + $0x2d0] sm:$0xff] }
  0x20   :  { %620 = vmatprep.subr.bf16.mxu1 %v619_v29  ;;  %v115_v6 = vld [vmem:[%s1171_s4 + $0x2f8] sm:$0xff]  ;;  %v112_v11 = vld [vmem:[%s1171_s4 + $0x2e0] sm:$0xff]  ;;  %v114_v13 = vld [vmem:[%s1171_s4 + $0x2f0] sm:$0xff] }
  0x21   :  { %v635_v14 = vpack.c.bf16 %v115_v6, %v111_v5  ;;  %v117_v15 = vld [vmem:[%s1171_s4 + $0x308] sm:$0xff]  ;;  %v119_v18 = vld [vmem:[%s1171_s4 + $0x318] sm:$0xff]  ;;  %v565_v20 = vpack.c.bf16 %v112_v11, %v108_v8  ;;  %v637_v21 = vpack.c.bf16 %v114_v13, %v110_v12  ;;  %v116_v23 = vld [vmem:[%s1171_s4 + $0x300] sm:$0xff] }
  0x22   :  { %550 = vmatpush1.bf16.msra.mxu0 %v549_v35  ;;  %v121_v16 = vld [vmem:[%s1171_s4 + $0x328] sm:$0xff]  ;;  %v123_v19 = vld [vmem:[%s1171_s4 + $0x338] sm:$0xff]  ;;  %v120_v24 = vld [vmem:[%s1171_s4 + $0x320] sm:$0xff] }
  0x23   :  { %622 = vmatpush1.bf16.msra.mxu1 %v621_v36  ;;  %552 = vmatprep.subr.bf16.mxu0 %v551_v37  ;;  %v165_v17 = vld [vmem:[%s1172_s0 + $0x8] sm:$0xff]  ;;  %v567_v22 = vpack.c.bf16 %v121_v16, %v117_v15  ;;  %v118_v25 = vld [vmem:[%s1171_s4 + $0x310] sm:$0xff]  ;;  %v639_v26 = vpack.c.bf16 %v123_v19, %v119_v18  ;;  %v127_v30 = vld [vmem:[%s1171_s4 + $0x358] sm:$0xff]  ;;  %v569_v32 = vpack.c.bf16 %v120_v24, %v116_v23 }
  0x24   :  { %624 = vmatprep.subr.bf16.mxu1 %v623_v41  ;;  %241 = vmatprep.mubr.f32.mxu0 %v165_v17  ;;  %v122_v27 = vld [vmem:[%s1171_s4 + $0x330] sm:$0xff]  ;;  %v125_v28 = vld [vmem:[%s1171_s4 + $0x348] sm:$0xff]  ;;  %v131_v31 = vld [vmem:[%s1171_s4 + $0x378] sm:$0xff] }
  0x25   :  { %383 = vmatprep.mubr.f32.mxu1 %v165_v17  ;;  %v129_v29 = vld [vmem:[%s1171_s4 + $0x368] sm:$0xff]  ;;  %v124_v33 = vld [vmem:[%s1171_s4 + $0x340] sm:$0xff]  ;;  %v641_v35 = vpack.c.bf16 %v122_v27, %v118_v25  ;;  %v126_v37 = vld [vmem:[%s1171_s4 + $0x350] sm:$0xff]  ;;  %v643_v40 = vpack.c.bf16 %v131_v31, %v127_v30 }
  0x26   :  { %554 = vmatpush1.bf16.msra.mxu0 %v553_v47  ;;  %v128_v34 = vld [vmem:[%s1171_s4 + $0x360] sm:$0xff]  ;;  %v571_v36 = vpack.c.bf16 %v129_v29, %v125_v28  ;;  %v130_v41 = vld [vmem:[%s1171_s4 + $0x370] sm:$0xff]  ;;  %v133_v42 = vld [vmem:[%s1171_s4 + $0x388] sm:$0xff]  ;;  %v678_v29 = vmov 0.0  }
  0x27   :  { %626 = vmatpush1.bf16.msra.mxu1 %v625_v48  ;;  %556 = vmatprep.subr.bf16.mxu0 %v555_v49  ;;  %v167_v38 = vld [vmem:[%s1173_s1] sm:$0xff]  ;;  %v137_v43 = vld [vmem:[%s1171_s4 + $0x3a8] sm:$0xff]  ;;  %v135_v44 = vld [vmem:[%s1171_s4 + $0x398] sm:$0xff]  ;;  %v573_v46 = vpack.c.bf16 %v128_v34, %v124_v33  ;;  %v645_v47 = vpack.c.bf16 %v130_v41, %v126_v37 }
  0x28   :  { %628 = vmatprep.subr.bf16.mxu1 %v627_v53  ;;  %v461_v39 = vld [vmem:[%s1174_s2] sm:$0xff]  ;;  %170 = vperm.xlu0 %673, %v167_v38   ;;  %v139_v45 = vld [vmem:[%s1171_s4 + $0x3b8] sm:$0xff]  ;;  %v575_v48 = vpack.c.bf16 %v137_v43, %v133_v42  ;;  %v134_v51 = vld [vmem:[%s1171_s4 + $0x390] sm:$0xff] }
  0x29   :  { %493 = vperm.xlu1 %674, %v461_v39   ;;  %v132_v49 = vld [vmem:[%s1171_s4 + $0x380] sm:$0xff]  ;;  %v647_v52 = vpack.c.bf16 %v139_v45, %v135_v44  ;;  %v138_v53 = vld [vmem:[%s1171_s4 + $0x3b0] sm:$0xff]  ;;  %v141_v54 = vld [vmem:[%s1171_s4 + $0x3c8] sm:$0xff] }
  0x2a   :  { %558 = vmatpush1.bf16.msra.mxu0 %v557_v59  ;;  %v136_v50 = vld [vmem:[%s1171_s4 + $0x3a0] sm:$0xff]  ;;  %v145_v55 = vld [vmem:[%s1171_s4 + $0x3e8] sm:$0xff]  ;;  %v143_v56 = vld [vmem:[%s1171_s4 + $0x3d8] sm:$0xff]  ;;  %v649_v59 = vpack.c.bf16 %v138_v53, %v134_v51 }
  0x2b   :  { %630 = vmatpush1.bf16.msra.mxu1 %v629_v60  ;;  %560 = vmatprep.subr.bf16.mxu0 %v559_v61  ;;  %v147_v57 = vld [vmem:[%s1171_s4 + $0x3f8] sm:$0xff]  ;;  %v577_v58 = vpack.c.bf16 %v136_v50, %v132_v49  ;;  %v579_v60 = vpack.c.bf16 %v145_v55, %v141_v54  ;;  %v140_v61 = vld [vmem:[%s1171_s4 + $0x3c0] sm:$0xff]  ;;  %v142_v63 = vld [vmem:[%s1171_s4 + $0x3d0] sm:$0xff] }
  0x2c   :  { %632 = vmatprep.subr.bf16.mxu1 %v631_v1  ;;  %v144_v62 = vld [vmem:[%s1171_s4 + $0x3e0] sm:$0xff]  ;;  %v651_v0 = vpack.c.bf16 %v147_v57, %v143_v56  ;;  %v146_v1 = vld [vmem:[%s1171_s4 + $0x3f0] sm:$0xff]  ;;  %v149_v2 = vld [vmem:[%s1171_s4 + $0x408] sm:$0xff] }
  0x2d   :  { %v153_v3 = vld [vmem:[%s1171_s4 + $0x428] sm:$0xff]  ;;  %v151_v4 = vld [vmem:[%s1171_s4 + $0x418] sm:$0xff]  ;;  %v581_v6 = vpack.c.bf16 %v144_v62, %v140_v61  ;;  %v150_v11 = vld [vmem:[%s1171_s4 + $0x410] sm:$0xff] }
  0x2e   :  { %562 = vmatpush1.bf16.msra.mxu0 %v561_v7  ;;  %v155_v5 = vld [vmem:[%s1171_s4 + $0x438] sm:$0xff]  ;;  %v653_v7 = vpack.c.bf16 %v146_v1, %v142_v63  ;;  %v583_v8 = vpack.c.bf16 %v153_v3, %v149_v2  ;;  %v154_v13 = vld [vmem:[%s1171_s4 + $0x430] sm:$0xff]  ;;  %v161_v15 = vld [vmem:[%s1171_s4 + $0x468] sm:$0xff] }
  0x2f   :  { %634 = vmatpush1.bf16.msra.mxu1 %v633_v9  ;;  %564 = vmatprep.subr.bf16.mxu0 %v563_v10  ;;  %v148_v9 = vld [vmem:[%s1171_s4 + $0x400] sm:$0xff]  ;;  %v655_v12 = vpack.c.bf16 %v155_v5, %v151_v4  ;;  %v159_v16 = vld [vmem:[%s1171_s4 + $0x458] sm:$0xff]  ;;  %v158_v25 = vld [vmem:[%s1171_s4 + $0x450] sm:$0xff] }
  0x30   :  { %636 = vmatprep.subr.bf16.mxu1 %v635_v14  ;;  %v152_v10 = vld [vmem:[%s1171_s4 + $0x420] sm:$0xff]  ;;  %v157_v14 = vld [vmem:[%s1171_s4 + $0x448] sm:$0xff]  ;;  %v163_v17 = vld [vmem:[%s1171_s4 + $0x478] sm:$0xff] }
  0x31   :  { %v164_v18 = vld [vmem:[%s1172_s0] sm:$0xff]  ;;  %v585_v19 = vpack.c.bf16 %v152_v10, %v148_v9  ;;  %v659_v24 = vpack.c.bf16 %v163_v17, %v159_v16  ;;  %v166_v30 = vld [vmem:[%s1172_s0 + $0x10] sm:$0xff] }
  0x32   :  { %566 = vmatpush1.bf16.msra.mxu0 %v565_v20  ;;  %v657_v20 = vpack.c.bf16 %v154_v13, %v150_v11  ;;  %v160_v23 = vld [vmem:[%s1171_s4 + $0x460] sm:$0xff] }
  0x33   :  { %638 = vmatpush1.bf16.msra.mxu1 %v637_v21  ;;  %568 = vmatprep.subr.bf16.mxu0 %v567_v22  ;;  %v587_v21 = vpack.c.bf16 %v161_v15, %v157_v14  ;;  %v156_v22 = vld [vmem:[%s1171_s4 + $0x440] sm:$0xff] }
  0x34   :  { %640 = vmatprep.subr.bf16.mxu1 %v639_v26  ;;  %v162_v26 = vld [vmem:[%s1171_s4 + $0x470] sm:$0xff]  ;;  %v589_v27 = vpack.c.bf16 %v160_v23, %v156_v22  ;;  %v462_v50 = vld [vmem:[%s1175_s3] sm:$0xff] }
  0x35   :  { %v661_v28 = vpack.c.bf16 %v162_v26, %v158_v25 }
  0x36   :  { %570 = vmatpush1.bf16.msra.mxu0 %v569_v32 }
  0x37   :  { %642 = vmatpush1.bf16.msra.mxu1 %v641_v35  ;;  %572 = vmatprep.subr.bf16.mxu0 %v571_v36 }
  0x38   :  { %644 = vmatprep.subr.bf16.mxu1 %v643_v40 }
  0x3a   :  { %574 = vmatpush1.bf16.msra.mxu0 %v573_v46 }
  0x3b   :  { %646 = vmatpush1.bf16.msra.mxu1 %v645_v47  ;;  %576 = vmatprep.subr.bf16.mxu0 %v575_v48 }
  0x3c   :  { %648 = vmatprep.subr.bf16.mxu1 %v647_v52 }
  0x3e   :  { %578 = vmatpush1.bf16.msra.mxu0 %v577_v58 }
  0x3f   :  { %650 = vmatpush1.bf16.msra.mxu1 %v649_v59  ;;  %580 = vmatprep.subr.bf16.mxu0 %v579_v60 }
  0x40   :  { %652 = vmatprep.subr.bf16.mxu1 %v651_v0 }
  0x42   :  { %582 = vmatpush1.bf16.msra.mxu0 %v581_v6 }
  0x43   :  { %654 = vmatpush1.bf16.msra.mxu1 %v653_v7  ;;  %584 = vmatprep.subr.bf16.mxu0 %v583_v8 }
  0x44   :  { %656 = vmatprep.subr.bf16.mxu1 %v655_v12 }
  0x45   :  { %242 = vmatmul.mubr.f32.vlgmr.msra.gmra.mrb[0].mxu0 %v164_v18 }
  0x46   :  { %384 = vmatmul.mubr.f32.vlgmr.msra.gmra.mrb[0].mxu1 %v164_v18  ;;  %586 = vmatpush1.bf16.msra.mxu0 %v585_v19 }
  0x47   :  { %658 = vmatpush1.bf16.msra.mxu1 %v657_v20  ;;  %588 = vmatprep.subr.bf16.mxu0 %v587_v21 }
  0x48   :  { %660 = vmatprep.subr.bf16.mxu1 %v659_v24  ;;  %312 = vmatprep.mubr.f32.mxu0 %v678_v29 }
  0x49   :  { %454 = vmatprep.mubr.f32.mxu1 %v678_v29 }
  0x4a   :  { %590 = vmatpush1.bf16.msra.mxu0 %v589_v27 }
  0x4b   :  { %662 = vmatpush1.bf16.msra.mxu1 %v661_v28 }
  0x4d   :  { %517 = vmatmul.mubr.msk.f32.vlgmr.msra.gmra.mrb[0].mxu0 %vm173_vm0, %v166_v30 }
  0x4e   :  { %518 = vmatmul.mubr.msk.f32.vlgmr.msra.gmra.mrb[0].mxu1 %vm173_vm0, %v166_v30 }
  0xa7   :  { %v171_v31 = vpop.permute.xlu0 %170 }
  0xa8   :  { %v494_v51 = vpop.permute.xlu1 %493 }
 0x120   :  { %v314_v32 = vpop.f32.mrb[0].mxu0 }
 0x121   :  { %v663_v33 = vadd.f32 %v314_v32, %v171_v31  ;;  %v456_v34 = vpop.f32.mrb[0].mxu1  ;;  %v316_v35 = vpop.f32.mrb[1].mxu0 }
 0x122   :  { %v665_v36 = vadd.f32 %v456_v34, %v171_v31  ;;  %v664_v37 = vadd.f32 %v316_v35, %v171_v31  ;;  %v458_v38 = vpop.f32.mrb[1].mxu1 }
 0x123   :  { %v469_v39 = vmul.f32 %v663_v33, %v663_v33  ;;  %v666_v42 = vadd.f32 %v458_v38, %v171_v31 }
 0x124   :  { %v463_v40 = vadd.f32 %v664_v37, %v663_v33  ;;  %v470_v41 = vmul.f32 %v664_v37, %v664_v37  ;;  %v471_v43 = vmul.f32 %v665_v36, %v665_v36 }
 0x125   :  { %v472_v47 = vmul.f32 %v666_v42, %v666_v42 }
 0x126   :  { %v464_v44 = vadd.f32 %v665_v36, %v463_v40  ;;  %v473_v45 = vadd.f32 %v470_v41, %v469_v39 }
 0x128   :  { %v465_v46 = vadd.f32 %v666_v42, %v464_v44  ;;  %v474_v48 = vadd.f32 %v473_v45, %v471_v43 }
 0x12a   :  { %466 = vadd.xlane.f32.xlu0 %v465_v46  ;;  %v475_v49 = vadd.f32 %v474_v48, %v472_v47 }
 0x12c   :  { %476 = vadd.xlane.f32.xlu1 %v475_v49 }
 0x13d   :  { %502 = vperm.xlu1 %674, %v462_v50  }
 0x1b7   :  { %v467_v52 = vpop.xlane.xlu0 %466 }
 0x1b8   :  { %v468_v53 = vmul.f32 0.001953125, %v467_v52 }
 0x1b9   :  { %v477_v54 = vpop.xlane.xlu1 %476 }
 0x1ba   :  { %v478_v55 = vmul.f32 0.001953125, %v477_v54  ;;  %v479_v56 = vmul.f32 %v468_v53, %v468_v53  ;;  %v481_v59 = vsub.f32 %v663_v33, %v468_v53  ;;  %v482_v60 = vsub.f32 %v664_v37, %v468_v53 }
 0x1bb   :  { %v483_v61 = vsub.f32 %v665_v36, %v468_v53  ;;  %v484_v62 = vsub.f32 %v666_v42, %v468_v53 }
 0x1bc   :  { %v480_v57 = vsub.f32 %v478_v55, %v479_v56 }
 0x1bd   :  { %v503_v8 = vpop.permute.xlu1 %502 }
 0x1be   :  { %v485_v58 = vadd.f32 1e-05, %v480_v57 }
 0x1c0   :  { %675 = vrsqrt.f32 %v485_v58 }
 0x1ca   :  { %v676_v63 = vpop.eup %675 }
 0x1cb   :  { %v487_v0 = vmul.f32 %v676_v63, %v481_v59  ;;  %v488_v1 = vmul.f32 %v676_v63, %v482_v60  ;;  %v489_v2 = vmul.f32 %v676_v63, %v483_v61  ;;  %v490_v3 = vmul.f32 %v676_v63, %v484_v62 }
 0x1cd   :  { %v496_v4 = vmul.f32 %v494_v51, %v487_v0  ;;  %v497_v5 = vmul.f32 %v494_v51, %v488_v1  ;;  %v498_v6 = vmul.f32 %v494_v51, %v489_v2  ;;  %v499_v7 = vmul.f32 %v494_v51, %v490_v3 }
 0x1cf   :  { %v505_v9 = vadd.f32 %v503_v8, %v496_v4  ;;  %v506_v10 = vadd.f32 %v503_v8, %v497_v5  ;;  %v507_v11 = vadd.f32 %v503_v8, %v498_v6  ;;  %v508_v12 = vadd.f32 %v503_v8, %v499_v7 }
 0x1d1   :  { %509 = vst [vmem:[%s1176_s5] sm:$0xff] %v505_v9  ;;  %510 = vst [vmem:[%s1176_s5 + $0x8] sm:$0xff] %v506_v10 }
 0x1d2   :  { %511 = vst [vmem:[%s1176_s5 + $0x10] sm:$0xff] %v507_v11  ;;  %512 = vst [vmem:[%s1176_s5 + $0x18] sm:$0xff] %v508_v12 }

// kernel: unet_forward.12
= control target key start
LH: loop header
LB: loop body
LE: loop exit
PB: predicated region body
PF: predicated region fallthrough
CT: control target
= control target key end

     0   :  { %v1399_v3 = vmov 0   ;;  %vm317_vm0 = vcmask 130048   ;;  %vm890_vm1 = vcmask 1043456   ;;  %s2506_s4 = inlined_call_operand.vmem [shape: f32[144,2048], index: 4, kind: input, shape index: {}]   ;;  %s2507_s0 = inlined_call_operand.vmem [shape: f32[4,144], index: 0, kind: input, shape index: {}]   ;;  %s2508_s1 = inlined_call_operand.vmem [shape: f32[4,1], index: 1, kind: input, shape index: {}]   ;;  %s2509_s2 = inlined_call_operand.vmem [shape: f32[4,1], index: 2, kind: input, shape index: {}]   ;;  %s2510_s3 = inlined_call_operand.vmem [shape: f32[4,1], index: 3, kind: input, shape index: {}]   ;;  %s2511_s5 = inlined_call_operand.vmem [shape: f32[4,2048], index: 5, kind: output, shape index: {}]  }
   0x1   :  { %v21_v0 = vld [vmem:[%s2506_s4 + $0x8] sm:$0xff]  ;;  %v23_v2 = vld [vmem:[%s2506_s4 + $0x18] sm:$0xff]  ;;  %1394 = vset.pattern.permute.xlu0 %v1399_v3  ;;  %1395 = vset.pattern.permute.xlu1 %v1399_v3  ;;  %v20_v6 = vld [vmem:[%s2506_s4] sm:$0xff] }
   0x2   :  { %v37_v1 = vld [vmem:[%s2506_s4 + $0x88] sm:$0xff]  ;;  %v39_v5 = vld [vmem:[%s2506_s4 + $0x98] sm:$0xff]  ;;  %v36_v7 = vld [vmem:[%s2506_s4 + $0x80] sm:$0xff] }
   0x3   :  { %v1105_v4 = vpack.c.bf16 %v37_v1, %v21_v0  ;;  %v1141_v8 = vpack.c.bf16 %v39_v5, %v23_v2  ;;  %v1107_v9 = vpack.c.bf16 %v36_v7, %v20_v6  ;;  %v22_v10 = vld [vmem:[%s2506_s4 + $0x10] sm:$0xff]  ;;  %v53_v12 = vld [vmem:[%s2506_s4 + $0x108] sm:$0xff]  ;;  %v55_v15 = vld [vmem:[%s2506_s4 + $0x118] sm:$0xff] }
   0x4   :  { %v38_v11 = vld [vmem:[%s2506_s4 + $0x90] sm:$0xff]  ;;  %v69_v14 = vld [vmem:[%s2506_s4 + $0x188] sm:$0xff]  ;;  %v71_v16 = vld [vmem:[%s2506_s4 + $0x198] sm:$0xff] }
   0x5   :  { %1106 = vmatprep.subr.bf16.mxu0 %v1105_v4  ;;  %v1143_v13 = vpack.c.bf16 %v38_v11, %v22_v10  ;;  %1142 = vmatprep.subr.bf16.mxu1 %v1141_v8  ;;  %v1109_v17 = vpack.c.bf16 %v69_v14, %v53_v12  ;;  %v1145_v18 = vpack.c.bf16 %v71_v16, %v55_v15  ;;  %v52_v19 = vld [vmem:[%s2506_s4 + $0x100] sm:$0xff]  ;;  %v54_v21 = vld [vmem:[%s2506_s4 + $0x110] sm:$0xff]  ;;  %v85_v24 = vld [vmem:[%s2506_s4 + $0x208] sm:$0xff] }
   0x6   :  { %1108 = vmatpush1.bf16.msra.mxu0 %v1107_v9  ;;  %v68_v20 = vld [vmem:[%s2506_s4 + $0x180] sm:$0xff]  ;;  %v70_v23 = vld [vmem:[%s2506_s4 + $0x190] sm:$0xff]  ;;  %v101_v25 = vld [vmem:[%s2506_s4 + $0x288] sm:$0xff] }
   0x7   :  { %1144 = vmatpush1.bf16.msra.mxu1 %v1143_v13  ;;  %v1111_v22 = vpack.c.bf16 %v68_v20, %v52_v19  ;;  %1110 = vmatprep.subr.bf16.mxu0 %v1109_v17  ;;  %v1147_v26 = vpack.c.bf16 %v70_v23, %v54_v21  ;;  %v1113_v27 = vpack.c.bf16 %v101_v25, %v85_v24  ;;  %v87_v28 = vld [vmem:[%s2506_s4 + $0x218] sm:$0xff]  ;;  %v84_v30 = vld [vmem:[%s2506_s4 + $0x200] sm:$0xff]  ;;  %v86_v33 = vld [vmem:[%s2506_s4 + $0x210] sm:$0xff] }
   0x8   :  { %1146 = vmatprep.subr.bf16.mxu1 %v1145_v18  ;;  %v103_v29 = vld [vmem:[%s2506_s4 + $0x298] sm:$0xff]  ;;  %v100_v32 = vld [vmem:[%s2506_s4 + $0x280] sm:$0xff]  ;;  %v102_v34 = vld [vmem:[%s2506_s4 + $0x290] sm:$0xff] }
   0x9   :  { %v1149_v31 = vpack.c.bf16 %v103_v29, %v87_v28  ;;  %v1115_v35 = vpack.c.bf16 %v100_v32, %v84_v30  ;;  %v117_v36 = vld [vmem:[%s2506_s4 + $0x308] sm:$0xff]  ;;  %v119_v38 = vld [vmem:[%s2506_s4 + $0x318] sm:$0xff]  ;;  %v1151_v39 = vpack.c.bf16 %v102_v34, %v86_v33  ;;  %v116_v42 = vld [vmem:[%s2506_s4 + $0x300] sm:$0xff] }
   0xa   :  { %1112 = vmatpush1.bf16.msra.mxu0 %v1111_v22  ;;  %v133_v37 = vld [vmem:[%s2506_s4 + $0x388] sm:$0xff]  ;;  %v135_v41 = vld [vmem:[%s2506_s4 + $0x398] sm:$0xff]  ;;  %v132_v43 = vld [vmem:[%s2506_s4 + $0x380] sm:$0xff] }
   0xb   :  { %1148 = vmatpush1.bf16.msra.mxu1 %v1147_v26  ;;  %1114 = vmatprep.subr.bf16.mxu0 %v1113_v27  ;;  %v1117_v40 = vpack.c.bf16 %v133_v37, %v117_v36  ;;  %v1153_v44 = vpack.c.bf16 %v135_v41, %v119_v38  ;;  %v118_v45 = vld [vmem:[%s2506_s4 + $0x310] sm:$0xff]  ;;  %v149_v47 = vld [vmem:[%s2506_s4 + $0x408] sm:$0xff]  ;;  %v151_v49 = vld [vmem:[%s2506_s4 + $0x418] sm:$0xff]  ;;  %v1119_v51 = vpack.c.bf16 %v132_v43, %v116_v42 }
   0xc   :  { %1150 = vmatprep.subr.bf16.mxu1 %v1149_v31  ;;  %v134_v46 = vld [vmem:[%s2506_s4 + $0x390] sm:$0xff]  ;;  %v165_v48 = vld [vmem:[%s2506_s4 + $0x488] sm:$0xff]  ;;  %v167_v50 = vld [vmem:[%s2506_s4 + $0x498] sm:$0xff] }
   0xd   :  { %v1155_v52 = vpack.c.bf16 %v134_v46, %v118_v45  ;;  %v1121_v53 = vpack.c.bf16 %v165_v48, %v149_v47  ;;  %v148_v54 = vld [vmem:[%s2506_s4 + $0x400] sm:$0xff]  ;;  %v150_v56 = vld [vmem:[%s2506_s4 + $0x410] sm:$0xff]  ;;  %v1157_v57 = vpack.c.bf16 %v167_v50, %v151_v49  ;;  %v181_v59 = vld [vmem:[%s2506_s4 + $0x508] sm:$0xff] }
   0xe   :  { %1116 = vmatpush1.bf16.msra.mxu0 %v1115_v35  ;;  %v164_v55 = vld [vmem:[%s2506_s4 + $0x480] sm:$0xff]  ;;  %v166_v58 = vld [vmem:[%s2506_s4 + $0x490] sm:$0xff]  ;;  %v197_v60 = vld [vmem:[%s2506_s4 + $0x588] sm:$0xff] }
   0xf   :  { %1152 = vmatpush1.bf16.msra.mxu1 %v1151_v39  ;;  %1118 = vmatprep.subr.bf16.mxu0 %v1117_v40  ;;  %v183_v61 = vld [vmem:[%s2506_s4 + $0x518] sm:$0xff]  ;;  %v1123_v63 = vpack.c.bf16 %v164_v55, %v148_v54  ;;  %v1159_v0 = vpack.c.bf16 %v166_v58, %v150_v56  ;;  %v1125_v1 = vpack.c.bf16 %v197_v60, %v181_v59  ;;  %v180_v2 = vld [vmem:[%s2506_s4 + $0x500] sm:$0xff]  ;;  %v182_v4 = vld [vmem:[%s2506_s4 + $0x510] sm:$0xff] }
  0x10   :  { %1154 = vmatprep.subr.bf16.mxu1 %v1153_v44  ;;  %v199_v62 = vld [vmem:[%s2506_s4 + $0x598] sm:$0xff]  ;;  %v196_v3 = vld [vmem:[%s2506_s4 + $0x580] sm:$0xff]  ;;  %v198_v6 = vld [vmem:[%s2506_s4 + $0x590] sm:$0xff] }
  0x11   :  { %v1161_v5 = vpack.c.bf16 %v199_v62, %v183_v61  ;;  %v213_v7 = vld [vmem:[%s2506_s4 + $0x608] sm:$0xff]  ;;  %v215_v9 = vld [vmem:[%s2506_s4 + $0x618] sm:$0xff]  ;;  %v1127_v11 = vpack.c.bf16 %v196_v3, %v180_v2  ;;  %v1163_v12 = vpack.c.bf16 %v198_v6, %v182_v4  ;;  %v212_v14 = vld [vmem:[%s2506_s4 + $0x600] sm:$0xff] }
  0x12   :  { %1120 = vmatpush1.bf16.msra.mxu0 %v1119_v51  ;;  %v229_v8 = vld [vmem:[%s2506_s4 + $0x688] sm:$0xff]  ;;  %v231_v10 = vld [vmem:[%s2506_s4 + $0x698] sm:$0xff]  ;;  %v228_v15 = vld [vmem:[%s2506_s4 + $0x680] sm:$0xff] }
  0x13   :  { %1156 = vmatpush1.bf16.msra.mxu1 %v1155_v52  ;;  %1122 = vmatprep.subr.bf16.mxu0 %v1121_v53  ;;  %v1129_v13 = vpack.c.bf16 %v229_v8, %v213_v7  ;;  %v214_v16 = vld [vmem:[%s2506_s4 + $0x610] sm:$0xff]  ;;  %v1165_v17 = vpack.c.bf16 %v231_v10, %v215_v9  ;;  %v245_v19 = vld [vmem:[%s2506_s4 + $0x708] sm:$0xff]  ;;  %v247_v21 = vld [vmem:[%s2506_s4 + $0x718] sm:$0xff]  ;;  %v1131_v23 = vpack.c.bf16 %v228_v15, %v212_v14 }
  0x14   :  { %1158 = vmatprep.subr.bf16.mxu1 %v1157_v57  ;;  %v230_v18 = vld [vmem:[%s2506_s4 + $0x690] sm:$0xff]  ;;  %v261_v20 = vld [vmem:[%s2506_s4 + $0x788] sm:$0xff]  ;;  %v263_v22 = vld [vmem:[%s2506_s4 + $0x798] sm:$0xff] }
  0x15   :  { %v1613_v24 = vld [vmem:[%s2507_s0] sm:$0xff]  ;;  %v1167_v25 = vpack.c.bf16 %v230_v18, %v214_v16  ;;  %v1133_v26 = vpack.c.bf16 %v261_v20, %v245_v19  ;;  %v246_v29 = vld [vmem:[%s2506_s4 + $0x710] sm:$0xff]  ;;  %v1169_v31 = vpack.c.bf16 %v263_v22, %v247_v21  ;;  %v277_v33 = vld [vmem:[%s2506_s4 + $0x808] sm:$0xff] }
  0x16   :  { %1124 = vmatpush1.bf16.msra.mxu0 %v1123_v63  ;;  %v244_v27 = vld [vmem:[%s2506_s4 + $0x700] sm:$0xff]  ;;  %v1626_v30 = vcombine.high %v1613_v24, %v1613_v24  ;;  %v262_v32 = vld [vmem:[%s2506_s4 + $0x790] sm:$0xff]  ;;  %v293_v34 = vld [vmem:[%s2506_s4 + $0x888] sm:$0xff] }
  0x17   :  { %1160 = vmatpush1.bf16.msra.mxu1 %v1159_v0  ;;  %1126 = vmatprep.subr.bf16.mxu0 %v1125_v1  ;;  %v260_v28 = vld [vmem:[%s2506_s4 + $0x780] sm:$0xff]  ;;  %v279_v35 = vld [vmem:[%s2506_s4 + $0x818] sm:$0xff]  ;;  %v1171_v38 = vpack.c.bf16 %v262_v32, %v246_v29  ;;  %v1137_v39 = vpack.c.bf16 %v293_v34, %v277_v33  ;;  %v278_v42 = vld [vmem:[%s2506_s4 + $0x810] sm:$0xff] }
  0x18   :  { %1162 = vmatprep.subr.bf16.mxu1 %v1161_v5  ;;  %v295_v36 = vld [vmem:[%s2506_s4 + $0x898] sm:$0xff]  ;;  %1097 = vmatprep.mubr.msk.f32.mxu0 %vm317_vm0, %v1626_v30  ;;  %v1135_v37 = vpack.c.bf16 %v260_v28, %v244_v27  ;;  %v276_v40 = vld [vmem:[%s2506_s4 + $0x800] sm:$0xff]  ;;  %v294_v44 = vld [vmem:[%s2506_s4 + $0x890] sm:$0xff] }
  0x19   :  { %1098 = vmatprep.mubr.msk.f32.mxu1 %vm317_vm0, %v1626_v30  ;;  %v292_v41 = vld [vmem:[%s2506_s4 + $0x880] sm:$0xff]  ;;  %v1173_v43 = vpack.c.bf16 %v295_v36, %v279_v35  ;;  %v25_v45 = vld [vmem:[%s2506_s4 + $0x28] sm:$0xff]  ;;  %v27_v47 = vld [vmem:[%s2506_s4 + $0x38] sm:$0xff]  ;;  %v1175_v50 = vpack.c.bf16 %v294_v44, %v278_v42 }
  0x1a   :  { %1128 = vmatpush1.bf16.msra.mxu0 %v1127_v11  ;;  %v41_v46 = vld [vmem:[%s2506_s4 + $0xa8] sm:$0xff]  ;;  %v43_v48 = vld [vmem:[%s2506_s4 + $0xb8] sm:$0xff]  ;;  %v1139_v49 = vpack.c.bf16 %v292_v41, %v276_v40  ;;  %v24_v52 = vld [vmem:[%s2506_s4 + $0x20] sm:$0xff] }
  0x1b   :  { %1164 = vmatpush1.bf16.msra.mxu1 %v1163_v12  ;;  %1130 = vmatprep.subr.bf16.mxu0 %v1129_v13  ;;  %v1177_v51 = vpack.c.bf16 %v41_v46, %v25_v45  ;;  %v40_v53 = vld [vmem:[%s2506_s4 + $0xa0] sm:$0xff]  ;;  %v26_v54 = vld [vmem:[%s2506_s4 + $0x30] sm:$0xff]  ;;  %v1213_v55 = vpack.c.bf16 %v43_v48, %v27_v47  ;;  %v57_v57 = vld [vmem:[%s2506_s4 + $0x128] sm:$0xff] }
  0x1c   :  { %1166 = vmatprep.subr.bf16.mxu1 %v1165_v17  ;;  %v42_v56 = vld [vmem:[%s2506_s4 + $0xb0] sm:$0xff]  ;;  %v73_v58 = vld [vmem:[%s2506_s4 + $0x1a8] sm:$0xff]  ;;  %v59_v59 = vld [vmem:[%s2506_s4 + $0x138] sm:$0xff]  ;;  %v1179_v61 = vpack.c.bf16 %v40_v53, %v24_v52 }
  0x1d   :  { %v75_v60 = vld [vmem:[%s2506_s4 + $0x1b8] sm:$0xff]  ;;  %v1215_v62 = vpack.c.bf16 %v42_v56, %v26_v54  ;;  %v1181_v63 = vpack.c.bf16 %v73_v58, %v57_v57  ;;  %v56_v0 = vld [vmem:[%s2506_s4 + $0x120] sm:$0xff]  ;;  %v58_v2 = vld [vmem:[%s2506_s4 + $0x130] sm:$0xff] }
  0x1e   :  { %1132 = vmatpush1.bf16.msra.mxu0 %v1131_v23  ;;  %v72_v1 = vld [vmem:[%s2506_s4 + $0x1a0] sm:$0xff]  ;;  %v1217_v3 = vpack.c.bf16 %v75_v60, %v59_v59  ;;  %v74_v4 = vld [vmem:[%s2506_s4 + $0x1b0] sm:$0xff]  ;;  %v89_v5 = vld [vmem:[%s2506_s4 + $0x228] sm:$0xff] }
  0x1f   :  { %1168 = vmatpush1.bf16.msra.mxu1 %v1167_v25  ;;  %1134 = vmatprep.subr.bf16.mxu0 %v1133_v26  ;;  %v105_v6 = vld [vmem:[%s2506_s4 + $0x2a8] sm:$0xff]  ;;  %v91_v7 = vld [vmem:[%s2506_s4 + $0x238] sm:$0xff]  ;;  %v1183_v9 = vpack.c.bf16 %v72_v1, %v56_v0  ;;  %v1219_v10 = vpack.c.bf16 %v74_v4, %v58_v2  ;;  %v88_v12 = vld [vmem:[%s2506_s4 + $0x220] sm:$0xff] }
  0x20   :  { %1170 = vmatprep.subr.bf16.mxu1 %v1169_v31  ;;  %v107_v8 = vld [vmem:[%s2506_s4 + $0x2b8] sm:$0xff]  ;;  %v1185_v11 = vpack.c.bf16 %v105_v6, %v89_v5  ;;  %v104_v13 = vld [vmem:[%s2506_s4 + $0x2a0] sm:$0xff]  ;;  %v90_v14 = vld [vmem:[%s2506_s4 + $0x230] sm:$0xff] }
  0x21   :  { %v1221_v15 = vpack.c.bf16 %v107_v8, %v91_v7  ;;  %v106_v16 = vld [vmem:[%s2506_s4 + $0x2b0] sm:$0xff]  ;;  %v121_v17 = vld [vmem:[%s2506_s4 + $0x328] sm:$0xff]  ;;  %v123_v19 = vld [vmem:[%s2506_s4 + $0x338] sm:$0xff]  ;;  %v1187_v21 = vpack.c.bf16 %v104_v13, %v88_v12 }
  0x22   :  { %1136 = vmatpush1.bf16.msra.mxu0 %v1135_v37  ;;  %v137_v18 = vld [vmem:[%s2506_s4 + $0x3a8] sm:$0xff]  ;;  %v139_v20 = vld [vmem:[%s2506_s4 + $0x3b8] sm:$0xff]  ;;  %v1223_v22 = vpack.c.bf16 %v106_v16, %v90_v14  ;;  %v120_v25 = vld [vmem:[%s2506_s4 + $0x320] sm:$0xff] }
  0x23   :  { %1172 = vmatpush1.bf16.msra.mxu1 %v1171_v38  ;;  %1138 = vmatprep.subr.bf16.mxu0 %v1137_v39  ;;  %v1189_v23 = vpack.c.bf16 %v137_v18, %v121_v17  ;;  %v136_v26 = vld [vmem:[%s2506_s4 + $0x3a0] sm:$0xff]  ;;  %v122_v27 = vld [vmem:[%s2506_s4 + $0x330] sm:$0xff]  ;;  %v1225_v28 = vpack.c.bf16 %v139_v20, %v123_v19  ;;  %v153_v31 = vld [vmem:[%s2506_s4 + $0x428] sm:$0xff] }
  0x24   :  { %1174 = vmatprep.subr.bf16.mxu1 %v1173_v43  ;;  %v138_v29 = vld [vmem:[%s2506_s4 + $0x3b0] sm:$0xff]  ;;  %v169_v32 = vld [vmem:[%s2506_s4 + $0x4a8] sm:$0xff]  ;;  %v155_v33 = vld [vmem:[%s2506_s4 + $0x438] sm:$0xff]  ;;  %v1191_v35 = vpack.c.bf16 %v136_v26, %v120_v25 }
  0x25   :  { %v171_v34 = vld [vmem:[%s2506_s4 + $0x4b8] sm:$0xff]  ;;  %v1227_v36 = vpack.c.bf16 %v138_v29, %v122_v27  ;;  %v1193_v37 = vpack.c.bf16 %v169_v32, %v153_v31  ;;  %v152_v38 = vld [vmem:[%s2506_s4 + $0x420] sm:$0xff]  ;;  %v154_v40 = vld [vmem:[%s2506_s4 + $0x430] sm:$0xff] }
  0x26   :  { %1140 = vmatpush1.bf16.msra.mxu0 %v1139_v49  ;;  %v168_v39 = vld [vmem:[%s2506_s4 + $0x4a0] sm:$0xff]  ;;  %v1229_v41 = vpack.c.bf16 %v171_v34, %v155_v33  ;;  %v170_v42 = vld [vmem:[%s2506_s4 + $0x4b0] sm:$0xff]  ;;  %v185_v43 = vld [vmem:[%s2506_s4 + $0x528] sm:$0xff] }
  0x27   :  { %1176 = vmatpush1.bf16.msra.mxu1 %v1175_v50  ;;  %1178 = vmatprep.subr.bf16.mxu0 %v1177_v51  ;;  %v201_v44 = vld [vmem:[%s2506_s4 + $0x5a8] sm:$0xff]  ;;  %v187_v45 = vld [vmem:[%s2506_s4 + $0x538] sm:$0xff]  ;;  %v1195_v47 = vpack.c.bf16 %v168_v39, %v152_v38  ;;  %v1231_v48 = vpack.c.bf16 %v170_v42, %v154_v40  ;;  %v184_v50 = vld [vmem:[%s2506_s4 + $0x520] sm:$0xff] }
  0x28   :  { %1214 = vmatprep.subr.bf16.mxu1 %v1213_v55  ;;  %v203_v46 = vld [vmem:[%s2506_s4 + $0x5b8] sm:$0xff]  ;;  %v1197_v49 = vpack.c.bf16 %v201_v44, %v185_v43  ;;  %v200_v51 = vld [vmem:[%s2506_s4 + $0x5a0] sm:$0xff]  ;;  %v186_v52 = vld [vmem:[%s2506_s4 + $0x530] sm:$0xff] }
  0x29   :  { %385 = vmatmul.mubr.f32.vlgmr.msra.gmra.mrb[0].mxu0 %v1613_v24  ;;  %v1233_v53 = vpack.c.bf16 %v203_v46, %v187_v45  ;;  %v202_v54 = vld [vmem:[%s2506_s4 + $0x5b0] sm:$0xff]  ;;  %v217_v55 = vld [vmem:[%s2506_s4 + $0x628] sm:$0xff]  ;;  %v219_v57 = vld [vmem:[%s2506_s4 + $0x638] sm:$0xff]  ;;  %v1199_v59 = vpack.c.bf16 %v200_v51, %v184_v50 }
  0x2a   :  { %456 = vmatmul.mubr.f32.vlgmr.msra.gmra.mrb[0].mxu1 %v1613_v24  ;;  %1180 = vmatpush1.bf16.msra.mxu0 %v1179_v61  ;;  %v233_v56 = vld [vmem:[%s2506_s4 + $0x6a8] sm:$0xff]  ;;  %v235_v58 = vld [vmem:[%s2506_s4 + $0x6b8] sm:$0xff]  ;;  %v1235_v60 = vpack.c.bf16 %v202_v54, %v186_v52  ;;  %v218_v0 = vld [vmem:[%s2506_s4 + $0x630] sm:$0xff] }
  0x2b   :  { %1216 = vmatpush1.bf16.msra.mxu1 %v1215_v62  ;;  %1182 = vmatprep.subr.bf16.mxu0 %v1181_v63  ;;  %v1201_v61 = vpack.c.bf16 %v233_v56, %v217_v55  ;;  %v216_v62 = vld [vmem:[%s2506_s4 + $0x620] sm:$0xff]  ;;  %v1237_v1 = vpack.c.bf16 %v235_v58, %v219_v57  ;;  %v234_v2 = vld [vmem:[%s2506_s4 + $0x6b0] sm:$0xff]  ;;  %v265_v4 = vld [vmem:[%s2506_s4 + $0x7a8] sm:$0xff] }
  0x2c   :  { %1218 = vmatprep.subr.bf16.mxu1 %v1217_v3  ;;  %1099 = vmatprep.mubr.msk.f32.mxu0 %vm317_vm0, %v1626_v30  ;;  %v232_v63 = vld [vmem:[%s2506_s4 + $0x6a0] sm:$0xff]  ;;  %v249_v3 = vld [vmem:[%s2506_s4 + $0x728] sm:$0xff]  ;;  %v251_v5 = vld [vmem:[%s2506_s4 + $0x738] sm:$0xff]  ;;  %v1239_v8 = vpack.c.bf16 %v234_v2, %v218_v0 }
  0x2d   :  { %1100 = vmatprep.mubr.msk.f32.mxu1 %vm317_vm0, %v1626_v30  ;;  %v267_v6 = vld [vmem:[%s2506_s4 + $0x7b8] sm:$0xff]  ;;  %v1203_v7 = vpack.c.bf16 %v232_v63, %v216_v62  ;;  %v250_v12 = vld [vmem:[%s2506_s4 + $0x730] sm:$0xff]  ;;  %v297_v16 = vld [vmem:[%s2506_s4 + $0x8a8] sm:$0xff] }
  0x2e   :  { %1184 = vmatpush1.bf16.msra.mxu0 %v1183_v9  ;;  %v1205_v9 = vpack.c.bf16 %v265_v4, %v249_v3  ;;  %v1241_v13 = vpack.c.bf16 %v267_v6, %v251_v5  ;;  %v266_v14 = vld [vmem:[%s2506_s4 + $0x7b0] sm:$0xff]  ;;  %v283_v17 = vld [vmem:[%s2506_s4 + $0x838] sm:$0xff]  ;;  %v45_v29 = vld [vmem:[%s2506_s4 + $0xc8] sm:$0xff] }
  0x2f   :  { %1220 = vmatpush1.bf16.msra.mxu1 %v1219_v10  ;;  %1186 = vmatprep.subr.bf16.mxu0 %v1185_v11  ;;  %v248_v10 = vld [vmem:[%s2506_s4 + $0x720] sm:$0xff]  ;;  %v299_v18 = vld [vmem:[%s2506_s4 + $0x8b8] sm:$0xff]  ;;  %v1243_v20 = vpack.c.bf16 %v266_v14, %v250_v12  ;;  %v282_v25 = vld [vmem:[%s2506_s4 + $0x830] sm:$0xff] }
  0x30   :  { %1222 = vmatprep.subr.bf16.mxu1 %v1221_v15  ;;  %v264_v11 = vld [vmem:[%s2506_s4 + $0x7a0] sm:$0xff]  ;;  %v281_v15 = vld [vmem:[%s2506_s4 + $0x828] sm:$0xff]  ;;  %v1245_v26 = vpack.c.bf16 %v299_v18, %v283_v17  ;;  %v298_v27 = vld [vmem:[%s2506_s4 + $0x8b0] sm:$0xff] }
  0x31   :  { %v1207_v19 = vpack.c.bf16 %v264_v11, %v248_v10  ;;  %v31_v31 = vld [vmem:[%s2506_s4 + $0x58] sm:$0xff]  ;;  %v1247_v34 = vpack.c.bf16 %v298_v27, %v282_v25  ;;  %v30_v38 = vld [vmem:[%s2506_s4 + $0x50] sm:$0xff]  ;;  %v77_v42 = vld [vmem:[%s2506_s4 + $0x1c8] sm:$0xff] }
  0x32   :  { %1188 = vmatpush1.bf16.msra.mxu0 %v1187_v21  ;;  %v1209_v21 = vpack.c.bf16 %v297_v16, %v281_v15  ;;  %v47_v32 = vld [vmem:[%s2506_s4 + $0xd8] sm:$0xff]  ;;  %v46_v40 = vld [vmem:[%s2506_s4 + $0xd0] sm:$0xff]  ;;  %v109_v54 = vld [vmem:[%s2506_s4 + $0x2c8] sm:$0xff] }
  0x33   :  { %1224 = vmatpush1.bf16.msra.mxu1 %v1223_v22  ;;  %1190 = vmatprep.subr.bf16.mxu0 %v1189_v23  ;;  %v280_v22 = vld [vmem:[%s2506_s4 + $0x820] sm:$0xff]  ;;  %v1285_v39 = vpack.c.bf16 %v47_v32, %v31_v31  ;;  %v63_v43 = vld [vmem:[%s2506_s4 + $0x158] sm:$0xff]  ;;  %v1287_v46 = vpack.c.bf16 %v46_v40, %v30_v38  ;;  %v62_v50 = vld [vmem:[%s2506_s4 + $0x150] sm:$0xff] }
  0x34   :  { %1226 = vmatprep.subr.bf16.mxu1 %v1225_v28  ;;  %v296_v23 = vld [vmem:[%s2506_s4 + $0x8a0] sm:$0xff]  ;;  %v29_v28 = vld [vmem:[%s2506_s4 + $0x48] sm:$0xff]  ;;  %v79_v44 = vld [vmem:[%s2506_s4 + $0x1d8] sm:$0xff] }
  0x35   :  { %v1211_v33 = vpack.c.bf16 %v296_v23, %v280_v22  ;;  %v1289_v51 = vpack.c.bf16 %v79_v44, %v63_v43  ;;  %v78_v52 = vld [vmem:[%s2506_s4 + $0x1d0] sm:$0xff]  ;;  %v95_v55 = vld [vmem:[%s2506_s4 + $0x258] sm:$0xff]  ;;  %v141_v2 = vld [vmem:[%s2506_s4 + $0x3c8] sm:$0xff] }
  0x36   :  { %1192 = vmatpush1.bf16.msra.mxu0 %v1191_v35  ;;  %v1249_v35 = vpack.c.bf16 %v45_v29, %v29_v28  ;;  %v111_v56 = vld [vmem:[%s2506_s4 + $0x2d8] sm:$0xff]  ;;  %v1291_v58 = vpack.c.bf16 %v78_v52, %v62_v50  ;;  %v94_v62 = vld [vmem:[%s2506_s4 + $0x250] sm:$0xff]  ;;  %v124_v6 = vld [vmem:[%s2506_s4 + $0x340] sm:$0xff] }
  0x37   :  { %1228 = vmatpush1.bf16.msra.mxu1 %v1227_v36  ;;  %1194 = vmatprep.subr.bf16.mxu0 %v1193_v37  ;;  %v28_v36 = vld [vmem:[%s2506_s4 + $0x40] sm:$0xff]  ;;  %v1293_v63 = vpack.c.bf16 %v111_v56, %v95_v55  ;;  %v110_v0 = vld [vmem:[%s2506_s4 + $0x2d0] sm:$0xff]  ;;  %v127_v3 = vld [vmem:[%s2506_s4 + $0x358] sm:$0xff] }
  0x38   :  { %1230 = vmatprep.subr.bf16.mxu1 %v1229_v41  ;;  %v44_v37 = vld [vmem:[%s2506_s4 + $0xc0] sm:$0xff]  ;;  %v61_v41 = vld [vmem:[%s2506_s4 + $0x148] sm:$0xff]  ;;  %v143_v4 = vld [vmem:[%s2506_s4 + $0x3d8] sm:$0xff] }
  0x39   :  { %v1251_v45 = vpack.c.bf16 %v44_v37, %v28_v36  ;;  %v126_v10 = vld [vmem:[%s2506_s4 + $0x350] sm:$0xff]  ;;  %v309_v11 = vld [vmem:[%s2508_s1] sm:$0xf]  ;;  %v1297_v12 = vpack.c.bf16 %v143_v4, %v127_v3  ;;  %v157_v14 = vld [vmem:[%s2506_s4 + $0x448] sm:$0xff] }
  0x3a   :  { %1196 = vmatpush1.bf16.msra.mxu0 %v1195_v47  ;;  %v1253_v47 = vpack.c.bf16 %v77_v42, %v61_v41  ;;  %v173_v15 = vld [vmem:[%s2506_s4 + $0x4c8] sm:$0xff]  ;;  %312 = vperm.xlu0 %1394, %v309_v11   ;;  %v159_v16 = vld [vmem:[%s2506_s4 + $0x458] sm:$0xff]  ;;  %v172_v22 = vld [vmem:[%s2506_s4 + $0x4c0] sm:$0xff] }
  0x3b   :  { %1232 = vmatpush1.bf16.msra.mxu1 %v1231_v48  ;;  %1198 = vmatprep.subr.bf16.mxu0 %v1197_v49  ;;  %v60_v48 = vld [vmem:[%s2506_s4 + $0x140] sm:$0xff]  ;;  %v175_v17 = vld [vmem:[%s2506_s4 + $0x4d8] sm:$0xff]  ;;  %v158_v23 = vld [vmem:[%s2506_s4 + $0x450] sm:$0xff] }
  0x3c   :  { %1234 = vmatprep.subr.bf16.mxu1 %v1233_v53  ;;  %v76_v49 = vld [vmem:[%s2506_s4 + $0x1c0] sm:$0xff]  ;;  %v93_v53 = vld [vmem:[%s2506_s4 + $0x248] sm:$0xff]  ;;  %v1301_v25 = vpack.c.bf16 %v175_v17, %v159_v16  ;;  %v191_v29 = vld [vmem:[%s2506_s4 + $0x558] sm:$0xff] }
  0x3d   :  { %v1255_v57 = vpack.c.bf16 %v76_v49, %v60_v48  ;;  %v189_v27 = vld [vmem:[%s2506_s4 + $0x548] sm:$0xff]  ;;  %v207_v31 = vld [vmem:[%s2506_s4 + $0x5d8] sm:$0xff]  ;;  %v204_v36 = vld [vmem:[%s2506_s4 + $0x5c0] sm:$0xff] }
  0x3e   :  { %1200 = vmatpush1.bf16.msra.mxu0 %v1199_v59  ;;  %v1257_v59 = vpack.c.bf16 %v109_v54, %v93_v53  ;;  %v205_v28 = vld [vmem:[%s2506_s4 + $0x5c8] sm:$0xff]  ;;  %v190_v37 = vld [vmem:[%s2506_s4 + $0x550] sm:$0xff]  ;;  %v1305_v38 = vpack.c.bf16 %v207_v31, %v191_v29  ;;  %v223_v42 = vld [vmem:[%s2506_s4 + $0x658] sm:$0xff] }
  0x3f   :  { %1236 = vmatpush1.bf16.msra.mxu1 %v1235_v60  ;;  %1202 = vmatprep.subr.bf16.mxu0 %v1201_v61  ;;  %v92_v60 = vld [vmem:[%s2506_s4 + $0x240] sm:$0xff]  ;;  %v221_v40 = vld [vmem:[%s2506_s4 + $0x648] sm:$0xff]  ;;  %v239_v43 = vld [vmem:[%s2506_s4 + $0x6d8] sm:$0xff] }
  0x40   :  { %1238 = vmatprep.subr.bf16.mxu1 %v1237_v1  ;;  %v108_v61 = vld [vmem:[%s2506_s4 + $0x2c0] sm:$0xff]  ;;  %v125_v1 = vld [vmem:[%s2506_s4 + $0x348] sm:$0xff]  ;;  %v222_v49 = vld [vmem:[%s2506_s4 + $0x650] sm:$0xff]  ;;  %v1309_v50 = vpack.c.bf16 %v239_v43, %v223_v42 }
  0x41   :  { %v1259_v5 = vpack.c.bf16 %v108_v61, %v92_v60  ;;  %v237_v41 = vld [vmem:[%s2506_s4 + $0x6c8] sm:$0xff]  ;;  %v236_v48 = vld [vmem:[%s2506_s4 + $0x6c0] sm:$0xff]  ;;  %v255_v54 = vld [vmem:[%s2506_s4 + $0x758] sm:$0xff] }
  0x42   :  { %1204 = vmatpush1.bf16.msra.mxu0 %v1203_v7  ;;  %v1295_v7 = vpack.c.bf16 %v110_v0, %v94_v62  ;;  %v253_v52 = vld [vmem:[%s2506_s4 + $0x748] sm:$0xff]  ;;  %v271_v55 = vld [vmem:[%s2506_s4 + $0x7d8] sm:$0xff]  ;;  %v268_v60 = vld [vmem:[%s2506_s4 + $0x7c0] sm:$0xff] }
  0x43   :  { %1240 = vmatpush1.bf16.msra.mxu1 %v1239_v8  ;;  %1206 = vmatprep.subr.bf16.mxu0 %v1205_v9  ;;  %v1261_v8 = vpack.c.bf16 %v141_v2, %v125_v1  ;;  %v140_v9 = vld [vmem:[%s2506_s4 + $0x3c0] sm:$0xff]  ;;  %v269_v53 = vld [vmem:[%s2506_s4 + $0x7c8] sm:$0xff]  ;;  %v254_v61 = vld [vmem:[%s2506_s4 + $0x750] sm:$0xff]  ;;  %v1313_v62 = vpack.c.bf16 %v271_v55, %v255_v54 }
  0x44   :  { %1242 = vmatprep.subr.bf16.mxu1 %v1241_v13  ;;  %v142_v13 = vld [vmem:[%s2506_s4 + $0x3d0] sm:$0xff]  ;;  %v1263_v18 = vpack.c.bf16 %v140_v9, %v124_v6  ;;  %v285_v0 = vld [vmem:[%s2506_s4 + $0x848] sm:$0xff]  ;;  %v287_v2 = vld [vmem:[%s2506_s4 + $0x858] sm:$0xff] }
  0x45   :  { %v301_v1 = vld [vmem:[%s2506_s4 + $0x8c8] sm:$0xff]  ;;  %v303_v3 = vld [vmem:[%s2506_s4 + $0x8d8] sm:$0xff]  ;;  %v286_v9 = vld [vmem:[%s2506_s4 + $0x850] sm:$0xff] }
  0x46   :  { %1208 = vmatpush1.bf16.msra.mxu0 %v1207_v19  ;;  %v1299_v19 = vpack.c.bf16 %v142_v13, %v126_v10  ;;  %v1281_v6 = vpack.c.bf16 %v301_v1, %v285_v0  ;;  %v1317_v10 = vpack.c.bf16 %v303_v3, %v287_v2  ;;  %v302_v11 = vld [vmem:[%s2506_s4 + $0x8d0] sm:$0xff]  ;;  %v49_v13 = vld [vmem:[%s2506_s4 + $0xe8] sm:$0xff]  ;;  %v179_v0 = vld [vmem:[%s2506_s4 + $0x4f8] sm:$0xff] }
  0x47   :  { %1244 = vmatpush1.bf16.msra.mxu1 %v1243_v20  ;;  %1210 = vmatprep.subr.bf16.mxu0 %v1209_v21  ;;  %v1265_v20 = vpack.c.bf16 %v173_v15, %v157_v14  ;;  %v156_v21 = vld [vmem:[%s2506_s4 + $0x440] sm:$0xff]  ;;  %v35_v14 = vld [vmem:[%s2506_s4 + $0x78] sm:$0xff]  ;;  %v1319_v17 = vpack.c.bf16 %v302_v11, %v286_v9  ;;  %v193_v9 = vld [vmem:[%s2506_s4 + $0x568] sm:$0xff] }
  0x48   :  { %1246 = vmatprep.subr.bf16.mxu1 %v1245_v26  ;;  %v174_v26 = vld [vmem:[%s2506_s4 + $0x4d0] sm:$0xff]  ;;  %v1267_v32 = vpack.c.bf16 %v172_v22, %v156_v21  ;;  %v51_v15 = vld [vmem:[%s2506_s4 + $0xf8] sm:$0xff] }
  0x49   :  { %v34_v21 = vld [vmem:[%s2506_s4 + $0x70] sm:$0xff]  ;;  %v1357_v22 = vpack.c.bf16 %v51_v15, %v35_v14  ;;  %v195_v11 = vld [vmem:[%s2506_s4 + $0x578] sm:$0xff] }
  0x4a   :  { %1212 = vmatpush1.bf16.msra.mxu0 %v1211_v33  ;;  %v1303_v33 = vpack.c.bf16 %v174_v26, %v158_v23  ;;  %v50_v23 = vld [vmem:[%s2506_s4 + $0xf0] sm:$0xff]  ;;  %v81_v26 = vld [vmem:[%s2506_s4 + $0x1e8] sm:$0xff] }
  0x4b   :  { %1248 = vmatpush1.bf16.msra.mxu1 %v1247_v34  ;;  %1250 = vmatprep.subr.bf16.mxu0 %v1249_v35  ;;  %v1269_v34 = vpack.c.bf16 %v205_v28, %v189_v27  ;;  %v188_v35 = vld [vmem:[%s2506_s4 + $0x540] sm:$0xff]  ;;  %v67_v27 = vld [vmem:[%s2506_s4 + $0x178] sm:$0xff]  ;;  %v1359_v31 = vpack.c.bf16 %v50_v23, %v34_v21  ;;  %v225_v21 = vld [vmem:[%s2506_s4 + $0x668] sm:$0xff] }
  0x4c   :  { %1286 = vmatprep.subr.bf16.mxu1 %v1285_v39  ;;  %v206_v39 = vld [vmem:[%s2506_s4 + $0x5d0] sm:$0xff]  ;;  %v1271_v44 = vpack.c.bf16 %v204_v36, %v188_v35  ;;  %v83_v28 = vld [vmem:[%s2506_s4 + $0x1f8] sm:$0xff] }
  0x4d   :  { %527 = vmatmul.mubr.f32.vlgmr.msra.gmra.mrb[2].mxu0 %v1613_v24  ;;  %v66_v35 = vld [vmem:[%s2506_s4 + $0x170] sm:$0xff]  ;;  %v1361_v36 = vpack.c.bf16 %v83_v28, %v67_v27  ;;  %v227_v23 = vld [vmem:[%s2506_s4 + $0x678] sm:$0xff] }
  0x4e   :  { %598 = vmatmul.mubr.f32.vlgmr.msra.gmra.mrb[2].mxu1 %v1613_v24  ;;  %1252 = vmatpush1.bf16.msra.mxu0 %v1251_v45  ;;  %v1307_v45 = vpack.c.bf16 %v206_v39, %v190_v37  ;;  %v82_v37 = vld [vmem:[%s2506_s4 + $0x1f0] sm:$0xff]  ;;  %v113_v39 = vld [vmem:[%s2506_s4 + $0x2e8] sm:$0xff] }
  0x4f   :  { %1288 = vmatpush1.bf16.msra.mxu1 %v1287_v46  ;;  %1254 = vmatprep.subr.bf16.mxu0 %v1253_v47  ;;  %v1273_v46 = vpack.c.bf16 %v237_v41, %v221_v40  ;;  %v220_v47 = vld [vmem:[%s2506_s4 + $0x640] sm:$0xff]  ;;  %v99_v40 = vld [vmem:[%s2506_s4 + $0x278] sm:$0xff]  ;;  %v1363_v43 = vpack.c.bf16 %v82_v37, %v66_v35  ;;  %v257_v35 = vld [vmem:[%s2506_s4 + $0x768] sm:$0xff] }
  0x50   :  { %1290 = vmatprep.subr.bf16.mxu1 %v1289_v51  ;;  %1101 = vmatprep.mubr.msk.f32.mxu0 %vm317_vm0, %v1626_v30  ;;  %v238_v51 = vld [vmem:[%s2506_s4 + $0x6d0] sm:$0xff]  ;;  %v1275_v56 = vpack.c.bf16 %v236_v48, %v220_v47  ;;  %v115_v41 = vld [vmem:[%s2506_s4 + $0x2f8] sm:$0xff] }
  0x51   :  { %1102 = vmatprep.mubr.msk.f32.mxu1 %vm317_vm0, %v1626_v30  ;;  %v98_v47 = vld [vmem:[%s2506_s4 + $0x270] sm:$0xff]  ;;  %v1365_v48 = vpack.c.bf16 %v115_v41, %v99_v40  ;;  %v259_v37 = vld [vmem:[%s2506_s4 + $0x778] sm:$0xff] }
  0x52   :  { %1256 = vmatpush1.bf16.msra.mxu0 %v1255_v57  ;;  %v1311_v57 = vpack.c.bf16 %v238_v51, %v222_v49  ;;  %v114_v49 = vld [vmem:[%s2506_s4 + $0x2f0] sm:$0xff]  ;;  %v145_v51 = vld [vmem:[%s2506_s4 + $0x3e8] sm:$0xff] }
  0x53   :  { %1292 = vmatpush1.bf16.msra.mxu1 %v1291_v58  ;;  %1258 = vmatprep.subr.bf16.mxu0 %v1257_v59  ;;  %v1277_v58 = vpack.c.bf16 %v269_v53, %v253_v52  ;;  %v252_v59 = vld [vmem:[%s2506_s4 + $0x740] sm:$0xff]  ;;  %v131_v52 = vld [vmem:[%s2506_s4 + $0x378] sm:$0xff]  ;;  %v1367_v55 = vpack.c.bf16 %v114_v49, %v98_v47  ;;  %v289_v47 = vld [vmem:[%s2506_s4 + $0x868] sm:$0xff] }
  0x54   :  { %1294 = vmatprep.subr.bf16.mxu1 %v1293_v63  ;;  %v270_v63 = vld [vmem:[%s2506_s4 + $0x7d0] sm:$0xff]  ;;  %v1279_v4 = vpack.c.bf16 %v268_v60, %v252_v59  ;;  %v147_v53 = vld [vmem:[%s2506_s4 + $0x3f8] sm:$0xff] }
  0x55   :  { %v130_v59 = vld [vmem:[%s2506_s4 + $0x370] sm:$0xff]  ;;  %v291_v49 = vld [vmem:[%s2506_s4 + $0x878] sm:$0xff] }
  0x56   :  { %1260 = vmatpush1.bf16.msra.mxu0 %v1259_v5  ;;  %v1315_v5 = vpack.c.bf16 %v270_v63, %v254_v61  ;;  %v146_v60 = vld [vmem:[%s2506_s4 + $0x3f0] sm:$0xff]  ;;  %v161_v61 = vld [vmem:[%s2506_s4 + $0x468] sm:$0xff]  ;;  %v163_v63 = vld [vmem:[%s2506_s4 + $0x478] sm:$0xff] }
  0x57   :  { %1296 = vmatpush1.bf16.msra.mxu1 %v1295_v7  ;;  %1262 = vmatprep.subr.bf16.mxu0 %v1261_v8  ;;  %v284_v7 = vld [vmem:[%s2506_s4 + $0x840] sm:$0xff]  ;;  %v1371_v2 = vpack.c.bf16 %v146_v60, %v130_v59 }
  0x58   :  { %1298 = vmatprep.subr.bf16.mxu1 %v1297_v12  ;;  %v300_v8 = vld [vmem:[%s2506_s4 + $0x8c0] sm:$0xff]  ;;  %v33_v12 = vld [vmem:[%s2506_s4 + $0x68] sm:$0xff] }
  0x59   :  { %v1283_v16 = vpack.c.bf16 %v300_v8, %v284_v7  ;;  %v1373_v7 = vpack.c.bf16 %v179_v0, %v163_v63  ;;  %v178_v8 = vld [vmem:[%s2506_s4 + $0x4f0] sm:$0xff]  ;;  %v888_v60 = vld [vmem:[%s2509_s2] sm:$0xf] }
  0x5a   :  { %1264 = vmatpush1.bf16.msra.mxu0 %v1263_v18  ;;  %v1321_v18 = vpack.c.bf16 %v49_v13, %v33_v12  ;;  %v211_v12 = vld [vmem:[%s2506_s4 + $0x5f8] sm:$0xff]  ;;  %1013 = vperm.xlu1 %1395, %v888_v60  }
  0x5b   :  { %1300 = vmatpush1.bf16.msra.mxu1 %v1299_v19  ;;  %1266 = vmatprep.subr.bf16.mxu0 %v1265_v20  ;;  %v32_v19 = vld [vmem:[%s2506_s4 + $0x60] sm:$0xff] }
  0x5c   :  { %1302 = vmatprep.subr.bf16.mxu1 %v1301_v25  ;;  %v48_v20 = vld [vmem:[%s2506_s4 + $0xe0] sm:$0xff]  ;;  %v65_v25 = vld [vmem:[%s2506_s4 + $0x168] sm:$0xff] }
  0x5d   :  { %v1323_v29 = vpack.c.bf16 %v48_v20, %v32_v19  ;;  %v1377_v19 = vpack.c.bf16 %v211_v12, %v195_v11  ;;  %v210_v20 = vld [vmem:[%s2506_s4 + $0x5f0] sm:$0xff] }
  0x5e   :  { %1268 = vmatpush1.bf16.msra.mxu0 %v1267_v32  ;;  %v1325_v32 = vpack.c.bf16 %v81_v26, %v65_v25  ;;  %v243_v25 = vld [vmem:[%s2506_s4 + $0x6f8] sm:$0xff] }
  0x5f   :  { %1304 = vmatpush1.bf16.msra.mxu1 %v1303_v33  ;;  %1270 = vmatprep.subr.bf16.mxu0 %v1269_v34  ;;  %v64_v33 = vld [vmem:[%s2506_s4 + $0x160] sm:$0xff] }
  0x60   :  { %1306 = vmatprep.subr.bf16.mxu1 %v1305_v38  ;;  %v80_v34 = vld [vmem:[%s2506_s4 + $0x1e0] sm:$0xff]  ;;  %v97_v38 = vld [vmem:[%s2506_s4 + $0x268] sm:$0xff] }
  0x61   :  { %v1327_v42 = vpack.c.bf16 %v80_v34, %v64_v33  ;;  %v1381_v33 = vpack.c.bf16 %v243_v25, %v227_v23  ;;  %v242_v34 = vld [vmem:[%s2506_s4 + $0x6f0] sm:$0xff] }
  0x62   :  { %1272 = vmatpush1.bf16.msra.mxu0 %v1271_v44  ;;  %v1329_v44 = vpack.c.bf16 %v113_v39, %v97_v38  ;;  %v275_v38 = vld [vmem:[%s2506_s4 + $0x7f8] sm:$0xff] }
  0x63   :  { %1308 = vmatpush1.bf16.msra.mxu1 %v1307_v45  ;;  %1274 = vmatprep.subr.bf16.mxu0 %v1273_v46  ;;  %v96_v45 = vld [vmem:[%s2506_s4 + $0x260] sm:$0xff] }
  0x64   :  { %1310 = vmatprep.subr.bf16.mxu1 %v1309_v50  ;;  %v112_v46 = vld [vmem:[%s2506_s4 + $0x2e0] sm:$0xff]  ;;  %v129_v50 = vld [vmem:[%s2506_s4 + $0x368] sm:$0xff] }
  0x65   :  { %v1331_v54 = vpack.c.bf16 %v112_v46, %v96_v45  ;;  %v1385_v45 = vpack.c.bf16 %v275_v38, %v259_v37  ;;  %v274_v46 = vld [vmem:[%s2506_s4 + $0x7f0] sm:$0xff] }
  0x66   :  { %1276 = vmatpush1.bf16.msra.mxu0 %v1275_v56  ;;  %v1333_v56 = vpack.c.bf16 %v145_v51, %v129_v50  ;;  %v307_v50 = vld [vmem:[%s2506_s4 + $0x8f8] sm:$0xff] }
  0x67   :  { %1312 = vmatpush1.bf16.msra.mxu1 %v1311_v57  ;;  %1278 = vmatprep.subr.bf16.mxu0 %v1277_v58  ;;  %v128_v57 = vld [vmem:[%s2506_s4 + $0x360] sm:$0xff] }
  0x68   :  { %1314 = vmatprep.subr.bf16.mxu1 %v1313_v62  ;;  %v144_v58 = vld [vmem:[%s2506_s4 + $0x3e0] sm:$0xff]  ;;  %v177_v62 = vld [vmem:[%s2506_s4 + $0x4e8] sm:$0xff] }
  0x69   :  { %v1335_v1 = vpack.c.bf16 %v144_v58, %v128_v57  ;;  %v1337_v3 = vpack.c.bf16 %v177_v62, %v161_v61  ;;  %v290_v57 = vld [vmem:[%s2506_s4 + $0x870] sm:$0xff] }
  0x6a   :  { %1280 = vmatpush1.bf16.msra.mxu0 %v1279_v4  ;;  %v160_v4 = vld [vmem:[%s2506_s4 + $0x460] sm:$0xff]  ;;  %v306_v58 = vld [vmem:[%s2506_s4 + $0x8f0] sm:$0xff] }
  0x6b   :  { %1316 = vmatpush1.bf16.msra.mxu1 %v1315_v5  ;;  %1282 = vmatprep.subr.bf16.mxu0 %v1281_v6  ;;  %v176_v5 = vld [vmem:[%s2506_s4 + $0x4e0] sm:$0xff]  ;;  %v162_v6 = vld [vmem:[%s2506_s4 + $0x470] sm:$0xff] }
  0x6c   :  { %1318 = vmatprep.subr.bf16.mxu1 %v1317_v10  ;;  %v209_v10 = vld [vmem:[%s2506_s4 + $0x5e8] sm:$0xff]  ;;  %v1339_v13 = vpack.c.bf16 %v176_v5, %v160_v4  ;;  %v1375_v14 = vpack.c.bf16 %v178_v8, %v162_v6 }
  0x6d   :  { %v1341_v15 = vpack.c.bf16 %v209_v10, %v193_v9 }
  0x6e   :  { %1284 = vmatpush1.bf16.msra.mxu0 %v1283_v16  ;;  %v192_v16 = vld [vmem:[%s2506_s4 + $0x560] sm:$0xff] }
  0x6f   :  { %1320 = vmatpush1.bf16.msra.mxu1 %v1319_v17  ;;  %1322 = vmatprep.subr.bf16.mxu0 %v1321_v18  ;;  %v208_v17 = vld [vmem:[%s2506_s4 + $0x5e0] sm:$0xff]  ;;  %v194_v18 = vld [vmem:[%s2506_s4 + $0x570] sm:$0xff] }
  0x70   :  { %1358 = vmatprep.subr.bf16.mxu1 %v1357_v22  ;;  %v241_v22 = vld [vmem:[%s2506_s4 + $0x6e8] sm:$0xff]  ;;  %v1343_v26 = vpack.c.bf16 %v208_v17, %v192_v16  ;;  %v1379_v27 = vpack.c.bf16 %v210_v20, %v194_v18 }
  0x71   :  { %669 = vmatmul.mubr.f32.vlgmr.msra.gmra.mrb[4].mxu0 %v1613_v24  ;;  %v1345_v28 = vpack.c.bf16 %v241_v22, %v225_v21 }
  0x72   :  { %740 = vmatmul.mubr.f32.vlgmr.msra.gmra.mrb[4].mxu1 %v1613_v24  ;;  %1324 = vmatpush1.bf16.msra.mxu0 %v1323_v29  ;;  %v224_v29 = vld [vmem:[%s2506_s4 + $0x660] sm:$0xff] }
  0x73   :  { %1360 = vmatpush1.bf16.msra.mxu1 %v1359_v31  ;;  %1326 = vmatprep.subr.bf16.mxu0 %v1325_v32  ;;  %v240_v31 = vld [vmem:[%s2506_s4 + $0x6e0] sm:$0xff]  ;;  %v226_v32 = vld [vmem:[%s2506_s4 + $0x670] sm:$0xff] }
  0x74   :  { %1362 = vmatprep.subr.bf16.mxu1 %v1361_v36  ;;  %1103 = vmatprep.mubr.msk.f32.mxu0 %vm317_vm0, %v1626_v30  ;;  %v273_v36 = vld [vmem:[%s2506_s4 + $0x7e8] sm:$0xff]  ;;  %v1347_v39 = vpack.c.bf16 %v240_v31, %v224_v29  ;;  %v1383_v40 = vpack.c.bf16 %v242_v34, %v226_v32 }
  0x75   :  { %1104 = vmatprep.mubr.msk.f32.mxu1 %vm317_vm0, %v1626_v30  ;;  %v1369_v30 = vpack.c.bf16 %v147_v53, %v131_v52  ;;  %v1349_v41 = vpack.c.bf16 %v273_v36, %v257_v35 }
  0x76   :  { %1328 = vmatpush1.bf16.msra.mxu0 %v1327_v42  ;;  %v256_v42 = vld [vmem:[%s2506_s4 + $0x760] sm:$0xff] }
  0x77   :  { %1364 = vmatpush1.bf16.msra.mxu1 %v1363_v43  ;;  %1330 = vmatprep.subr.bf16.mxu0 %v1329_v44  ;;  %v272_v43 = vld [vmem:[%s2506_s4 + $0x7e0] sm:$0xff]  ;;  %v258_v44 = vld [vmem:[%s2506_s4 + $0x770] sm:$0xff] }
  0x78   :  { %1366 = vmatprep.subr.bf16.mxu1 %v1365_v48  ;;  %v305_v48 = vld [vmem:[%s2506_s4 + $0x8e8] sm:$0xff]  ;;  %v1351_v51 = vpack.c.bf16 %v272_v43, %v256_v42  ;;  %v1387_v52 = vpack.c.bf16 %v274_v46, %v258_v44 }
  0x79   :  { %v1353_v53 = vpack.c.bf16 %v305_v48, %v289_v47 }
  0x7a   :  { %1332 = vmatpush1.bf16.msra.mxu0 %v1331_v54  ;;  %v288_v54 = vld [vmem:[%s2506_s4 + $0x860] sm:$0xff] }
  0x7b   :  { %1368 = vmatpush1.bf16.msra.mxu1 %v1367_v55  ;;  %1334 = vmatprep.subr.bf16.mxu0 %v1333_v56  ;;  %v304_v55 = vld [vmem:[%s2506_s4 + $0x8e0] sm:$0xff]  ;;  %v1389_v56 = vpack.c.bf16 %v307_v50, %v291_v49 }
  0x7c   :  { %1370 = vmatprep.subr.bf16.mxu1 %v1369_v30  ;;  %v1355_v59 = vpack.c.bf16 %v304_v55, %v288_v54  ;;  %v1391_v30 = vpack.c.bf16 %v306_v58, %v290_v57 }
  0x7e   :  { %1336 = vmatpush1.bf16.msra.mxu0 %v1335_v1 }
  0x7f   :  { %1372 = vmatpush1.bf16.msra.mxu1 %v1371_v2  ;;  %1338 = vmatprep.subr.bf16.mxu0 %v1337_v3 }
  0x80   :  { %1374 = vmatprep.subr.bf16.mxu1 %v1373_v7 }
  0x82   :  { %1340 = vmatpush1.bf16.msra.mxu0 %v1339_v13 }
  0x83   :  { %1376 = vmatpush1.bf16.msra.mxu1 %v1375_v14  ;;  %1342 = vmatprep.subr.bf16.mxu0 %v1341_v15 }
  0x84   :  { %1378 = vmatprep.subr.bf16.mxu1 %v1377_v19 }
  0x86   :  { %1344 = vmatpush1.bf16.msra.mxu0 %v1343_v26 }
  0x87   :  { %1380 = vmatpush1.bf16.msra.mxu1 %v1379_v27  ;;  %1346 = vmatprep.subr.bf16.mxu0 %v1345_v28 }
  0x88   :  { %1382 = vmatprep.subr.bf16.mxu1 %v1381_v33 }
  0x8a   :  { %1348 = vmatpush1.bf16.msra.mxu0 %v1347_v39 }
  0x8b   :  { %1384 = vmatpush1.bf16.msra.mxu1 %v1383_v40  ;;  %1350 = vmatprep.subr.bf16.mxu0 %v1349_v41 }
  0x8c   :  { %1386 = vmatprep.subr.bf16.mxu1 %v1385_v45 }
  0x8e   :  { %1352 = vmatpush1.bf16.msra.mxu0 %v1351_v51 }
  0x8f   :  { %1388 = vmatpush1.bf16.msra.mxu1 %v1387_v52  ;;  %1354 = vmatprep.subr.bf16.mxu0 %v1353_v53 }
  0x90   :  { %1390 = vmatprep.subr.bf16.mxu1 %v1389_v56 }
  0x92   :  { %1356 = vmatpush1.bf16.msra.mxu0 %v1355_v59 }
  0x93   :  { %1392 = vmatpush1.bf16.msra.mxu1 %v1391_v30 }
  0x95   :  { %811 = vmatmul.mubr.f32.vlgmr.msra.gmra.mrb[6].mxu0 %v1613_v24 }
  0x96   :  { %882 = vmatmul.mubr.f32.vlgmr.msra.gmra.mrb[6].mxu1 %v1613_v24 }
  0xb9   :  { %v2333_v5 = vpop.permute.xlu0 %312 }
  0xfc   :  { %v386_v61 = vpop.f32.mrb[0].mxu0 }
  0xfd   :  { %v388_v62 = vpop.f32.mrb[1].mxu0  ;;  %v457_v63 = vpop.f32.mrb[0].mxu1  ;;  %v2336_v6 = vadd.f32 %v386_v61, %v2333_v5 }
  0xfe   :  { %v459_v0 = vpop.f32.mrb[1].mxu1  ;;  %v2339_v24 = vadd.f32 %v388_v62, %v2333_v5  ;;  %v2346_v9 = vadd.f32 %v457_v63, %v2333_v5 }
  0xff   :  { %v925_v7 = vmul.f32 %v2336_v6, %v2336_v6  ;;  %v891_v10 = vsel %vm890_vm1, %v2336_v6, 0.0  ;;  %v2357_v16 = vadd.f32 %v459_v0, %v2333_v5 }
 0x100   :  { %v926_v8 = vmul.f32 %v2339_v24, %v2339_v24  ;;  %v892_v11 = vsel %vm890_vm1, %v2339_v24, 0.0  ;;  %v927_v15 = vmul.f32 %v2346_v9, %v2346_v9  ;;  %v894_v21 = vsel %vm890_vm1, %v2346_v9, 0.0 }
 0x101   :  { %v941_v13 = vsel %vm890_vm1, %v925_v7, 0.0  ;;  %v893_v19 = vadd.f32 %v892_v11, %v891_v10  ;;  %v928_v26 = vmul.f32 %v2357_v16, %v2357_v16  ;;  %v896_v28 = vsel %vm890_vm1, %v2357_v16, 0.0 }
 0x102   :  { %v942_v14 = vsel %vm890_vm1, %v926_v8, 0.0  ;;  %v944_v25 = vsel %vm890_vm1, %v927_v15, 0.0 }
 0x103   :  { %v943_v23 = vadd.f32 %v942_v14, %v941_v13  ;;  %v895_v27 = vadd.f32 %v894_v21, %v893_v19  ;;  %v946_v33 = vsel %vm890_vm1, %v928_v26, 0.0 }
 0x105   :  { %v945_v32 = vadd.f32 %v944_v25, %v943_v23  ;;  %v897_v35 = vadd.f32 %v896_v28, %v895_v27 }
 0x107   :  { %v947_v39 = vadd.f32 %v946_v33, %v945_v32 }
 0x120   :  { %v528_v1 = vpop.f32.mrb[2].mxu0 }
 0x121   :  { %v530_v2 = vpop.f32.mrb[3].mxu0  ;;  %v599_v3 = vpop.f32.mrb[2].mxu1  ;;  %v2362_v22 = vadd.f32 %v528_v1, %v2333_v5 }
 0x122   :  { %v601_v4 = vpop.f32.mrb[3].mxu1  ;;  %v2372_v31 = vadd.f32 %v530_v2, %v2333_v5  ;;  %v2381_v38 = vadd.f32 %v599_v3, %v2333_v5 }
 0x123   :  { %v929_v29 = vmul.f32 %v2362_v22, %v2362_v22  ;;  %v898_v34 = vsel %vm890_vm1, %v2362_v22, 0.0  ;;  %v2389_v45 = vadd.f32 %v601_v4, %v2333_v5 }
 0x124   :  { %v930_v37 = vmul.f32 %v2372_v31, %v2372_v31  ;;  %v899_v40 = vadd.f32 %v898_v34, %v897_v35  ;;  %v900_v41 = vsel %vm890_vm1, %v2372_v31, 0.0  ;;  %v931_v44 = vmul.f32 %v2381_v38, %v2381_v38 }
 0x125   :  { %v948_v36 = vsel %vm890_vm1, %v929_v29, 0.0  ;;  %v902_v47 = vsel %vm890_vm1, %v2381_v38, 0.0  ;;  %v932_v51 = vmul.f32 %v2389_v45, %v2389_v45  ;;  %v904_v53 = vsel %vm890_vm1, %v2389_v45, 0.0 }
 0x126   :  { %v949_v42 = vadd.f32 %v948_v36, %v947_v39  ;;  %v950_v43 = vsel %vm890_vm1, %v930_v37, 0.0  ;;  %v901_v46 = vadd.f32 %v900_v41, %v899_v40  ;;  %v952_v50 = vsel %vm890_vm1, %v931_v44, 0.0 }
 0x127   :  { %v954_v57 = vsel %vm890_vm1, %v932_v51, 0.0 }
 0x128   :  { %v951_v49 = vadd.f32 %v950_v43, %v949_v42  ;;  %v903_v52 = vadd.f32 %v902_v47, %v901_v46 }
 0x12a   :  { %v953_v56 = vadd.f32 %v952_v50, %v951_v49  ;;  %v905_v59 = vadd.f32 %v904_v53, %v903_v52 }
 0x12c   :  { %v955_v62 = vadd.f32 %v954_v57, %v953_v56  ;;  %v1014_v56 = vpop.permute.xlu1 %1013 }
 0x144   :  { %v670_v12 = vpop.f32.mrb[4].mxu0 }
 0x145   :  { %v672_v17 = vpop.f32.mrb[5].mxu0  ;;  %v741_v18 = vpop.f32.mrb[4].mxu1  ;;  %v2394_v48 = vadd.f32 %v670_v12, %v2333_v5 }
 0x146   :  { %v743_v20 = vpop.f32.mrb[5].mxu1  ;;  %v2404_v55 = vadd.f32 %v672_v17, %v2333_v5  ;;  %v2413_v61 = vadd.f32 %v741_v18, %v2333_v5 }
 0x147   :  { %v933_v54 = vmul.f32 %v2394_v48, %v2394_v48  ;;  %v906_v58 = vsel %vm890_vm1, %v2394_v48, 0.0  ;;  %v2421_v4 = vadd.f32 %v743_v20, %v2333_v5 }
 0x148   :  { %v934_v60 = vmul.f32 %v2404_v55, %v2404_v55  ;;  %v907_v63 = vadd.f32 %v906_v58, %v905_v59  ;;  %v908_v0 = vsel %vm890_vm1, %v2404_v55, 0.0  ;;  %v935_v3 = vmul.f32 %v2413_v61, %v2413_v61 }
 0x149   :  { %v956_v30 = vsel %vm890_vm1, %v933_v54, 0.0  ;;  %v910_v8 = vsel %vm890_vm1, %v2413_v61, 0.0  ;;  %v936_v12 = vmul.f32 %v2421_v4, %v2421_v4  ;;  %v912_v14 = vsel %vm890_vm1, %v2421_v4, 0.0  ;;  %v889_v54 = vld [vmem:[%s2510_s3] sm:$0xf] }
 0x14a   :  { %v957_v1 = vadd.f32 %v956_v30, %v955_v62  ;;  %v958_v2 = vsel %vm890_vm1, %v934_v60, 0.0  ;;  %v909_v7 = vadd.f32 %v908_v0, %v907_v63  ;;  %v960_v11 = vsel %vm890_vm1, %v935_v3, 0.0 }
 0x14b   :  { %v962_v18 = vsel %vm890_vm1, %v936_v12, 0.0 }
 0x14c   :  { %v959_v10 = vadd.f32 %v958_v2, %v957_v1  ;;  %v911_v13 = vadd.f32 %v910_v8, %v909_v7 }
 0x14e   :  { %v961_v15 = vadd.f32 %v960_v11, %v959_v10  ;;  %v913_v23 = vadd.f32 %v912_v14, %v911_v13 }
 0x150   :  { %v963_v33 = vadd.f32 %v962_v18, %v961_v15 }
 0x168   :  { %v812_v17 = vpop.f32.mrb[6].mxu0 }
 0x169   :  { %v2432_v19 = vadd.f32 %v812_v17, %v2333_v5  ;;  %v883_v20 = vpop.f32.mrb[6].mxu1  ;;  %v814_v21 = vpop.f32.mrb[7].mxu0 }
 0x16a   :  { %v2435_v25 = vadd.f32 %v883_v20, %v2333_v5  ;;  %v2438_v26 = vadd.f32 %v814_v21, %v2333_v5  ;;  %v885_v27 = vpop.f32.mrb[7].mxu1 }
 0x16b   :  { %v914_v28 = vsel %vm890_vm1, %v2432_v19, 0.0  ;;  %v937_v29 = vmul.f32 %v2432_v19, %v2432_v19  ;;  %v2445_v32 = vadd.f32 %v885_v27, %v2333_v5 }
 0x16c   :  { %v915_v34 = vadd.f32 %v914_v28, %v913_v23  ;;  %v916_v35 = vsel %vm890_vm1, %v2438_v26, 0.0  ;;  %v938_v36 = vmul.f32 %v2438_v26, %v2438_v26  ;;  %v939_v39 = vmul.f32 %v2435_v25, %v2435_v25 }
 0x16d   :  { %v964_v37 = vsel %vm890_vm1, %v937_v29, 0.0  ;;  %v918_v5 = vsel %vm890_vm1, %v2435_v25, 0.0  ;;  %v940_v43 = vmul.f32 %v2445_v32, %v2445_v32  ;;  %v920_v47 = vsel %vm890_vm1, %v2445_v32, 0.0 }
 0x16e   :  { %v917_v40 = vadd.f32 %v916_v35, %v915_v34  ;;  %v965_v41 = vadd.f32 %v964_v37, %v963_v33  ;;  %v966_v42 = vsel %vm890_vm1, %v938_v36, 0.0  ;;  %v968_v49 = vsel %vm890_vm1, %v939_v39, 0.0 }
 0x16f   :  { %v970_v52 = vsel %vm890_vm1, %v940_v43, 0.0 }
 0x170   :  { %v919_v44 = vadd.f32 %v918_v5, %v917_v40  ;;  %v967_v46 = vadd.f32 %v966_v42, %v965_v41 }
 0x172   :  { %v921_v50 = vadd.f32 %v920_v47, %v919_v44  ;;  %v969_v51 = vadd.f32 %v968_v49, %v967_v46 }
 0x174   :  { %922 = vadd.xlane.f32.xlu0 %v921_v50  ;;  %v971_v53 = vadd.f32 %v970_v52, %v969_v51 }
 0x176   :  { %972 = vadd.xlane.f32.xlu1 %v971_v53 }
 0x187   :  { %1034 = vperm.xlu1 %1395, %v889_v54  }
 0x201   :  { %v923_v57 = vpop.xlane.xlu0 %922 }
 0x202   :  { %v924_v58 = vmul.f32 0.00048828125, %v923_v57 }
 0x203   :  { %v973_v59 = vpop.xlane.xlu1 %972 }
 0x204   :  { %v974_v30 = vmul.f32 0.00048828125, %v973_v59  ;;  %v975_v60 = vmul.f32 %v924_v58, %v924_v58  ;;  %v977_v0 = vsub.f32 %v2336_v6, %v924_v58  ;;  %v978_v1 = vsub.f32 %v2339_v24, %v924_v58 }
 0x205   :  { %v979_v2 = vsub.f32 %v2346_v9, %v924_v58  ;;  %v980_v3 = vsub.f32 %v2357_v16, %v924_v58  ;;  %v981_v7 = vsub.f32 %v2362_v22, %v924_v58  ;;  %v982_v8 = vsub.f32 %v2372_v31, %v924_v58 }
 0x206   :  { %v976_v62 = vsub.f32 %v974_v30, %v975_v60  ;;  %v983_v10 = vsub.f32 %v2381_v38, %v924_v58  ;;  %v984_v11 = vsub.f32 %v2389_v45, %v924_v58  ;;  %v985_v12 = vsub.f32 %v2394_v48, %v924_v58 }
 0x207   :  { %v986_v13 = vsub.f32 %v2404_v55, %v924_v58  ;;  %v987_v6 = vsub.f32 %v2413_v61, %v924_v58  ;;  %v988_v24 = vsub.f32 %v2421_v4, %v924_v58  ;;  %v989_v9 = vsub.f32 %v2432_v19, %v924_v58  ;;  %v1035_v5 = vpop.permute.xlu1 %1034 }
 0x208   :  { %v993_v63 = vadd.f32 1e-05, %v976_v62  ;;  %v990_v16 = vsub.f32 %v2438_v26, %v924_v58  ;;  %v991_v22 = vsub.f32 %v2435_v25, %v924_v58  ;;  %v992_v31 = vsub.f32 %v2445_v32, %v924_v58 }
 0x20a   :  { %1397 = vrsqrt.f32 %v993_v63 }
 0x214   :  { %v1398_v14 = vpop.eup %1397 }
 0x215   :  { %v995_v38 = vmul.f32 %v1398_v14, %v977_v0  ;;  %v996_v15 = vmul.f32 %v1398_v14, %v978_v1  ;;  %v997_v45 = vmul.f32 %v1398_v14, %v979_v2  ;;  %v998_v17 = vmul.f32 %v1398_v14, %v980_v3 }
 0x216   :  { %v999_v48 = vmul.f32 %v1398_v14, %v981_v7  ;;  %v1000_v18 = vmul.f32 %v1398_v14, %v982_v8  ;;  %v1001_v55 = vmul.f32 %v1398_v14, %v983_v10  ;;  %v1002_v20 = vmul.f32 %v1398_v14, %v984_v11 }
 0x217   :  { %v1003_v61 = vmul.f32 %v1398_v14, %v985_v12  ;;  %v1004_v21 = vmul.f32 %v1398_v14, %v986_v13  ;;  %v1005_v4 = vmul.f32 %v1398_v14, %v987_v6  ;;  %v1006_v23 = vmul.f32 %v1398_v14, %v988_v24 }
 0x218   :  { %v1007_v27 = vmul.f32 %v1398_v14, %v989_v9  ;;  %v1008_v19 = vmul.f32 %v1398_v14, %v990_v16  ;;  %v1009_v28 = vmul.f32 %v1398_v14, %v991_v22  ;;  %v1010_v26 = vmul.f32 %v1398_v14, %v992_v31 }
 0x219   :  { %v1016_v29 = vmul.f32 %v1014_v56, %v995_v38  ;;  %v1017_v25 = vmul.f32 %v1014_v56, %v996_v15  ;;  %v1018_v33 = vmul.f32 %v1014_v56, %v997_v45  ;;  %v1019_v32 = vmul.f32 %v1014_v56, %v998_v17 }
 0x21a   :  { %v1020_v34 = vmul.f32 %v1014_v56, %v999_v48  ;;  %v1021_v35 = vmul.f32 %v1014_v56, %v1000_v18  ;;  %v1022_v36 = vmul.f32 %v1014_v56, %v1001_v55  ;;  %v1023_v37 = vmul.f32 %v1014_v56, %v1002_v20 }
 0x21b   :  { %v1024_v39 = vmul.f32 %v1014_v56, %v1003_v61  ;;  %v1025_v40 = vmul.f32 %v1014_v56, %v1004_v21  ;;  %v1026_v41 = vmul.f32 %v1014_v56, %v1005_v4  ;;  %v1027_v42 = vmul.f32 %v1014_v56, %v1006_v23 }
 0x21c   :  { %v1028_v43 = vmul.f32 %v1014_v56, %v1007_v27  ;;  %v1029_v44 = vmul.f32 %v1014_v56, %v1008_v19  ;;  %v1030_v46 = vmul.f32 %v1014_v56, %v1009_v28  ;;  %v1031_v47 = vmul.f32 %v1014_v56, %v1010_v26 }
 0x21d   :  { %v1037_v49 = vadd.f32 %v1035_v5, %v1016_v29  ;;  %v1038_v50 = vadd.f32 %v1035_v5, %v1017_v25  ;;  %v1039_v51 = vadd.f32 %v1035_v5, %v1018_v33  ;;  %v1040_v52 = vadd.f32 %v1035_v5, %v1019_v32 }
 0x21e   :  { %v1041_v53 = vadd.f32 %v1035_v5, %v1020_v34  ;;  %v1042_v54 = vadd.f32 %v1035_v5, %v1021_v35  ;;  %v1043_v57 = vadd.f32 %v1035_v5, %v1022_v36  ;;  %v1044_v58 = vadd.f32 %v1035_v5, %v1023_v37 }
 0x21f   :  { %v1045_v59 = vadd.f32 %v1035_v5, %v1024_v39  ;;  %v1046_v30 = vadd.f32 %v1035_v5, %v1025_v40  ;;  %v1047_v60 = vadd.f32 %v1035_v5, %v1026_v41  ;;  %v1048_v62 = vadd.f32 %v1035_v5, %v1027_v42 }
 0x220   :  { %v1049_v63 = vadd.f32 %v1035_v5, %v1028_v43  ;;  %v1050_v0 = vadd.f32 %v1035_v5, %v1029_v44  ;;  %v1051_v1 = vadd.f32 %v1035_v5, %v1030_v46  ;;  %v1052_v2 = vadd.f32 %v1035_v5, %v1031_v47 }
 0x221   :  { %v1069_v3 = vcombine.low %v1037_v49, %v1038_v50  ;;  %v1070_v7 = vcombine.low %v1039_v51, %v1040_v52  ;;  %v1071_v8 = vcombine.low %v1041_v53, %v1042_v54  ;;  %v1072_v56 = vcombine.low %v1043_v57, %v1044_v58 }
 0x222   :  { %v1073_v10 = vcombine.low %v1045_v59, %v1046_v30  ;;  %v1074_v11 = vcombine.low %v1047_v60, %v1048_v62  ;;  %v1075_v12 = vcombine.low %v1049_v63, %v1050_v0  ;;  %v1076_v13 = vcombine.low %v1051_v1, %v1052_v2 }
 0x223   :  { %1085 = vst [vmem:[%s2511_s5] sm:$0xff] %v1069_v3  ;;  %1086 = vst [vmem:[%s2511_s5 + $0x8] sm:$0xff] %v1070_v7 }
 0x224   :  { %1087 = vst [vmem:[%s2511_s5 + $0x10] sm:$0xff] %v1071_v8  ;;  %1088 = vst [vmem:[%s2511_s5 + $0x18] sm:$0xff] %v1072_v56 }
 0x225   :  { %1089 = vst [vmem:[%s2511_s5 + $0x20] sm:$0xff] %v1073_v10  ;;  %1090 = vst [vmem:[%s2511_s5 + $0x28] sm:$0xff] %v1074_v11 }
 0x226   :  { %1091 = vst [vmem:[%s2511_s5 + $0x30] sm:$0xff] %v1075_v12  ;;  %1092 = vst [vmem:[%s2511_s5 + $0x38] sm:$0xff] %v1076_v13 }

// kernel: unet_forward.13
= control target key start
LH: loop header
LB: loop body
LE: loop exit
PB: predicated region body
PF: predicated region fallthrough
CT: control target
= control target key end

     0   :  { %v1040_v3 = vmov 0.0   ;;  %v1041_v10 = vmov 0   ;;  %vm309_vm0 = vcmask 588800   ;;  %s1574_s2 = inlined_call_operand.vmem [shape: f32[72,2048], index: 2, kind: input, shape index: {}]   ;;  %s1575_s0 = inlined_call_operand.vmem [shape: f32[8,72], index: 0, kind: input, shape index: {}]   ;;  %s1576_s1 = inlined_call_operand.vmem [shape: f32[8,1], index: 1, kind: input, shape index: {}]   ;;  %s1577_s3 = inlined_call_operand.vmem [shape: f32[8,2048], index: 3, kind: output, shape index: {}]  }
   0x1   :  { %v15_v0 = vld [vmem:[%s1574_s2 + $0x8] sm:$0xff]  ;;  %v17_v2 = vld [vmem:[%s1574_s2 + $0x18] sm:$0xff]  ;;  %377 = vmatprep.mubr.f32.mxu0 %v1040_v3  ;;  %448 = vmatprep.mubr.f32.mxu1 %v1040_v3  ;;  %v14_v8 = vld [vmem:[%s1574_s2] sm:$0xff] }
   0x2   :  { %v31_v1 = vld [vmem:[%s1574_s2 + $0x88] sm:$0xff]  ;;  %v159_v4 = vmax.f32 %v15_v0, 0.0  ;;  %v33_v6 = vld [vmem:[%s1574_s2 + $0x98] sm:$0xff]  ;;  %v161_v7 = vmax.f32 %v17_v2, 0.0  ;;  %v30_v9 = vld [vmem:[%s1574_s2 + $0x80] sm:$0xff]  ;;  %1039 = vset.pattern.permute.xlu0 %v1041_v10  ;;  %v158_v12 = vmax.f32 %v14_v8, 0.0 }
   0x3   :  { %v175_v5 = vmax.f32 %v31_v1, 0.0  ;;  %v177_v11 = vmax.f32 %v33_v6, 0.0  ;;  %v174_v13 = vmax.f32 %v30_v9, 0.0  ;;  %v16_v14 = vld [vmem:[%s1574_s2 + $0x10] sm:$0xff]  ;;  %v47_v16 = vld [vmem:[%s1574_s2 + $0x108] sm:$0xff]  ;;  %v49_v22 = vld [vmem:[%s1574_s2 + $0x118] sm:$0xff] }
   0x4   :  { %v32_v15 = vld [vmem:[%s1574_s2 + $0x90] sm:$0xff]  ;;  %v160_v18 = vmax.f32 %v16_v14, 0.0  ;;  %v63_v20 = vld [vmem:[%s1574_s2 + $0x188] sm:$0xff]  ;;  %v191_v21 = vmax.f32 %v47_v16, 0.0  ;;  %v65_v23 = vld [vmem:[%s1574_s2 + $0x198] sm:$0xff]  ;;  %v193_v27 = vmax.f32 %v49_v22, 0.0 }
   0x5   :  { %v909_v17 = vpack.c.bf16 %v175_v5, %v159_v4  ;;  %v176_v19 = vmax.f32 %v32_v15, 0.0  ;;  %v925_v24 = vpack.c.bf16 %v177_v11, %v161_v7  ;;  %v911_v25 = vpack.c.bf16 %v174_v13, %v158_v12  ;;  %v46_v28 = vld [vmem:[%s1574_s2 + $0x100] sm:$0xff]  ;;  %v48_v30 = vld [vmem:[%s1574_s2 + $0x110] sm:$0xff]  ;;  %v79_v36 = vld [vmem:[%s1574_s2 + $0x208] sm:$0xff] }
   0x6   :  { %v207_v26 = vmax.f32 %v63_v20, 0.0  ;;  %v62_v29 = vld [vmem:[%s1574_s2 + $0x180] sm:$0xff]  ;;  %v209_v32 = vmax.f32 %v65_v23, 0.0  ;;  %v190_v33 = vmax.f32 %v46_v28, 0.0  ;;  %v64_v35 = vld [vmem:[%s1574_s2 + $0x190] sm:$0xff]  ;;  %v95_v37 = vld [vmem:[%s1574_s2 + $0x288] sm:$0xff] }
   0x7   :  { %910 = vmatprep.subr.bf16.mxu0 %v909_v17  ;;  %v927_v31 = vpack.c.bf16 %v176_v19, %v160_v18  ;;  %v206_v34 = vmax.f32 %v62_v29, 0.0  ;;  %926 = vmatprep.subr.bf16.mxu1 %v925_v24  ;;  %v192_v39 = vmax.f32 %v48_v30, 0.0  ;;  %v208_v40 = vmax.f32 %v64_v35, 0.0  ;;  %v81_v42 = vld [vmem:[%s1574_s2 + $0x218] sm:$0xff]  ;;  %v78_v44 = vld [vmem:[%s1574_s2 + $0x200] sm:$0xff]  ;;  %v80_v50 = vld [vmem:[%s1574_s2 + $0x210] sm:$0xff] }
   0x8   :  { %912 = vmatpush1.bf16.msra.mxu0 %v911_v25  ;;  %v913_v38 = vpack.c.bf16 %v207_v26, %v191_v21  ;;  %v223_v41 = vmax.f32 %v79_v36, 0.0  ;;  %v97_v43 = vld [vmem:[%s1574_s2 + $0x298] sm:$0xff]  ;;  %v929_v45 = vpack.c.bf16 %v209_v32, %v193_v27  ;;  %v239_v47 = vmax.f32 %v95_v37, 0.0  ;;  %v94_v49 = vld [vmem:[%s1574_s2 + $0x280] sm:$0xff]  ;;  %v96_v51 = vld [vmem:[%s1574_s2 + $0x290] sm:$0xff] }
   0x9   :  { %928 = vmatpush1.bf16.msra.mxu1 %v927_v31  ;;  %v915_v46 = vpack.c.bf16 %v206_v34, %v190_v33  ;;  %v225_v48 = vmax.f32 %v81_v42, 0.0  ;;  %v931_v52 = vpack.c.bf16 %v208_v40, %v192_v39  ;;  %v241_v53 = vmax.f32 %v97_v43, 0.0  ;;  %v111_v56 = vld [vmem:[%s1574_s2 + $0x308] sm:$0xff]  ;;  %v113_v58 = vld [vmem:[%s1574_s2 + $0x318] sm:$0xff]  ;;  %v110_v0 = vld [vmem:[%s1574_s2 + $0x300] sm:$0xff] }
   0xa   :  { %914 = vmatprep.subr.bf16.mxu0 %v913_v38  ;;  %v222_v54 = vmax.f32 %v78_v44, 0.0  ;;  %v238_v55 = vmax.f32 %v94_v49, 0.0  ;;  %v127_v57 = vld [vmem:[%s1574_s2 + $0x388] sm:$0xff]  ;;  %930 = vmatprep.subr.bf16.mxu1 %v929_v45  ;;  %v917_v59 = vpack.c.bf16 %v239_v47, %v223_v41  ;;  %v224_v60 = vmax.f32 %v80_v50, 0.0  ;;  %v129_v63 = vld [vmem:[%s1574_s2 + $0x398] sm:$0xff]  ;;  %v126_v1 = vld [vmem:[%s1574_s2 + $0x380] sm:$0xff] }
   0xb   :  { %v240_v61 = vmax.f32 %v96_v51, 0.0  ;;  %v255_v62 = vmax.f32 %v111_v56, 0.0  ;;  %v933_v2 = vpack.c.bf16 %v241_v53, %v225_v48  ;;  %v271_v5 = vmax.f32 %v127_v57, 0.0  ;;  %v112_v7 = vld [vmem:[%s1574_s2 + $0x310] sm:$0xff]  ;;  %v143_v13 = vld [vmem:[%s1574_s2 + $0x408] sm:$0xff]  ;;  %v145_v14 = vld [vmem:[%s1574_s2 + $0x418] sm:$0xff] }
   0xc   :  { %916 = vmatpush1.bf16.msra.mxu0 %v915_v46  ;;  %v919_v4 = vpack.c.bf16 %v238_v55, %v222_v54  ;;  %v257_v6 = vmax.f32 %v113_v58, 0.0  ;;  %v128_v8 = vld [vmem:[%s1574_s2 + $0x390] sm:$0xff]  ;;  %v273_v10 = vmax.f32 %v129_v63, 0.0  ;;  %v254_v11 = vmax.f32 %v110_v0, 0.0  ;;  %v142_v18 = vld [vmem:[%s1574_s2 + $0x400] sm:$0xff]  ;;  %v19_v19 = vld [vmem:[%s1574_s2 + $0x28] sm:$0xff] }
   0xd   :  { %932 = vmatpush1.bf16.msra.mxu1 %v931_v52  ;;  %918 = vmatprep.subr.bf16.mxu0 %v917_v59  ;;  %v935_v9 = vpack.c.bf16 %v240_v61, %v224_v60  ;;  %v270_v12 = vmax.f32 %v126_v1, 0.0  ;;  %v921_v15 = vpack.c.bf16 %v271_v5, %v255_v62  ;;  %v256_v16 = vmax.f32 %v112_v7, 0.0  ;;  %v35_v20 = vld [vmem:[%s1574_s2 + $0xa8] sm:$0xff]  ;;  %v21_v22 = vld [vmem:[%s1574_s2 + $0x38] sm:$0xff]  ;;  %v18_v24 = vld [vmem:[%s1574_s2 + $0x20] sm:$0xff] }
   0xe   :  { %934 = vmatprep.subr.bf16.mxu1 %v933_v2  ;;  %v272_v17 = vmax.f32 %v128_v8, 0.0  ;;  %v937_v21 = vpack.c.bf16 %v273_v10, %v257_v6  ;;  %v37_v23 = vld [vmem:[%s1574_s2 + $0xb8] sm:$0xff]  ;;  %v287_v26 = vmax.f32 %v143_v13, 0.0  ;;  %v144_v27 = vld [vmem:[%s1574_s2 + $0x410] sm:$0xff]  ;;  %v34_v28 = vld [vmem:[%s1574_s2 + $0xa0] sm:$0xff]  ;;  %v289_v31 = vmax.f32 %v145_v14, 0.0 }
   0xf   :  { %v923_v25 = vpack.c.bf16 %v270_v12, %v254_v11  ;;  %v20_v29 = vld [vmem:[%s1574_s2 + $0x30] sm:$0xff]  ;;  %v163_v32 = vmax.f32 %v19_v19, 0.0  ;;  %v179_v33 = vmax.f32 %v35_v20, 0.0  ;;  %v51_v35 = vld [vmem:[%s1574_s2 + $0x128] sm:$0xff]  ;;  %v165_v37 = vmax.f32 %v21_v22, 0.0  ;;  %v53_v41 = vld [vmem:[%s1574_s2 + $0x138] sm:$0xff] }
  0x10   :  { %920 = vmatpush1.bf16.msra.mxu0 %v919_v4  ;;  %v939_v30 = vpack.c.bf16 %v272_v17, %v256_v16  ;;  %v36_v34 = vld [vmem:[%s1574_s2 + $0xb0] sm:$0xff]  ;;  %v67_v36 = vld [vmem:[%s1574_s2 + $0x1a8] sm:$0xff]  ;;  %v181_v38 = vmax.f32 %v37_v23, 0.0  ;;  %v162_v39 = vmax.f32 %v18_v24, 0.0  ;;  %v178_v40 = vmax.f32 %v34_v28, 0.0  ;;  %v69_v42 = vld [vmem:[%s1574_s2 + $0x1b8] sm:$0xff] }
  0x11   :  { %936 = vmatpush1.bf16.msra.mxu1 %v935_v9  ;;  %922 = vmatprep.subr.bf16.mxu0 %v921_v15  ;;  %v286_v43 = vmax.f32 %v142_v18, 0.0  ;;  %v164_v44 = vmax.f32 %v20_v29, 0.0  ;;  %v50_v45 = vld [vmem:[%s1574_s2 + $0x120] sm:$0xff]  ;;  %v52_v47 = vld [vmem:[%s1574_s2 + $0x130] sm:$0xff]  ;;  %v180_v48 = vmax.f32 %v36_v34, 0.0  ;;  %v195_v49 = vmax.f32 %v51_v35, 0.0 }
  0x12   :  { %938 = vmatprep.subr.bf16.mxu1 %v937_v21  ;;  %v66_v46 = vld [vmem:[%s1574_s2 + $0x1a0] sm:$0xff]  ;;  %v211_v50 = vmax.f32 %v67_v36, 0.0  ;;  %v68_v51 = vld [vmem:[%s1574_s2 + $0x1b0] sm:$0xff]  ;;  %v83_v52 = vld [vmem:[%s1574_s2 + $0x228] sm:$0xff]  ;;  %v288_v54 = vmax.f32 %v144_v27, 0.0  ;;  %v941_v55 = vpack.c.bf16 %v179_v33, %v163_v32  ;;  %v197_v56 = vmax.f32 %v53_v41, 0.0 }
  0x13   :  { %v99_v53 = vld [vmem:[%s1574_s2 + $0x2a8] sm:$0xff]  ;;  %v213_v57 = vmax.f32 %v69_v42, 0.0  ;;  %v1229_v58 = vld [vmem:[%s1575_s0] sm:$0xff]  ;;  %v957_v59 = vpack.c.bf16 %v181_v38, %v165_v37  ;;  %v943_v60 = vpack.c.bf16 %v178_v40, %v162_v39  ;;  %v194_v61 = vmax.f32 %v50_v45, 0.0  ;;  %v85_v63 = vld [vmem:[%s1574_s2 + $0x238] sm:$0xff] }
  0x14   :  { %924 = vmatpush1.bf16.msra.mxu0 %v923_v25  ;;  %v210_v62 = vmax.f32 %v66_v46, 0.0  ;;  %v101_v0 = vld [vmem:[%s1574_s2 + $0x2b8] sm:$0xff]  ;;  %v196_v1 = vmax.f32 %v52_v47, 0.0  ;;  %v212_v2 = vmax.f32 %v68_v51, 0.0  ;;  %v227_v4 = vmax.f32 %v83_v52, 0.0  ;;  %v82_v8 = vld [vmem:[%s1574_s2 + $0x220] sm:$0xff] }
  0x15   :  { %940 = vmatpush1.bf16.msra.mxu1 %v939_v30  ;;  %329 = vmatprep.subr.mxu0 %v287_v26  ;;  %v243_v5 = vmax.f32 %v99_v53, 0.0  ;;  %v959_v6 = vpack.c.bf16 %v180_v48, %v164_v44  ;;  %v945_v7 = vpack.c.bf16 %v211_v50, %v195_v49  ;;  %v98_v9 = vld [vmem:[%s1574_s2 + $0x2a0] sm:$0xff]  ;;  %v84_v10 = vld [vmem:[%s1574_s2 + $0x230] sm:$0xff]  ;;  %v961_v11 = vpack.c.bf16 %v213_v57, %v197_v56  ;;  %v115_v15 = vld [vmem:[%s1574_s2 + $0x328] sm:$0xff] }
  0x16   :  { %400 = vmatprep.subr.mxu1 %v289_v31  ;;  %v229_v12 = vmax.f32 %v85_v63, 0.0  ;;  %v245_v13 = vmax.f32 %v101_v0, 0.0  ;;  %v100_v14 = vld [vmem:[%s1574_s2 + $0x2b0] sm:$0xff]  ;;  %v131_v16 = vld [vmem:[%s1574_s2 + $0x3a8] sm:$0xff]  ;;  %v947_v17 = vpack.c.bf16 %v210_v62, %v194_v61  ;;  %v117_v18 = vld [vmem:[%s1574_s2 + $0x338] sm:$0xff]  ;;  %v963_v20 = vpack.c.bf16 %v212_v2, %v196_v1 }
  0x17   :  { %v133_v19 = vld [vmem:[%s1574_s2 + $0x3b8] sm:$0xff]  ;;  %v949_v21 = vpack.c.bf16 %v243_v5, %v227_v4  ;;  %v226_v22 = vmax.f32 %v82_v8, 0.0  ;;  %v242_v23 = vmax.f32 %v98_v9, 0.0  ;;  %v228_v24 = vmax.f32 %v84_v10, 0.0  ;;  %v114_v28 = vld [vmem:[%s1574_s2 + $0x320] sm:$0xff]  ;;  %v116_v33 = vld [vmem:[%s1574_s2 + $0x330] sm:$0xff] }
  0x18   :  { %330 = vmatpush1.msra.mxu0 %v286_v43  ;;  %v244_v25 = vmax.f32 %v100_v14, 0.0  ;;  %v259_v26 = vmax.f32 %v115_v15, 0.0  ;;  %v275_v27 = vmax.f32 %v131_v16, 0.0  ;;  %v130_v29 = vld [vmem:[%s1574_s2 + $0x3a0] sm:$0xff]  ;;  %v965_v30 = vpack.c.bf16 %v245_v13, %v229_v12  ;;  %v132_v34 = vld [vmem:[%s1574_s2 + $0x3b0] sm:$0xff]  ;;  %v147_v42 = vld [vmem:[%s1574_s2 + $0x428] sm:$0xff] }
  0x19   :  { %401 = vmatpush1.msra.mxu1 %v288_v54  ;;  %901 = vmatmul.mubr.msk.f32.vlgmr.msra.gmra.mrb[0].mxu0 %vm309_vm0, %v1229_v58  ;;  %v261_v31 = vmax.f32 %v117_v18, 0.0  ;;  %v277_v32 = vmax.f32 %v133_v19, 0.0  ;;  %v951_v35 = vpack.c.bf16 %v242_v23, %v226_v22  ;;  %v258_v36 = vmax.f32 %v114_v28, 0.0  ;;  %v149_v43 = vld [vmem:[%s1574_s2 + $0x438] sm:$0xff]  ;;  %v23_v45 = vld [vmem:[%s1574_s2 + $0x48] sm:$0xff]  ;;  %v22_v49 = vld [vmem:[%s1574_s2 + $0x40] sm:$0xff] }
  0x1a   :  { %902 = vmatmul.mubr.msk.f32.vlgmr.msra.gmra.mrb[0].mxu1 %vm309_vm0, %v1229_v58  ;;  %942 = vmatprep.subr.bf16.mxu0 %v941_v55  ;;  %v274_v37 = vmax.f32 %v130_v29, 0.0  ;;  %v967_v38 = vpack.c.bf16 %v244_v25, %v228_v24  ;;  %v953_v39 = vpack.c.bf16 %v275_v27, %v259_v26  ;;  %v260_v40 = vmax.f32 %v116_v33, 0.0  ;;  %v39_v46 = vld [vmem:[%s1574_s2 + $0xc8] sm:$0xff]  ;;  %v25_v47 = vld [vmem:[%s1574_s2 + $0x58] sm:$0xff]  ;;  %v38_v50 = vld [vmem:[%s1574_s2 + $0xc0] sm:$0xff] }
  0x1b   :  { %958 = vmatprep.subr.bf16.mxu1 %v957_v59  ;;  %944 = vmatpush1.bf16.msra.mxu0 %v943_v60  ;;  %v276_v41 = vmax.f32 %v132_v34, 0.0  ;;  %v969_v44 = vpack.c.bf16 %v277_v32, %v261_v31  ;;  %v41_v48 = vld [vmem:[%s1574_s2 + $0xd8] sm:$0xff]  ;;  %v291_v52 = vmax.f32 %v147_v42, 0.0  ;;  %v146_v53 = vld [vmem:[%s1574_s2 + $0x420] sm:$0xff]  ;;  %v148_v54 = vld [vmem:[%s1574_s2 + $0x430] sm:$0xff]  ;;  %v293_v57 = vmax.f32 %v149_v43, 0.0 }
  0x1c   :  { %960 = vmatpush1.bf16.msra.mxu1 %v959_v6  ;;  %946 = vmatprep.subr.bf16.mxu0 %v945_v7  ;;  %v955_v51 = vpack.c.bf16 %v274_v37, %v258_v36  ;;  %v24_v55 = vld [vmem:[%s1574_s2 + $0x50] sm:$0xff]  ;;  %v167_v59 = vmax.f32 %v23_v45, 0.0  ;;  %v183_v60 = vmax.f32 %v39_v46, 0.0  ;;  %v55_v62 = vld [vmem:[%s1574_s2 + $0x148] sm:$0xff]  ;;  %v169_v0 = vmax.f32 %v25_v47, 0.0  ;;  %v57_v5 = vld [vmem:[%s1574_s2 + $0x158] sm:$0xff] }
  0x1d   :  { %962 = vmatprep.subr.bf16.mxu1 %v961_v11  ;;  %519 = vmatprep.mubr.f32.mxu0 %v1040_v3  ;;  %v971_v56 = vpack.c.bf16 %v276_v41, %v260_v40  ;;  %v40_v61 = vld [vmem:[%s1574_s2 + $0xd0] sm:$0xff]  ;;  %v71_v63 = vld [vmem:[%s1574_s2 + $0x1c8] sm:$0xff]  ;;  %v185_v1 = vmax.f32 %v41_v48, 0.0  ;;  %v166_v2 = vmax.f32 %v22_v49, 0.0  ;;  %v182_v4 = vmax.f32 %v38_v50, 0.0  ;;  %v73_v6 = vld [vmem:[%s1574_s2 + $0x1d8] sm:$0xff] }
  0x1e   :  { %590 = vmatprep.mubr.f32.mxu1 %v1040_v3  ;;  %v290_v7 = vmax.f32 %v146_v53, 0.0  ;;  %v168_v8 = vmax.f32 %v24_v55, 0.0  ;;  %v54_v9 = vld [vmem:[%s1574_s2 + $0x140] sm:$0xff]  ;;  %v56_v11 = vld [vmem:[%s1574_s2 + $0x150] sm:$0xff]  ;;  %v184_v12 = vmax.f32 %v40_v61, 0.0  ;;  %v199_v13 = vmax.f32 %v55_v62, 0.0 }
  0x1f   :  { %948 = vmatpush1.bf16.msra.mxu0 %v947_v17  ;;  %v70_v10 = vld [vmem:[%s1574_s2 + $0x1c0] sm:$0xff]  ;;  %v215_v14 = vmax.f32 %v71_v63, 0.0  ;;  %v72_v15 = vld [vmem:[%s1574_s2 + $0x1d0] sm:$0xff]  ;;  %v87_v16 = vld [vmem:[%s1574_s2 + $0x248] sm:$0xff]  ;;  %v292_v18 = vmax.f32 %v148_v54, 0.0  ;;  %v973_v19 = vpack.c.bf16 %v183_v60, %v167_v59  ;;  %v989_v22 = vpack.c.bf16 %v185_v1, %v169_v0 }
  0x20   :  { %964 = vmatpush1.bf16.msra.mxu1 %v963_v20  ;;  %950 = vmatprep.subr.bf16.mxu0 %v949_v21  ;;  %v103_v17 = vld [vmem:[%s1574_s2 + $0x2c8] sm:$0xff]  ;;  %v201_v20 = vmax.f32 %v57_v5, 0.0  ;;  %v217_v21 = vmax.f32 %v73_v6, 0.0  ;;  %v975_v23 = vpack.c.bf16 %v182_v4, %v166_v2  ;;  %v198_v24 = vmax.f32 %v54_v9, 0.0  ;;  %v89_v26 = vld [vmem:[%s1574_s2 + $0x258] sm:$0xff]  ;;  %v86_v34 = vld [vmem:[%s1574_s2 + $0x240] sm:$0xff] }
  0x21   :  { %966 = vmatprep.subr.bf16.mxu1 %v965_v30  ;;  %v214_v25 = vmax.f32 %v70_v10, 0.0  ;;  %v105_v27 = vld [vmem:[%s1574_s2 + $0x2d8] sm:$0xff]  ;;  %v200_v28 = vmax.f32 %v56_v11, 0.0  ;;  %v216_v29 = vmax.f32 %v72_v15, 0.0  ;;  %v231_v30 = vmax.f32 %v87_v16, 0.0  ;;  %v88_v36 = vld [vmem:[%s1574_s2 + $0x250] sm:$0xff] }
  0x22   :  { %v247_v31 = vmax.f32 %v103_v17, 0.0  ;;  %v991_v32 = vpack.c.bf16 %v184_v12, %v168_v8  ;;  %v977_v33 = vpack.c.bf16 %v215_v14, %v199_v13  ;;  %v993_v37 = vpack.c.bf16 %v217_v21, %v201_v20  ;;  %v104_v40 = vld [vmem:[%s1574_s2 + $0x2d0] sm:$0xff]  ;;  %v119_v41 = vld [vmem:[%s1574_s2 + $0x348] sm:$0xff]  ;;  %v137_v45 = vld [vmem:[%s1574_s2 + $0x3d8] sm:$0xff] }
  0x23   :  { %952 = vmatpush1.bf16.msra.mxu0 %v951_v35  ;;  %v102_v35 = vld [vmem:[%s1574_s2 + $0x2c0] sm:$0xff]  ;;  %v135_v42 = vld [vmem:[%s1574_s2 + $0x3c8] sm:$0xff]  ;;  %v979_v43 = vpack.c.bf16 %v214_v25, %v198_v24  ;;  %v995_v46 = vpack.c.bf16 %v216_v29, %v200_v28  ;;  %v230_v48 = vmax.f32 %v86_v34, 0.0  ;;  %v232_v50 = vmax.f32 %v88_v36, 0.0  ;;  %v120_v60 = vld [vmem:[%s1574_s2 + $0x350] sm:$0xff] }
  0x24   :  { %968 = vmatpush1.bf16.msra.mxu1 %v967_v38  ;;  %954 = vmatprep.subr.bf16.mxu0 %v953_v39  ;;  %v233_v38 = vmax.f32 %v89_v26, 0.0  ;;  %v249_v39 = vmax.f32 %v105_v27, 0.0  ;;  %v981_v47 = vpack.c.bf16 %v247_v31, %v231_v30  ;;  %v246_v49 = vmax.f32 %v102_v35, 0.0  ;;  %v118_v54 = vld [vmem:[%s1574_s2 + $0x340] sm:$0xff]  ;;  %v136_v61 = vld [vmem:[%s1574_s2 + $0x3d0] sm:$0xff]  ;;  %v151_v6 = vld [vmem:[%s1574_s2 + $0x448] sm:$0xff] }
  0x25   :  { %970 = vmatprep.subr.bf16.mxu1 %v969_v44  ;;  %v121_v44 = vld [vmem:[%s1574_s2 + $0x358] sm:$0xff]  ;;  %v279_v53 = vmax.f32 %v135_v42, 0.0  ;;  %v134_v55 = vld [vmem:[%s1574_s2 + $0x3c0] sm:$0xff]  ;;  %v281_v59 = vmax.f32 %v137_v45, 0.0  ;;  %v262_v63 = vmax.f32 %v118_v54, 0.0  ;;  %v264_v4 = vmax.f32 %v120_v60, 0.0 }
  0x26   :  { %v983_v62 = vpack.c.bf16 %v246_v49, %v230_v48  ;;  %v278_v0 = vmax.f32 %v134_v55, 0.0  ;;  %v280_v5 = vmax.f32 %v136_v61, 0.0  ;;  %v303_v8 = vld [vmem:[%s1576_s1] sm:$0xff]  ;;  %v27_v10 = vld [vmem:[%s1574_s2 + $0x68] sm:$0xff]  ;;  %v29_v12 = vld [vmem:[%s1574_s2 + $0x78] sm:$0xff]  ;;  %v295_v17 = vmax.f32 %v151_v6, 0.0 }
  0x27   :  { %956 = vmatpush1.bf16.msra.mxu0 %v955_v51  ;;  %v248_v51 = vmax.f32 %v104_v40, 0.0  ;;  %v43_v11 = vld [vmem:[%s1574_s2 + $0xe8] sm:$0xff]  ;;  %306 = vperm.xlu0 %1039, %v303_v8   ;;  %v45_v13 = vld [vmem:[%s1574_s2 + $0xf8] sm:$0xff]  ;;  %v26_v14 = vld [vmem:[%s1574_s2 + $0x60] sm:$0xff]  ;;  %v173_v28 = vmax.f32 %v29_v12, 0.0 }
  0x28   :  { %972 = vmatpush1.bf16.msra.mxu1 %v971_v56  ;;  %471 = vmatprep.subr.mxu0 %v291_v52  ;;  %v263_v52 = vmax.f32 %v119_v41, 0.0  ;;  %v997_v56 = vpack.c.bf16 %v249_v39, %v233_v38  ;;  %v42_v15 = vld [vmem:[%s1574_s2 + $0xe0] sm:$0xff]  ;;  %v987_v16 = vpack.c.bf16 %v278_v0, %v262_v63  ;;  %v28_v20 = vld [vmem:[%s1574_s2 + $0x70] sm:$0xff]  ;;  %v1003_v21 = vpack.c.bf16 %v280_v5, %v264_v4  ;;  %v59_v26 = vld [vmem:[%s1574_s2 + $0x168] sm:$0xff] }
  0x29   :  { %542 = vmatprep.subr.mxu1 %v293_v57  ;;  %v265_v57 = vmax.f32 %v121_v44, 0.0  ;;  %v999_v1 = vpack.c.bf16 %v248_v51, %v232_v50  ;;  %v187_v24 = vmax.f32 %v43_v11, 0.0  ;;  %v44_v25 = vld [vmem:[%s1574_s2 + $0xf0] sm:$0xff]  ;;  %v75_v27 = vld [vmem:[%s1574_s2 + $0x1e8] sm:$0xff]  ;;  %v189_v29 = vmax.f32 %v45_v13, 0.0  ;;  %v58_v36 = vld [vmem:[%s1574_s2 + $0x160] sm:$0xff] }
  0x2a   :  { %v985_v2 = vpack.c.bf16 %v279_v53, %v263_v52  ;;  %v170_v30 = vmax.f32 %v26_v14, 0.0  ;;  %v186_v31 = vmax.f32 %v42_v15, 0.0  ;;  %v172_v35 = vmax.f32 %v28_v20, 0.0  ;;  %v60_v38 = vld [vmem:[%s1574_s2 + $0x170] sm:$0xff]  ;;  %v107_v44 = vld [vmem:[%s1574_s2 + $0x2e8] sm:$0xff]  ;;  %v93_v53 = vld [vmem:[%s1574_s2 + $0x278] sm:$0xff] }
  0x2b   :  { %472 = vmatpush1.msra.mxu0 %v290_v7  ;;  %v153_v7 = vld [vmem:[%s1574_s2 + $0x458] sm:$0xff]  ;;  %v1001_v9 = vpack.c.bf16 %v281_v59, %v265_v57  ;;  %v188_v39 = vmax.f32 %v44_v25, 0.0  ;;  %v203_v40 = vmax.f32 %v59_v26, 0.0  ;;  %v219_v41 = vmax.f32 %v75_v27, 0.0  ;;  %v76_v42 = vld [vmem:[%s1574_s2 + $0x1f0] sm:$0xff]  ;;  %v106_v63 = vld [vmem:[%s1574_s2 + $0x2e0] sm:$0xff] }
  0x2c   :  { %543 = vmatpush1.msra.mxu1 %v292_v18  ;;  %903 = vmatmul.mubr.msk.f32.vlgmr.msra.gmra.mrb[2].mxu0 %vm309_vm0, %v1229_v58  ;;  %v150_v18 = vld [vmem:[%s1574_s2 + $0x440] sm:$0xff]  ;;  %v1021_v49 = vpack.c.bf16 %v189_v29, %v173_v28  ;;  %v1007_v50 = vpack.c.bf16 %v186_v31, %v170_v30  ;;  %v202_v51 = vmax.f32 %v58_v36, 0.0  ;;  %v109_v54 = vld [vmem:[%s1574_s2 + $0x2f8] sm:$0xff]  ;;  %v204_v55 = vmax.f32 %v60_v38, 0.0  ;;  %v92_v0 = vld [vmem:[%s1574_s2 + $0x270] sm:$0xff] }
  0x2d   :  { %904 = vmatmul.mubr.msk.f32.vlgmr.msra.gmra.mrb[2].mxu1 %vm309_vm0, %v1229_v58  ;;  %974 = vmatprep.subr.bf16.mxu0 %v973_v19  ;;  %v152_v19 = vld [vmem:[%s1574_s2 + $0x450] sm:$0xff]  ;;  %v294_v34 = vmax.f32 %v150_v18, 0.0  ;;  %v251_v59 = vmax.f32 %v107_v44, 0.0  ;;  %v1023_v60 = vpack.c.bf16 %v188_v39, %v172_v35  ;;  %v1009_v61 = vpack.c.bf16 %v219_v41, %v203_v40  ;;  %v123_v6 = vld [vmem:[%s1574_s2 + $0x368] sm:$0xff]  ;;  %v138_v20 = vld [vmem:[%s1574_s2 + $0x3e0] sm:$0xff] }
  0x2e   :  { %990 = vmatprep.subr.bf16.mxu1 %v989_v22  ;;  %976 = vmatpush1.bf16.msra.mxu0 %v975_v23  ;;  %v297_v22 = vmax.f32 %v153_v7, 0.0  ;;  %v171_v23 = vmax.f32 %v27_v10, 0.0  ;;  %v296_v45 = vmax.f32 %v152_v19, 0.0  ;;  %v253_v4 = vmax.f32 %v109_v54, 0.0  ;;  %v108_v5 = vld [vmem:[%s1574_s2 + $0x2f0] sm:$0xff]  ;;  %v139_v7 = vld [vmem:[%s1574_s2 + $0x3e8] sm:$0xff] }
  0x2f   :  { %992 = vmatpush1.bf16.msra.mxu1 %v991_v32  ;;  %978 = vmatprep.subr.bf16.mxu0 %v977_v33  ;;  %v61_v32 = vld [vmem:[%s1574_s2 + $0x178] sm:$0xff]  ;;  %v250_v14 = vmax.f32 %v106_v63, 0.0  ;;  %v236_v15 = vmax.f32 %v92_v0, 0.0  ;;  %v283_v18 = vmax.f32 %v139_v7, 0.0  ;;  %v122_v19 = vld [vmem:[%s1574_s2 + $0x360] sm:$0xff]  ;;  %v140_v25 = vld [vmem:[%s1574_s2 + $0x3f0] sm:$0xff] }
  0x30   :  { %994 = vmatprep.subr.bf16.mxu1 %v993_v37  ;;  %661 = vmatprep.mubr.f32.mxu0 %v1040_v3  ;;  %v77_v33 = vld [vmem:[%s1574_s2 + $0x1f8] sm:$0xff]  ;;  %v74_v37 = vld [vmem:[%s1574_s2 + $0x1e0] sm:$0xff]  ;;  %v266_v27 = vmax.f32 %v122_v19, 0.0  ;;  %v282_v28 = vmax.f32 %v138_v20, 0.0  ;;  %v156_v40 = vld [vmem:[%s1574_s2 + $0x470] sm:$0xff] }
  0x31   :  { %732 = vmatprep.mubr.f32.mxu1 %v1040_v3  ;;  %v221_v48 = vmax.f32 %v77_v33, 0.0  ;;  %v218_v52 = vmax.f32 %v74_v37, 0.0  ;;  %v141_v10 = vld [vmem:[%s1574_s2 + $0x3f8] sm:$0xff]  ;;  %v154_v38 = vld [vmem:[%s1574_s2 + $0x460] sm:$0xff] }
  0x32   :  { %980 = vmatpush1.bf16.msra.mxu0 %v979_v43  ;;  %v91_v43 = vld [vmem:[%s1574_s2 + $0x268] sm:$0xff]  ;;  %v1019_v35 = vpack.c.bf16 %v282_v28, %v266_v27  ;;  %v298_v41 = vmax.f32 %v154_v38, 0.0 }
  0x33   :  { %996 = vmatpush1.bf16.msra.mxu1 %v995_v46  ;;  %982 = vmatprep.subr.bf16.mxu0 %v981_v47  ;;  %v1005_v46 = vpack.c.bf16 %v187_v24, %v171_v23  ;;  %v205_v47 = vmax.f32 %v61_v32, 0.0  ;;  %v235_v57 = vmax.f32 %v91_v43, 0.0  ;;  %v1011_v8 = vpack.c.bf16 %v218_v52, %v202_v51  ;;  %v124_v24 = vld [vmem:[%s1574_s2 + $0x370] sm:$0xff] }
  0x34   :  { %998 = vmatprep.subr.bf16.mxu1 %v997_v56  ;;  %v220_v56 = vmax.f32 %v76_v42, 0.0  ;;  %v285_v23 = vmax.f32 %v141_v10, 0.0  ;;  %v268_v31 = vmax.f32 %v124_v24, 0.0  ;;  %v284_v32 = vmax.f32 %v140_v25, 0.0 }
  0x35   :  { %v1013_v12 = vpack.c.bf16 %v251_v59, %v235_v57  ;;  %v300_v42 = vmax.f32 %v156_v40, 0.0 }
  0x36   :  { %984 = vmatpush1.bf16.msra.mxu0 %v983_v62  ;;  %v90_v62 = vld [vmem:[%s1574_s2 + $0x260] sm:$0xff]  ;;  %v1027_v11 = vpack.c.bf16 %v220_v56, %v204_v55  ;;  %v1035_v36 = vpack.c.bf16 %v284_v32, %v268_v31 }
  0x37   :  { %1000 = vmatpush1.bf16.msra.mxu1 %v999_v1  ;;  %986 = vmatprep.subr.bf16.mxu0 %v985_v2  ;;  %v1025_v1 = vpack.c.bf16 %v221_v48, %v205_v47  ;;  %v237_v2 = vmax.f32 %v93_v53, 0.0  ;;  %v234_v13 = vmax.f32 %v90_v62, 0.0 }
  0x38   :  { %1002 = vmatprep.subr.bf16.mxu1 %v1001_v9  ;;  %v125_v9 = vld [vmem:[%s1574_s2 + $0x378] sm:$0xff] }
  0x39   :  { %v1015_v26 = vpack.c.bf16 %v250_v14, %v234_v13 }
  0x3a   :  { %988 = vmatpush1.bf16.msra.mxu0 %v987_v16  ;;  %v252_v16 = vmax.f32 %v108_v5, 0.0 }
  0x3b   :  { %1004 = vmatpush1.bf16.msra.mxu1 %v1003_v21  ;;  %613 = vmatprep.subr.mxu0 %v295_v17  ;;  %v267_v17 = vmax.f32 %v123_v6, 0.0  ;;  %v1029_v21 = vpack.c.bf16 %v253_v4, %v237_v2 }
  0x3c   :  { %684 = vmatprep.subr.mxu1 %v297_v22  ;;  %v269_v22 = vmax.f32 %v125_v9, 0.0  ;;  %v1031_v29 = vpack.c.bf16 %v252_v16, %v236_v15 }
  0x3d   :  { %v1017_v30 = vpack.c.bf16 %v283_v18, %v267_v17 }
  0x3e   :  { %614 = vmatpush1.msra.mxu0 %v294_v34  ;;  %v1033_v33 = vpack.c.bf16 %v285_v23, %v269_v22  ;;  %v155_v34 = vld [vmem:[%s1574_s2 + $0x468] sm:$0xff] }
  0x3f   :  { %685 = vmatpush1.msra.mxu1 %v296_v45  ;;  %905 = vmatmul.mubr.msk.f32.vlgmr.msra.gmra.mrb[4].mxu0 %vm309_vm0, %v1229_v58  ;;  %v299_v37 = vmax.f32 %v155_v34, 0.0 }
  0x40   :  { %906 = vmatmul.mubr.msk.f32.vlgmr.msra.gmra.mrb[4].mxu1 %vm309_vm0, %v1229_v58  ;;  %1006 = vmatprep.subr.bf16.mxu0 %v1005_v46 }
  0x41   :  { %1022 = vmatprep.subr.bf16.mxu1 %v1021_v49  ;;  %1008 = vmatpush1.bf16.msra.mxu0 %v1007_v50 }
  0x42   :  { %1024 = vmatpush1.bf16.msra.mxu1 %v1023_v60  ;;  %1010 = vmatprep.subr.bf16.mxu0 %v1009_v61 }
  0x43   :  { %1026 = vmatprep.subr.bf16.mxu1 %v1025_v1  ;;  %803 = vmatprep.mubr.f32.mxu0 %v1040_v3 }
  0x44   :  { %874 = vmatprep.mubr.f32.mxu1 %v1040_v3  ;;  %v157_v3 = vld [vmem:[%s1574_s2 + $0x478] sm:$0xff] }
  0x45   :  { %1012 = vmatpush1.bf16.msra.mxu0 %v1011_v8  ;;  %v301_v39 = vmax.f32 %v157_v3, 0.0 }
  0x46   :  { %1028 = vmatpush1.bf16.msra.mxu1 %v1027_v11  ;;  %1014 = vmatprep.subr.bf16.mxu0 %v1013_v12 }
  0x47   :  { %1030 = vmatprep.subr.bf16.mxu1 %v1029_v21 }
  0x49   :  { %1016 = vmatpush1.bf16.msra.mxu0 %v1015_v26 }
  0x4a   :  { %1032 = vmatpush1.bf16.msra.mxu1 %v1031_v29  ;;  %1018 = vmatprep.subr.bf16.mxu0 %v1017_v30 }
  0x4b   :  { %1034 = vmatprep.subr.bf16.mxu1 %v1033_v33 }
  0x4d   :  { %1020 = vmatpush1.bf16.msra.mxu0 %v1019_v35 }
  0x4e   :  { %1036 = vmatpush1.bf16.msra.mxu1 %v1035_v36  ;;  %755 = vmatprep.subr.mxu0 %v299_v37 }
  0x4f   :  { %826 = vmatprep.subr.mxu1 %v301_v39 }
  0x51   :  { %756 = vmatpush1.msra.mxu0 %v298_v41 }
  0x52   :  { %827 = vmatpush1.msra.mxu1 %v300_v42  ;;  %907 = vmatmul.mubr.msk.f32.vlgmr.msra.gmra.mrb[6].mxu0 %vm309_vm0, %v1229_v58 }
  0x53   :  { %908 = vmatmul.mubr.msk.f32.vlgmr.msra.gmra.mrb[6].mxu1 %vm309_vm0, %v1229_v58 }
  0xa6   :  { %v307_v43 = vpop.permute.xlu0 %306 }
  0xec   :  { %v379_v44 = vpop.f32.mrb[0].mxu0 }
  0xed   :  { %v450_v45 = vpop.f32.mrb[0].mxu1  ;;  %v380_v46 = vadd.f32 %v379_v44, %v307_v43  ;;  %v381_v47 = vpop.f32.mrb[1].mxu0 }
  0xee   :  { %v451_v48 = vadd.f32 %v450_v45, %v307_v43  ;;  %v382_v49 = vadd.f32 %v381_v47, %v307_v43  ;;  %v452_v50 = vpop.f32.mrb[1].mxu1 }
  0xef   :  { %881 = vst [vmem:[%s1577_s3] sm:$0xff] %v380_v46  ;;  %v453_v51 = vadd.f32 %v452_v50, %v307_v43 }
  0xf0   :  { %883 = vst [vmem:[%s1577_s3 + $0x10] sm:$0xff] %v451_v48  ;;  %882 = vst [vmem:[%s1577_s3 + $0x8] sm:$0xff] %v382_v49 }
  0xf1   :  { %884 = vst [vmem:[%s1577_s3 + $0x18] sm:$0xff] %v453_v51 }
  0xff   :  { %v521_v58 = vpop.f32.mrb[2].mxu0 }
 0x100   :  { %v522_v52 = vadd.f32 %v521_v58, %v307_v43  ;;  %v592_v53 = vpop.f32.mrb[2].mxu1  ;;  %v523_v54 = vpop.f32.mrb[3].mxu0 }
 0x101   :  { %v593_v55 = vadd.f32 %v592_v53, %v307_v43  ;;  %v524_v56 = vadd.f32 %v523_v54, %v307_v43  ;;  %v594_v57 = vpop.f32.mrb[3].mxu1 }
 0x102   :  { %885 = vst [vmem:[%s1577_s3 + $0x20] sm:$0xff] %v522_v52  ;;  %v595_v59 = vadd.f32 %v594_v57, %v307_v43 }
 0x103   :  { %887 = vst [vmem:[%s1577_s3 + $0x30] sm:$0xff] %v593_v55  ;;  %886 = vst [vmem:[%s1577_s3 + $0x28] sm:$0xff] %v524_v56 }
 0x104   :  { %888 = vst [vmem:[%s1577_s3 + $0x38] sm:$0xff] %v595_v59 }
 0x112   :  { %v663_v60 = vpop.f32.mrb[4].mxu0 }
 0x113   :  { %v664_v61 = vadd.f32 %v663_v60, %v307_v43  ;;  %v734_v62 = vpop.f32.mrb[4].mxu1  ;;  %v665_v63 = vpop.f32.mrb[5].mxu0 }
 0x114   :  { %v735_v0 = vadd.f32 %v734_v62, %v307_v43  ;;  %v666_v1 = vadd.f32 %v665_v63, %v307_v43  ;;  %v736_v2 = vpop.f32.mrb[5].mxu1 }
 0x115   :  { %889 = vst [vmem:[%s1577_s3 + $0x40] sm:$0xff] %v664_v61  ;;  %v737_v4 = vadd.f32 %v736_v2, %v307_v43 }
 0x116   :  { %891 = vst [vmem:[%s1577_s3 + $0x50] sm:$0xff] %v735_v0  ;;  %890 = vst [vmem:[%s1577_s3 + $0x48] sm:$0xff] %v666_v1 }
 0x117   :  { %892 = vst [vmem:[%s1577_s3 + $0x58] sm:$0xff] %v737_v4 }
 0x125   :  { %v805_v5 = vpop.f32.mrb[6].mxu0 }
 0x126   :  { %v806_v6 = vadd.f32 %v805_v5, %v307_v43  ;;  %v876_v7 = vpop.f32.mrb[6].mxu1  ;;  %v807_v8 = vpop.f32.mrb[7].mxu0 }
 0x127   :  { %v877_v9 = vadd.f32 %v876_v7, %v307_v43  ;;  %v808_v10 = vadd.f32 %v807_v8, %v307_v43  ;;  %v878_v11 = vpop.f32.mrb[7].mxu1 }
 0x128   :  { %893 = vst [vmem:[%s1577_s3 + $0x60] sm:$0xff] %v806_v6  ;;  %v879_v12 = vadd.f32 %v878_v11, %v307_v43 }
 0x129   :  { %895 = vst [vmem:[%s1577_s3 + $0x70] sm:$0xff] %v877_v9  ;;  %894 = vst [vmem:[%s1577_s3 + $0x68] sm:$0xff] %v808_v10 }
 0x12a   :  { %896 = vst [vmem:[%s1577_s3 + $0x78] sm:$0xff] %v879_v12 }

</bundles_post_ra>
